<compile_context>
chip_gen: v6e
topology: v6e:2x2x1
jax: 0.10.0
libtpu: 0.0.40
codegen_flags: <defaults>
</compile_context>

<pallas_src>
import functools
import math

import jax
import jax.numpy as jnp
from jax.experimental import pallas as pl
from jax.experimental.pallas import tpu as pltpu

LANE = 128  # pad every feature dim up to a multiple of 128 lanes


# ----------------------------------------------------------------------------
# In-kernel helpers
# ----------------------------------------------------------------------------


def _mm(a, b):
    """MXU matmul, fp32 accumulation. Callers pass bf16 operands (casts hoisted)."""
    return jax.lax.dot_general(
        a, b, dimension_numbers=(((1,), (0,)), ((), ())),
        preferred_element_type=jnp.float32)


def _mm_t(a, b):
    """a @ b.T without materialising the transpose (contract last dims)."""
    return jax.lax.dot_general(
        a, b, dimension_numbers=(((1,), (1,)), ((), ())),
        preferred_element_type=jnp.float32)


def _softmax(s):
    m = jnp.max(s, axis=-1, keepdims=True)
    e = jnp.exp(s - m)
    return e / jnp.sum(e, axis=-1, keepdims=True)


def _ln(x, g, b, d_valid, eps=1e-5):
    # Padded lanes of x are zero -> sums only see the valid columns; divide by
    # the true feature count.  gamma/beta are zero-padded so the output keeps
    # zeros in the padded lanes.
    inv_d = 1.0 / d_valid
    mean = jnp.sum(x, axis=-1, keepdims=True) * inv_d
    var = jnp.sum(x * x, axis=-1, keepdims=True) * inv_d - mean * mean
    var = jnp.maximum(var, 0.0)
    return (x - mean) * jax.lax.rsqrt(var + eps) * g + b


# ----------------------------------------------------------------------------
# Fused Pallas kernels
# ----------------------------------------------------------------------------


def _hcl_stack_kernel(a_ref, x0_ref,
                      wqkv, bqkv, wo, bo, lng, lnb, f1w, f1b, f2w, f2b,
                      out_ref, x_sc, attn_sc,
                      *, d_model, dkp, dvp, scale):
    """One grid step == one whole HCLLayer.  x and attn carried in VMEM scratch."""
    l = pl.program_id(0)

    @pl.when(l == 0)
    def _():
        x_sc[...] = x0_ref[...]
        attn_sc[...] = jnp.zeros_like(attn_sc)   # softmax(scores + 0) == softmax(scores)

    a = a_ref[...]                                # bf16 [N, N], resident across layers
    x = x_sc[...]                                 # fp32 [N, Dp]
    xb = x.astype(jnp.bfloat16)

    # GraphConv(norm='both'): A_hat @ (Z W) + b == (A_hat @ Z) @ W + b.
    ax = _mm(a, xb)                               # A @ X, reused for Q, K and V
    axb = ax.astype(jnp.bfloat16)

    qkv = _mm(axb, wqkv[...]) + bqkv[...]         # fused Q|K|V projection
    q = qkv[:, :dkp]
    k = qkv[:, dkp:2 * dkp]
    v = qkv[:, 2 * dkp:2 * dkp + dvp]

    s = _mm_t(q.astype(jnp.bfloat16), k.astype(jnp.bfloat16)) * scale
    s = s + attn_sc[...]                          # chained attention (zeros at layer 0)
    p = _softmax(s)
    attn_sc[...] = p                              # stays in VMEM, never hits HBM

    pv = _mm(p.astype(jnp.bfloat16), v.astype(jnp.bfloat16))
    apv = _mm(a, pv.astype(jnp.bfloat16))
    attn_out = _mm(apv.astype(jnp.bfloat16), wo[...]) + bo[...]
    attn_out = _ln(attn_out, lng[...], lnb[...], d_model)

    ff_in = attn_out + x
    a_ff = _mm(a, ff_in.astype(jnp.bfloat16))
    h = jnp.maximum(_mm(a_ff.astype(jnp.bfloat16), f1w[...]) + f1b[...], 0.0)
    a_h = _mm(a, h.astype(jnp.bfloat16))
    out = _mm(a_h.astype(jnp.bfloat16), f2w[...]) + f2b[...]
    out = _ln(out, lng[...], lnb[...], d_model)   # same (shared) LayerNorm, as in the spec

    x_sc[...] = out
    out_ref[...] = out                            # output block resident; written back at end


def _tf_stack_kernel(y0_ref, wqkv, bqkv, wo, bo, g1, be1, w1, b1, w2, b2, g2, be2,
                     out_ref, y_sc, *, heads, d_model, kp):
    """One grid step == one post-LN transformer encoder layer; heads batched."""
    l = pl.program_id(0)

    @pl.when(l == 0)
    def _():
        y_sc[...] = y0_ref[...]

    y = y_sc[...]
    yb = y.astype(jnp.bfloat16)

    qkv = _mm(yb, wqkv[...]) + bqkv[...]          # one wide matmul: [P, 3*H*kp]

    hd = d_model // heads
    scale = 1.0 / math.sqrt(hd)

    def blk(i):
        return qkv[:, i * kp:(i + 1) * kp]        # 128-lane (vreg-boundary) slices

    q3 = jnp.stack([blk(h) for h in range(heads)], axis=0)               # [H, P, kp]
    k3 = jnp.stack([blk(heads + h) for h in range(heads)], axis=0)
    v3 = jnp.stack([blk(2 * heads + h) for h in range(heads)], axis=0)

    s3 = jnp.einsum('hqd,hkd->hqk', q3.astype(jnp.bfloat16),
                    k3.astype(jnp.bfloat16),
                    preferred_element_type=jnp.float32) * scale
    p3 = _softmax(s3)
    o3 = jnp.einsum('hqk,hkd->hqd', p3.astype(jnp.bfloat16),
                    v3.astype(jnp.bfloat16),
                    preferred_element_type=jnp.float32)

    # concat(head outputs) @ Wo  ==  sum_h O_h @ Wo_h  (head-major row blocks of Wo)
    wo_b = wo[...]
    mha = _mm(o3[0].astype(jnp.bfloat16), wo_b[0:kp, :])
    for h in range(1, heads):
        mha = mha + _mm(o3[h].astype(jnp.bfloat16), wo_b[h * kp:(h + 1) * kp, :])
    mha = mha + bo[...]

    x1 = _ln(y + mha, g1[...], be1[...], d_model)
    ff = jnp.maximum(_mm(x1.astype(jnp.bfloat16), w1[...]) + b1[...], 0.0)
    ff = _mm(ff.astype(jnp.bfloat16), w2[...]) + b2[...]
    out = _ln(x1 + ff, g2[...], be2[...], d_model)

    y_sc[...] = out
    out_ref[...] = out


def _head_kernel(segn, segp, node_ref, path_ref,
                 lqw, lqb, k1w, k1b, k2w, k2b, v1w, v1b, v2w, v2b,
                 lhw, lhb, w1, b1, w2, b2, w3, b3, w4, b4, o_ref):
    """Fused segment-sum pooling (as matmul) + Gating + 4-layer MLP classifier."""
    ast_node = _mm(segn[...], node_ref[...].astype(jnp.bfloat16))   # [B, Dp]
    ast_path = _mm(segp[...], path_ref[...].astype(jnp.bfloat16))   # [B, Dp]
    nb = ast_node.astype(jnp.bfloat16)
    pb = ast_path.astype(jnp.bfloat16)

    # Gating(Q=ast_node, K=ast_node, V=ast_path); all torch heads share the same
    # Linear layers -> identical heads; replication folded into lhw at init.
    q = _mm(nb, lqw[...]) + lqb[...]
    k1 = _mm(nb, k1w[...]) + k1b[...]
    k2 = _mm(pb, k2w[...]) + k2b[...]
    v1 = _mm(nb, v1w[...]) + v1b[...]
    v2 = _mm(pb, v2w[...]) + v2b[...]

    kv1 = jnp.sum(q * k1, axis=-1, keepdims=True)
    kv2 = jnp.sum(q * k2, axis=-1, keepdims=True)
    mx = jnp.maximum(kv1, kv2)
    e1 = jnp.exp(kv1 - mx)
    e2 = jnp.exp(kv2 - mx)
    inv = 1.0 / (e1 + e2)
    head = (e1 * inv) * v1 + (e2 * inv) * v2

    ast_out = _mm(head.astype(jnp.bfloat16), lhw[...]) + lhb[...]

    # Classifier MLP (dropout = identity in eval); output stays 128-lane padded.
    h = jnp.maximum(_mm(ast_out.astype(jnp.bfloat16), w1[...]) + b1[...], 0.0)
    h = jnp.maximum(_mm(h.astype(jnp.bfloat16), w2[...]) + b2[...], 0.0)
    h = jnp.maximum(_mm(h.astype(jnp.bfloat16), w3[...]) + b3[...], 0.0)
    o_ref[...] = _mm(h.astype(jnp.bfloat16), w4[...]) + b4[...]


# ----------------------------------------------------------------------------
# pallas_call wrappers
# ----------------------------------------------------------------------------

_CPARAMS = pltpu.CompilerParams(
    dimension_semantics=("arbitrary",),          # layers are sequential
    vmem_limit_bytes=64 * 1024 * 1024)


def _stacked_spec(arr):
    shape = tuple(arr.shape[1:])
    return pl.BlockSpec((None,) + shape, lambda l: (l,) + (0,) * len(shape))


def _resident_spec(arr):
    return pl.BlockSpec(arr.shape, lambda l: (0,) * arr.ndim)


def hcl_stack(p, a_hat, x0, *, n_layers, d_model, d_k, d_v):
    n, dp = x0.shape
    weights = [p["wqkv"], p["bqkv"], p["wo"], p["bo"], p["lng"], p["lnb"],
               p["f1w"], p["f1b"], p["f2w"], p["f2b"]]
    kernel = functools.partial(_hcl_stack_kernel, d_model=d_model,
                               dkp=_pad_to(d_k), dvp=_pad_to(d_v),
                               scale=1.0 / math.sqrt(d_k))
    return pl.pallas_call(
        kernel, grid=(n_layers,),
        in_specs=[_resident_spec(a_hat), _resident_spec(x0)]
                 + [_stacked_spec(w) for w in weights],
        out_specs=pl.BlockSpec((n, dp), lambda l: (0, 0)),
        out_shape=jax.ShapeDtypeStruct((n, dp), jnp.float32),
        scratch_shapes=[pltpu.VMEM((n, dp), jnp.float32),
                        pltpu.VMEM((n, n), jnp.float32)],
        compiler_params=_CPARAMS,
    )(a_hat, x0, *weights)


def tf_stack(p, y0, *, n_layers, heads, d_model):
    rows, dp = y0.shape
    weights = [p["wqkv"], p["bqkv"], p["wo"], p["bo"], p["ln1g"], p["ln1b"],
               p["w1"], p["b1"], p["w2"], p["b2"], p["ln2g"], p["ln2b"]]
    kernel = functools.partial(_tf_stack_kernel, heads=heads, d_model=d_model, kp=LANE)
    return pl.pallas_call(
        kernel, grid=(n_layers,),
        in_specs=[_resident_spec(y0)] + [_stacked_spec(w) for w in weights],
        out_specs=pl.BlockSpec((rows, dp), lambda l: (0, 0)),
        out_shape=jax.ShapeDtypeStruct((rows, dp), jnp.float32),
        scratch_shapes=[pltpu.VMEM((rows, dp), jnp.float32)],
        compiler_params=_CPARAMS,
    )(y0, *weights)


def pooling_gating_classifier(gp, cla, seg_node, seg_path, node_emb, path_emb):
    b = seg_node.shape[0]
    cp = cla[3][0].shape[1]   # padded class width (128)
    args = [seg_node, seg_path, node_emb, path_emb,
            gp["lq"][0], gp["lq"][1], gp["lk1"][0], gp["lk1"][1],
            gp["lk2"][0], gp["lk2"][1], gp["lv1"][0], gp["lv1"][1],
            gp["lv2"][0], gp["lv2"][1], gp["lh"][0], gp["lh"][1],
            cla[0][0], cla[0][1], cla[1][0], cla[1][1],
            cla[2][0], cla[2][1], cla[3][0], cla[3][1]]
    return pl.pallas_call(
        _head_kernel, grid=(1,),
        in_specs=[pl.BlockSpec(a.shape, lambda i: (0, 0)) for a in args],
        out_specs=pl.BlockSpec((b, cp), lambda i: (0, 0)),
        out_shape=jax.ShapeDtypeStruct((b, cp), jnp.float32),
        compiler_params=pltpu.CompilerParams(vmem_limit_bytes=64 * 1024 * 1024),
    )(*args)


def cla_model_forward(params, a_hat, node_emb_p, path_emb_p, seg_node, seg_path,
                      *, n_class, n_heads, in_feature, d_k, d_v, n_layers):
    x = hcl_stack(params["hcl"], a_hat, node_emb_p,
                  n_layers=n_layers, d_model=in_feature, d_k=d_k, d_v=d_v)
    # TODO(synk): tfEncoder's source was not provided; implemented as a standard
    # post-LN multi-head self-attention transformer encoder stack (n_layers, n_heads).
    y = tf_stack(params["tf"], path_emb_p,
                 n_layers=n_layers, heads=n_heads, d_model=in_feature)
    out_p = pooling_gating_classifier(params["gating"], params["cla"],
                                      seg_node, seg_path, x, y)
    return out_p[:, :n_class]


# ----------------------------------------------------------------------------
# Deterministic, lane-padded parameter initialization (weights stored bf16)
# ----------------------------------------------------------------------------


def _pad_to(n):
    return max(LANE, ((n + LANE - 1) // LANE) * LANE)


def _pad_mat(w, rows, cols):
    return jnp.zeros((rows, cols), jnp.float32).at[:w.shape[0], :w.shape[1]].set(w)


def _pad_vec(b, cols):
    return jnp.zeros((1, cols), jnp.float32).at[0, :b.shape[0]].set(b)


def _raw_linear(key, fan_in, fan_out):
    kw, kb = jax.random.split(key)
    bound = 1.0 / math.sqrt(fan_in)
    w = jax.random.uniform(kw, (fan_in, fan_out), jnp.float32, -bound, bound)
    b = jax.random.uniform(kb, (fan_out,), jnp.float32, -bound, bound)
    return w, b


def _ln_params(dim):
    pad = _pad_to(dim)
    return (jnp.zeros((1, pad), jnp.float32).at[0, :dim].set(1.0),
            jnp.zeros((1, pad), jnp.float32))


def init_hcl_stack(keys, L, in_feature, d_k, d_v, hidden_size):
    dp, dkp, dvp, hsp = _pad_to(in_feature), _pad_to(d_k), _pad_to(d_v), _pad_to(hidden_size)
    acc = {k: [] for k in ("wqkv", "bqkv", "wo", "bo", "lng", "lnb",
                           "f1w", "f1b", "f2w", "f2b")}
    for _ in range(L):
        wq, bq = _raw_linear(next(keys), in_feature, d_k)
        wk, bk = _raw_linear(next(keys), in_feature, d_k)
        wv, bv = _raw_linear(next(keys), in_feature, d_v)
        acc["wqkv"].append(jnp.concatenate([_pad_mat(wq, dp, dkp),
                                            _pad_mat(wk, dp, dkp),
                                            _pad_mat(wv, dp, dvp)], axis=1))
        acc["bqkv"].append(jnp.concatenate([_pad_vec(bq, dkp), _pad_vec(bk, dkp),
                                            _pad_vec(bv, dvp)], axis=1))
        w, b = _raw_linear(next(keys), d_v, in_feature)
        acc["wo"].append(_pad_mat(w, dvp, dp)); acc["bo"].append(_pad_vec(b, dp))
        g, be = _ln_params(in_feature)
        acc["lng"].append(g); acc["lnb"].append(be)
        w, b = _raw_linear(next(keys), in_feature, hidden_size)
        acc["f1w"].append(_pad_mat(w, dp, hsp)); acc["f1b"].append(_pad_vec(b, hsp))
        w, b = _raw_linear(next(keys), hidden_size, in_feature)
        acc["f2w"].append(_pad_mat(w, hsp, dp)); acc["f2b"].append(_pad_vec(b, dp))
    bf16 = {"wqkv", "wo", "f1w", "f2w"}
    return {k: jnp.stack(v).astype(jnp.bfloat16 if k in bf16 else jnp.float32)
            for k, v in acc.items()}


def init_tf_stack(keys, L, d_model, heads):
    dp, kp = _pad_to(d_model), LANE
    hd = d_model // heads
    f4 = 4 * d_model
    f4p = _pad_to(f4)
    acc = {k: [] for k in ("wqkv", "bqkv", "wo", "bo", "ln1g", "ln1b",
                           "w1", "b1", "w2", "b2", "ln2g", "ln2b")}
    for _ in range(L):
        blocks, bias_blocks = [], []
        for _proj in range(3):   # q, k, v
            w, b = _raw_linear(next(keys), d_model, d_model)
            for h in range(heads):
                blocks.append(_pad_mat(w[:, h * hd:(h + 1) * hd], dp, kp))
                bias_blocks.append(_pad_vec(b[h * hd:(h + 1) * hd], kp))
        acc["wqkv"].append(jnp.concatenate(blocks, axis=1))          # [dp, 3*H*kp]
        acc["bqkv"].append(jnp.concatenate(bias_blocks, axis=1))
        w, b = _raw_linear(next(keys), d_model, d_model)
        acc["wo"].append(jnp.concatenate(
            [_pad_mat(w[h * hd:(h + 1) * hd, :], kp, dp) for h in range(heads)], axis=0))
        acc["bo"].append(_pad_vec(b, dp))
        g, be = _ln_params(d_model); acc["ln1g"].append(g); acc["ln1b"].append(be)
        w, b = _raw_linear(next(keys), d_model, f4)
        acc["w1"].append(_pad_mat(w, dp, f4p)); acc["b1"].append(_pad_vec(b, f4p))
        w, b = _raw_linear(next(keys), f4, d_model)
        acc["w2"].append(_pad_mat(w, f4p, dp)); acc["b2"].append(_pad_vec(b, dp))
        g, be = _ln_params(d_model); acc["ln2g"].append(g); acc["ln2b"].append(be)
    bf16 = {"wqkv", "wo", "w1", "w2"}
    return {k: jnp.stack(v).astype(jnp.bfloat16 if k in bf16 else jnp.float32)
            for k, v in acc.items()}


def init_head(keys, in_feature, heads, n_class):
    dp = _pad_to(in_feature)
    hd = in_feature // heads

    def lin(fi, fo):
        w, b = _raw_linear(next(keys), fi, fo)
        return (_pad_mat(w, _pad_to(fi), _pad_to(fo)).astype(jnp.bfloat16),
                _pad_vec(b, _pad_to(fo)))

    gate = {"lq": lin(in_feature, hd), "lk1": lin(in_feature, hd),
            "lk2": lin(in_feature, hd), "lv1": lin(in_feature, hd),
            "lv2": lin(in_feature, hd)}
    # Fold the head replication into the weight:
    # concat([head]*heads) @ W_lh == head @ (sum over the heads' row-blocks of W_lh).
    lh_w, lh_b = _raw_linear(next(keys), in_feature, in_feature)
    lh_w_collapsed = lh_w.reshape(heads, hd, in_feature).sum(axis=0)
    gate["lh"] = (_pad_mat(lh_w_collapsed, _pad_to(hd), dp).astype(jnp.bfloat16),
                  _pad_vec(lh_b, dp))
    cla = [lin(in_feature, 1024), lin(1024, 512), lin(512, 128), lin(128, n_class)]
    return gate, cla


def init_params(key, in_feature, n_layers, n_heads, n_class, d_k, d_v, hidden_size):
    keys = iter(jax.random.split(key, 128))
    hcl = init_hcl_stack(keys, n_layers, in_feature, d_k, d_v, hidden_size)
    tf = init_tf_stack(keys, n_layers, in_feature, n_heads)
    gate, cla = init_head(keys, in_feature, n_heads, n_class)
    return {"hcl": hcl, "tf": tf, "gating": gate, "cla": cla}


def build_segment_matrix(counts, total):
    rows, start = [], 0
    for c in counts:
        rows.append(jnp.zeros((total,), jnp.float32).at[start:start + c].set(1.0))
        start += c
    return jnp.stack(rows).astype(jnp.bfloat16)   # 0/1 -> exact in bf16


# ----------------------------------------------------------------------------
# Main
# ----------------------------------------------------------------------------

if __name__ == "__main__":
    in_feature = 32
    n_layers = 2
    n_heads = 4
    n_class = 5
    d_k = 16
    d_v = 16
    hidden_size = 64

    node_num = [5, 3]   # nodes per graph in the batch
    path_num = [4, 4]   # paths per graph in the batch
    N = sum(node_num)
    P = sum(path_num)

    key = jax.random.PRNGKey(0)
    k_par, k_adj, k_node, k_path = jax.random.split(key, 4)

    params = init_params(k_par, in_feature, n_layers, n_heads, n_class,
                         d_k, d_v, hidden_size)

    # dense symmetric adjacency with self-loops, normalized D^-1/2 A D^-1/2 (bf16 in HBM)
    adj = (jax.random.uniform(k_adj, (N, N)) < 0.4).astype(jnp.float32)
    adj = jnp.minimum(jnp.maximum(adj, adj.T) + jnp.eye(N, dtype=jnp.float32), 1.0)
    dis = 1.0 / jnp.sqrt(jnp.sum(adj, axis=1))
    a_hat = (adj * dis[:, None] * dis[None, :]).astype(jnp.bfloat16)

    node_emb = jax.random.normal(k_node, (N, in_feature), jnp.float32)
    path_emb = jax.random.normal(k_path, (P, in_feature), jnp.float32)

    # Lane-pad the embeddings once; they stay padded through the whole model.
    dpad = _pad_to(in_feature)
    node_emb_p = jnp.zeros((N, dpad), jnp.float32).at[:, :in_feature].set(node_emb)
    path_emb_p = jnp.zeros((P, dpad), jnp.float32).at[:, :in_feature].set(path_emb)

    # 0/1 segment matrices turn the pooling loop into a single matmul.
    seg_node = build_segment_matrix(node_num, N)
    seg_path = build_segment_matrix(path_num, P)

    fwd = jax.jit(functools.partial(
        cla_model_forward, n_class=n_class, n_heads=n_heads,
        in_feature=in_feature, d_k=d_k, d_v=d_v, n_layers=n_layers))

    out = fwd(params, a_hat, node_emb_p, path_emb_p, seg_node, seg_path)
    out = jax.block_until_ready(out)
    assert out.shape == (len(node_num), n_class)
    print("KERNEL_OK")
</pallas_src>

<mosaic_0001>
module attributes {stable_mosaic.version = 11 : i64} {
  func.func @_hcl_stack_kernel(%arg0: i32, %arg1: memref<8x8xbf16, #tpu.memory_space<vmem>>, %arg2: memref<8x128xf32, #tpu.memory_space<vmem>>, %arg3: memref<1x128x384xbf16, #tpu.memory_space<vmem>>, %arg4: memref<1x1x384xf32, #tpu.memory_space<vmem>>, %arg5: memref<1x128x128xbf16, #tpu.memory_space<vmem>>, %arg6: memref<1x1x128xf32, #tpu.memory_space<vmem>>, %arg7: memref<1x1x128xf32, #tpu.memory_space<vmem>>, %arg8: memref<1x1x128xf32, #tpu.memory_space<vmem>>, %arg9: memref<1x128x128xbf16, #tpu.memory_space<vmem>>, %arg10: memref<1x1x128xf32, #tpu.memory_space<vmem>>, %arg11: memref<1x128x128xbf16, #tpu.memory_space<vmem>>, %arg12: memref<1x1x128xf32, #tpu.memory_space<vmem>>, %arg13: memref<8x128xf32, #tpu.memory_space<vmem>>, %arg14: memref<8x128xf32, #tpu.memory_space<vmem>>, %arg15: memref<8x8xf32, #tpu.memory_space<vmem>>) attributes {dimension_semantics = [#tpu.dimension_semantics<arbitrary>], iteration_bounds = array<i64: 2>, scalar_prefetch = 0 : i64, scratch_operands = 2 : i64, tpu.core_type = #tpu.core_type<tc>, window_params = [{pipeline_mode = #tpu.pipeline_mode<synchronous>, transform_indices = @transform_0, window_bounds = array<i64: 8, 8>}, {pipeline_mode = #tpu.pipeline_mode<synchronous>, transform_indices = @transform_1, window_bounds = array<i64: 8, 128>}, {transform_indices = @transform_2, window_bounds = array<i64: 1, 128, 384>}, {transform_indices = @transform_3, window_bounds = array<i64: 1, 1, 384>}, {transform_indices = @transform_4, window_bounds = array<i64: 1, 128, 128>}, {transform_indices = @transform_5, window_bounds = array<i64: 1, 1, 128>}, {transform_indices = @transform_6, window_bounds = array<i64: 1, 1, 128>}, {transform_indices = @transform_7, window_bounds = array<i64: 1, 1, 128>}, {transform_indices = @transform_8, window_bounds = array<i64: 1, 128, 128>}, {transform_indices = @transform_9, window_bounds = array<i64: 1, 1, 128>}, {transform_indices = @transform_10, window_bounds = array<i64: 1, 128, 128>}, {transform_indices = @transform_11, window_bounds = array<i64: 1, 1, 128>}, {pipeline_mode = #tpu.pipeline_mode<synchronous>, transform_indices = @transform_12, window_bounds = array<i64: 8, 128>}]} {
    %c0_i32 = arith.constant 0 : i32
    %0 = arith.cmpi eq, %arg0, %c0_i32 : i32
    %1 = arith.extui %0 : i1 to i32
    %c0_i32_0 = arith.constant 0 : i32
    %2 = arith.cmpi ne, %1, %c0_i32_0 : i32
    scf.if %2 {
      %c0_73 = arith.constant 0 : index
      %c0_74 = arith.constant 0 : index
      %129 = vector.load %arg2[%c0_73, %c0_74] : memref<8x128xf32, #tpu.memory_space<vmem>>, vector<8x128xf32>
      %c0_75 = arith.constant 0 : index
      %c0_76 = arith.constant 0 : index
      %130 = vector.load %arg14[%c0_75, %c0_76] : memref<8x128xf32, #tpu.memory_space<vmem>>, vector<8x128xf32>
      tpu.vector_store %arg14[%c0_75, %c0_76], %129 {strides = array<i32>} : memref<8x128xf32, #tpu.memory_space<vmem>>, vector<8x128xf32>,
      %cst_77 = arith.constant 0.000000e+00 : f32
      %131 = vector.broadcast %cst_77 : f32 to vector<8x8xf32>
      %c0_78 = arith.constant 0 : index
      %c0_79 = arith.constant 0 : index
      %132 = vector.load %arg15[%c0_78, %c0_79] : memref<8x8xf32, #tpu.memory_space<vmem>>, vector<8x8xf32>
      tpu.vector_store %arg15[%c0_78, %c0_79], %131 {strides = array<i32>} : memref<8x8xf32, #tpu.memory_space<vmem>>, vector<8x8xf32>,
    } else {
    }
    %c0 = arith.constant 0 : index
    %c0_1 = arith.constant 0 : index
    %3 = vector.load %arg1[%c0, %c0_1] : memref<8x8xbf16, #tpu.memory_space<vmem>>, vector<8x8xbf16>
    %c0_2 = arith.constant 0 : index
    %c0_3 = arith.constant 0 : index
    %4 = vector.load %arg14[%c0_2, %c0_3] : memref<8x128xf32, #tpu.memory_space<vmem>>, vector<8x128xf32>
    %5 = arith.truncf %4 : vector<8x128xf32> to vector<8x128xbf16>
    %cst = arith.constant dense<0.000000e+00> : vector<8x128xf32>
    %6 = tpu.matmul %3, %5, %cst {dimension_numbers = #tpu.dot_dimension_numbers<[1], [0], [0], [1], [0, 0, 1, 1], [], []>} : vector<8x8xbf16>, vector<8x128xbf16>, vector<8x128xf32> -> vector<8x128xf32>
    %7 = arith.truncf %6 : vector<8x128xf32> to vector<8x128xbf16>
    %c0_4 = arith.constant 0 : index
    %c0_5 = arith.constant 0 : index
    %c0_6 = arith.constant 0 : index
    %8 = vector.load %arg3[%c0_4, %c0_5, %c0_6] : memref<1x128x384xbf16, #tpu.memory_space<vmem>>, vector<1x128x384xbf16>
    %9 = vector.shape_cast %8 : vector<1x128x384xbf16> to vector<128x384xbf16>
    %cst_7 = arith.constant dense<0.000000e+00> : vector<8x384xf32>
    %10 = tpu.matmul %7, %9, %cst_7 {dimension_numbers = #tpu.dot_dimension_numbers<[1], [0], [0], [1], [0, 0, 1, 1], [], []>} : vector<8x128xbf16>, vector<128x384xbf16>, vector<8x384xf32> -> vector<8x384xf32>
    %c0_8 = arith.constant 0 : index
    %c0_9 = arith.constant 0 : index
    %c0_10 = arith.constant 0 : index
    %11 = vector.load %arg4[%c0_8, %c0_9, %c0_10] : memref<1x1x384xf32, #tpu.memory_space<vmem>>, vector<1x1x384xf32>
    %12 = vector.shape_cast %11 : vector<1x1x384xf32> to vector<1x384xf32>
    %13 = vector.broadcast %12 : vector<1x384xf32> to vector<8x384xf32>
    %14 = arith.addf %10, %13 : vector<8x384xf32>
    %15 = vector.extract_strided_slice %14 {offsets = [0, 0], sizes = [8, 128], strides = [1, 1]} : vector<8x384xf32> to vector<8x128xf32>
    %16 = vector.extract_strided_slice %14 {offsets = [0, 128], sizes = [8, 128], strides = [1, 1]} : vector<8x384xf32> to vector<8x128xf32>
    %17 = vector.extract_strided_slice %14 {offsets = [0, 256], sizes = [8, 128], strides = [1, 1]} : vector<8x384xf32> to vector<8x128xf32>
    %18 = arith.truncf %15 : vector<8x128xf32> to vector<8x128xbf16>
    %19 = arith.truncf %16 : vector<8x128xf32> to vector<8x128xbf16>
    %cst_11 = arith.constant dense<0.000000e+00> : vector<8x8xf32>
    %20 = tpu.matmul %18, %19, %cst_11 {dimension_numbers = #tpu.dot_dimension_numbers<[1], [1], [0], [0], [0, 0, 1, 0], [], []>} : vector<8x128xbf16>, vector<8x128xbf16>, vector<8x8xf32> -> vector<8x8xf32>
    %cst_12 = arith.constant 2.500000e-01 : f32
    %21 = vector.broadcast %cst_12 : f32 to vector<8x8xf32>
    %22 = arith.mulf %20, %21 : vector<8x8xf32>
    %c0_13 = arith.constant 0 : index
    %c0_14 = arith.constant 0 : index
    %23 = vector.load %arg15[%c0_13, %c0_14] : memref<8x8xf32, #tpu.memory_space<vmem>>, vector<8x8xf32>
    %24 = arith.addf %22, %23 : vector<8x8xf32>
    %cst_15 = arith.constant dense<0xFF800000> : vector<8xf32>
    %25 = vector.multi_reduction <maximumf>, %24, %cst_15 [1] : vector<8x8xf32> to vector<8xf32>
    %26 = vector.shape_cast %25 : vector<8xf32> to vector<8x1xf32>
    %27 = vector.broadcast %26 : vector<8x1xf32> to vector<8x8xf32>
    %28 = arith.subf %24, %27 : vector<8x8xf32>
    %29 = math.exp %28 : vector<8x8xf32>
    %cst_16 = arith.constant dense<0.000000e+00> : vector<8xf32>
    %30 = vector.multi_reduction <add>, %29, %cst_16 [1] : vector<8x8xf32> to vector<8xf32>
    %31 = vector.shape_cast %30 : vector<8xf32> to vector<8x1xf32>
    %32 = vector.broadcast %31 : vector<8x1xf32> to vector<8x8xf32>
    %33 = arith.divf %29, %32 : vector<8x8xf32>
    %c0_17 = arith.constant 0 : index
    %c0_18 = arith.constant 0 : index
    %34 = vector.load %arg15[%c0_17, %c0_18] : memref<8x8xf32, #tpu.memory_space<vmem>>, vector<8x8xf32>
    tpu.vector_store %arg15[%c0_17, %c0_18], %33 {strides = array<i32>} : memref<8x8xf32, #tpu.memory_space<vmem>>, vector<8x8xf32>,
    %35 = arith.truncf %33 : vector<8x8xf32> to vector<8x8xbf16>
    %36 = arith.truncf %17 : vector<8x128xf32> to vector<8x128xbf16>
    %cst_19 = arith.constant dense<0.000000e+00> : vector<8x128xf32>
    %37 = tpu.matmul %35, %36, %cst_19 {dimension_numbers = #tpu.dot_dimension_numbers<[1], [0], [0], [1], [0, 0, 1, 1], [], []>} : vector<8x8xbf16>, vector<8x128xbf16>, vector<8x128xf32> -> vector<8x128xf32>
    %38 = arith.truncf %37 : vector<8x128xf32> to vector<8x128xbf16>
    %cst_20 = arith.constant dense<0.000000e+00> : vector<8x128xf32>
    %39 = tpu.matmul %3, %38, %cst_20 {dimension_numbers = #tpu.dot_dimension_numbers<[1], [0], [0], [1], [0, 0, 1, 1], [], []>} : vector<8x8xbf16>, vector<8x128xbf16>, vector<8x128xf32> -> vector<8x128xf32>
    %40 = arith.truncf %39 : vector<8x128xf32> to vector<8x128xbf16>
    %c0_21 = arith.constant 0 : index
    %c0_22 = arith.constant 0 : index
    %c0_23 = arith.constant 0 : index
    %41 = vector.load %arg5[%c0_21, %c0_22, %c0_23] : memref<1x128x128xbf16, #tpu.memory_space<vmem>>, vector<1x128x128xbf16>
    %42 = vector.shape_cast %41 : vector<1x128x128xbf16> to vector<128x128xbf16>
    %cst_24 = arith.constant dense<0.000000e+00> : vector<8x128xf32>
    %43 = tpu.matmul %40, %42, %cst_24 {dimension_numbers = #tpu.dot_dimension_numbers<[1], [0], [0], [1], [0, 0, 1, 1], [], []>} : vector<8x128xbf16>, vector<128x128xbf16>, vector<8x128xf32> -> vector<8x128xf32>
    %c0_25 = arith.constant 0 : index
    %c0_26 = arith.constant 0 : index
    %c0_27 = arith.constant 0 : index
    %44 = vector.load %arg6[%c0_25, %c0_26, %c0_27] : memref<1x1x128xf32, #tpu.memory_space<vmem>>, vector<1x1x128xf32>
    %45 = vector.shape_cast %44 : vector<1x1x128xf32> to vector<1x128xf32>
    %46 = vector.broadcast %45 : vector<1x128xf32> to vector<8x128xf32>
    %47 = arith.addf %43, %46 : vector<8x128xf32>
    %c0_28 = arith.constant 0 : index
    %c0_29 = arith.constant 0 : index
    %c0_30 = arith.constant 0 : index
    %48 = vector.load %arg7[%c0_28, %c0_29, %c0_30] : memref<1x1x128xf32, #tpu.memory_space<vmem>>, vector<1x1x128xf32>
    %49 = vector.shape_cast %48 : vector<1x1x128xf32> to vector<1x128xf32>
    %c0_31 = arith.constant 0 : index
    %c0_32 = arith.constant 0 : index
    %c0_33 = arith.constant 0 : index
    %50 = vector.load %arg8[%c0_31, %c0_32, %c0_33] : memref<1x1x128xf32, #tpu.memory_space<vmem>>, vector<1x1x128xf32>
    %51 = vector.shape_cast %50 : vector<1x1x128xf32> to vector<1x128xf32>
    %cst_34 = arith.constant dense<0.000000e+00> : vector<8xf32>
    %52 = vector.multi_reduction <add>, %47, %cst_34 [1] : vector<8x128xf32> to vector<8xf32>
    %53 = vector.shape_cast %52 : vector<8xf32> to vector<8x1xf32>
    %cst_35 = arith.constant 3.125000e-02 : f32
    %54 = vector.broadcast %cst_35 : f32 to vector<8x1xf32>
    %55 = arith.mulf %53, %54 : vector<8x1xf32>
    %56 = arith.mulf %47, %47 : vector<8x128xf32>
    %cst_36 = arith.constant dense<0.000000e+00> : vector<8xf32>
    %57 = vector.multi_reduction <add>, %56, %cst_36 [1] : vector<8x128xf32> to vector<8xf32>
    %58 = vector.shape_cast %57 : vector<8xf32> to vector<8x1xf32>
    %cst_37 = arith.constant 3.125000e-02 : f32
    %59 = vector.broadcast %cst_37 : f32 to vector<8x1xf32>
    %60 = arith.mulf %58, %59 : vector<8x1xf32>
    %61 = arith.mulf %55, %55 : vector<8x1xf32>
    %62 = arith.subf %60, %61 : vector<8x1xf32>
    %cst_38 = arith.constant 0.000000e+00 : f32
    %63 = vector.broadcast %cst_38 : f32 to vector<8x1xf32>
    %64 = arith.maximumf %62, %63 : vector<8x1xf32>
    %65 = vector.broadcast %55 : vector<8x1xf32> to vector<8x128xf32>
    %66 = arith.subf %47, %65 : vector<8x128xf32>
    %cst_39 = arith.constant 9.99999974E-6 : f32
    %67 = vector.broadcast %cst_39 : f32 to vector<8x1xf32>
    %68 = arith.addf %64, %67 : vector<8x1xf32>
    %69 = math.rsqrt %68 : vector<8x1xf32>
    %70 = vector.broadcast %69 : vector<8x1xf32> to vector<8x128xf32>
    %71 = arith.mulf %66, %70 : vector<8x128xf32>
    %72 = vector.broadcast %49 : vector<1x128xf32> to vector<8x128xf32>
    %73 = arith.mulf %71, %72 : vector<8x128xf32>
    %74 = vector.broadcast %51 : vector<1x128xf32> to vector<8x128xf32>
    %75 = arith.addf %73, %74 : vector<8x128xf32>
    %76 = arith.addf %75, %4 : vector<8x128xf32>
    %77 = arith.truncf %76 : vector<8x128xf32> to vector<8x128xbf16>
    %cst_40 = arith.constant dense<0.000000e+00> : vector<8x128xf32>
    %78 = tpu.matmul %3, %77, %cst_40 {dimension_numbers = #tpu.dot_dimension_numbers<[1], [0], [0], [1], [0, 0, 1, 1], [], []>} : vector<8x8xbf16>, vector<8x128xbf16>, vector<8x128xf32> -> vector<8x128xf32>
    %79 = arith.truncf %78 : vector<8x128xf32> to vector<8x128xbf16>
    %c0_41 = arith.constant 0 : index
    %c0_42 = arith.constant 0 : index
    %c0_43 = arith.constant 0 : index
    %80 = vector.load %arg9[%c0_41, %c0_42, %c0_43] : memref<1x128x128xbf16, #tpu.memory_space<vmem>>, vector<1x128x128xbf16>
    %81 = vector.shape_cast %80 : vector<1x128x128xbf16> to vector<128x128xbf16>
    %cst_44 = arith.constant dense<0.000000e+00> : vector<8x128xf32>
    %82 = tpu.matmul %79, %81, %cst_44 {dimension_numbers = #tpu.dot_dimension_numbers<[1], [0], [0], [1], [0, 0, 1, 1], [], []>} : vector<8x128xbf16>, vector<128x128xbf16>, vector<8x128xf32> -> vector<8x128xf32>
    %c0_45 = arith.constant 0 : index
    %c0_46 = arith.constant 0 : index
    %c0_47 = arith.constant 0 : index
    %83 = vector.load %arg10[%c0_45, %c0_46, %c0_47] : memref<1x1x128xf32, #tpu.memory_space<vmem>>, vector<1x1x128xf32>
    %84 = vector.shape_cast %83 : vector<1x1x128xf32> to vector<1x128xf32>
    %85 = vector.broadcast %84 : vector<1x128xf32> to vector<8x128xf32>
    %86 = arith.addf %82, %85 : vector<8x128xf32>
    %cst_48 = arith.constant 0.000000e+00 : f32
    %87 = vector.broadcast %cst_48 : f32 to vector<8x128xf32>
    %88 = arith.maximumf %86, %87 : vector<8x128xf32>
    %89 = arith.truncf %88 : vector<8x128xf32> to vector<8x128xbf16>
    %cst_49 = arith.constant dense<0.000000e+00> : vector<8x128xf32>
    %90 = tpu.matmul %3, %89, %cst_49 {dimension_numbers = #tpu.dot_dimension_numbers<[1], [0], [0], [1], [0, 0, 1, 1], [], []>} : vector<8x8xbf16>, vector<8x128xbf16>, vector<8x128xf32> -> vector<8x128xf32>
    %91 = arith.truncf %90 : vector<8x128xf32> to vector<8x128xbf16>
    %c0_50 = arith.constant 0 : index
    %c0_51 = arith.constant 0 : index
    %c0_52 = arith.constant 0 : index
    %92 = vector.load %arg11[%c0_50, %c0_51, %c0_52] : memref<1x128x128xbf16, #tpu.memory_space<vmem>>, vector<1x128x128xbf16>
    %93 = vector.shape_cast %92 : vector<1x128x128xbf16> to vector<128x128xbf16>
    %cst_53 = arith.constant dense<0.000000e+00> : vector<8x128xf32>
    %94 = tpu.matmul %91, %93, %cst_53 {dimension_numbers = #tpu.dot_dimension_numbers<[1], [0], [0], [1], [0, 0, 1, 1], [], []>} : vector<8x128xbf16>, vector<128x128xbf16>, vector<8x128xf32> -> vector<8x128xf32>
    %c0_54 = arith.constant 0 : index
    %c0_55 = arith.constant 0 : index
    %c0_56 = arith.constant 0 : index
    %95 = vector.load %arg12[%c0_54, %c0_55, %c0_56] : memref<1x1x128xf32, #tpu.memory_space<vmem>>, vector<1x1x128xf32>
    %96 = vector.shape_cast %95 : vector<1x1x128xf32> to vector<1x128xf32>
    %97 = vector.broadcast %96 : vector<1x128xf32> to vector<8x128xf32>
    %98 = arith.addf %94, %97 : vector<8x128xf32>
    %c0_57 = arith.constant 0 : index
    %c0_58 = arith.constant 0 : index
    %c0_59 = arith.constant 0 : index
    %99 = vector.load %arg7[%c0_57, %c0_58, %c0_59] : memref<1x1x128xf32, #tpu.memory_space<vmem>>, vector<1x1x128xf32>
    %100 = vector.shape_cast %99 : vector<1x1x128xf32> to vector<1x128xf32>
    %c0_60 = arith.constant 0 : index
    %c0_61 = arith.constant 0 : index
    %c0_62 = arith.constant 0 : index
    %101 = vector.load %arg8[%c0_60, %c0_61, %c0_62] : memref<1x1x128xf32, #tpu.memory_space<vmem>>, vector<1x1x128xf32>
    %102 = vector.shape_cast %101 : vector<1x1x128xf32> to vector<1x128xf32>
    %cst_63 = arith.constant dense<0.000000e+00> : vector<8xf32>
    %103 = vector.multi_reduction <add>, %98, %cst_63 [1] : vector<8x128xf32> to vector<8xf32>
    %104 = vector.shape_cast %103 : vector<8xf32> to vector<8x1xf32>
    %cst_64 = arith.constant 3.125000e-02 : f32
    %105 = vector.broadcast %cst_64 : f32 to vector<8x1xf32>
    %106 = arith.mulf %104, %105 : vector<8x1xf32>
    %107 = arith.mulf %98, %98 : vector<8x128xf32>
    %cst_65 = arith.constant dense<0.000000e+00> : vector<8xf32>
    %108 = vector.multi_reduction <add>, %107, %cst_65 [1] : vector<8x128xf32> to vector<8xf32>
    %109 = vector.shape_cast %108 : vector<8xf32> to vector<8x1xf32>
    %cst_66 = arith.constant 3.125000e-02 : f32
    %110 = vector.broadcast %cst_66 : f32 to vector<8x1xf32>
    %111 = arith.mulf %109, %110 : vector<8x1xf32>
    %112 = arith.mulf %106, %106 : vector<8x1xf32>
    %113 = arith.subf %111, %112 : vector<8x1xf32>
    %cst_67 = arith.constant 0.000000e+00 : f32
    %114 = vector.broadcast %cst_67 : f32 to vector<8x1xf32>
    %115 = arith.maximumf %113, %114 : vector<8x1xf32>
    %116 = vector.broadcast %106 : vector<8x1xf32> to vector<8x128xf32>
    %117 = arith.subf %98, %116 : vector<8x128xf32>
    %cst_68 = arith.constant 9.99999974E-6 : f32
    %118 = vector.broadcast %cst_68 : f32 to vector<8x1xf32>
    %119 = arith.addf %115, %118 : vector<8x1xf32>
    %120 = math.rsqrt %119 : vector<8x1xf32>
    %121 = vector.broadcast %120 : vector<8x1xf32> to vector<8x128xf32>
    %122 = arith.mulf %117, %121 : vector<8x128xf32>
    %123 = vector.broadcast %100 : vector<1x128xf32> to vector<8x128xf32>
    %124 = arith.mulf %122, %123 : vector<8x128xf32>
    %125 = vector.broadcast %102 : vector<1x128xf32> to vector<8x128xf32>
    %126 = arith.addf %124, %125 : vector<8x128xf32>
    %c0_69 = arith.constant 0 : index
    %c0_70 = arith.constant 0 : index
    %127 = vector.load %arg14[%c0_69, %c0_70] : memref<8x128xf32, #tpu.memory_space<vmem>>, vector<8x128xf32>
    tpu.vector_store %arg14[%c0_69, %c0_70], %126 {strides = array<i32>} : memref<8x128xf32, #tpu.memory_space<vmem>>, vector<8x128xf32>,
    %c0_71 = arith.constant 0 : index
    %c0_72 = arith.constant 0 : index
    %128 = vector.load %arg13[%c0_71, %c0_72] : memref<8x128xf32, #tpu.memory_space<vmem>>, vector<8x128xf32>
    tpu.vector_store %arg13[%c0_71, %c0_72], %126 {strides = array<i32>} : memref<8x128xf32, #tpu.memory_space<vmem>>, vector<8x128xf32>,
    return
  }
  func.func @transform_0(%arg0: i32) -> (i32, i32) {
    %c0_i32 = arith.constant 0 : i32
    %c0_i32_0 = arith.constant 0 : i32
    %c0_i32_1 = arith.constant 0 : i32
    return %c0_i32, %c0_i32_0 : i32, i32
  }
  func.func @transform_1(%arg0: i32) -> (i32, i32) {
    %c0_i32 = arith.constant 0 : i32
    %c0_i32_0 = arith.constant 0 : i32
    %c0_i32_1 = arith.constant 0 : i32
    return %c0_i32, %c0_i32_0 : i32, i32
  }
  func.func @transform_2(%arg0: i32) -> (i32, i32, i32) {
    %c0_i32 = arith.constant 0 : i32
    %c0_i32_0 = arith.constant 0 : i32
    %c0_i32_1 = arith.constant 0 : i32
    return %arg0, %c0_i32, %c0_i32_0 : i32, i32, i32
  }
  func.func @transform_3(%arg0: i32) -> (i32, i32, i32) {
    %c0_i32 = arith.constant 0 : i32
    %c0_i32_0 = arith.constant 0 : i32
    %c0_i32_1 = arith.constant 0 : i32
    return %arg0, %c0_i32, %c0_i32_0 : i32, i32, i32
  }
  func.func @transform_4(%arg0: i32) -> (i32, i32, i32) {
    %c0_i32 = arith.constant 0 : i32
    %c0_i32_0 = arith.constant 0 : i32
    %c0_i32_1 = arith.constant 0 : i32
    return %arg0, %c0_i32, %c0_i32_0 : i32, i32, i32
  }
  func.func @transform_5(%arg0: i32) -> (i32, i32, i32) {
    %c0_i32 = arith.constant 0 : i32
    %c0_i32_0 = arith.constant 0 : i32
    %c0_i32_1 = arith.constant 0 : i32
    return %arg0, %c0_i32, %c0_i32_0 : i32, i32, i32
  }
  func.func @transform_6(%arg0: i32) -> (i32, i32, i32) {
    %c0_i32 = arith.constant 0 : i32
    %c0_i32_0 = arith.constant 0 : i32
    %c0_i32_1 = arith.constant 0 : i32
    return %arg0, %c0_i32, %c0_i32_0 : i32, i32, i32
  }
  func.func @transform_7(%arg0: i32) -> (i32, i32, i32) {
    %c0_i32 = arith.constant 0 : i32
    %c0_i32_0 = arith.constant 0 : i32
    %c0_i32_1 = arith.constant 0 : i32
    return %arg0, %c0_i32, %c0_i32_0 : i32, i32, i32
  }
  func.func @transform_8(%arg0: i32) -> (i32, i32, i32) {
    %c0_i32 = arith.constant 0 : i32
    %c0_i32_0 = arith.constant 0 : i32
    %c0_i32_1 = arith.constant 0 : i32
    return %arg0, %c0_i32, %c0_i32_0 : i32, i32, i32
  }
  func.func @transform_9(%arg0: i32) -> (i32, i32, i32) {
    %c0_i32 = arith.constant 0 : i32
    %c0_i32_0 = arith.constant 0 : i32
    %c0_i32_1 = arith.constant 0 : i32
    return %arg0, %c0_i32, %c0_i32_0 : i32, i32, i32
  }
  func.func @transform_10(%arg0: i32) -> (i32, i32, i32) {
    %c0_i32 = arith.constant 0 : i32
    %c0_i32_0 = arith.constant 0 : i32
    %c0_i32_1 = arith.constant 0 : i32
    return %arg0, %c0_i32, %c0_i32_0 : i32, i32, i32
  }
  func.func @transform_11(%arg0: i32) -> (i32, i32, i32) {
    %c0_i32 = arith.constant 0 : i32
    %c0_i32_0 = arith.constant 0 : i32
    %c0_i32_1 = arith.constant 0 : i32
    return %arg0, %c0_i32, %c0_i32_0 : i32, i32, i32
  }
  func.func @transform_12(%arg0: i32) -> (i32, i32) {
    %c0_i32 = arith.constant 0 : i32
    %c0_i32_0 = arith.constant 0 : i32
    %c0_i32_1 = arith.constant 0 : i32
    return %c0_i32, %c0_i32_0 : i32, i32
  }
}

module attributes {stable_mosaic.version = 11 : i64} {
  func.func @_tf_stack_kernel(%arg0: i32, %arg1: memref<8x128xf32, #tpu.memory_space<vmem>>, %arg2: memref<1x128x1536xbf16, #tpu.memory_space<vmem>>, %arg3: memref<1x1x1536xf32, #tpu.memory_space<vmem>>, %arg4: memref<1x512x128xbf16, #tpu.memory_space<vmem>>, %arg5: memref<1x1x128xf32, #tpu.memory_space<vmem>>, %arg6: memref<1x1x128xf32, #tpu.memory_space<vmem>>, %arg7: memref<1x1x128xf32, #tpu.memory_space<vmem>>, %arg8: memref<1x128x128xbf16, #tpu.memory_space<vmem>>, %arg9: memref<1x1x128xf32, #tpu.memory_space<vmem>>, %arg10: memref<1x128x128xbf16, #tpu.memory_space<vmem>>, %arg11: memref<1x1x128xf32, #tpu.memory_space<vmem>>, %arg12: memref<1x1x128xf32, #tpu.memory_space<vmem>>, %arg13: memref<1x1x128xf32, #tpu.memory_space<vmem>>, %arg14: memref<8x128xf32, #tpu.memory_space<vmem>>, %arg15: memref<8x128xf32, #tpu.memory_space<vmem>>) attributes {dimension_semantics = [#tpu.dimension_semantics<arbitrary>], iteration_bounds = array<i64: 2>, scalar_prefetch = 0 : i64, scratch_operands = 1 : i64, tpu.core_type = #tpu.core_type<tc>, window_params = [{pipeline_mode = #tpu.pipeline_mode<synchronous>, transform_indices = @transform_0, window_bounds = array<i64: 8, 128>}, {transform_indices = @transform_1, window_bounds = array<i64: 1, 128, 1536>}, {transform_indices = @transform_2, window_bounds = array<i64: 1, 1, 1536>}, {transform_indices = @transform_3, window_bounds = array<i64: 1, 512, 128>}, {transform_indices = @transform_4, window_bounds = array<i64: 1, 1, 128>}, {transform_indices = @transform_5, window_bounds = array<i64: 1, 1, 128>}, {transform_indices = @transform_6, window_bounds = array<i64: 1, 1, 128>}, {transform_indices = @transform_7, window_bounds = array<i64: 1, 128, 128>}, {transform_indices = @transform_8, window_bounds = array<i64: 1, 1, 128>}, {transform_indices = @transform_9, window_bounds = array<i64: 1, 128, 128>}, {transform_indices = @transform_10, window_bounds = array<i64: 1, 1, 128>}, {transform_indices = @transform_11, window_bounds = array<i64: 1, 1, 128>}, {transform_indices = @transform_12, window_bounds = array<i64: 1, 1, 128>}, {pipeline_mode = #tpu.pipeline_mode<synchronous>, transform_indices = @transform_13, window_bounds = array<i64: 8, 128>}]} {
    %c0_i32 = arith.constant 0 : i32
    %0 = arith.cmpi eq, %arg0, %c0_i32 : i32
    %1 = arith.extui %0 : i1 to i32
    %c0_i32_0 = arith.constant 0 : i32
    %2 = arith.cmpi ne, %1, %c0_i32_0 : i32
    scf.if %2 {
      %c0_66 = arith.constant 0 : index
      %c0_67 = arith.constant 0 : index
      %163 = vector.load %arg1[%c0_66, %c0_67] : memref<8x128xf32, #tpu.memory_space<vmem>>, vector<8x128xf32>
      %c0_68 = arith.constant 0 : index
      %c0_69 = arith.constant 0 : index
      %164 = vector.load %arg15[%c0_68, %c0_69] : memref<8x128xf32, #tpu.memory_space<vmem>>, vector<8x128xf32>
      tpu.vector_store %arg15[%c0_68, %c0_69], %163 {strides = array<i32>} : memref<8x128xf32, #tpu.memory_space<vmem>>, vector<8x128xf32>,
    } else {
    }
    %c0 = arith.constant 0 : index
    %c0_1 = arith.constant 0 : index
    %3 = vector.load %arg15[%c0, %c0_1] : memref<8x128xf32, #tpu.memory_space<vmem>>, vector<8x128xf32>
    %4 = arith.truncf %3 : vector<8x128xf32> to vector<8x128xbf16>
    %c0_2 = arith.constant 0 : index
    %c0_3 = arith.constant 0 : index
    %c0_4 = arith.constant 0 : index
    %5 = vector.load %arg2[%c0_2, %c0_3, %c0_4] : memref<1x128x1536xbf16, #tpu.memory_space<vmem>>, vector<1x128x1536xbf16>
    %6 = vector.shape_cast %5 : vector<1x128x1536xbf16> to vector<128x1536xbf16>
    %cst = arith.constant dense<0.000000e+00> : vector<8x1536xf32>
    %7 = tpu.matmul %4, %6, %cst {dimension_numbers = #tpu.dot_dimension_numbers<[1], [0], [0], [1], [0, 0, 1, 1], [], []>} : vector<8x128xbf16>, vector<128x1536xbf16>, vector<8x1536xf32> -> vector<8x1536xf32>
    %c0_5 = arith.constant 0 : index
    %c0_6 = arith.constant 0 : index
    %c0_7 = arith.constant 0 : index
    %8 = vector.load %arg3[%c0_5, %c0_6, %c0_7] : memref<1x1x1536xf32, #tpu.memory_space<vmem>>, vector<1x1x1536xf32>
    %9 = vector.shape_cast %8 : vector<1x1x1536xf32> to vector<1x1536xf32>
    %10 = vector.broadcast %9 : vector<1x1536xf32> to vector<8x1536xf32>
    %11 = arith.addf %7, %10 : vector<8x1536xf32>
    %12 = vector.extract_strided_slice %11 {offsets = [0, 0], sizes = [8, 128], strides = [1, 1]} : vector<8x1536xf32> to vector<8x128xf32>
    %13 = vector.extract_strided_slice %11 {offsets = [0, 128], sizes = [8, 128], strides = [1, 1]} : vector<8x1536xf32> to vector<8x128xf32>
    %14 = vector.extract_strided_slice %11 {offsets = [0, 256], sizes = [8, 128], strides = [1, 1]} : vector<8x1536xf32> to vector<8x128xf32>
    %15 = vector.extract_strided_slice %11 {offsets = [0, 384], sizes = [8, 128], strides = [1, 1]} : vector<8x1536xf32> to vector<8x128xf32>
    %16 = vector.shape_cast %12 : vector<8x128xf32> to vector<1x8x128xf32>
    %17 = vector.shape_cast %13 : vector<8x128xf32> to vector<1x8x128xf32>
    %18 = vector.shape_cast %14 : vector<8x128xf32> to vector<1x8x128xf32>
    %19 = vector.shape_cast %15 : vector<8x128xf32> to vector<1x8x128xf32>
    %20 = tpu.concatenate %16, %17, %18, %19 in 0 : vector<1x8x128xf32>, vector<1x8x128xf32>, vector<1x8x128xf32>, vector<1x8x128xf32> -> vector<4x8x128xf32>
    %21 = vector.extract_strided_slice %11 {offsets = [0, 512], sizes = [8, 128], strides = [1, 1]} : vector<8x1536xf32> to vector<8x128xf32>
    %22 = vector.extract_strided_slice %11 {offsets = [0, 640], sizes = [8, 128], strides = [1, 1]} : vector<8x1536xf32> to vector<8x128xf32>
    %23 = vector.extract_strided_slice %11 {offsets = [0, 768], sizes = [8, 128], strides = [1, 1]} : vector<8x1536xf32> to vector<8x128xf32>
    %24 = vector.extract_strided_slice %11 {offsets = [0, 896], sizes = [8, 128], strides = [1, 1]} : vector<8x1536xf32> to vector<8x128xf32>
    %25 = vector.shape_cast %21 : vector<8x128xf32> to vector<1x8x128xf32>
    %26 = vector.shape_cast %22 : vector<8x128xf32> to vector<1x8x128xf32>
    %27 = vector.shape_cast %23 : vector<8x128xf32> to vector<1x8x128xf32>
    %28 = vector.shape_cast %24 : vector<8x128xf32> to vector<1x8x128xf32>
    %29 = tpu.concatenate %25, %26, %27, %28 in 0 : vector<1x8x128xf32>, vector<1x8x128xf32>, vector<1x8x128xf32>, vector<1x8x128xf32> -> vector<4x8x128xf32>
    %30 = vector.extract_strided_slice %11 {offsets = [0, 1024], sizes = [8, 128], strides = [1, 1]} : vector<8x1536xf32> to vector<8x128xf32>
    %31 = vector.extract_strided_slice %11 {offsets = [0, 1152], sizes = [8, 128], strides = [1, 1]} : vector<8x1536xf32> to vector<8x128xf32>
    %32 = vector.extract_strided_slice %11 {offsets = [0, 1280], sizes = [8, 128], strides = [1, 1]} : vector<8x1536xf32> to vector<8x128xf32>
    %33 = vector.extract_strided_slice %11 {offsets = [0, 1408], sizes = [8, 128], strides = [1, 1]} : vector<8x1536xf32> to vector<8x128xf32>
    %34 = vector.shape_cast %30 : vector<8x128xf32> to vector<1x8x128xf32>
    %35 = vector.shape_cast %31 : vector<8x128xf32> to vector<1x8x128xf32>
    %36 = vector.shape_cast %32 : vector<8x128xf32> to vector<1x8x128xf32>
    %37 = vector.shape_cast %33 : vector<8x128xf32> to vector<1x8x128xf32>
    %38 = tpu.concatenate %34, %35, %36, %37 in 0 : vector<1x8x128xf32>, vector<1x8x128xf32>, vector<1x8x128xf32>, vector<1x8x128xf32> -> vector<4x8x128xf32>
    %39 = arith.truncf %20 : vector<4x8x128xf32> to vector<4x8x128xbf16>
    %40 = arith.truncf %29 : vector<4x8x128xf32> to vector<4x8x128xbf16>
    "tpu.trace_start"() <{level = 10 : i32, message = "hqd,hkd->hqk"}> : () -> ()
    %cst_8 = arith.constant dense<0.000000e+00> : vector<4x8x8xf32>
    %41 = tpu.matmul %39, %40, %cst_8 {dimension_numbers = #tpu.dot_dimension_numbers<[2], [2], [1], [1], [0, 0, 0, 1, 1, 1], [0], [0]>} : vector<4x8x128xbf16>, vector<4x8x128xbf16>, vector<4x8x8xf32> -> vector<4x8x8xf32>
    "tpu.trace_stop"() : () -> ()
    %cst_9 = arith.constant 0.353553385 : f32
    %42 = vector.broadcast %cst_9 : f32 to vector<4x8x8xf32>
    %43 = arith.mulf %41, %42 : vector<4x8x8xf32>
    %cst_10 = arith.constant dense<0xFF800000> : vector<4x8xf32>
    %44 = vector.multi_reduction <maximumf>, %43, %cst_10 [2] : vector<4x8x8xf32> to vector<4x8xf32>
    %45 = vector.shape_cast %44 : vector<4x8xf32> to vector<4x8x1xf32>
    %46 = vector.broadcast %45 : vector<4x8x1xf32> to vector<4x8x8xf32>
    %47 = arith.subf %43, %46 : vector<4x8x8xf32>
    %48 = math.exp %47 : vector<4x8x8xf32>
    %cst_11 = arith.constant dense<0.000000e+00> : vector<4x8xf32>
    %49 = vector.multi_reduction <add>, %48, %cst_11 [2] : vector<4x8x8xf32> to vector<4x8xf32>
    %50 = vector.shape_cast %49 : vector<4x8xf32> to vector<4x8x1xf32>
    %51 = vector.broadcast %50 : vector<4x8x1xf32> to vector<4x8x8xf32>
    %52 = arith.divf %48, %51 : vector<4x8x8xf32>
    %53 = arith.truncf %52 : vector<4x8x8xf32> to vector<4x8x8xbf16>
    %54 = arith.truncf %38 : vector<4x8x128xf32> to vector<4x8x128xbf16>
    "tpu.trace_start"() <{level = 10 : i32, message = "hqk,hkd->hqd"}> : () -> ()
    %cst_12 = arith.constant dense<0.000000e+00> : vector<4x8x128xf32>
    %55 = tpu.matmul %53, %54, %cst_12 {dimension_numbers = #tpu.dot_dimension_numbers<[2], [1], [1], [2], [0, 0, 0, 1, 1, 2], [0], [0]>} : vector<4x8x8xbf16>, vector<4x8x128xbf16>, vector<4x8x128xf32> -> vector<4x8x128xf32>
    "tpu.trace_stop"() : () -> ()
    %c0_13 = arith.constant 0 : index
    %c0_14 = arith.constant 0 : index
    %c0_15 = arith.constant 0 : index
    %56 = vector.load %arg4[%c0_13, %c0_14, %c0_15] : memref<1x512x128xbf16, #tpu.memory_space<vmem>>, vector<1x512x128xbf16>
    %57 = vector.shape_cast %56 : vector<1x512x128xbf16> to vector<512x128xbf16>
    %58 = vector.extract_strided_slice %55 {offsets = [0, 0, 0], sizes = [1, 8, 128], strides = [1, 1, 1]} : vector<4x8x128xf32> to vector<1x8x128xf32>
    %59 = vector.shape_cast %58 : vector<1x8x128xf32> to vector<8x128xf32>
    %60 = arith.truncf %59 : vector<8x128xf32> to vector<8x128xbf16>
    %61 = vector.extract_strided_slice %57 {offsets = [0, 0], sizes = [128, 128], strides = [1, 1]} : vector<512x128xbf16> to vector<128x128xbf16>
    %cst_16 = arith.constant dense<0.000000e+00> : vector<8x128xf32>
    %62 = tpu.matmul %60, %61, %cst_16 {dimension_numbers = #tpu.dot_dimension_numbers<[1], [0], [0], [1], [0, 0, 1, 1], [], []>} : vector<8x128xbf16>, vector<128x128xbf16>, vector<8x128xf32> -> vector<8x128xf32>
    %63 = vector.extract_strided_slice %55 {offsets = [1, 0, 0], sizes = [1, 8, 128], strides = [1, 1, 1]} : vector<4x8x128xf32> to vector<1x8x128xf32>
    %64 = vector.shape_cast %63 : vector<1x8x128xf32> to vector<8x128xf32>
    %65 = arith.truncf %64 : vector<8x128xf32> to vector<8x128xbf16>
    %66 = vector.extract_strided_slice %57 {offsets = [128, 0], sizes = [128, 128], strides = [1, 1]} : vector<512x128xbf16> to vector<128x128xbf16>
    %cst_17 = arith.constant dense<0.000000e+00> : vector<8x128xf32>
    %67 = tpu.matmul %65, %66, %cst_17 {dimension_numbers = #tpu.dot_dimension_numbers<[1], [0], [0], [1], [0, 0, 1, 1], [], []>} : vector<8x128xbf16>, vector<128x128xbf16>, vector<8x128xf32> -> vector<8x128xf32>
    %68 = arith.addf %62, %67 : vector<8x128xf32>
    %69 = vector.extract_strided_slice %55 {offsets = [2, 0, 0], sizes = [1, 8, 128], strides = [1, 1, 1]} : vector<4x8x128xf32> to vector<1x8x128xf32>
    %70 = vector.shape_cast %69 : vector<1x8x128xf32> to vector<8x128xf32>
    %71 = arith.truncf %70 : vector<8x128xf32> to vector<8x128xbf16>
    %72 = vector.extract_strided_slice %57 {offsets = [256, 0], sizes = [128, 128], strides = [1, 1]} : vector<512x128xbf16> to vector<128x128xbf16>
    %cst_18 = arith.constant dense<0.000000e+00> : vector<8x128xf32>
    %73 = tpu.matmul %71, %72, %cst_18 {dimension_numbers = #tpu.dot_dimension_numbers<[1], [0], [0], [1], [0, 0, 1, 1], [], []>} : vector<8x128xbf16>, vector<128x128xbf16>, vector<8x128xf32> -> vector<8x128xf32>
    %74 = arith.addf %68, %73 : vector<8x128xf32>
    %75 = vector.extract_strided_slice %55 {offsets = [3, 0, 0], sizes = [1, 8, 128], strides = [1, 1, 1]} : vector<4x8x128xf32> to vector<1x8x128xf32>
    %76 = vector.shape_cast %75 : vector<1x8x128xf32> to vector<8x128xf32>
    %77 = arith.truncf %76 : vector<8x128xf32> to vector<8x128xbf16>
    %78 = vector.extract_strided_slice %57 {offsets = [384, 0], sizes = [128, 128], strides = [1, 1]} : vector<512x128xbf16> to vector<128x128xbf16>
    %cst_19 = arith.constant dense<0.000000e+00> : vector<8x128xf32>
    %79 = tpu.matmul %77, %78, %cst_19 {dimension_numbers = #tpu.dot_dimension_numbers<[1], [0], [0], [1], [0, 0, 1, 1], [], []>} : vector<8x128xbf16>, vector<128x128xbf16>, vector<8x128xf32> -> vector<8x128xf32>
    %80 = arith.addf %74, %79 : vector<8x128xf32>
    %c0_20 = arith.constant 0 : index
    %c0_21 = arith.constant 0 : index
    %c0_22 = arith.constant 0 : index
    %81 = vector.load %arg5[%c0_20, %c0_21, %c0_22] : memref<1x1x128xf32, #tpu.memory_space<vmem>>, vector<1x1x128xf32>
    %82 = vector.shape_cast %81 : vector<1x1x128xf32> to vector<1x128xf32>
    %83 = vector.broadcast %82 : vector<1x128xf32> to vector<8x128xf32>
    %84 = arith.addf %80, %83 : vector<8x128xf32>
    %85 = arith.addf %3, %84 : vector<8x128xf32>
    %c0_23 = arith.constant 0 : index
    %c0_24 = arith.constant 0 : index
    %c0_25 = arith.constant 0 : index
    %86 = vector.load %arg6[%c0_23, %c0_24, %c0_25] : memref<1x1x128xf32, #tpu.memory_space<vmem>>, vector<1x1x128xf32>
    %87 = vector.shape_cast %86 : vector<1x1x128xf32> to vector<1x128xf32>
    %c0_26 = arith.constant 0 : index
    %c0_27 = arith.constant 0 : index
    %c0_28 = arith.constant 0 : index
    %88 = vector.load %arg7[%c0_26, %c0_27, %c0_28] : memref<1x1x128xf32, #tpu.memory_space<vmem>>, vector<1x1x128xf32>
    %89 = vector.shape_cast %88 : vector<1x1x128xf32> to vector<1x128xf32>
    %cst_29 = arith.constant dense<0.000000e+00> : vector<8xf32>
    %90 = vector.multi_reduction <add>, %85, %cst_29 [1] : vector<8x128xf32> to vector<8xf32>
    %91 = vector.shape_cast %90 : vector<8xf32> to vector<8x1xf32>
    %cst_30 = arith.constant 3.125000e-02 : f32
    %92 = vector.broadcast %cst_30 : f32 to vector<8x1xf32>
    %93 = arith.mulf %91, %92 : vector<8x1xf32>
    %94 = arith.mulf %85, %85 : vector<8x128xf32>
    %cst_31 = arith.constant dense<0.000000e+00> : vector<8xf32>
    %95 = vector.multi_reduction <add>, %94, %cst_31 [1] : vector<8x128xf32> to vector<8xf32>
    %96 = vector.shape_cast %95 : vector<8xf32> to vector<8x1xf32>
    %cst_32 = arith.constant 3.125000e-02 : f32
    %97 = vector.broadcast %cst_32 : f32 to vector<8x1xf32>
    %98 = arith.mulf %96, %97 : vector<8x1xf32>
    %99 = arith.mulf %93, %93 : vector<8x1xf32>
    %100 = arith.subf %98, %99 : vector<8x1xf32>
    %cst_33 = arith.constant 0.000000e+00 : f32
    %101 = vector.broadcast %cst_33 : f32 to vector<8x1xf32>
    %102 = arith.maximumf %100, %101 : vector<8x1xf32>
    %103 = vector.broadcast %93 : vector<8x1xf32> to vector<8x128xf32>
    %104 = arith.subf %85, %103 : vector<8x128xf32>
    %cst_34 = arith.constant 9.99999974E-6 : f32
    %105 = vector.broadcast %cst_34 : f32 to vector<8x1xf32>
    %106 = arith.addf %102, %105 : vector<8x1xf32>
    %107 = math.rsqrt %106 : vector<8x1xf32>
    %108 = vector.broadcast %107 : vector<8x1xf32> to vector<8x128xf32>
    %109 = arith.mulf %104, %108 : vector<8x128xf32>
    %110 = vector.broadcast %87 : vector<1x128xf32> to vector<8x128xf32>
    %111 = arith.mulf %109, %110 : vector<8x128xf32>
    %112 = vector.broadcast %89 : vector<1x128xf32> to vector<8x128xf32>
    %113 = arith.addf %111, %112 : vector<8x128xf32>
    %114 = arith.truncf %113 : vector<8x128xf32> to vector<8x128xbf16>
    %c0_35 = arith.constant 0 : index
    %c0_36 = arith.constant 0 : index
    %c0_37 = arith.constant 0 : index
    %115 = vector.load %arg8[%c0_35, %c0_36, %c0_37] : memref<1x128x128xbf16, #tpu.memory_space<vmem>>, vector<1x128x128xbf16>
    %116 = vector.shape_cast %115 : vector<1x128x128xbf16> to vector<128x128xbf16>
    %cst_38 = arith.constant dense<0.000000e+00> : vector<8x128xf32>
    %117 = tpu.matmul %114, %116, %cst_38 {dimension_numbers = #tpu.dot_dimension_numbers<[1], [0], [0], [1], [0, 0, 1, 1], [], []>} : vector<8x128xbf16>, vector<128x128xbf16>, vector<8x128xf32> -> vector<8x128xf32>
    %c0_39 = arith.constant 0 : index
    %c0_40 = arith.constant 0 : index
    %c0_41 = arith.constant 0 : index
    %118 = vector.load %arg9[%c0_39, %c0_40, %c0_41] : memref<1x1x128xf32, #tpu.memory_space<vmem>>, vector<1x1x128xf32>
    %119 = vector.shape_cast %118 : vector<1x1x128xf32> to vector<1x128xf32>
    %120 = vector.broadcast %119 : vector<1x128xf32> to vector<8x128xf32>
    %121 = arith.addf %117, %120 : vector<8x128xf32>
    %cst_42 = arith.constant 0.000000e+00 : f32
    %122 = vector.broadcast %cst_42 : f32 to vector<8x128xf32>
    %123 = arith.maximumf %121, %122 : vector<8x128xf32>
    %124 = arith.truncf %123 : vector<8x128xf32> to vector<8x128xbf16>
    %c0_43 = arith.constant 0 : index
    %c0_44 = arith.constant 0 : index
    %c0_45 = arith.constant 0 : index
    %125 = vector.load %arg10[%c0_43, %c0_44, %c0_45] : memref<1x128x128xbf16, #tpu.memory_space<vmem>>, vector<1x128x128xbf16>
    %126 = vector.shape_cast %125 : vector<1x128x128xbf16> to vector<128x128xbf16>
    %cst_46 = arith.constant dense<0.000000e+00> : vector<8x128xf32>
    %127 = tpu.matmul %124, %126, %cst_46 {dimension_numbers = #tpu.dot_dimension_numbers<[1], [0], [0], [1], [0, 0, 1, 1], [], []>} : vector<8x128xbf16>, vector<128x128xbf16>, vector<8x128xf32> -> vector<8x128xf32>
    %c0_47 = arith.constant 0 : index
    %c0_48 = arith.constant 0 : index
    %c0_49 = arith.constant 0 : index
    %128 = vector.load %arg11[%c0_47, %c0_48, %c0_49] : memref<1x1x128xf32, #tpu.memory_space<vmem>>, vector<1x1x128xf32>
    %129 = vector.shape_cast %128 : vector<1x1x128xf32> to vector<1x128xf32>
    %130 = vector.broadcast %129 : vector<1x128xf32> to vector<8x128xf32>
    %131 = arith.addf %127, %130 : vector<8x128xf32>
    %132 = arith.addf %113, %131 : vector<8x128xf32>
    %c0_50 = arith.constant 0 : index
    %c0_51 = arith.constant 0 : index
    %c0_52 = arith.constant 0 : index
    %133 = vector.load %arg12[%c0_50, %c0_51, %c0_52] : memref<1x1x128xf32, #tpu.memory_space<vmem>>, vector<1x1x128xf32>
    %134 = vector.shape_cast %133 : vector<1x1x128xf32> to vector<1x128xf32>
    %c0_53 = arith.constant 0 : index
    %c0_54 = arith.constant 0 : index
    %c0_55 = arith.constant 0 : index
    %135 = vector.load %arg13[%c0_53, %c0_54, %c0_55] : memref<1x1x128xf32, #tpu.memory_space<vmem>>, vector<1x1x128xf32>
    %136 = vector.shape_cast %135 : vector<1x1x128xf32> to vector<1x128xf32>
    %cst_56 = arith.constant dense<0.000000e+00> : vector<8xf32>
    %137 = vector.multi_reduction <add>, %132, %cst_56 [1] : vector<8x128xf32> to vector<8xf32>
    %138 = vector.shape_cast %137 : vector<8xf32> to vector<8x1xf32>
    %cst_57 = arith.constant 3.125000e-02 : f32
    %139 = vector.broadcast %cst_57 : f32 to vector<8x1xf32>
    %140 = arith.mulf %138, %139 : vector<8x1xf32>
    %141 = arith.mulf %132, %132 : vector<8x128xf32>
    %cst_58 = arith.constant dense<0.000000e+00> : vector<8xf32>
    %142 = vector.multi_reduction <add>, %141, %cst_58 [1] : vector<8x128xf32> to vector<8xf32>
    %143 = vector.shape_cast %142 : vector<8xf32> to vector<8x1xf32>
    %cst_59 = arith.constant 3.125000e-02 : f32
    %144 = vector.broadcast %cst_59 : f32 to vector<8x1xf32>
    %145 = arith.mulf %143, %144 : vector<8x1xf32>
    %146 = arith.mulf %140, %140 : vector<8x1xf32>
    %147 = arith.subf %145, %146 : vector<8x1xf32>
    %cst_60 = arith.constant 0.000000e+00 : f32
    %148 = vector.broadcast %cst_60 : f32 to vector<8x1xf32>
    %149 = arith.maximumf %147, %148 : vector<8x1xf32>
    %150 = vector.broadcast %140 : vector<8x1xf32> to vector<8x128xf32>
    %151 = arith.subf %132, %150 : vector<8x128xf32>
    %cst_61 = arith.constant 9.99999974E-6 : f32
    %152 = vector.broadcast %cst_61 : f32 to vector<8x1xf32>
    %153 = arith.addf %149, %152 : vector<8x1xf32>
    %154 = math.rsqrt %153 : vector<8x1xf32>
    %155 = vector.broadcast %154 : vector<8x1xf32> to vector<8x128xf32>
    %156 = arith.mulf %151, %155 : vector<8x128xf32>
    %157 = vector.broadcast %134 : vector<1x128xf32> to vector<8x128xf32>
    %158 = arith.mulf %156, %157 : vector<8x128xf32>
    %159 = vector.broadcast %136 : vector<1x128xf32> to vector<8x128xf32>
    %160 = arith.addf %158, %159 : vector<8x128xf32>
    %c0_62 = arith.constant 0 : index
    %c0_63 = arith.constant 0 : index
    %161 = vector.load %arg15[%c0_62, %c0_63] : memref<8x128xf32, #tpu.memory_space<vmem>>, vector<8x128xf32>
    tpu.vector_store %arg15[%c0_62, %c0_63], %160 {strides = array<i32>} : memref<8x128xf32, #tpu.memory_space<vmem>>, vector<8x128xf32>,
    %c0_64 = arith.constant 0 : index
    %c0_65 = arith.constant 0 : index
    %162 = vector.load %arg14[%c0_64, %c0_65] : memref<8x128xf32, #tpu.memory_space<vmem>>, vector<8x128xf32>
    tpu.vector_store %arg14[%c0_64, %c0_65], %160 {strides = array<i32>} : memref<8x128xf32, #tpu.memory_space<vmem>>, vector<8x128xf32>,
    return
  }
  func.func @transform_0(%arg0: i32) -> (i32, i32) {
    %c0_i32 = arith.constant 0 : i32
    %c0_i32_0 = arith.constant 0 : i32
    %c0_i32_1 = arith.constant 0 : i32
    return %c0_i32, %c0_i32_0 : i32, i32
  }
  func.func @transform_1(%arg0: i32) -> (i32, i32, i32) {
    %c0_i32 = arith.constant 0 : i32
    %c0_i32_0 = arith.constant 0 : i32
    %c0_i32_1 = arith.constant 0 : i32
    return %arg0, %c0_i32, %c0_i32_0 : i32, i32, i32
  }
  func.func @transform_2(%arg0: i32) -> (i32, i32, i32) {
    %c0_i32 = arith.constant 0 : i32
    %c0_i32_0 = arith.constant 0 : i32
    %c0_i32_1 = arith.constant 0 : i32
    return %arg0, %c0_i32, %c0_i32_0 : i32, i32, i32
  }
  func.func @transform_3(%arg0: i32) -> (i32, i32, i32) {
    %c0_i32 = arith.constant 0 : i32
    %c0_i32_0 = arith.constant 0 : i32
    %c0_i32_1 = arith.constant 0 : i32
    return %arg0, %c0_i32, %c0_i32_0 : i32, i32, i32
  }
  func.func @transform_4(%arg0: i32) -> (i32, i32, i32) {
    %c0_i32 = arith.constant 0 : i32
    %c0_i32_0 = arith.constant 0 : i32
    %c0_i32_1 = arith.constant 0 : i32
    return %arg0, %c0_i32, %c0_i32_0 : i32, i32, i32
  }
  func.func @transform_5(%arg0: i32) -> (i32, i32, i32) {
    %c0_i32 = arith.constant 0 : i32
    %c0_i32_0 = arith.constant 0 : i32
    %c0_i32_1 = arith.constant 0 : i32
    return %arg0, %c0_i32, %c0_i32_0 : i32, i32, i32
  }
  func.func @transform_6(%arg0: i32) -> (i32, i32, i32) {
    %c0_i32 = arith.constant 0 : i32
    %c0_i32_0 = arith.constant 0 : i32
    %c0_i32_1 = arith.constant 0 : i32
    return %arg0, %c0_i32, %c0_i32_0 : i32, i32, i32
  }
  func.func @transform_7(%arg0: i32) -> (i32, i32, i32) {
    %c0_i32 = arith.constant 0 : i32
    %c0_i32_0 = arith.constant 0 : i32
    %c0_i32_1 = arith.constant 0 : i32
    return %arg0, %c0_i32, %c0_i32_0 : i32, i32, i32
  }
  func.func @transform_8(%arg0: i32) -> (i32, i32, i32) {
    %c0_i32 = arith.constant 0 : i32
    %c0_i32_0 = arith.constant 0 : i32
    %c0_i32_1 = arith.constant 0 : i32
    return %arg0, %c0_i32, %c0_i32_0 : i32, i32, i32
  }
  func.func @transform_9(%arg0: i32) -> (i32, i32, i32) {
    %c0_i32 = arith.constant 0 : i32
    %c0_i32_0 = arith.constant 0 : i32
    %c0_i32_1 = arith.constant 0 : i32
    return %arg0, %c0_i32, %c0_i32_0 : i32, i32, i32
  }
  func.func @transform_10(%arg0: i32) -> (i32, i32, i32) {
    %c0_i32 = arith.constant 0 : i32
    %c0_i32_0 = arith.constant 0 : i32
    %c0_i32_1 = arith.constant 0 : i32
    return %arg0, %c0_i32, %c0_i32_0 : i32, i32, i32
  }
  func.func @transform_11(%arg0: i32) -> (i32, i32, i32) {
    %c0_i32 = arith.constant 0 : i32
    %c0_i32_0 = arith.constant 0 : i32
    %c0_i32_1 = arith.constant 0 : i32
    return %arg0, %c0_i32, %c0_i32_0 : i32, i32, i32
  }
  func.func @transform_12(%arg0: i32) -> (i32, i32, i32) {
    %c0_i32 = arith.constant 0 : i32
    %c0_i32_0 = arith.constant 0 : i32
    %c0_i32_1 = arith.constant 0 : i32
    return %arg0, %c0_i32, %c0_i32_0 : i32, i32, i32
  }
  func.func @transform_13(%arg0: i32) -> (i32, i32) {
    %c0_i32 = arith.constant 0 : i32
    %c0_i32_0 = arith.constant 0 : i32
    %c0_i32_1 = arith.constant 0 : i32
    return %c0_i32, %c0_i32_0 : i32, i32
  }
}

module attributes {stable_mosaic.version = 11 : i64} {
  func.func @_head_kernel(%arg0: i32, %arg1: memref<2x8xbf16, #tpu.memory_space<vmem>>, %arg2: memref<2x8xbf16, #tpu.memory_space<vmem>>, %arg3: memref<8x128xf32, #tpu.memory_space<vmem>>, %arg4: memref<8x128xf32, #tpu.memory_space<vmem>>, %arg5: memref<128x128xbf16, #tpu.memory_space<vmem>>, %arg6: memref<1x128xf32, #tpu.memory_space<vmem>>, %arg7: memref<128x128xbf16, #tpu.memory_space<vmem>>, %arg8: memref<1x128xf32, #tpu.memory_space<vmem>>, %arg9: memref<128x128xbf16, #tpu.memory_space<vmem>>, %arg10: memref<1x128xf32, #tpu.memory_space<vmem>>, %arg11: memref<128x128xbf16, #tpu.memory_space<vmem>>, %arg12: memref<1x128xf32, #tpu.memory_space<vmem>>, %arg13: memref<128x128xbf16, #tpu.memory_space<vmem>>, %arg14: memref<1x128xf32, #tpu.memory_space<vmem>>, %arg15: memref<128x128xbf16, #tpu.memory_space<vmem>>, %arg16: memref<1x128xf32, #tpu.memory_space<vmem>>, %arg17: memref<128x1024xbf16, #tpu.memory_space<vmem>>, %arg18: memref<1x1024xf32, #tpu.memory_space<vmem>>, %arg19: memref<1024x512xbf16, #tpu.memory_space<vmem>>, %arg20: memref<1x512xf32, #tpu.memory_space<vmem>>, %arg21: memref<512x128xbf16, #tpu.memory_space<vmem>>, %arg22: memref<1x128xf32, #tpu.memory_space<vmem>>, %arg23: memref<128x128xbf16, #tpu.memory_space<vmem>>, %arg24: memref<1x128xf32, #tpu.memory_space<vmem>>, %arg25: memref<2x128xf32, #tpu.memory_space<vmem>>) attributes {dimension_semantics = [#tpu.dimension_semantics<arbitrary>], iteration_bounds = array<i64: 1>, scalar_prefetch = 0 : i64, scratch_operands = 0 : i64, tpu.core_type = #tpu.core_type<tc>, window_params = [{pipeline_mode = #tpu.pipeline_mode<synchronous>, transform_indices = @transform_0, window_bounds = array<i64: 2, 8>}, {pipeline_mode = #tpu.pipeline_mode<synchronous>, transform_indices = @transform_1, window_bounds = array<i64: 2, 8>}, {pipeline_mode = #tpu.pipeline_mode<synchronous>, transform_indices = @transform_2, window_bounds = array<i64: 8, 128>}, {pipeline_mode = #tpu.pipeline_mode<synchronous>, transform_indices = @transform_3, window_bounds = array<i64: 8, 128>}, {pipeline_mode = #tpu.pipeline_mode<synchronous>, transform_indices = @transform_4, window_bounds = array<i64: 128, 128>}, {pipeline_mode = #tpu.pipeline_mode<synchronous>, transform_indices = @transform_5, window_bounds = array<i64: 1, 128>}, {pipeline_mode = #tpu.pipeline_mode<synchronous>, transform_indices = @transform_6, window_bounds = array<i64: 128, 128>}, {pipeline_mode = #tpu.pipeline_mode<synchronous>, transform_indices = @transform_7, window_bounds = array<i64: 1, 128>}, {pipeline_mode = #tpu.pipeline_mode<synchronous>, transform_indices = @transform_8, window_bounds = array<i64: 128, 128>}, {pipeline_mode = #tpu.pipeline_mode<synchronous>, transform_indices = @transform_9, window_bounds = array<i64: 1, 128>}, {pipeline_mode = #tpu.pipeline_mode<synchronous>, transform_indices = @transform_10, window_bounds = array<i64: 128, 128>}, {pipeline_mode = #tpu.pipeline_mode<synchronous>, transform_indices = @transform_11, window_bounds = array<i64: 1, 128>}, {pipeline_mode = #tpu.pipeline_mode<synchronous>, transform_indices = @transform_12, window_bounds = array<i64: 128, 128>}, {pipeline_mode = #tpu.pipeline_mode<synchronous>, transform_indices = @transform_13, window_bounds = array<i64: 1, 128>}, {pipeline_mode = #tpu.pipeline_mode<synchronous>, transform_indices = @transform_14, window_bounds = array<i64: 128, 128>}, {pipeline_mode = #tpu.pipeline_mode<synchronous>, transform_indices = @transform_15, window_bounds = array<i64: 1, 128>}, {pipeline_mode = #tpu.pipeline_mode<synchronous>, transform_indices = @transform_16, window_bounds = array<i64: 128, 1024>}, {pipeline_mode = #tpu.pipeline_mode<synchronous>, transform_indices = @transform_17, window_bounds = array<i64: 1, 1024>}, {pipeline_mode = #tpu.pipeline_mode<synchronous>, transform_indices = @transform_18, window_bounds = array<i64: 1024, 512>}, {pipeline_mode = #tpu.pipeline_mode<synchronous>, transform_indices = @transform_19, window_bounds = array<i64: 1, 512>}, {pipeline_mode = #tpu.pipeline_mode<synchronous>, transform_indices = @transform_20, window_bounds = array<i64: 512, 128>}, {pipeline_mode = #tpu.pipeline_mode<synchronous>, transform_indices = @transform_21, window_bounds = array<i64: 1, 128>}, {pipeline_mode = #tpu.pipeline_mode<synchronous>, transform_indices = @transform_22, window_bounds = array<i64: 128, 128>}, {pipeline_mode = #tpu.pipeline_mode<synchronous>, transform_indices = @transform_23, window_bounds = array<i64: 1, 128>}, {pipeline_mode = #tpu.pipeline_mode<synchronous>, transform_indices = @transform_24, window_bounds = array<i64: 2, 128>}]} {
    %c0 = arith.constant 0 : index
    %c0_0 = arith.constant 0 : index
    %0 = vector.load %arg1[%c0, %c0_0] : memref<2x8xbf16, #tpu.memory_space<vmem>>, vector<2x8xbf16>
    %c0_1 = arith.constant 0 : index
    %c0_2 = arith.constant 0 : index
    %1 = vector.load %arg3[%c0_1, %c0_2] : memref<8x128xf32, #tpu.memory_space<vmem>>, vector<8x128xf32>
    %2 = arith.truncf %1 : vector<8x128xf32> to vector<8x128xbf16>
    %cst = arith.constant dense<0.000000e+00> : vector<2x128xf32>
    %3 = tpu.matmul %0, %2, %cst {dimension_numbers = #tpu.dot_dimension_numbers<[1], [0], [0], [1], [0, 0, 1, 1], [], []>} : vector<2x8xbf16>, vector<8x128xbf16>, vector<2x128xf32> -> vector<2x128xf32>
    %c0_3 = arith.constant 0 : index
    %c0_4 = arith.constant 0 : index
    %4 = vector.load %arg2[%c0_3, %c0_4] : memref<2x8xbf16, #tpu.memory_space<vmem>>, vector<2x8xbf16>
    %c0_5 = arith.constant 0 : index
    %c0_6 = arith.constant 0 : index
    %5 = vector.load %arg4[%c0_5, %c0_6] : memref<8x128xf32, #tpu.memory_space<vmem>>, vector<8x128xf32>
    %6 = arith.truncf %5 : vector<8x128xf32> to vector<8x128xbf16>
    %cst_7 = arith.constant dense<0.000000e+00> : vector<2x128xf32>
    %7 = tpu.matmul %4, %6, %cst_7 {dimension_numbers = #tpu.dot_dimension_numbers<[1], [0], [0], [1], [0, 0, 1, 1], [], []>} : vector<2x8xbf16>, vector<8x128xbf16>, vector<2x128xf32> -> vector<2x128xf32>
    %8 = arith.truncf %3 : vector<2x128xf32> to vector<2x128xbf16>
    %9 = arith.truncf %7 : vector<2x128xf32> to vector<2x128xbf16>
    %c0_8 = arith.constant 0 : index
    %c0_9 = arith.constant 0 : index
    %10 = vector.load %arg5[%c0_8, %c0_9] : memref<128x128xbf16, #tpu.memory_space<vmem>>, vector<128x128xbf16>
    %cst_10 = arith.constant dense<0.000000e+00> : vector<2x128xf32>
    %11 = tpu.matmul %8, %10, %cst_10 {dimension_numbers = #tpu.dot_dimension_numbers<[1], [0], [0], [1], [0, 0, 1, 1], [], []>} : vector<2x128xbf16>, vector<128x128xbf16>, vector<2x128xf32> -> vector<2x128xf32>
    %c0_11 = arith.constant 0 : index
    %c0_12 = arith.constant 0 : index
    %12 = vector.load %arg6[%c0_11, %c0_12] : memref<1x128xf32, #tpu.memory_space<vmem>>, vector<1x128xf32>
    %13 = vector.broadcast %12 : vector<1x128xf32> to vector<2x128xf32>
    %14 = arith.addf %11, %13 : vector<2x128xf32>
    %c0_13 = arith.constant 0 : index
    %c0_14 = arith.constant 0 : index
    %15 = vector.load %arg7[%c0_13, %c0_14] : memref<128x128xbf16, #tpu.memory_space<vmem>>, vector<128x128xbf16>
    %cst_15 = arith.constant dense<0.000000e+00> : vector<2x128xf32>
    %16 = tpu.matmul %8, %15, %cst_15 {dimension_numbers = #tpu.dot_dimension_numbers<[1], [0], [0], [1], [0, 0, 1, 1], [], []>} : vector<2x128xbf16>, vector<128x128xbf16>, vector<2x128xf32> -> vector<2x128xf32>
    %c0_16 = arith.constant 0 : index
    %c0_17 = arith.constant 0 : index
    %17 = vector.load %arg8[%c0_16, %c0_17] : memref<1x128xf32, #tpu.memory_space<vmem>>, vector<1x128xf32>
    %18 = vector.broadcast %17 : vector<1x128xf32> to vector<2x128xf32>
    %19 = arith.addf %16, %18 : vector<2x128xf32>
    %c0_18 = arith.constant 0 : index
    %c0_19 = arith.constant 0 : index
    %20 = vector.load %arg9[%c0_18, %c0_19] : memref<128x128xbf16, #tpu.memory_space<vmem>>, vector<128x128xbf16>
    %cst_20 = arith.constant dense<0.000000e+00> : vector<2x128xf32>
    %21 = tpu.matmul %9, %20, %cst_20 {dimension_numbers = #tpu.dot_dimension_numbers<[1], [0], [0], [1], [0, 0, 1, 1], [], []>} : vector<2x128xbf16>, vector<128x128xbf16>, vector<2x128xf32> -> vector<2x128xf32>
    %c0_21 = arith.constant 0 : index
    %c0_22 = arith.constant 0 : index
    %22 = vector.load %arg10[%c0_21, %c0_22] : memref<1x128xf32, #tpu.memory_space<vmem>>, vector<1x128xf32>
    %23 = vector.broadcast %22 : vector<1x128xf32> to vector<2x128xf32>
    %24 = arith.addf %21, %23 : vector<2x128xf32>
    %c0_23 = arith.constant 0 : index
    %c0_24 = arith.constant 0 : index
    %25 = vector.load %arg11[%c0_23, %c0_24] : memref<128x128xbf16, #tpu.memory_space<vmem>>, vector<128x128xbf16>
    %cst_25 = arith.constant dense<0.000000e+00> : vector<2x128xf32>
    %26 = tpu.matmul %8, %25, %cst_25 {dimension_numbers = #tpu.dot_dimension_numbers<[1], [0], [0], [1], [0, 0, 1, 1], [], []>} : vector<2x128xbf16>, vector<128x128xbf16>, vector<2x128xf32> -> vector<2x128xf32>
    %c0_26 = arith.constant 0 : index
    %c0_27 = arith.constant 0 : index
    %27 = vector.load %arg12[%c0_26, %c0_27] : memref<1x128xf32, #tpu.memory_space<vmem>>, vector<1x128xf32>
    %28 = vector.broadcast %27 : vector<1x128xf32> to vector<2x128xf32>
    %29 = arith.addf %26, %28 : vector<2x128xf32>
    %c0_28 = arith.constant 0 : index
    %c0_29 = arith.constant 0 : index
    %30 = vector.load %arg13[%c0_28, %c0_29] : memref<128x128xbf16, #tpu.memory_space<vmem>>, vector<128x128xbf16>
    %cst_30 = arith.constant dense<0.000000e+00> : vector<2x128xf32>
    %31 = tpu.matmul %9, %30, %cst_30 {dimension_numbers = #tpu.dot_dimension_numbers<[1], [0], [0], [1], [0, 0, 1, 1], [], []>} : vector<2x128xbf16>, vector<128x128xbf16>, vector<2x128xf32> -> vector<2x128xf32>
    %c0_31 = arith.constant 0 : index
    %c0_32 = arith.constant 0 : index
    %32 = vector.load %arg14[%c0_31, %c0_32] : memref<1x128xf32, #tpu.memory_space<vmem>>, vector<1x128xf32>
    %33 = vector.broadcast %32 : vector<1x128xf32> to vector<2x128xf32>
    %34 = arith.addf %31, %33 : vector<2x128xf32>
    %35 = arith.mulf %14, %19 : vector<2x128xf32>
    %cst_33 = arith.constant dense<0.000000e+00> : vector<2xf32>
    %36 = vector.multi_reduction <add>, %35, %cst_33 [1] : vector<2x128xf32> to vector<2xf32>
    %37 = vector.shape_cast %36 : vector<2xf32> to vector<2x1xf32>
    %38 = arith.mulf %14, %24 : vector<2x128xf32>
    %cst_34 = arith.constant dense<0.000000e+00> : vector<2xf32>
    %39 = vector.multi_reduction <add>, %38, %cst_34 [1] : vector<2x128xf32> to vector<2xf32>
    %40 = vector.shape_cast %39 : vector<2xf32> to vector<2x1xf32>
    %41 = arith.maximumf %37, %40 : vector<2x1xf32>
    %42 = arith.subf %37, %41 : vector<2x1xf32>
    %43 = math.exp %42 : vector<2x1xf32>
    %44 = arith.subf %40, %41 : vector<2x1xf32>
    %45 = math.exp %44 : vector<2x1xf32>
    %46 = arith.addf %43, %45 : vector<2x1xf32>
    %cst_35 = arith.constant 1.000000e+00 : f32
    %47 = vector.broadcast %cst_35 : f32 to vector<2x1xf32>
    %48 = arith.divf %47, %46 : vector<2x1xf32>
    %49 = arith.mulf %43, %48 : vector<2x1xf32>
    %50 = vector.broadcast %49 : vector<2x1xf32> to vector<2x128xf32>
    %51 = arith.mulf %50, %29 : vector<2x128xf32>
    %52 = arith.mulf %45, %48 : vector<2x1xf32>
    %53 = vector.broadcast %52 : vector<2x1xf32> to vector<2x128xf32>
    %54 = arith.mulf %53, %34 : vector<2x128xf32>
    %55 = arith.addf %51, %54 : vector<2x128xf32>
    %56 = arith.truncf %55 : vector<2x128xf32> to vector<2x128xbf16>
    %c0_36 = arith.constant 0 : index
    %c0_37 = arith.constant 0 : index
    %57 = vector.load %arg15[%c0_36, %c0_37] : memref<128x128xbf16, #tpu.memory_space<vmem>>, vector<128x128xbf16>
    %cst_38 = arith.constant dense<0.000000e+00> : vector<2x128xf32>
    %58 = tpu.matmul %56, %57, %cst_38 {dimension_numbers = #tpu.dot_dimension_numbers<[1], [0], [0], [1], [0, 0, 1, 1], [], []>} : vector<2x128xbf16>, vector<128x128xbf16>, vector<2x128xf32> -> vector<2x128xf32>
    %c0_39 = arith.constant 0 : index
    %c0_40 = arith.constant 0 : index
    %59 = vector.load %arg16[%c0_39, %c0_40] : memref<1x128xf32, #tpu.memory_space<vmem>>, vector<1x128xf32>
    %60 = vector.broadcast %59 : vector<1x128xf32> to vector<2x128xf32>
    %61 = arith.addf %58, %60 : vector<2x128xf32>
    %62 = arith.truncf %61 : vector<2x128xf32> to vector<2x128xbf16>
    %c0_41 = arith.constant 0 : index
    %c0_42 = arith.constant 0 : index
    %63 = vector.load %arg17[%c0_41, %c0_42] : memref<128x1024xbf16, #tpu.memory_space<vmem>>, vector<128x1024xbf16>
    %cst_43 = arith.constant dense<0.000000e+00> : vector<2x1024xf32>
    %64 = tpu.matmul %62, %63, %cst_43 {dimension_numbers = #tpu.dot_dimension_numbers<[1], [0], [0], [1], [0, 0, 1, 1], [], []>} : vector<2x128xbf16>, vector<128x1024xbf16>, vector<2x1024xf32> -> vector<2x1024xf32>
    %c0_44 = arith.constant 0 : index
    %c0_45 = arith.constant 0 : index
    %65 = vector.load %arg18[%c0_44, %c0_45] : memref<1x1024xf32, #tpu.memory_space<vmem>>, vector<1x1024xf32>
    %66 = vector.broadcast %65 : vector<1x1024xf32> to vector<2x1024xf32>
    %67 = arith.addf %64, %66 : vector<2x1024xf32>
    %cst_46 = arith.constant 0.000000e+00 : f32
    %68 = vector.broadcast %cst_46 : f32 to vector<2x1024xf32>
    %69 = arith.maximumf %67, %68 : vector<2x1024xf32>
    %70 = arith.truncf %69 : vector<2x1024xf32> to vector<2x1024xbf16>
    %c0_47 = arith.constant 0 : index
    %c0_48 = arith.constant 0 : index
    %71 = vector.load %arg19[%c0_47, %c0_48] : memref<1024x512xbf16, #tpu.memory_space<vmem>>, vector<1024x512xbf16>
    %cst_49 = arith.constant dense<0.000000e+00> : vector<2x512xf32>
    %72 = tpu.matmul %70, %71, %cst_49 {dimension_numbers = #tpu.dot_dimension_numbers<[1], [0], [0], [1], [0, 0, 1, 1], [], []>} : vector<2x1024xbf16>, vector<1024x512xbf16>, vector<2x512xf32> -> vector<2x512xf32>
    %c0_50 = arith.constant 0 : index
    %c0_51 = arith.constant 0 : index
    %73 = vector.load %arg20[%c0_50, %c0_51] : memref<1x512xf32, #tpu.memory_space<vmem>>, vector<1x512xf32>
    %74 = vector.broadcast %73 : vector<1x512xf32> to vector<2x512xf32>
    %75 = arith.addf %72, %74 : vector<2x512xf32>
    %cst_52 = arith.constant 0.000000e+00 : f32
    %76 = vector.broadcast %cst_52 : f32 to vector<2x512xf32>
    %77 = arith.maximumf %75, %76 : vector<2x512xf32>
    %78 = arith.truncf %77 : vector<2x512xf32> to vector<2x512xbf16>
    %c0_53 = arith.constant 0 : index
    %c0_54 = arith.constant 0 : index
    %79 = vector.load %arg21[%c0_53, %c0_54] : memref<512x128xbf16, #tpu.memory_space<vmem>>, vector<512x128xbf16>
    %cst_55 = arith.constant dense<0.000000e+00> : vector<2x128xf32>
    %80 = tpu.matmul %78, %79, %cst_55 {dimension_numbers = #tpu.dot_dimension_numbers<[1], [0], [0], [1], [0, 0, 1, 1], [], []>} : vector<2x512xbf16>, vector<512x128xbf16>, vector<2x128xf32> -> vector<2x128xf32>
    %c0_56 = arith.constant 0 : index
    %c0_57 = arith.constant 0 : index
    %81 = vector.load %arg22[%c0_56, %c0_57] : memref<1x128xf32, #tpu.memory_space<vmem>>, vector<1x128xf32>
    %82 = vector.broadcast %81 : vector<1x128xf32> to vector<2x128xf32>
    %83 = arith.addf %80, %82 : vector<2x128xf32>
    %cst_58 = arith.constant 0.000000e+00 : f32
    %84 = vector.broadcast %cst_58 : f32 to vector<2x128xf32>
    %85 = arith.maximumf %83, %84 : vector<2x128xf32>
    %86 = arith.truncf %85 : vector<2x128xf32> to vector<2x128xbf16>
    %c0_59 = arith.constant 0 : index
    %c0_60 = arith.constant 0 : index
    %87 = vector.load %arg23[%c0_59, %c0_60] : memref<128x128xbf16, #tpu.memory_space<vmem>>, vector<128x128xbf16>
    %cst_61 = arith.constant dense<0.000000e+00> : vector<2x128xf32>
    %88 = tpu.matmul %86, %87, %cst_61 {dimension_numbers = #tpu.dot_dimension_numbers<[1], [0], [0], [1], [0, 0, 1, 1], [], []>} : vector<2x128xbf16>, vector<128x128xbf16>, vector<2x128xf32> -> vector<2x128xf32>
    %c0_62 = arith.constant 0 : index
    %c0_63 = arith.constant 0 : index
    %89 = vector.load %arg24[%c0_62, %c0_63] : memref<1x128xf32, #tpu.memory_space<vmem>>, vector<1x128xf32>
    %90 = vector.broadcast %89 : vector<1x128xf32> to vector<2x128xf32>
    %91 = arith.addf %88, %90 : vector<2x128xf32>
    %c0_64 = arith.constant 0 : index
    %c0_65 = arith.constant 0 : index
    %92 = vector.load %arg25[%c0_64, %c0_65] : memref<2x128xf32, #tpu.memory_space<vmem>>, vector<2x128xf32>
    tpu.vector_store %arg25[%c0_64, %c0_65], %91 {strides = array<i32>} : memref<2x128xf32, #tpu.memory_space<vmem>>, vector<2x128xf32>,
    return
  }
  func.func @transform_0(%arg0: i32) -> (i32, i32) {
    %c0_i32 = arith.constant 0 : i32
    %c0_i32_0 = arith.constant 0 : i32
    %c0_i32_1 = arith.constant 0 : i32
    return %c0_i32, %c0_i32_0 : i32, i32
  }
  func.func @transform_1(%arg0: i32) -> (i32, i32) {
    %c0_i32 = arith.constant 0 : i32
    %c0_i32_0 = arith.constant 0 : i32
    %c0_i32_1 = arith.constant 0 : i32
    return %c0_i32, %c0_i32_0 : i32, i32
  }
  func.func @transform_2(%arg0: i32) -> (i32, i32) {
    %c0_i32 = arith.constant 0 : i32
    %c0_i32_0 = arith.constant 0 : i32
    %c0_i32_1 = arith.constant 0 : i32
    return %c0_i32, %c0_i32_0 : i32, i32
  }
  func.func @transform_3(%arg0: i32) -> (i32, i32) {
    %c0_i32 = arith.constant 0 : i32
    %c0_i32_0 = arith.constant 0 : i32
    %c0_i32_1 = arith.constant 0 : i32
    return %c0_i32, %c0_i32_0 : i32, i32
  }
  func.func @transform_4(%arg0: i32) -> (i32, i32) {
    %c0_i32 = arith.constant 0 : i32
    %c0_i32_0 = arith.constant 0 : i32
    %c0_i32_1 = arith.constant 0 : i32
    return %c0_i32, %c0_i32_0 : i32, i32
  }
  func.func @transform_5(%arg0: i32) -> (i32, i32) {
    %c0_i32 = arith.constant 0 : i32
    %c0_i32_0 = arith.constant 0 : i32
    %c0_i32_1 = arith.constant 0 : i32
    return %c0_i32, %c0_i32_0 : i32, i32
  }
  func.func @transform_6(%arg0: i32) -> (i32, i32) {
    %c0_i32 = arith.constant 0 : i32
    %c0_i32_0 = arith.constant 0 : i32
    %c0_i32_1 = arith.constant 0 : i32
    return %c0_i32, %c0_i32_0 : i32, i32
  }
  func.func @transform_7(%arg0: i32) -> (i32, i32) {
    %c0_i32 = arith.constant 0 : i32
    %c0_i32_0 = arith.constant 0 : i32
    %c0_i32_1 = arith.constant 0 : i32
    return %c0_i32, %c0_i32_0 : i32, i32
  }
  func.func @transform_8(%arg0: i32) -> (i32, i32) {
    %c0_i32 = arith.constant 0 : i32
    %c0_i32_0 = arith.constant 0 : i32
    %c0_i32_1 = arith.constant 0 : i32
    return %c0_i32, %c0_i32_0 : i32, i32
  }
  func.func @transform_9(%arg0: i32) -> (i32, i32) {
    %c0_i32 = arith.constant 0 : i32
    %c0_i32_0 = arith.constant 0 : i32
    %c0_i32_1 = arith.constant 0 : i32
    return %c0_i32, %c0_i32_0 : i32, i32
  }
  func.func @transform_10(%arg0: i32) -> (i32, i32) {
    %c0_i32 = arith.constant 0 : i32
    %c0_i32_0 = arith.constant 0 : i32
    %c0_i32_1 = arith.constant 0 : i32
    return %c0_i32, %c0_i32_0 : i32, i32
  }
  func.func @transform_11(%arg0: i32) -> (i32, i32) {
    %c0_i32 = arith.constant 0 : i32
    %c0_i32_0 = arith.constant 0 : i32
    %c0_i32_1 = arith.constant 0 : i32
    return %c0_i32, %c0_i32_0 : i32, i32
  }
  func.func @transform_12(%arg0: i32) -> (i32, i32) {
    %c0_i32 = arith.constant 0 : i32
    %c0_i32_0 = arith.constant 0 : i32
    %c0_i32_1 = arith.constant 0 : i32
    return %c0_i32, %c0_i32_0 : i32, i32
  }
  func.func @transform_13(%arg0: i32) -> (i32, i32) {
    %c0_i32 = arith.constant 0 : i32
    %c0_i32_0 = arith.constant 0 : i32
    %c0_i32_1 = arith.constant 0 : i32
    return %c0_i32, %c0_i32_0 : i32, i32
  }
  func.func @transform_14(%arg0: i32) -> (i32, i32) {
    %c0_i32 = arith.constant 0 : i32
    %c0_i32_0 = arith.constant 0 : i32
    %c0_i32_1 = arith.constant 0 : i32
    return %c0_i32, %c0_i32_0 : i32, i32
  }
  func.func @transform_15(%arg0: i32) -> (i32, i32) {
    %c0_i32 = arith.constant 0 : i32
    %c0_i32_0 = arith.constant 0 : i32
    %c0_i32_1 = arith.constant 0 : i32
    return %c0_i32, %c0_i32_0 : i32, i32
  }
  func.func @transform_16(%arg0: i32) -> (i32, i32) {
    %c0_i32 = arith.constant 0 : i32
    %c0_i32_0 = arith.constant 0 : i32
    %c0_i32_1 = arith.constant 0 : i32
    return %c0_i32, %c0_i32_0 : i32, i32
  }
  func.func @transform_17(%arg0: i32) -> (i32, i32) {
    %c0_i32 = arith.constant 0 : i32
    %c0_i32_0 = arith.constant 0 : i32
    %c0_i32_1 = arith.constant 0 : i32
    return %c0_i32, %c0_i32_0 : i32, i32
  }
  func.func @transform_18(%arg0: i32) -> (i32, i32) {
    %c0_i32 = arith.constant 0 : i32
    %c0_i32_0 = arith.constant 0 : i32
    %c0_i32_1 = arith.constant 0 : i32
    return %c0_i32, %c0_i32_0 : i32, i32
  }
  func.func @transform_19(%arg0: i32) -> (i32, i32) {
    %c0_i32 = arith.constant 0 : i32
    %c0_i32_0 = arith.constant 0 : i32
    %c0_i32_1 = arith.constant 0 : i32
    return %c0_i32, %c0_i32_0 : i32, i32
  }
  func.func @transform_20(%arg0: i32) -> (i32, i32) {
    %c0_i32 = arith.constant 0 : i32
    %c0_i32_0 = arith.constant 0 : i32
    %c0_i32_1 = arith.constant 0 : i32
    return %c0_i32, %c0_i32_0 : i32, i32
  }
  func.func @transform_21(%arg0: i32) -> (i32, i32) {
    %c0_i32 = arith.constant 0 : i32
    %c0_i32_0 = arith.constant 0 : i32
    %c0_i32_1 = arith.constant 0 : i32
    return %c0_i32, %c0_i32_0 : i32, i32
  }
  func.func @transform_22(%arg0: i32) -> (i32, i32) {
    %c0_i32 = arith.constant 0 : i32
    %c0_i32_0 = arith.constant 0 : i32
    %c0_i32_1 = arith.constant 0 : i32
    return %c0_i32, %c0_i32_0 : i32, i32
  }
  func.func @transform_23(%arg0: i32) -> (i32, i32) {
    %c0_i32 = arith.constant 0 : i32
    %c0_i32_0 = arith.constant 0 : i32
    %c0_i32_1 = arith.constant 0 : i32
    return %c0_i32, %c0_i32_0 : i32, i32
  }
  func.func @transform_24(%arg0: i32) -> (i32, i32) {
    %c0_i32 = arith.constant 0 : i32
    %c0_i32_0 = arith.constant 0 : i32
    %c0_i32_1 = arith.constant 0 : i32
    return %c0_i32, %c0_i32_0 : i32, i32
  }
}

</mosaic_0001>

<bundles_post_ra>
// kernel: cla_model_forward.3
= control target key start
LH: loop header
LB: loop body
LE: loop exit
PB: predicated region body
PF: predicated region fallthrough
CT: control target
= control target key end

     0   :  { %s3367_s0 = inlined_call_operand.hbm [shape: bf16[8,8], index: 0, kind: input, shape index: {}]   ;;  %s3368_s1 = inlined_call_operand.vmem [shape: f32[8,128], index: 1, kind: input, shape index: {}]   ;;  %s3369_s2 = inlined_call_operand.hbm [shape: bf16[2,128,384], index: 2, kind: input, shape index: {}]   ;;  %s3370_s3 = inlined_call_operand.hbm [shape: f32[2,1,384], index: 3, kind: input, shape index: {}]   ;;  %s3371_s4 = inlined_call_operand.hbm [shape: bf16[2,128,128], index: 4, kind: input, shape index: {}]   ;;  %s3372_s5 = inlined_call_operand.hbm [shape: f32[2,1,128], index: 5, kind: input, shape index: {}]   ;;  %s3373_s6 = inlined_call_operand.hbm [shape: f32[2,1,128], index: 6, kind: input, shape index: {}]   ;;  %s3374_s7 = inlined_call_operand.hbm [shape: f32[2,1,128], index: 7, kind: input, shape index: {}]   ;;  %s3375_s8 = inlined_call_operand.hbm [shape: bf16[2,128,128], index: 8, kind: input, shape index: {}]   ;;  %s3376_s9 = inlined_call_operand.hbm [shape: f32[2,1,128], index: 9, kind: input, shape index: {}]   ;;  %s3377_s10 = inlined_call_operand.hbm [shape: bf16[2,128,128], index: 10, kind: input, shape index: {}]   ;;  %s3378_s11 = inlined_call_operand.hbm [shape: f32[2,1,128], index: 11, kind: input, shape index: {}]   ;;  %s3379_s12 = inlined_call_operand.vmem [shape: f32[8,128], index: 12, kind: output, shape index: {}]  }
   0x1   :  { %3392 = sst [smem:[#allocation30_spill]] %s3367_s0 }
   0x2   :  { %3393 = sst [smem:[#allocation31_spill]] %s3368_s1 }
   0x3   :  { %3394 = sst [smem:[#allocation32_spill]] %s3369_s2 }
   0x4   :  { %3395 = sst [smem:[#allocation33_spill]] %s3371_s4 }
   0x5   :  { %3396 = sst [smem:[#allocation34_spill]] %s3376_s9 }
   0x6   :  { %3397 = sst [smem:[#allocation35_spill]] %s3378_s11 }
   0x7   :  { %3398 = sst [smem:[#allocation36_spill]] %s3379_s12 }
   0x8   :  { %17 = vsyncpa [#allocation5], 0 }
   0x9   :  { %18 = vsyncpa [#allocation7], 0 }
   0xa   :  { %20 = vsyncpa [#allocation7 + $0x1], 0 }
   0xb   :  { %21 = vsyncpa [#allocation10], 0 }
   0xc   :  { %23 = vsyncpa [#allocation10 + $0x1], 0 }
   0xd   :  { %24 = vsyncpa [#allocation13], 0 }
   0xe   :  { %26 = vsyncpa [#allocation13 + $0x1], 0 }
   0xf   :  { %27 = vsyncpa [#allocation16], 0 }
  0x10   :  { %29 = vsyncpa [#allocation16 + $0x1], 0 }
  0x11   :  { %30 = vsyncpa [#allocation19], 0 }
  0x12   :  { %32 = vsyncpa [#allocation19 + $0x1], 0  ;;  %s2787_s21 = smov 0   ;;  %s2789_s22 = smov 0  }
  0x13   :  { %s2791_s23 = smov 0   ;;  %s2793_s24 = smov 0  }
  0x14 LB: > { %3399 = sst [smem:[#allocation27_spill]] %s2697_s23  ;;  %s2808_s25 = sadd.s32 1, %s2701_s24   ;;  %s2701_s24 = sphi %s2793_s24, %s3427_s24   ;;  %s2697_s23 = sphi %s2791_s23, %s3429_s23   ;;  %s2693_s22 = sphi %s2789_s22, %s3431_s22   ;;  %s2689_s21 = sphi %s2787_s21, %s3430_s21  }
  0x15   : > { %3400 = sst [smem:[#allocation28_spill]] %s2808_s25  ;;  %s87_s26 = sadd.s32 1, %s2697_s23 }
  0x16   : > { %s84_s27 = ssub.s32 %s2701_s24, %s2808_s25  ;;  %p94_p0 = scmp.ne.s32.totalorder %s2697_s23, %s2693_s22 }
  0x17   : > { %p85_p1 = scmp.eq.s32.totalorder %s84_s27, 0  ;;  %p95_p2 = scmp.eq.s32.totalorder %s2701_s24, 0 }
  0x18   : > { %p2234_p3 = scmp.lt.s32.totalorder %s2701_s24, 2  ;;  %s2821_s29 = sand.u32 1, %s2701_s24  }
  0x19   : > { %s2818_s28 = scalar_select %p85_p1, %s2697_s23, %s87_s26  }
  0x1a   : > { %p96_p4 = por %p95_p2, %p94_p0  ;;  %s2824_s30 = sand.u32 1, %s2697_s23  }
  0x1b   : > { %3401 = sst [smem:[#allocation29_spill]] %s2818_s28  ;;  %s2168_s13 = smul.u32 192, %s2824_s30 }
  0x1c   : > { %p2827_p5 = pnand %p2234_p3, %p96_p4  ;;  %s2169_s15 = smul.u32 3072, %s2701_s24 }
  0x1d   : > { %s3403_s2 = sld [smem:[#allocation32_spill]]  ;;  %s397_s19 = scalar_lea.vmem [#allocation6], %s2168_s13 }
  0x1e   : > { %s404_s20 = sshll.u32 %s397_s19, 4  ;;  %p2844_p7 = pneg %p2827_p5  ;;  %s2837_s20 = int_to_ptr.vmem [resolvable:$true] %s404_s20 }
  0x23   : > { %s2835_s18 = scalar_lea.hbm %s3403_s2, %s2169_s15  ;;  %s2346_s17 = scalar_lea.hbm %s3403_s2, 6144 }
  0x24   : > { %s2341_s27 = scalar_lea.hbm %s2835_s18, 3072  ;;  %p2347_p10 = scmp.lt.s32.totalorder %s2835_s18, %s3403_s2 }
  0x25   : > { %p2342_p6 = scmp.ne.s32.totalorder %s2835_s18, %s2341_s27  ;;  %p2348_p11 = scmp.lt.s32.totalorder %s2346_s17, %s2341_s27 }
  0x27   : > { %p2344_p8 = pnand %p2844_p7, %p2342_p6  ;;  %p2349_p12 = por %p2348_p11, %p2347_p10 }
  0x29   : > { %p2345_p9 = pneg %p2344_p8 }
  0x2b   : > { %p2350_p13 = pnand %p2349_p12, %p2345_p9 }
  0x2d   : > { %2353 = shalt.err (!%p2350_p13)
}
  0x2e   : > { %s2354_s26 = scalar_lea.vmem %s2837_s20, 3072  ;;  %s2703_s23 = smov [#allocation6]  }
  0x2f   : > { %p2355_p0 = scmp.ne.s32.totalorder %s2837_s20, %s2354_s26  ;;  %s2359_s15 = sshll.u32 %s2703_s23, 4  ;;  %s2360_s15 = int_to_ptr.vmem [resolvable:$false] %s2359_s15 }
  0x30   : > { %s2361_s16 = scalar_lea.vmem %s2360_s15, 6144  ;;  %p2362_p3 = scmp.lt.s32.totalorder %s2837_s20, %s2360_s15 }
  0x31   : > { %p2357_p1 = pnand %p2355_p0, %p2844_p7  ;;  %p2363_p4 = scmp.lt.s32.totalorder %s2361_s16, %s2354_s26 }
  0x33   : > { %p2358_p2 = pneg %p2357_p1  ;;  %p2364_p6 = por %p2363_p4, %p2362_p3 }
  0x35   : > { %p2365_p8 = pnand %p2364_p6, %p2358_p2 }
  0x37   : > { %2368 = shalt.err (!%p2365_p8)
}
  0x38   : > { %s2704_s27 = smov 192   ;;  %s2705_s17 = smov 12  }
  0x39   : > { %s3405_s23 = scalar_lea.sflag [#allocation7], %s2821_s29  ;;  %s2869_s13 = sshll.u32 %s2824_s30, 6 }
  0x3a   : > { %2205 = dma.hbm_to_vmem [thread:$0]  (!%p2827_p5), %s2835_s18, 3072, %s2837_s20, %s3405_s23, %s2704_s27, %s2704_s27, %s2705_s17  }
  0x3b   : > { %s2872_s26 = sshll.u32 %s2701_s24, 10  ;;  %s3406_s4 = sld [smem:[#allocation33_spill]] }
  0x3c   : > { %s437_s2 = scalar_lea.vmem [#allocation9], %s2869_s13  ;;  %s2884_s12 = sshll.u32 %s2701_s24, 4 }
  0x3d   : > { %s444_s25 = sshll.u32 %s437_s2, 4  ;;  %s2881_s25 = int_to_ptr.vmem [resolvable:$true] %s444_s25 }
  0x41   : > { %s2878_s16 = scalar_lea.hbm %s3406_s4, %s2872_s26  ;;  %s2374_s23 = scalar_lea.hbm %s3406_s4, 2048 }
  0x42   : > { %s2369_s20 = scalar_lea.hbm %s2878_s16, 1024  ;;  %p2375_p12 = scmp.lt.s32.totalorder %s2878_s16, %s3406_s4 }
  0x43   : > { %p2370_p9 = scmp.ne.s32.totalorder %s2878_s16, %s2369_s20  ;;  %p2376_p13 = scmp.lt.s32.totalorder %s2374_s23, %s2369_s20 }
  0x45   : > { %p2372_p10 = pnand %p2370_p9, %p2844_p7  ;;  %p2377_p0 = por %p2376_p13, %p2375_p12 }
  0x47   : > { %p2373_p11 = pneg %p2372_p10 }
  0x49   : > { %p2378_p1 = pnand %p2377_p0, %p2373_p11 }
  0x4b   : > { %2381 = shalt.err (!%p2378_p1)
}
  0x4c   : > { %s2382_s2 = scalar_lea.vmem %s2881_s25, 1024  ;;  %s2706_s18 = smov [#allocation9]  }
  0x4d   : > { %p2383_p2 = scmp.ne.s32.totalorder %s2881_s25, %s2382_s2  ;;  %s2387_s27 = sshll.u32 %s2706_s18, 4  ;;  %s2388_s27 = int_to_ptr.vmem [resolvable:$false] %s2387_s27 }
  0x4e   : > { %s2389_s17 = scalar_lea.vmem %s2388_s27, 2048  ;;  %p2390_p6 = scmp.lt.s32.totalorder %s2881_s25, %s2388_s27 }
  0x4f   : > { %p2385_p3 = pnand %p2383_p2, %p2844_p7  ;;  %p2391_p8 = scmp.lt.s32.totalorder %s2389_s17, %s2382_s2 }
  0x51   : > { %p2386_p4 = pneg %p2385_p3  ;;  %p2392_p9 = por %p2391_p8, %p2390_p6 }
  0x53   : > { %p2393_p10 = pnand %p2392_p9, %p2386_p4 }
  0x55   : > { %2396 = shalt.err (!%p2393_p10)
}
  0x56   : > { %s3385_s20 = smov 64   ;;  %s2708_s23 = smov 4  }
  0x57   : > { %s3407_s18 = scalar_lea.sflag [#allocation10], %s2821_s29  ;;  %s2916_s2 = scalar_lea.hbm %s3373_s6, %s2884_s12 }
  0x58   : > { %2211 = dma.hbm_to_vmem [thread:$0]  (!%p2827_p5), %s2878_s16, 1024, %s2881_s25, %s3407_s18, %s3385_s20, %s3385_s20, %s2708_s23  }
  0x59   : > { %s474_s27 = scalar_lea.vmem [#allocation12], %s2824_s30  ;;  %s472_s4 = scalar_lea.sflag [#allocation13], %s2821_s29 }
  0x5a   : > { %s481_s17 = sshll.u32 %s474_s27, 4  ;;  %s2397_s1 = scalar_lea.hbm %s2916_s2, 16  ;;  %s482_s17 = int_to_ptr.vmem [resolvable:$true] %s481_s17 }
  0x5b   : > { %p2398_p11 = scmp.ne.s32.totalorder %s2916_s2, %s2397_s1  ;;  %s2402_s25 = scalar_lea.hbm %s3373_s6, 32 }
  0x5c   : > { %p2403_p0 = scmp.lt.s32.totalorder %s2916_s2, %s3373_s6  ;;  %p2404_p1 = scmp.lt.s32.totalorder %s2402_s25, %s2397_s1 }
  0x5d   : > { %p2400_p12 = pnand %p2398_p11, %p2844_p7 }
  0x5e   : > { %p2405_p2 = por %p2404_p1, %p2403_p0 }
  0x5f   : > { %p2401_p13 = pneg %p2400_p12 }
  0x61   : > { %p2406_p3 = pnand %p2405_p2, %p2401_p13 }
  0x63   : > { %2409 = shalt.err (!%p2406_p3)
}
  0x64   : > { %s2410_s19 = scalar_lea.vmem %s482_s17, 16  ;;  %s2709_s15 = smov [#allocation12]  }
  0x65   : > { %p2411_p4 = scmp.ne.s32.totalorder %s482_s17, %s2410_s19  ;;  %s2415_s27 = sshll.u32 %s2709_s15, 4  ;;  %s2416_s27 = int_to_ptr.vmem [resolvable:$false] %s2415_s27 }
  0x66   : > { %s2417_s20 = scalar_lea.vmem %s2416_s27, 32  ;;  %p2418_p9 = scmp.lt.s32.totalorder %s482_s17, %s2416_s27 }
  0x67   : > { %p2413_p6 = pnand %p2411_p4, %p2844_p7  ;;  %p2419_p10 = scmp.lt.s32.totalorder %s2417_s20, %s2410_s19 }
  0x69   : > { %p2414_p8 = pneg %p2413_p6  ;;  %p2420_p11 = por %p2419_p10, %p2418_p9 }
  0x6b   : > { %p2421_p12 = pnand %p2420_p11, %p2414_p8 }
  0x6d   : > { %2424 = shalt.err (!%p2421_p12)
}
  0x6e   : > { %2217 = dma.hbm_to_vmem [thread:$0]  (!%p2827_p5), %s2916_s2, 16, %s482_s17, %s472_s4  }
  0x6f   : > { %s2942_s11 = scalar_lea.hbm %s3375_s8, %s2872_s26  ;;  %s509_s20 = scalar_lea.vmem [#allocation15], %s2869_s13 }
  0x70   : > { %s516_s25 = sshll.u32 %s509_s20, 4  ;;  %s3391_s16 = scalar_lea.sflag [#allocation16], %s2821_s29  ;;  %s2945_s25 = int_to_ptr.vmem [resolvable:$true] %s516_s25 }
  0x71   : > { %s2425_s18 = scalar_lea.hbm %s2942_s11, 1024  ;;  %s2430_s17 = scalar_lea.hbm %s3375_s8, 2048 }
  0x72   : > { %p2426_p13 = scmp.ne.s32.totalorder %s2942_s11, %s2425_s18  ;;  %p2431_p2 = scmp.lt.s32.totalorder %s2942_s11, %s3375_s8 }
  0x73   : > { %p2432_p3 = scmp.lt.s32.totalorder %s2430_s17, %s2425_s18 }
  0x74   : > { %p2428_p0 = pnand %p2426_p13, %p2844_p7 }
  0x75   : > { %p2433_p4 = por %p2432_p3, %p2431_p2 }
  0x76   : > { %p2429_p1 = pneg %p2428_p0 }
  0x78   : > { %p2434_p6 = pnand %p2433_p4, %p2429_p1 }
  0x7a   : > { %2437 = shalt.err (!%p2434_p6)
}
  0x7b   : > { %s2438_s1 = scalar_lea.vmem %s2945_s25, 1024  ;;  %s2710_s9 = smov [#allocation15]  }
  0x7c   : > { %p2439_p8 = scmp.ne.s32.totalorder %s2945_s25, %s2438_s1  ;;  %s2443_s20 = sshll.u32 %s2710_s9, 4  ;;  %s2444_s20 = int_to_ptr.vmem [resolvable:$false] %s2443_s20 }
  0x7d   : > { %s2445_s19 = scalar_lea.vmem %s2444_s20, 2048  ;;  %p2446_p11 = scmp.lt.s32.totalorder %s2945_s25, %s2444_s20 }
  0x7e   : > { %p2441_p9 = pnand %p2439_p8, %p2844_p7  ;;  %p2447_p12 = scmp.lt.s32.totalorder %s2445_s19, %s2438_s1 }
  0x80   : > { %p2442_p10 = pneg %p2441_p9  ;;  %p2448_p13 = por %p2447_p12, %p2446_p11 }
  0x82   : > { %p2449_p0 = pnand %p2448_p13, %p2442_p10 }
  0x84   : > { %2452 = shalt.err (!%p2449_p0)
}
  0x85   : > { %s3408_s18 = smov 64   ;;  %s2977_s15 = scalar_lea.hbm %s3377_s10, %s2872_s26 }
  0x86   : > { %2223 = dma.hbm_to_vmem [thread:$0]  (!%p2827_p5), %s2942_s11, 1024, %s2945_s25, %s3391_s16, %s3408_s18, %s3408_s18, %s2708_s23  }
  0x87   : > { %s547_s27 = scalar_lea.vmem [#allocation18], %s2869_s13  ;;  %s3390_s9 = scalar_lea.sflag [#allocation19], %s2821_s29 }
  0x88   : > { %s554_s1 = sshll.u32 %s547_s27, 4  ;;  %s2453_s20 = scalar_lea.hbm %s2977_s15, 1024  ;;  %s2980_s1 = int_to_ptr.vmem [resolvable:$true] %s554_s1 }
  0x89   : > { %p2454_p1 = scmp.ne.s32.totalorder %s2977_s15, %s2453_s20  ;;  %s2458_s25 = scalar_lea.hbm %s3377_s10, 2048 }
  0x8a   : > { %p2459_p4 = scmp.lt.s32.totalorder %s2977_s15, %s3377_s10  ;;  %p2460_p6 = scmp.lt.s32.totalorder %s2458_s25, %s2453_s20 }
  0x8b   : > { %p2456_p2 = pnand %p2454_p1, %p2844_p7 }
  0x8c   : > { %p2461_p8 = por %p2460_p6, %p2459_p4 }
  0x8d   : > { %p2457_p3 = pneg %p2456_p2 }
  0x8f   : > { %p2462_p9 = pnand %p2461_p8, %p2457_p3 }
  0x91   : > { %2465 = shalt.err (!%p2462_p9)
}
  0x92   : > { %s2466_s13 = scalar_lea.vmem %s2980_s1, 1024  ;;  %s2711_s17 = smov [#allocation18]  }
  0x93   : > { %p2467_p10 = scmp.ne.s32.totalorder %s2980_s1, %s2466_s13  ;;  %s2471_s27 = sshll.u32 %s2711_s17, 4  ;;  %s2472_s27 = int_to_ptr.vmem [resolvable:$false] %s2471_s27 }
  0x94   : > { %s2473_s19 = scalar_lea.vmem %s2472_s27, 2048  ;;  %p2474_p13 = scmp.lt.s32.totalorder %s2980_s1, %s2472_s27 }
  0x95   : > { %p2469_p11 = pnand %p2467_p10, %p2844_p7  ;;  %p2475_p0 = scmp.lt.s32.totalorder %s2473_s19, %s2466_s13 }
  0x97   : > { %p2470_p12 = pneg %p2469_p11  ;;  %p2476_p1 = por %p2475_p0, %p2474_p13 }
  0x99   : > { %p2477_p2 = pnand %p2476_p1, %p2470_p12 }
  0x9b   : > { %2480 = shalt.err (!%p2477_p2)
}
  0x9c   : > { %2229 = dma.hbm_to_vmem [thread:$0]  (!%p2827_p5), %s2977_s15, 1024, %s2980_s1, %s3390_s9, %s3408_s18, %s3408_s18, %s2708_s23  }
  0x9d   : > { %s3009_s20 = sadd.s32 4294967295, %s2701_s24   ;;  %p100_p3 = scmp.ne.s32.totalorder %s2693_s22, %s2689_s21 }
  0x9e   : > { %p3387_p4 = scmp.eq.s32.totalorder %s3009_s20, 0  ;;  %p1916_p6 = scmp.ge.s32.totalorder %s2701_s24, 1 }
  0x9f   : > { %p366_p8 = scmp.lt.s32.totalorder %s2701_s24, 3  ;;  %s2712_s23 = smov [#allocation4]  }
  0xa0   : > { %p3018_p9 = por %p3387_p4, %p100_p3  ;;  %s379_s18 = sshll.u32 %s2712_s23, 4  ;;  %s380_s18 = int_to_ptr.vmem [resolvable:$true] %s379_s18 }
  0xa1   : > { %p3023_p11 = pnand %p1916_p6, %p366_p8  ;;  %s2170_s15 = smul.u32 3, %s2824_s30 }
  0xa2   : > { %s3409_s11 = scalar_select %p3018_p9, 1, 0 }
  0xa3   : > { %s3410_s25 = scalar_select %p3023_p11, 1, 0 }
  0xa4   : > { %p2198_p12 = pneg %p3023_p11  ;;  %s2171_s21 = smul.u32 48, %s2701_s24 }
  0xa5   : > { %s418_s2 = scalar_lea.vmem [#allocation8], %s2170_s15  ;;  %s2492_s19 = scalar_lea.vmem %s380_s18, 64 }
  0xa6   : > { %p3033_p13 = pnand %p2198_p12, %p3387_p4  ;;  %s426_s26 = sshll.u32 %s418_s2, 4  ;;  %s3042_s26 = int_to_ptr.vmem [resolvable:$true] %s426_s26 }
  0xa7   : > { %s3040_s27 = scalar_lea.hbm %s3370_s3, %s2171_s21  ;;  %p2493_p1 = scmp.ne.s32.totalorder %s380_s18, %s2492_s19 }
  0xa8   : > { %p2483_p0 = pneg %p3033_p13  ;;  %p2500_p6 = scmp.lt.s32.totalorder %s380_s18, %s380_s18 }
  0xa9   : > { %p2501_p8 = scmp.lt.s32.totalorder %s2492_s19, %s2492_s19 }
  0xaa   : > { %p2495_p2 = pnand %p2493_p1, %p2483_p0 }
  0xab   : > { %p2502_p12 = por %p2501_p8, %p2500_p6 }
  0xac   : > { %p2496_p3 = pneg %p2495_p2 }
  0xae   : > { %p2503_p10 = pnand %p2502_p12, %p2496_p3 }
  0xb0   : > { %2506 = shalt.err (!%p2503_p10)
}
  0xb1   : > { %s3412_s0 = sld [smem:[#allocation30_spill]]  ;;  %s2507_s15 = scalar_lea.hbm %s3040_s27, 48 }
  0xb2   : > { %p2508_p4 = scmp.ne.s32.totalorder %s3040_s27, %s2507_s15  ;;  %s2512_s13 = scalar_lea.hbm %s3370_s3, 96 }
  0xb3   : > { %p2513_p10 = scmp.lt.s32.totalorder %s3040_s27, %s3370_s3  ;;  %p2514_p2 = scmp.lt.s32.totalorder %s2512_s13, %s2507_s15 }
  0xb4   : > { %p2510_p0 = pnand %p2508_p4, %p2844_p7 }
  0xb5   : > { %p2515_p3 = por %p2514_p2, %p2513_p10 }
  0xb6   : > { %p2511_p1 = pneg %p2510_p0 }
  0xb7   : > { %2201 = dma.hbm_to_vmem [thread:$0]  (!%p3033_p13), %s3412_s0, 64, %s380_s18, [#allocation5]  }
  0xb8   : > { %p2516_p6 = pnand %p2515_p3, %p2511_p1 }
  0xba   : > { %2519 = shalt.err (!%p2516_p6)
}
  0xbb   : > { %s2520_s18 = scalar_lea.vmem %s3042_s26, 48  ;;  %s2713_s1 = smov [#allocation8]  }
  0xbc   : > { %p2521_p13 = scmp.ne.s32.totalorder %s3042_s26, %s2520_s18  ;;  %s2525_s24 = sshll.u32 %s2713_s1, 4  ;;  %s2526_s24 = int_to_ptr.vmem [resolvable:$false] %s2525_s24 }
  0xbd   : > { %s2527_s23 = scalar_lea.vmem %s2526_s24, 96  ;;  %p2528_p12 = scmp.lt.s32.totalorder %s3042_s26, %s2526_s24 }
  0xbe   : > { %p2523_p4 = pnand %p2521_p13, %p2844_p7  ;;  %p2529_p0 = scmp.lt.s32.totalorder %s2527_s23, %s2520_s18 }
  0xc0   : > { %p2524_p8 = pneg %p2523_p4  ;;  %p2530_p9 = por %p2529_p0, %p2528_p12 }
  0xc2   : > { %p2531_p11 = pnand %p2530_p9, %p2524_p8 }
  0xc4   : > { %2534 = shalt.err (!%p2531_p11)
}
  0xc5   : > { %s3413_s15 = scalar_lea.sflag [#allocation7], %s2821_s29  ;;  %s462_s13 = scalar_lea.hbm %s3372_s5, %s2884_s12 }
  0xc6   : > { %2208 = dma.hbm_to_vmem [thread:$0]  (!%p2827_p5), %s3040_s27, 48, %s3042_s26, %s3413_s15  }
  0xc7   : > { %s457_s17 = scalar_lea.vmem [#allocation11], %s2824_s30  ;;  %s2535_s18 = scalar_lea.hbm %s462_s13, 16 }
  0xc8   : > { %s464_s19 = sshll.u32 %s457_s17, 4  ;;  %p2536_p9 = scmp.ne.s32.totalorder %s462_s13, %s2535_s18  ;;  %s465_s19 = int_to_ptr.vmem [resolvable:$true] %s464_s19 }
  0xc9   : > { %s2540_s23 = scalar_lea.hbm %s3372_s5, 32  ;;  %p2541_p10 = scmp.lt.s32.totalorder %s462_s13, %s3372_s5 }
  0xca   : > { %p2538_p11 = pnand %p2536_p9, %p2844_p7  ;;  %p2542_p2 = scmp.lt.s32.totalorder %s2540_s23, %s2535_s18 }
  0xcc   : > { %p2539_p1 = pneg %p2538_p11  ;;  %p2543_p3 = por %p2542_p2, %p2541_p10 }
  0xce   : > { %p2544_p6 = pnand %p2543_p3, %p2539_p1 }
  0xd0   : > { %2547 = shalt.err (!%p2544_p6)
}
  0xd1   : > { %s2548_s26 = scalar_lea.vmem %s465_s19, 16  ;;  %s2714_s27 = smov [#allocation11]  }
  0xd2   : > { %p2549_p13 = scmp.ne.s32.totalorder %s465_s19, %s2548_s26  ;;  %s2553_s15 = sshll.u32 %s2714_s27, 4  ;;  %s2554_s15 = int_to_ptr.vmem [resolvable:$false] %s2553_s15 }
  0xd3   : > { %s2555_s21 = scalar_lea.vmem %s2554_s15, 32  ;;  %p2556_p12 = scmp.lt.s32.totalorder %s465_s19, %s2554_s15 }
  0xd4   : > { %p2551_p4 = pnand %p2549_p13, %p2844_p7  ;;  %p2557_p0 = scmp.lt.s32.totalorder %s2555_s21, %s2548_s26 }
  0xd6   : > { %p2552_p8 = pneg %p2551_p4  ;;  %p2558_p9 = por %p2557_p0, %p2556_p12 }
  0xd8   : > { %p2559_p11 = pnand %p2558_p9, %p2552_p8 }
  0xda   : > { %2562 = shalt.err (!%p2559_p11)
}
  0xdb   : > { %s3414_s16 = scalar_lea.sflag [#allocation10], %s2821_s29  ;;  %s496_s17 = scalar_lea.hbm %s3374_s7, %s2884_s12 }
  0xdc   : > { %2214 = dma.hbm_to_vmem [thread:$0]  (!%p2827_p5), %s462_s13, 16, %s465_s19, %s3414_s16  }
  0xdd   : > { %s491_s18 = scalar_lea.vmem [#allocation14], %s2824_s30  ;;  %s2563_s24 = scalar_lea.hbm %s496_s17, 16 }
  0xde   : > { %s498_s1 = sshll.u32 %s491_s18, 4  ;;  %p2564_p1 = scmp.ne.s32.totalorder %s496_s17, %s2563_s24  ;;  %s499_s1 = int_to_ptr.vmem [resolvable:$true] %s498_s1 }
  0xdf   : > { %s2568_s27 = scalar_lea.hbm %s3374_s7, 32  ;;  %p2569_p3 = scmp.lt.s32.totalorder %s496_s17, %s3374_s7 }
  0xe0   : > { %p2566_p10 = pnand %p2564_p1, %p2844_p7  ;;  %p2570_p6 = scmp.lt.s32.totalorder %s2568_s27, %s2563_s24 }
  0xe2   : > { %p2567_p2 = pneg %p2566_p10  ;;  %p2571_p13 = por %p2570_p6, %p2569_p3 }
  0xe4   : > { %p2572_p4 = pnand %p2571_p13, %p2567_p2 }
  0xe6   : > { %2575 = shalt.err (!%p2572_p4)
}
  0xe7   : > { %s2576_s13 = scalar_lea.vmem %s499_s1, 16  ;;  %s2715_s19 = smov [#allocation14]  }
  0xe8   : > { %p2577_p8 = scmp.ne.s32.totalorder %s499_s1, %s2576_s13  ;;  %s2581_s16 = sshll.u32 %s2715_s19, 4  ;;  %s2582_s16 = int_to_ptr.vmem [resolvable:$false] %s2581_s16 }
  0xe9   : > { %s2583_s9 = scalar_lea.vmem %s2582_s16, 32  ;;  %p2584_p9 = scmp.lt.s32.totalorder %s499_s1, %s2582_s16 }
  0xea   : > { %p2579_p12 = pnand %p2577_p8, %p2844_p7  ;;  %p2585_p11 = scmp.lt.s32.totalorder %s2583_s9, %s2576_s13 }
  0xec   : > { %p2580_p0 = pneg %p2579_p12  ;;  %p2586_p1 = por %p2585_p11, %p2584_p9 }
  0xee   : > { %p2587_p10 = pnand %p2586_p1, %p2580_p0 }
  0xf0   : > { %2590 = shalt.err (!%p2587_p10)
}
  0xf1   : > { %2220 = dma.hbm_to_vmem [thread:$0]  (!%p2827_p5), %s496_s17, 16, %s499_s1, %s472_s4  }
  0xf2   : > { %s3415_s24 = sld [smem:[#allocation34_spill]]  ;;  %s529_s27 = scalar_lea.vmem [#allocation17], %s2824_s30 }
  0xf3   : > { %s536_s15 = sshll.u32 %s529_s27, 4  ;;  %s537_s15 = int_to_ptr.vmem [resolvable:$true] %s536_s15 }
  0xf8   : > { %s3416_s26 = smov %s3415_s24  ;;  %s534_s23 = scalar_lea.hbm %s3415_s24, %s2884_s12 }
  0xf9   : > { %s2591_s21 = scalar_lea.hbm %s534_s23, 16  ;;  %s2596_s16 = scalar_lea.hbm %s3416_s26, 32 }
  0xfa   : > { %p2592_p2 = scmp.ne.s32.totalorder %s534_s23, %s2591_s21  ;;  %p2597_p13 = scmp.lt.s32.totalorder %s534_s23, %s3416_s26 }
  0xfb   : > { %p2598_p4 = scmp.lt.s32.totalorder %s2596_s16, %s2591_s21 }
  0xfc   : > { %p2594_p3 = pnand %p2592_p2, %p2844_p7 }
  0xfd   : > { %p2599_p8 = por %p2598_p4, %p2597_p13 }
  0xfe   : > { %p2595_p6 = pneg %p2594_p3 }
 0x100   : > { %p2600_p12 = pnand %p2599_p8, %p2595_p6 }
 0x102   : > { %2603 = shalt.err (!%p2600_p12)
}
 0x103   : > { %s2604_s4 = scalar_lea.vmem %s537_s15, 16  ;;  %s2716_s17 = smov [#allocation17]  }
 0x104   : > { %p2605_p0 = scmp.ne.s32.totalorder %s537_s15, %s2604_s4  ;;  %s2609_s1 = sshll.u32 %s2716_s17, 4  ;;  %s2610_s1 = int_to_ptr.vmem [resolvable:$false] %s2609_s1 }
 0x105   : > { %s2611_s2 = scalar_lea.vmem %s2610_s1, 32  ;;  %p2612_p1 = scmp.lt.s32.totalorder %s537_s15, %s2610_s1 }
 0x106   : > { %p2607_p9 = pnand %p2605_p0, %p2844_p7  ;;  %p2613_p10 = scmp.lt.s32.totalorder %s2611_s2, %s2604_s4 }
 0x108   : > { %p2608_p11 = pneg %p2607_p9  ;;  %p2614_p2 = por %p2613_p10, %p2612_p1 }
 0x10a   : > { %p2615_p3 = pnand %p2614_p2, %p2608_p11 }
 0x10c   : > { %2618 = shalt.err (!%p2615_p3)
}
 0x10d   : > { %s3417_s0 = scalar_lea.sflag [#allocation16], %s2821_s29  ;;  %s3418_s27 = sld [smem:[#allocation35_spill]] }
 0x10e   : > { %2226 = dma.hbm_to_vmem [thread:$0]  (!%p2827_p5), %s534_s23, 16, %s537_s15, %s3417_s0  }
 0x10f   : > { %s567_s13 = scalar_lea.vmem [#allocation20], %s2824_s30 }
 0x110   : > { %s574_s19 = sshll.u32 %s567_s13, 4  ;;  %s575_s19 = int_to_ptr.vmem [resolvable:$true] %s574_s19 }
 0x113   : > { %s572_s21 = scalar_lea.hbm %s3418_s27, %s2884_s12  ;;  %s2624_s17 = scalar_lea.hbm %s3418_s27, 32 }
 0x114   : > { %s2619_s16 = scalar_lea.hbm %s572_s21, 16  ;;  %p2625_p8 = scmp.lt.s32.totalorder %s572_s21, %s3418_s27 }
 0x115   : > { %p2620_p6 = scmp.ne.s32.totalorder %s572_s21, %s2619_s16  ;;  %p2626_p12 = scmp.lt.s32.totalorder %s2624_s17, %s2619_s16 }
 0x117   : > { %p2622_p13 = pnand %p2620_p6, %p2844_p7  ;;  %p2627_p0 = por %p2626_p12, %p2625_p8 }
 0x119   : > { %p2623_p4 = pneg %p2622_p13 }
 0x11b   : > { %p2628_p9 = pnand %p2627_p0, %p2623_p4 }
 0x11d   : > { %2631 = shalt.err (!%p2628_p9)
}
 0x11e   : > { %s2632_s12 = scalar_lea.vmem %s575_s19, 16  ;;  %s2717_s30 = smov [#allocation20]  }
 0x11f   : > { %p2633_p11 = scmp.ne.s32.totalorder %s575_s19, %s2632_s12  ;;  %s2637_s23 = sshll.u32 %s2717_s30, 4  ;;  %s2638_s23 = int_to_ptr.vmem [resolvable:$false] %s2637_s23 }
 0x120   : > { %s2639_s15 = scalar_lea.vmem %s2638_s23, 32  ;;  %p2640_p2 = scmp.lt.s32.totalorder %s575_s19, %s2638_s23 }
 0x121   : > { %p2635_p1 = pnand %p2633_p11, %p2844_p7  ;;  %p2641_p3 = scmp.lt.s32.totalorder %s2639_s15, %s2632_s12 }
 0x123   : > { %p2636_p10 = pneg %p2635_p1  ;;  %p2642_p6 = por %p2641_p3, %p2640_p2 }
 0x125   : > { %p2643_p13 = pnand %p2642_p6, %p2636_p10 }
 0x127   : > { %2646 = shalt.err (!%p2643_p13)
}
 0x128   : > { %s3419_s0 = scalar_lea.sflag [#allocation19], %s2821_s29  ;;  %p3420_p4 = scmp.ne.s32.totalorder %s3410_s25, 0 }
 0x129   : > { %2232 = dma.hbm_to_vmem [thread:$0]  (!%p2827_p5), %s572_s21, 16, %s575_s19, %s3419_s0  }
 0x12a   : > { %583 = sbr.rel (%p3420_p4) target bundleno = 2980 (0xba4), region = 68  ;;  %p3421_p7 = scmp.eq.s32.totalorder (!%p3420_p4), %s3009_s20, 0 }
 0x12f   : > { %2664 = dma.done.wait (%p3421_p7), [#allocation5], 64   ;;  %p3422_p8 = pmov %p3421_p7 }
 0x130   : > { %s589_s28 = sand.u32 1, %s3009_s20   ;;  %s3157_s18 = sand.u32 1, %s2693_s22  }
 0x131   : > { %2666 = vsyncadd (%p3422_p8), [#allocation5], 4294967232  ;;  %s2172_s14 = smul.u32 192, %s3157_s18  ;;  %s590_s24 = scalar_lea.sflag [#allocation7], %s589_s28 }
 0x132   : > { %p3423_p5 = scmp.ne.s32.totalorder %s3409_s11, 0 }
 0x133   : > { %s3160_s29 = scalar_lea.vmem [#allocation6], %s2172_s14 }
 0x134   : > { %2668 = dma.done.wait (%p3423_p5), %s590_s24, 3120  }
 0x135   : > { %2670 = vsyncadd (%p3423_p5), %s590_s24, 4294964176  ;;  %s2173_s25 = smul.u32 3, %s3157_s18  ;;  %s1937_s21 = sshll.u32 %s3157_s18, 6 }
 0x136   : > { %s608_s19 = scalar_lea.sflag [#allocation10], %s589_s28  ;;  %s3170_s16 = scalar_lea.vmem [#allocation9], %s1937_s21 }
 0x137   : > { %s3168_s13 = scalar_lea.vmem [#allocation8], %s2173_s25 }
 0x138   : > { %2672 = dma.done.wait (%p3423_p5), %s608_s19, 1040  }
 0x139   : > { %2674 = vsyncadd (%p3423_p5), %s608_s19, 4294966256  ;;  %s619_s9 = scalar_lea.vmem [#allocation11], %s3157_s18  ;;  %s625_s4 = scalar_lea.sflag [#allocation13], %s589_s28 }
 0x13a   : > { %s627_s17 = scalar_lea.vmem [#allocation12], %s3157_s18 }
 0x13b   : > { %2676 = dma.done.wait (%p3423_p5), %s625_s4, 32  }
 0x13c   : > { %2678 = vsyncadd (%p3423_p5), %s625_s4, 4294967264  ;;  %s635_s1 = scalar_lea.vmem [#allocation14], %s3157_s18  ;;  %s641_s2 = scalar_lea.sflag [#allocation16], %s589_s28 }
 0x13d   : > { %s3183_s12 = scalar_lea.vmem [#allocation15], %s1937_s21 }
 0x13e   : > { %2680 = dma.done.wait (%p3423_p5), %s641_s2, 1040  }
 0x13f   : > { %2682 = vsyncadd (%p3423_p5), %s641_s2, 4294966256  ;;  %s652_s30 = scalar_lea.vmem [#allocation17], %s3157_s18  ;;  %s658_s23 = scalar_lea.sflag [#allocation19], %s589_s28 }
 0x140   : > { %s3190_s15 = scalar_lea.vmem [#allocation18], %s1937_s21 }
 0x141   : > { %2684 = dma.done.wait (%p3423_p5), %s658_s23, 1040  }
 0x142   : > { %2686 = vsyncadd (%p3423_p5), %s658_s23, 4294966256  ;;  %s669_s0 = scalar_lea.vmem [#allocation20], %s3157_s18  ;;  %p3424_p12 = scmp.ne.s32.totalorder %s3009_s20, 0 }
 0x143   : > { %s3425_s25 = sld [smem:[#allocation31_spill]] (!%p3424_p12) }
 0x144   : > { %749 = sbr.rel (%p3424_p12) target bundleno = 331 (0x14b), region = 116 }
 0x149   : > { %v750_v0 = vld [vmem:[%s3425_s25] sm:$0xff]  ;;  %vm752_vm0 = vcmask 64512   ;;  %v2718_v1 = vmov 0.0  }
 0x14a   : > { %751 = vst [vmem:[#allocation2] sm:$0xff] %v750_v0  ;;  %753 = vst.msk [vmem:[#allocation3] sm:$0xff] %vm752_vm0, %v2718_v1 }
 0x14b PF: > { %vm761_vm1 = vcmask 1043456   ;;  %v2719_v3 = vmov 0.0   ;;  %vm2720_vm2 = vmmov 0   ;;  %v3209_v5 = vld [vmem:[#allocation4] sm:$0xf]  ;;  %vm757_vm3 = vcmask 64512  }
 0x14c   : > { %2052 = vmatprep.subr.bf16.mxu1 %v2719_v3  ;;  %2054 = vmatprep.mubr.msk.bf16.mxu1 %vm2720_vm2, %v2719_v3  ;;  %v2279_v6 = vld [vmem:[%s3160_s29 + $0xac] ss:$12 sps:$4 sm:$0xff]   ;;  %v2280_v8 = vld [vmem:[%s3160_s29 + $0xb0] ss:$12 sps:$4 sm:$0xff]   ;;  %v2277_v9 = vld [vmem:[%s3160_s29 + $0xa8] ss:$12 sps:$4 sm:$0xff]   ;;  %v840_v37 = vlaneseq }
 0x14d   : > { %2058 = vmatprep.subr.bf16.mxu0 %v2719_v3  ;;  %2074 = vmatprep.mubr.msk.bf16.mxu0 %vm2720_vm2, %v2719_v3  ;;  %v2283_v10 = vld [vmem:[%s3160_s29 + $0x94] ss:$12 sps:$4 sm:$0xff]   ;;  %v2284_v11 = vld [vmem:[%s3160_s29 + $0x98] ss:$12 sps:$4 sm:$0xff]   ;;  %v2281_v12 = vld [vmem:[%s3160_s29 + $0x90] ss:$12 sps:$4 sm:$0xff]  }
 0x14e   : > { %2059 = vmatpush3.bf16.msra.mxu0 %v2280_v8  ;;  %v2287_v13 = vld [vmem:[%s3160_s29 + $0x7c] ss:$12 sps:$4 sm:$0xff]   ;;  %v2288_v14 = vld [vmem:[%s3160_s29 + $0x80] ss:$12 sps:$4 sm:$0xff]   ;;  %v2285_v15 = vld [vmem:[%s3160_s29 + $0x78] ss:$12 sps:$4 sm:$0xff]  }
 0x14f   : > { %2060 = vmatprep.subr.bf16.mxu0 %v2719_v3  ;;  %v2291_v16 = vld [vmem:[%s3160_s29 + $0x64] ss:$12 sps:$4 sm:$0xff]   ;;  %v2292_v17 = vld [vmem:[%s3160_s29 + $0x68] ss:$12 sps:$4 sm:$0xff]   ;;  %v2289_v18 = vld [vmem:[%s3160_s29 + $0x60] ss:$12 sps:$4 sm:$0xff]  }
 0x150   : > { %v2295_v19 = vld [vmem:[%s3160_s29 + $0x4c] ss:$12 sps:$4 sm:$0xff]   ;;  %v2296_v20 = vld [vmem:[%s3160_s29 + $0x50] ss:$12 sps:$4 sm:$0xff]   ;;  %v2293_v21 = vld [vmem:[%s3160_s29 + $0x48] ss:$12 sps:$4 sm:$0xff]  }
 0x151   : > { %v3202_v2 = vld [vmem:[#allocation2] sm:$0xff]  ;;  %v2299_v22 = vld [vmem:[%s3160_s29 + $0x34] ss:$12 sps:$4 sm:$0xff]   ;;  %v2300_v23 = vld [vmem:[%s3160_s29 + $0x38] ss:$12 sps:$4 sm:$0xff]   ;;  %v2721_v31 = vmov 0  }
 0x152   : > { %v756_v4 = vpack.c.bf16 %v3202_v2, %v3202_v2  ;;  %2061 = vmatpush3.bf16.msra.mxu0 %v2284_v11  ;;  %v2297_v24 = vld [vmem:[%s3160_s29 + $0x30] ss:$12 sps:$4 sm:$0xff]   ;;  %v2304_v26 = vld [vmem:[%s3160_s29 + $0x20] ss:$12 sps:$4 sm:$0xff]   ;;  %v2301_v27 = vld [vmem:[%s3160_s29 + $0x18] ss:$12 sps:$4 sm:$0xff]  }
 0x153   : > { %2062 = vmatprep.subr.bf16.mxu0 %v2719_v3  ;;  %v2303_v25 = vld [vmem:[%s3160_s29 + $0x1c] ss:$12 sps:$4 sm:$0xff]   ;;  %v2307_v28 = vld [vmem:[%s3160_s29 + $0x4] ss:$12 sps:$4 sm:$0xff]   ;;  %v2305_v29 = vld [vmem:[%s3160_s29] ss:$12 sps:$4 sm:$0xff]  }
 0x154   : > { %v763_v7 = vsel %vm761_vm1, %v756_v4, 0  ;;  %v2308_v30 = vld [vmem:[%s3160_s29 + $0x8] ss:$12 sps:$4 sm:$0xff]   ;;  %v841_v38 = vshrl.u32 %v840_v37, 7  ;;  %v838_v40 = vld [vmem:[%s3168_s13] sm:$0x7] }
 0x155   : > { %2053 = vmatpush3.bf16.msra.mxu1 %v763_v7  ;;  %v1107_v62 = vld [vmem:[#allocation3] sm:$0xff]  ;;  %s3426_s28 = sld [smem:[#allocation36_spill]] }
 0x156   : > { %983 = vmatprep.subr.bf16.mxu1 %v2279_v6  ;;  %2063 = vmatpush3.bf16.msra.mxu0 %v2288_v14  ;;  %v846_v39 = vsub.s32 1, %v841_v38  ;;  %v850_v41 = vsub.s32 2, %v841_v38  ;;  %v842_v43 = vsub.s32 0, %v841_v38 }
 0x157   : > { %2064 = vmatprep.subr.bf16.mxu0 %v2719_v3 }
 0x158   : > { %2055 = vmatmul.mubr.msk.bf16.vlgmr.msra.gmra.mxu1 %vm757_vm3, %v3209_v5  ;;  %v847_v42 = vrot.slane %v838_v40, %v846_v39  ;;  %v851_v46 = vrot.slane %v838_v40, %v850_v41  ;;  %v843_v50 = vrot.slane %v838_v40, %v842_v43 }
 0x159   : > { %984 = vmatpush1.bf16.msra.mxu1 %v2277_v9  ;;  %1015 = vmatprep.mubr.bf16.mxu1 %v2721_v31 }
 0x15a   : > { %985 = vmatprep.subr.bf16.mxu1 %v2283_v10  ;;  %2065 = vmatpush3.bf16.msra.mxu0 %v2292_v17  ;;  %v2309_v17 = vld [vmem:[%s3170_s16 + $0x38] sm:$0xff]  }
 0x15b   : > { %2066 = vmatprep.subr.bf16.mxu0 %v2719_v3 }
 0x15d   : > { %986 = vmatpush1.bf16.msra.mxu1 %v2281_v12 }
 0x15e   : > { %987 = vmatprep.subr.bf16.mxu1 %v2287_v13  ;;  %2067 = vmatpush3.bf16.msra.mxu0 %v2296_v20  ;;  %v2312_v20 = vld [vmem:[%s3170_s16 + $0x20] sm:$0xff]  }
 0x15f   : > { %2068 = vmatprep.subr.bf16.mxu0 %v2719_v3 }
 0x161   : > { %988 = vmatpush1.bf16.msra.mxu1 %v2285_v15 }
 0x162   : > { %989 = vmatprep.subr.bf16.mxu1 %v2291_v16  ;;  %2069 = vmatpush3.bf16.msra.mxu0 %v2300_v23  ;;  %v2315_v23 = vld [vmem:[%s3170_s16 + $0x8] sm:$0xff]  }
 0x163   : > { %2070 = vmatprep.subr.bf16.mxu0 %v2719_v3 }
 0x165   : > { %990 = vmatpush1.bf16.msra.mxu1 %v2289_v18  ;;  %v2310_v18 = vld [vmem:[%s3170_s16 + $0x30] sm:$0xff]  }
 0x166   : > { %991 = vmatprep.subr.bf16.mxu1 %v2295_v19  ;;  %2071 = vmatpush3.bf16.msra.mxu0 %v2304_v26  ;;  %v2311_v19 = vld [vmem:[%s3170_s16 + $0x28] sm:$0xff]  }
 0x167   : > { %2072 = vmatprep.subr.bf16.mxu0 %v2719_v3 }
 0x169   : > { %992 = vmatpush1.bf16.msra.mxu1 %v2293_v21  ;;  %v2313_v21 = vld [vmem:[%s3170_s16 + $0x18] sm:$0xff]  }
 0x16a   : > { %993 = vmatprep.subr.bf16.mxu1 %v2299_v22  ;;  %2073 = vmatpush3.bf16.msra.mxu0 %v2308_v30  ;;  %v2314_v22 = vld [vmem:[%s3170_s16 + $0x10] sm:$0xff]   ;;  %v2316_v30 = vld [vmem:[%s3170_s16] sm:$0xff]  }
 0x16b   : > { %2096 = vmatprep.subr.bf16.mxu0 %v2719_v3 }
 0x16d   : > { %994 = vmatpush1.bf16.msra.mxu1 %v2297_v24 }
 0x16e   : > { %995 = vmatprep.subr.bf16.mxu1 %v2303_v25 }
 0x171   : > { %996 = vmatpush1.bf16.msra.mxu1 %v2301_v27 }
 0x172   : > { %997 = vmatprep.subr.bf16.mxu1 %v2307_v28 }
 0x175   : > { %998 = vmatpush1.bf16.msra.mxu1 %v2305_v29 }
 0x176   : > { %2078 = vmatprep.subr.bf16.mxu1 %v2719_v3 }
 0x218   : > { %v799_v32 = vpop.f32.mrf.mxu1 }
 0x219   : > { %v805_v33 = vpack.c.bf16 %v799_v32, %v799_v32 }
 0x21a   : > { %v2056_v34 = vpop.f32.mrf.mxu1 }
 0x21b   : > { %1016 = vmatmul.mubr.bf16.vlgmr.msra.gmra.mxu1 %v805_v33  ;;  %2075 = vmatmul.mubr.bf16.vlgmr.msra.gmra.mxu0 %v805_v33 }
 0x21c   : > { %v802_v35 = vpop.f32.mrf.mxu1  ;;  %2080 = vmatprep.mubr.msk.bf16.mxu1 %vm2720_vm2, %v2719_v3  ;;  %2112 = vmatprep.mubr.msk.bf16.mxu0 %vm2720_vm2, %v2719_v3 }
 0x21d   : > { %2097 = vmatpush3.bf16.msra.mxu0 %v2309_v17 }
 0x21e   : > { %v2057_v36 = vpop.f32.mrf.mxu1  ;;  %2098 = vmatprep.subr.bf16.mxu0 %v2719_v3 }
 0x21f   : > { %v1968_v36 = vld [vmem:[%s619_s9] ss:$0 sm:$0xff] }
 0x221   : > { %2099 = vmatpush3.bf16.msra.mxu0 %v2310_v18 }
 0x222   : > { %2100 = vmatprep.subr.bf16.mxu0 %v2719_v3 }
 0x225   : > { %2101 = vmatpush3.bf16.msra.mxu0 %v2311_v19 }
 0x226   : > { %2102 = vmatprep.subr.bf16.mxu0 %v2719_v3 }
 0x229   : > { %2103 = vmatpush3.bf16.msra.mxu0 %v2312_v20 }
 0x22a   : > { %2104 = vmatprep.subr.bf16.mxu0 %v2719_v3 }
 0x22d   : > { %2105 = vmatpush3.bf16.msra.mxu0 %v2313_v21  ;;  %v2325_v21 = vld [vmem:[%s3190_s15 + $0x38] sm:$0xff]  }
 0x22e   : > { %2106 = vmatprep.subr.bf16.mxu0 %v2719_v3 }
 0x231   : > { %2107 = vmatpush3.bf16.msra.mxu0 %v2314_v22  ;;  %v2326_v22 = vld [vmem:[%s3190_s15 + $0x30] sm:$0xff]  }
 0x232   : > { %2108 = vmatprep.subr.bf16.mxu0 %v2719_v3 }
 0x235   : > { %2109 = vmatpush3.bf16.msra.mxu0 %v2315_v23  ;;  %v2327_v23 = vld [vmem:[%s3190_s15 + $0x28] sm:$0xff]  }
 0x236   : > { %2110 = vmatprep.subr.bf16.mxu0 %v2719_v3 }
 0x239   : > { %2111 = vmatpush3.bf16.msra.mxu0 %v2316_v30 }
 0x23a   : > { %2142 = vmatprep.subr.bf16.mxu0 %v2719_v3 }
 0x2db   : > { %v1017_v44 = vpop.f32.mrf.mxu1  ;;  %v1058_v45 = vpop.f32.mrf.mxu0 }
 0x2dc   : > { %v1059_v54 = vadd.f32 %v1058_v45, %v851_v46  ;;  %v1018_v57 = vadd.f32 %v1017_v44, %v843_v50 }
 0x2dd   : > { %v1019_v47 = vpop.f32.mrf.mxu1  ;;  %v2076_v48 = vpop.f32.mrf.mxu0 }
 0x2de   : > { %v1020_v49 = vadd.f32 %v1019_v47, %v847_v42  ;;  %v1122_v58 = vpack.c.bf16 %v1059_v54, %v1059_v54  ;;  %v1064_v59 = vpack.c.bf16 %v1018_v57, %v1018_v57 }
 0x2df   : > { %v1021_v51 = vpop.f32.mrf.mxu1  ;;  %v1061_v52 = vpop.f32.mrf.mxu0 }
 0x2e0   : > { %v1065_v53 = vpack.c.bf16 %v1020_v49, %v1020_v49  ;;  %v1127_v60 = vsel %vm761_vm1, %v1122_v58, 0 }
 0x2e1   : > { %v1022_v55 = vpop.f32.mrf.mxu1  ;;  %v2077_v56 = vpop.f32.mrf.mxu0 }
 0x2e2   : > { %2079 = vmatpush3.bf16.xpose.msra.mxu1 %v1065_v53  ;;  %v3294_v53 = vld [vmem:[%s627_s17] ss:$0 sm:$0xff] }
 0x2e3   : > { %2084 = vmatprep.subr.bf16.mxu1 %v2719_v3  ;;  %v3298_v55 = vld [vmem:[%s635_s1] ss:$0 sm:$0xff] }
 0x2e9   : > { %2081 = vmatmul.mubr.bf16.vlgmr.msra.gmra.mxu1 %v1064_v59 }
 0x2ea   : > { %2085 = vmatpush3.bf16.msra.mxu1 %v1127_v60  ;;  %2086 = vmatprep.mubr.msk.bf16.mxu1 %vm2720_vm2, %v2719_v3 }
 0x2eb   : > { %2090 = vmatprep.subr.bf16.mxu1 %v2719_v3 }
 0x3a9   : > { %v1100_v61 = vpop.f32.mrf.mxu1 }
 0x3aa   : > { %v1106_v63 = vmul.f32 0.25, %v1100_v61  ;;  %v2317_v61 = vld [vmem:[%s3183_s12 + $0x38] sm:$0xff]  }
 0x3ab   : > { %v2082_v0 = vpop.f32.mrf.mxu1 }
 0x3ac   : > { %v1108_v1 = vadd.f32 %v1107_v62, %v1106_v63  ;;  %v2318_v62 = vld [vmem:[%s3183_s12 + $0x30] sm:$0xff]   ;;  %v2320_v63 = vld [vmem:[%s3183_s12 + $0x20] sm:$0xff]   ;;  %v2321_v0 = vld [vmem:[%s3183_s12 + $0x18] sm:$0xff]  }
 0x3ad   : > { %v1103_v4 = vpop.f32.mrf.mxu1 }
 0x3ae   : > { %v1109_v6 = vsel %vm757_vm3, %v1108_v1, -inf  ;;  %v2323_v4 = vld [vmem:[%s3183_s12 + $0x8] sm:$0xff]  }
 0x3af   : > { %1110 = vmax.xlane.f32.xlu0 %v1109_v6  ;;  %v2083_v7 = vpop.f32.mrf.mxu1  ;;  %v2324_v6 = vld [vmem:[%s3183_s12] sm:$0xff]  }
 0x438   : > { %v1111_v8 = vpop.xlane.xlu0 %1110 }
 0x439   : > { %v1112_v9 = vsub.f32 %v1108_v1, %v1111_v8  ;;  %v2322_v1 = vld [vmem:[%s3183_s12 + $0x10] sm:$0xff]  }
 0x43b   : > { %v1113_v10 = vmul.f32 1.442695, %v1112_v9 }
 0x43d   : > { %2333 = vpow2.f32 %v1113_v10 }
 0x44a   : > { %v2334_v11 = vpop.eup %2333 }
 0x44b   : > { %v1115_v12 = vsel %vm757_vm3, %v2334_v11, 0.0 }
 0x44c   : > { %1116 = vadd.xlane.f32.xlu0 %v1115_v12  ;;  %v1980_v12 = vld [vmem:[%s652_s30] ss:$0 sm:$0xff] }
 0x4d5   : > { %v1117_v13 = vpop.xlane.xlu0 %1116 }
 0x4d6   : > { %2335 = vrcp.f32 %v1117_v13 }
 0x4e3   : > { %v2336_v14 = vpop.eup %2335 }
 0x4e4   : > { %v1119_v15 = vmul.f32 %v2336_v14, %v2334_v11 }
 0x4e6   : > { %1120 = vst.msk [vmem:[#allocation3] sm:$0xff] %vm757_vm3, %v1119_v15  ;;  %v1121_v16 = vpack.c.bf16 %v1119_v15, %v1119_v15 }
 0x4e8   : > { %2087 = vmatmul.mubr.msk.bf16.vlgmr.msra.gmra.mxu1 %vm757_vm3, %v1121_v16 }
 0x4e9   : > { %2092 = vmatprep.mubr.msk.bf16.mxu1 %vm2720_vm2, %v2719_v3 }
 0x5a8   : > { %v1163_v24 = vpop.f32.mrf.mxu1 }
 0x5a9   : > { %v1169_v25 = vpack.c.bf16 %v1163_v24, %v1163_v24  ;;  %v2328_v24 = vld [vmem:[%s3190_s15 + $0x20] sm:$0xff]  }
 0x5aa   : > { %v2088_v26 = vpop.f32.mrf.mxu1 }
 0x5ab   : > { %v1171_v27 = vsel %vm761_vm1, %v1169_v25, 0  ;;  %v2329_v25 = vld [vmem:[%s3190_s15 + $0x18] sm:$0xff]   ;;  %v2331_v26 = vld [vmem:[%s3190_s15 + $0x8] sm:$0xff]  }
 0x5ac   : > { %v1166_v28 = vpop.f32.mrf.mxu1  ;;  %2091 = vmatpush3.bf16.msra.mxu1 %v1171_v27  ;;  %v2332_v27 = vld [vmem:[%s3190_s15] sm:$0xff]  }
 0x5ad   : > { %2116 = vmatprep.subr.bf16.mxu1 %v2719_v3 }
 0x5ae   : > { %v2089_v29 = vpop.f32.mrf.mxu1 }
 0x5af   : > { %2093 = vmatmul.mubr.msk.bf16.vlgmr.msra.gmra.mxu1 %vm757_vm3, %v3209_v5 }
 0x5b0   : > { %2118 = vmatprep.mubr.msk.bf16.mxu1 %vm2720_vm2, %v2719_v3 }
 0x66f   : > { %v1207_v31 = vpop.f32.mrf.mxu1 }
 0x670   : > { %v1213_v32 = vpack.c.bf16 %v1207_v31, %v1207_v31 }
 0x671   : > { %v2094_v33 = vpop.f32.mrf.mxu1 }
 0x672   : > { %2113 = vmatmul.mubr.bf16.vlgmr.msra.gmra.mxu0 %v1213_v32  ;;  %v1990_v33 = vld [vmem:[%s669_s0] ss:$0 sm:$0xff] }
 0x673   : > { %v1210_v34 = vpop.f32.mrf.mxu1  ;;  %2144 = vmatprep.mubr.msk.bf16.mxu0 %vm2720_vm2, %v2719_v3 }
 0x675   : > { %v2095_v35 = vpop.f32.mrf.mxu1 }
 0x732   : > { %v1319_v37 = vpop.f32.mrf.mxu0 }
 0x733   : > { %v1320_v38 = vadd.f32 %v1968_v36, %v1319_v37 }
 0x734   : > { %v2114_v39 = vpop.f32.mrf.mxu0 }
 0x735   : > { %1327 = vadd.xlane.f32.xlu1 %v1320_v38  ;;  %v1330_v41 = vmul.f32 %v1320_v38, %v1320_v38 }
 0x736   : > { %v1322_v40 = vpop.f32.mrf.mxu0 }
 0x738   : > { %v2115_v42 = vpop.f32.mrf.mxu0 }
 0x739   : > { %1331 = vadd.xlane.f32.xlu1 %v1330_v41 }
 0x7be   : > { %v1328_v43 = vpop.xlane.xlu1 %1327 }
 0x7bf   : > { %v1329_v44 = vmul.f32 0.03125, %v1328_v43 }
 0x7c1   : > { %v1334_v46 = vmul.f32 %v1329_v44, %v1329_v44  ;;  %v1337_v51 = vsub.f32 %v1320_v38, %v1329_v44 }
 0x7c2   : > { %v1332_v45 = vpop.xlane.xlu1 %1331 }
 0x7c3   : > { %v1333_v47 = vmul.f32 0.03125, %v1332_v45 }
 0x7c5   : > { %v1335_v48 = vsub.f32 %v1333_v47, %v1334_v46 }
 0x7c7   : > { %v1336_v49 = vmax.f32 %v1335_v48, 0.0 }
 0x7c9   : > { %v1338_v50 = vadd.f32 1e-05, %v1336_v49 }
 0x7cb   : > { %2337 = vrsqrt.f32 %v1338_v50 }
 0x7d8   : > { %v2338_v52 = vpop.eup %2337 }
 0x7d9   : > { %v1340_v54 = vmul.f32 %v2338_v52, %v1337_v51 }
 0x7db   : > { %v1347_v56 = vmul.f32 %v3294_v53, %v1340_v54 }
 0x7dd   : > { %v1354_v57 = vadd.f32 %v3298_v55, %v1347_v56 }
 0x7df   : > { %v1355_v58 = vadd.f32 %v1354_v57, %v3202_v2  ;;  %v2319_v2 = vld [vmem:[%s3183_s12 + $0x28] sm:$0xff]  }
 0x7e1   : > { %v1356_v59 = vpack.c.bf16 %v1355_v58, %v1355_v58 }
 0x7e3   : > { %v1358_v60 = vsel %vm761_vm1, %v1356_v59, 0 }
 0x7e4   : > { %2117 = vmatpush3.bf16.msra.mxu1 %v1358_v60 }
 0x7e5   : > { %2122 = vmatprep.subr.bf16.mxu1 %v2719_v3 }
 0x7e7   : > { %2119 = vmatmul.mubr.msk.bf16.vlgmr.msra.gmra.mxu1 %vm757_vm3, %v3209_v5 }
 0x7e8   : > { %2123 = vmatpush3.bf16.msra.mxu1 %v2317_v61  ;;  %2138 = vmatprep.mubr.msk.bf16.mxu1 %vm2720_vm2, %v2719_v3 }
 0x7e9   : > { %2124 = vmatprep.subr.bf16.mxu1 %v2719_v3 }
 0x7ec   : > { %2125 = vmatpush3.bf16.msra.mxu1 %v2318_v62 }
 0x7ed   : > { %2126 = vmatprep.subr.bf16.mxu1 %v2719_v3 }
 0x7f0   : > { %2127 = vmatpush3.bf16.msra.mxu1 %v2319_v2 }
 0x7f1   : > { %2128 = vmatprep.subr.bf16.mxu1 %v2719_v3 }
 0x7f4   : > { %2129 = vmatpush3.bf16.msra.mxu1 %v2320_v63 }
 0x7f5   : > { %2130 = vmatprep.subr.bf16.mxu1 %v2719_v3 }
 0x7f8   : > { %2131 = vmatpush3.bf16.msra.mxu1 %v2321_v0 }
 0x7f9   : > { %2132 = vmatprep.subr.bf16.mxu1 %v2719_v3 }
 0x7fc   : > { %2133 = vmatpush3.bf16.msra.mxu1 %v2322_v1 }
 0x7fd   : > { %2134 = vmatprep.subr.bf16.mxu1 %v2719_v3 }
 0x800   : > { %2135 = vmatpush3.bf16.msra.mxu1 %v2323_v4 }
 0x801   : > { %2136 = vmatprep.subr.bf16.mxu1 %v2719_v3 }
 0x804   : > { %2137 = vmatpush3.bf16.msra.mxu1 %v2324_v6 }
 0x8a7   : > { %v1394_v7 = vpop.f32.mrf.mxu1 }
 0x8a8   : > { %v1400_v8 = vpack.c.bf16 %v1394_v7, %v1394_v7 }
 0x8a9   : > { %v2120_v9 = vpop.f32.mrf.mxu1 }
 0x8aa   : > { %2139 = vmatmul.mubr.bf16.vlgmr.msra.gmra.mxu1 %v1400_v8 }
 0x8ab   : > { %v1397_v10 = vpop.f32.mrf.mxu1 }
 0x8ad   : > { %v2121_v11 = vpop.f32.mrf.mxu1 }
 0x96a   : > { %v1506_v13 = vpop.f32.mrf.mxu1 }
 0x96b   : > { %v1507_v14 = vadd.f32 %v1980_v12, %v1506_v13 }
 0x96c   : > { %v2140_v15 = vpop.f32.mrf.mxu1 }
 0x96d   : > { %v1512_v16 = vmax.f32 %v1507_v14, 0.0 }
 0x96e   : > { %v1509_v17 = vpop.f32.mrf.mxu1 }
 0x96f   : > { %v1513_v18 = vpack.c.bf16 %v1512_v16, %v1512_v16 }
 0x970   : > { %v2141_v19 = vpop.f32.mrf.mxu1 }
 0x971   : > { %v1515_v20 = vsel %vm761_vm1, %v1513_v18, 0 }
 0x972   : > { %2143 = vmatpush3.bf16.msra.mxu0 %v1515_v20 }
 0x973   : > { %2148 = vmatprep.subr.bf16.mxu0 %v2719_v3 }
 0x975   : > { %2145 = vmatmul.mubr.msk.bf16.vlgmr.msra.gmra.mxu0 %vm757_vm3, %v3209_v5  ;;  %v2330_v5 = vld [vmem:[%s3190_s15 + $0x10] sm:$0xff]  }
 0x976   : > { %2149 = vmatpush3.bf16.msra.mxu0 %v2325_v21  ;;  %2164 = vmatprep.mubr.msk.bf16.mxu0 %vm2720_vm2, %v2719_v3 }
 0x977   : > { %2150 = vmatprep.subr.bf16.mxu0 %v2719_v3 }
 0x97a   : > { %2151 = vmatpush3.bf16.msra.mxu0 %v2326_v22 }
 0x97b   : > { %2152 = vmatprep.subr.bf16.mxu0 %v2719_v3 }
 0x97e   : > { %2153 = vmatpush3.bf16.msra.mxu0 %v2327_v23 }
 0x97f   : > { %2154 = vmatprep.subr.bf16.mxu0 %v2719_v3 }
 0x982   : > { %2155 = vmatpush3.bf16.msra.mxu0 %v2328_v24 }
 0x983   : > { %2156 = vmatprep.subr.bf16.mxu0 %v2719_v3 }
 0x986   : > { %2157 = vmatpush3.bf16.msra.mxu0 %v2329_v25 }
 0x987   : > { %2158 = vmatprep.subr.bf16.mxu0 %v2719_v3 }
 0x98a   : > { %2159 = vmatpush3.bf16.msra.mxu0 %v2330_v5 }
 0x98b   : > { %2160 = vmatprep.subr.bf16.mxu0 %v2719_v3 }
 0x98e   : > { %2161 = vmatpush3.bf16.msra.mxu0 %v2331_v26 }
 0x98f   : > { %2162 = vmatprep.subr.bf16.mxu0 %v2719_v3 }
 0x992   : > { %2163 = vmatpush3.bf16.msra.mxu0 %v2332_v27 }
 0xa35   : > { %v1551_v28 = vpop.f32.mrf.mxu0 }
 0xa36   : > { %v1557_v29 = vpack.c.bf16 %v1551_v28, %v1551_v28 }
 0xa37   : > { %v2146_v30 = vpop.f32.mrf.mxu0 }
 0xa38   : > { %2165 = vmatmul.mubr.bf16.vlgmr.msra.gmra.mxu0 %v1557_v29 }
 0xa39   : > { %v1554_v31 = vpop.f32.mrf.mxu0 }
 0xa3b   : > { %v2147_v32 = vpop.f32.mrf.mxu0 }
 0xaf8   : > { %v1663_v34 = vpop.f32.mrf.mxu0 }
 0xaf9   : > { %v1664_v35 = vadd.f32 %v1990_v33, %v1663_v34 }
 0xafa   : > { %v2166_v36 = vpop.f32.mrf.mxu0 }
 0xafb   : > { %1669 = vadd.xlane.f32.xlu0 %v1664_v35  ;;  %v1672_v37 = vmul.f32 %v1664_v35, %v1664_v35 }
 0xafc   : > { %v1666_v38 = vpop.f32.mrf.mxu0 }
 0xafd   : > { %1673 = vadd.xlane.f32.xlu1 %v1672_v37 }
 0xafe   : > { %v2167_v39 = vpop.f32.mrf.mxu0 }
 0xb84   : > { %v1670_v40 = vpop.xlane.xlu0 %1669 }
 0xb85   : > { %v1671_v3 = vmul.f32 0.03125, %v1670_v40 }
 0xb86   : > { %v1674_v41 = vpop.xlane.xlu1 %1673 }
 0xb87   : > { %v1676_v42 = vmul.f32 %v1671_v3, %v1671_v3  ;;  %v1675_v43 = vmul.f32 0.03125, %v1674_v41  ;;  %v1679_v47 = vsub.f32 %v1664_v35, %v1671_v3 }
 0xb89   : > { %v1677_v44 = vsub.f32 %v1675_v43, %v1676_v42 }
 0xb8b   : > { %v1678_v45 = vmax.f32 %v1677_v44, 0.0 }
 0xb8d   : > { %v1680_v46 = vadd.f32 1e-05, %v1678_v45 }
 0xb8f   : > { %2339 = vrsqrt.f32 %v1680_v46 }
 0xb9c   : > { %v2340_v48 = vpop.eup %2339 }
 0xb9d   : > { %v1682_v49 = vmul.f32 %v2340_v48, %v1679_v47 }
 0xb9f   : > { %v1683_v50 = vmul.f32 %v3294_v53, %v1682_v49 }
 0xba1   : > { %v1684_v51 = vadd.f32 %v3298_v55, %v1683_v50 }
 0xba3   : > { %1685 = vst [vmem:[#allocation2] sm:$0xff] %v1684_v51  ;;  %1686 = vst [vmem:[%s3426_s28] sm:$0xff] %v1684_v51 }
 0xba4 PF: > { %s3427_s24 = sld [smem:[#allocation28_spill]]  ;;  %s3430_s21 = smov %s2693_s22 }
 0xba5   : > { %s3428_s18 = sld [smem:[#allocation27_spill]] }
 0xba6   : > { %s3429_s23 = sld [smem:[#allocation29_spill]] }
 0xbaa   : > { %p35_p0 = scmp.ge.s32.totalorder %s3427_s24, 4  }
 0xbab   : > { %s3431_s22 = smov %s3428_s18 }
 0xbac   :  { %37 = sbr.rel (!%p35_p0) target bundleno = 20 (0x14), region = 220 }
 0xbb1   :  { %1698 = vsyncpa [#allocation5], 1 }
 0xbb2   :  { %1700 = vsyncpa [#allocation5 + $0x1], 1 }
 0xbb3   :  { %1701 = vsyncpa [#allocation7], 1 }
 0xbb4   :  { %1703 = vsyncpa [#allocation7 + $0x1], 1 }
 0xbb5   :  { %1704 = vsyncpa [#allocation10], 1 }
 0xbb6   :  { %1706 = vsyncpa [#allocation10 + $0x1], 1 }
 0xbb7   :  { %1707 = vsyncpa [#allocation13], 1 }
 0xbb8   :  { %1709 = vsyncpa [#allocation13 + $0x1], 1 }
 0xbb9   :  { %1710 = vsyncpa [#allocation16], 1 }
 0xbba   :  { %1712 = vsyncpa [#allocation16 + $0x1], 1 }
 0xbbb   :  { %1713 = vsyncpa [#allocation19], 1 }
 0xbbc   :  { %1715 = vsyncpa [#allocation19 + $0x1], 1 }

// kernel: cla_model_forward.4
= control target key start
LH: loop header
LB: loop body
LE: loop exit
PB: predicated region body
PF: predicated region fallthrough
CT: control target
= control target key end

     0   :  { %s4905_s0 = inlined_call_operand.hbm [shape: f32[8,128], index: 0, kind: input, shape index: {}]   ;;  %s4906_s1 = inlined_call_operand.hbm [shape: bf16[2,128,1536], index: 1, kind: input, shape index: {}]   ;;  %s4907_s2 = inlined_call_operand.vmem [shape: f32[2,1,1536], index: 2, kind: input, shape index: {}]   ;;  %s4908_s3 = inlined_call_operand.vmem [shape: bf16[2,512,128], index: 3, kind: input, shape index: {}]   ;;  %s4909_s4 = inlined_call_operand.hbm [shape: f32[2,1,128], index: 4, kind: input, shape index: {}]   ;;  %s4910_s5 = inlined_call_operand.hbm [shape: f32[2,1,128], index: 5, kind: input, shape index: {}]   ;;  %s4911_s6 = inlined_call_operand.hbm [shape: f32[2,1,128], index: 6, kind: input, shape index: {}]   ;;  %s4912_s7 = inlined_call_operand.vmem [shape: bf16[2,128,128], index: 7, kind: input, shape index: {}]   ;;  %s4913_s8 = inlined_call_operand.hbm [shape: f32[2,1,128], index: 8, kind: input, shape index: {}]   ;;  %s4914_s9 = inlined_call_operand.hbm [shape: bf16[2,128,128], index: 9, kind: input, shape index: {}]   ;;  %s4915_s10 = inlined_call_operand.hbm [shape: f32[2,1,128], index: 10, kind: input, shape index: {}]   ;;  %s4916_s11 = inlined_call_operand.hbm [shape: f32[2,1,128], index: 11, kind: input, shape index: {}]   ;;  %s4917_s12 = inlined_call_operand.hbm [shape: f32[2,1,128], index: 12, kind: input, shape index: {}]   ;;  %s4918_s13 = inlined_call_operand.vmem [shape: f32[8,128], index: 13, kind: output, shape index: {}]  }
   0x1   :  { %4926 = sst [smem:[#allocation28_spill]] %s4905_s0 }
   0x2   :  { %4927 = sst [smem:[#allocation29_spill]] %s4906_s1 }
   0x3   :  { %4928 = sst [smem:[#allocation30_spill]] %s4907_s2 }
   0x4   :  { %4929 = sst [smem:[#allocation31_spill]] %s4910_s5 }
   0x5   :  { %4930 = sst [smem:[#allocation32_spill]] %s4912_s7 }
   0x6   :  { %4931 = sst [smem:[#allocation33_spill]] %s4913_s8 }
   0x7   :  { %4932 = sst [smem:[#allocation34_spill]] %s4915_s10 }
   0x8   :  { %4933 = sst [smem:[#allocation35_spill]] %s4918_s13 }
   0x9   :  { %18 = vsyncpa [#allocation4], 0 }
   0xa   :  { %19 = vsyncpa [#allocation6], 0 }
   0xb   :  { %21 = vsyncpa [#allocation6 + $0x1], 0 }
   0xc   :  { %22 = vsyncpa [#allocation9], 0 }
   0xd   :  { %24 = vsyncpa [#allocation9 + $0x1], 0 }
   0xe   :  { %25 = vsyncpa [#allocation12], 0 }
   0xf   :  { %27 = vsyncpa [#allocation12 + $0x1], 0 }
  0x10   :  { %28 = vsyncpa [#allocation15], 0 }
  0x11   :  { %30 = vsyncpa [#allocation15 + $0x1], 0 }
  0x12   :  { %31 = vsyncpa [#allocation18], 0 }
  0x13   :  { %33 = vsyncpa [#allocation18 + $0x1], 0  ;;  %s4200_s25 = smov 0   ;;  %s4202_s26 = smov 0  }
  0x14   :  { %s4204_s27 = smov 0   ;;  %s4206_s28 = smov 0  }
  0x15 LB: > { %4934 = sst [smem:[#allocation25_spill]] %s4107_s27  ;;  %s4221_s29 = sadd.s32 1, %s4111_s28   ;;  %s4111_s28 = sphi %s4206_s28, %s4966_s28   ;;  %s4107_s27 = sphi %s4204_s27, %s4968_s27   ;;  %s4103_s26 = sphi %s4202_s26, %s4970_s26   ;;  %s4099_s25 = sphi %s4200_s25, %s4969_s25  }
  0x16   : > { %4935 = sst [smem:[#allocation26_spill]] %s4221_s29  ;;  %s67_s30 = sadd.s32 1, %s4107_s27 }
  0x17   : > { %s64_s14 = ssub.s32 %s4111_s28, %s4221_s29  ;;  %p74_p0 = scmp.ne.s32.totalorder %s4107_s27, %s4103_s26 }
  0x18   : > { %p65_p1 = scmp.eq.s32.totalorder %s64_s14, 0  ;;  %p75_p2 = scmp.eq.s32.totalorder %s4111_s28, 0 }
  0x19   : > { %p3524_p3 = scmp.lt.s32.totalorder %s4111_s28, 2  ;;  %s4234_s16 = sand.u32 1, %s4111_s28  }
  0x1a   : > { %s4231_s15 = scalar_select %p65_p1, %s4107_s27, %s67_s30  }
  0x1b   : > { %p76_p4 = por %p75_p2, %p74_p0  ;;  %s4237_s17 = sand.u32 1, %s4107_s27  }
  0x1c   : > { %4936 = sst [smem:[#allocation27_spill]] %s4231_s15  ;;  %s3465_s18 = smul.u32 768, %s4237_s17 }
  0x1d   : > { %p4240_p5 = pnand %p3524_p3, %p76_p4  ;;  %s3466_s20 = smul.u32 12288, %s4111_s28 }
  0x1e   : > { %s4938_s1 = sld [smem:[#allocation29_spill]]  ;;  %s426_s24 = scalar_lea.vmem [#allocation5], %s3465_s18 }
  0x1f   : > { %s433_s30 = sshll.u32 %s426_s24, 4  ;;  %p4257_p7 = pneg %p4240_p5  ;;  %s4250_s30 = int_to_ptr.vmem [resolvable:$true] %s433_s30 }
  0x24   : > { %s4248_s23 = scalar_lea.hbm %s4938_s1, %s3466_s20  ;;  %s3784_s22 = scalar_lea.hbm %s4938_s1, 24576 }
  0x25   : > { %s3779_s15 = scalar_lea.hbm %s4248_s23, 12288  ;;  %p3785_p10 = scmp.lt.s32.totalorder %s4248_s23, %s4938_s1 }
  0x26   : > { %p3780_p6 = scmp.ne.s32.totalorder %s4248_s23, %s3779_s15  ;;  %p3786_p11 = scmp.lt.s32.totalorder %s3784_s22, %s3779_s15 }
  0x28   : > { %p3782_p8 = pnand %p4257_p7, %p3780_p6  ;;  %p3787_p12 = por %p3786_p11, %p3785_p10 }
  0x2a   : > { %p3783_p9 = pneg %p3782_p8 }
  0x2c   : > { %p3788_p13 = pnand %p3787_p12, %p3783_p9 }
  0x2e   : > { %3791 = shalt.err (!%p3788_p13)
}
  0x2f   : > { %s3792_s14 = scalar_lea.vmem %s4250_s30, 12288  ;;  %s4113_s29 = smov [#allocation5]  }
  0x30   : > { %p3793_p0 = scmp.ne.s32.totalorder %s4250_s30, %s3792_s14  ;;  %s3797_s20 = sshll.u32 %s4113_s29, 4  ;;  %s3798_s20 = int_to_ptr.vmem [resolvable:$false] %s3797_s20 }
  0x31   : > { %s3799_s21 = scalar_lea.vmem %s3798_s20, 24576  ;;  %p3800_p3 = scmp.lt.s32.totalorder %s4250_s30, %s3798_s20 }
  0x32   : > { %p3795_p1 = pnand %p3793_p0, %p4257_p7  ;;  %p3801_p4 = scmp.lt.s32.totalorder %s3799_s21, %s3792_s14 }
  0x34   : > { %p3796_p2 = pneg %p3795_p1  ;;  %p3802_p6 = por %p3801_p4, %p3800_p3 }
  0x36   : > { %p3803_p8 = pnand %p3802_p6, %p3796_p2 }
  0x38   : > { %3806 = shalt.err (!%p3803_p8)
}
  0x39   : > { %s4114_s15 = smov 768   ;;  %s4115_s22 = smov 48  }
  0x3a   : > { %s4940_s18 = scalar_lea.sflag [#allocation6], %s4234_s16  ;;  %s4282_s29 = sshll.u32 %s4111_s28, 4 }
  0x3b   : > { %3498 = dma.hbm_to_vmem [thread:$0]  (!%p4240_p5), %s4248_s23, 12288, %s4250_s30, %s4940_s18, %s4114_s15, %s4114_s15, %s4115_s22  }
  0x3c   : > { %s4941_s5 = sld [smem:[#allocation31_spill]]  ;;  %s478_s21 = scalar_lea.vmem [#allocation8], %s4237_s17 }
  0x3d   : > { %s485_s1 = sshll.u32 %s478_s21, 4  ;;  %s486_s1 = int_to_ptr.vmem [resolvable:$true] %s485_s1 }
  0x42   : > { %s4288_s20 = scalar_lea.hbm %s4941_s5, %s4282_s29  ;;  %s3812_s15 = scalar_lea.hbm %s4941_s5, 32 }
  0x43   : > { %s3807_s7 = scalar_lea.hbm %s4288_s20, 16  ;;  %p3813_p12 = scmp.lt.s32.totalorder %s4288_s20, %s4941_s5 }
  0x44   : > { %p3808_p9 = scmp.ne.s32.totalorder %s4288_s20, %s3807_s7  ;;  %p3814_p13 = scmp.lt.s32.totalorder %s3812_s15, %s3807_s7 }
  0x46   : > { %p3810_p10 = pnand %p3808_p9, %p4257_p7  ;;  %p3815_p0 = por %p3814_p13, %p3813_p12 }
  0x48   : > { %p3811_p11 = pneg %p3810_p10 }
  0x4a   : > { %p3816_p1 = pnand %p3815_p0, %p3811_p11 }
  0x4c   : > { %3819 = shalt.err (!%p3816_p1)
}
  0x4d   : > { %s3820_s14 = scalar_lea.vmem %s486_s1, 16  ;;  %s4116_s24 = smov [#allocation8]  }
  0x4e   : > { %p3821_p2 = scmp.ne.s32.totalorder %s486_s1, %s3820_s14  ;;  %s3825_s21 = sshll.u32 %s4116_s24, 4  ;;  %s3826_s21 = int_to_ptr.vmem [resolvable:$false] %s3825_s21 }
  0x4f   : > { %s3827_s13 = scalar_lea.vmem %s3826_s21, 32  ;;  %p3828_p6 = scmp.lt.s32.totalorder %s486_s1, %s3826_s21 }
  0x50   : > { %p3823_p3 = pnand %p3821_p2, %p4257_p7  ;;  %p3829_p8 = scmp.lt.s32.totalorder %s3827_s13, %s3820_s14 }
  0x52   : > { %p3824_p4 = pneg %p3823_p3  ;;  %p3830_p9 = por %p3829_p8, %p3828_p6 }
  0x54   : > { %p3831_p10 = pnand %p3830_p9, %p3824_p4 }
  0x56   : > { %3834 = shalt.err (!%p3831_p10)
}
  0x57   : > { %s4942_s7 = scalar_lea.sflag [#allocation9], %s4234_s16  ;;  %s4943_s8 = sld [smem:[#allocation33_spill]] }
  0x58   : > { %3504 = dma.hbm_to_vmem [thread:$0]  (!%p4240_p5), %s4288_s20, 16, %s486_s1, %s4942_s7  }
  0x59   : > { %s520_s13 = scalar_lea.vmem [#allocation11], %s4237_s17 }
  0x5a   : > { %s527_s22 = sshll.u32 %s520_s13, 4  ;;  %s528_s22 = int_to_ptr.vmem [resolvable:$true] %s527_s22 }
  0x5d   : > { %s4314_s15 = scalar_lea.hbm %s4943_s8, %s4282_s29  ;;  %s3840_s1 = scalar_lea.hbm %s4943_s8, 32 }
  0x5e   : > { %s3835_s14 = scalar_lea.hbm %s4314_s15, 16  ;;  %p3841_p0 = scmp.lt.s32.totalorder %s4314_s15, %s4943_s8 }
  0x5f   : > { %p3836_p11 = scmp.ne.s32.totalorder %s4314_s15, %s3835_s14  ;;  %p3842_p1 = scmp.lt.s32.totalorder %s3840_s1, %s3835_s14 }
  0x61   : > { %p3838_p12 = pnand %p3836_p11, %p4257_p7  ;;  %p3843_p2 = por %p3842_p1, %p3841_p0 }
  0x63   : > { %p3839_p13 = pneg %p3838_p12 }
  0x65   : > { %p3844_p3 = pnand %p3843_p2, %p3839_p13 }
  0x67   : > { %3847 = shalt.err (!%p3844_p3)
}
  0x68   : > { %s3848_s23 = scalar_lea.vmem %s528_s22, 16  ;;  %s4117_s30 = smov [#allocation11]  }
  0x69   : > { %p3849_p4 = scmp.ne.s32.totalorder %s528_s22, %s3848_s23  ;;  %s3853_s13 = sshll.u32 %s4117_s30, 4  ;;  %s3854_s13 = int_to_ptr.vmem [resolvable:$false] %s3853_s13 }
  0x6a   : > { %s3855_s18 = scalar_lea.vmem %s3854_s13, 32  ;;  %p3856_p9 = scmp.lt.s32.totalorder %s528_s22, %s3854_s13 }
  0x6b   : > { %p3851_p6 = pnand %p3849_p4, %p4257_p7  ;;  %p3857_p10 = scmp.lt.s32.totalorder %s3855_s18, %s3848_s23 }
  0x6d   : > { %p3852_p8 = pneg %p3851_p6  ;;  %p3858_p11 = por %p3857_p10, %p3856_p9 }
  0x6f   : > { %p3859_p12 = pnand %p3858_p11, %p3852_p8 }
  0x71   : > { %3862 = shalt.err (!%p3859_p12)
}
  0x72   : > { %s4944_s14 = scalar_lea.sflag [#allocation12], %s4234_s16  ;;  %s4945_s10 = sld [smem:[#allocation34_spill]] }
  0x73   : > { %3510 = dma.hbm_to_vmem [thread:$0]  (!%p4240_p5), %s4314_s15, 16, %s528_s22, %s4944_s14  }
  0x74   : > { %s558_s18 = scalar_lea.vmem [#allocation14], %s4237_s17 }
  0x75   : > { %s565_s20 = sshll.u32 %s558_s18, 4  ;;  %s566_s20 = int_to_ptr.vmem [resolvable:$true] %s565_s20 }
  0x78   : > { %s4340_s1 = scalar_lea.hbm %s4945_s10, %s4282_s29  ;;  %s3868_s15 = scalar_lea.hbm %s4945_s10, 32 }
  0x79   : > { %s3863_s23 = scalar_lea.hbm %s4340_s1, 16  ;;  %p3869_p2 = scmp.lt.s32.totalorder %s4340_s1, %s4945_s10 }
  0x7a   : > { %p3864_p13 = scmp.ne.s32.totalorder %s4340_s1, %s3863_s23  ;;  %p3870_p3 = scmp.lt.s32.totalorder %s3868_s15, %s3863_s23 }
  0x7c   : > { %p3866_p0 = pnand %p3864_p13, %p4257_p7  ;;  %p3871_p4 = por %p3870_p3, %p3869_p2 }
  0x7e   : > { %p3867_p1 = pneg %p3866_p0 }
  0x80   : > { %p3872_p6 = pnand %p3871_p4, %p3867_p1 }
  0x82   : > { %3875 = shalt.err (!%p3872_p6)
}
  0x83   : > { %s3876_s24 = scalar_lea.vmem %s566_s20, 16  ;;  %s4118_s21 = smov [#allocation14]  }
  0x84   : > { %p3877_p8 = scmp.ne.s32.totalorder %s566_s20, %s3876_s24  ;;  %s3881_s18 = sshll.u32 %s4118_s21, 4  ;;  %s3882_s18 = int_to_ptr.vmem [resolvable:$false] %s3881_s18 }
  0x85   : > { %s3883_s7 = scalar_lea.vmem %s3882_s18, 32  ;;  %p3884_p11 = scmp.lt.s32.totalorder %s566_s20, %s3882_s18 }
  0x86   : > { %p3879_p9 = pnand %p3877_p8, %p4257_p7  ;;  %p3885_p12 = scmp.lt.s32.totalorder %s3883_s7, %s3876_s24 }
  0x88   : > { %p3880_p10 = pneg %p3879_p9  ;;  %p3886_p13 = por %p3885_p12, %p3884_p11 }
  0x8a   : > { %p3887_p0 = pnand %p3886_p13, %p3880_p10 }
  0x8c   : > { %3890 = shalt.err (!%p3887_p0)
}
  0x8d   : > { %s4946_s23 = scalar_lea.sflag [#allocation15], %s4234_s16  ;;  %s4363_s30 = sadd.s32 4294967295, %s4111_s28  }
  0x8e   : > { %3516 = dma.hbm_to_vmem [thread:$0]  (!%p4240_p5), %s4340_s1, 16, %s566_s20, %s4946_s23  }
  0x8f   : > { %p80_p1 = scmp.ne.s32.totalorder %s4103_s26, %s4099_s25  ;;  %p4922_p2 = scmp.eq.s32.totalorder %s4363_s30, 0 }
  0x90   : > { %p3045_p3 = scmp.ge.s32.totalorder %s4111_s28, 1  ;;  %p398_p4 = scmp.lt.s32.totalorder %s4111_s28, 3 }
  0x91   : > { %p4373_p8 = por %p4922_p2, %p80_p1  ;;  %s4119_s1 = smov [#allocation3]  }
  0x92   : > { %p4377_p9 = pnand %p3045_p3, %p398_p4  ;;  %s411_s20 = sshll.u32 %s4119_s1, 4  ;;  %s4381_s20 = int_to_ptr.vmem [resolvable:$true] %s411_s20 }
  0x93   : > { %s4947_s7 = scalar_select %p4373_p8, 1, 0 }
  0x94   : > { %s4948_s13 = scalar_select %p4377_p9, 1, 0 }
  0x95   : > { %p3491_p10 = pneg %p4377_p9  ;;  %s4389_s22 = scalar_lea.hbm %s4909_s4, %s4282_s29 }
  0x96   : > { %s461_s14 = scalar_lea.vmem [#allocation7], %s4237_s17  ;;  %s3891_s18 = scalar_lea.hbm %s4389_s22, 16 }
  0x97   : > { %s468_s24 = sshll.u32 %s461_s14, 4  ;;  %p4394_p11 = pnand %p3491_p10, %p4922_p2  ;;  %s469_s24 = int_to_ptr.vmem [resolvable:$true] %s468_s24 }
  0x98   : > { %p3892_p12 = scmp.ne.s32.totalorder %s4389_s22, %s3891_s18  ;;  %s3896_s25 = scalar_lea.hbm %s4909_s4, 32 }
  0x99   : > { %s4949_s21 = scalar_select %p4394_p11, 1, 0 }
  0x9a   : > { %p3894_p13 = pnand %p3892_p12, %p4257_p7  ;;  %p3897_p1 = scmp.lt.s32.totalorder %s4389_s22, %s4909_s4 }
  0x9b   : > { %p3898_p3 = scmp.lt.s32.totalorder %s3896_s25, %s3891_s18 }
  0x9c   : > { %p3895_p0 = pneg %p3894_p13 }
  0x9d   : > { %p3899_p4 = por %p3898_p3, %p3897_p1 }
  0x9f   : > { %p3900_p10 = pnand %p3899_p4, %p3895_p0 }
  0xa1   : > { %3903 = shalt.err (!%p3900_p10)
}
  0xa2   : > { %s3904_s14 = scalar_lea.vmem %s469_s24, 16  ;;  %s4120_s8 = smov [#allocation7]  }
  0xa3   : > { %p3905_p6 = scmp.ne.s32.totalorder %s469_s24, %s3904_s14  ;;  %s3909_s10 = sshll.u32 %s4120_s8, 4  ;;  %s3910_s10 = int_to_ptr.vmem [resolvable:$false] %s3909_s10 }
  0xa4   : > { %s3911_s2 = scalar_lea.vmem %s3910_s10, 32  ;;  %p3912_p12 = scmp.lt.s32.totalorder %s469_s24, %s3910_s10 }
  0xa5   : > { %p3907_p2 = pnand %p3905_p6, %p4257_p7  ;;  %p3913_p13 = scmp.lt.s32.totalorder %s3911_s2, %s3904_s14 }
  0xa7   : > { %p3908_p8 = pneg %p3907_p2  ;;  %p3914_p9 = por %p3913_p13, %p3912_p12 }
  0xa9   : > { %p3915_p11 = pnand %p3914_p9, %p3908_p8 }
  0xab   : > { %3918 = shalt.err (!%p3915_p11)
}
  0xac   : > { %s4950_s5 = scalar_lea.sflag [#allocation6], %s4234_s16  ;;  %s4420_s23 = scalar_lea.hbm %s4911_s6, %s4282_s29 }
  0xad   : > { %3501 = dma.hbm_to_vmem [thread:$0]  (!%p4240_p5), %s4389_s22, 16, %s469_s24, %s4950_s5  }
  0xae   : > { %p4951_p2 = scmp.ne.s32.totalorder %s4949_s21, 0  ;;  %s3930_s2 = scalar_lea.vmem %s4381_s20, 128 }
  0xaf   : > { %p3931_p8 = scmp.ne.s32.totalorder %s4381_s20, %s3930_s2  ;;  %p3938_p0 = scmp.lt.s32.totalorder %s4381_s20, %s4381_s20 }
  0xb0   : > { %p3921_p6 = pneg %p4951_p2  ;;  %p3939_p1 = scmp.lt.s32.totalorder %s3930_s2, %s3930_s2 }
  0xb2   : > { %p3933_p9 = pnand %p3931_p8, %p3921_p6  ;;  %p3940_p3 = por %p3939_p1, %p3938_p0 }
  0xb4   : > { %p3934_p11 = pneg %p3933_p9 }
  0xb6   : > { %p3941_p4 = pnand %p3940_p3, %p3934_p11 }
  0xb8   : > { %3944 = shalt.err (!%p3941_p4)
}
  0xb9   : > { %s4952_s0 = sld [smem:[#allocation28_spill]]  ;;  %s495_s24 = scalar_lea.vmem [#allocation10], %s4237_s17 }
  0xba   : > { %s502_s1 = sshll.u32 %s495_s24, 4  ;;  %s3053_s25 = sshll.u32 %s4237_s17, 6  ;;  %s503_s1 = int_to_ptr.vmem [resolvable:$true] %s502_s1 }
  0xbb   : > { %s3945_s15 = scalar_lea.hbm %s4420_s23, 16  ;;  %s3950_s5 = scalar_lea.hbm %s4911_s6, 32 }
  0xbc   : > { %p3946_p10 = scmp.ne.s32.totalorder %s4420_s23, %s3945_s15  ;;  %p3951_p6 = scmp.lt.s32.totalorder %s4420_s23, %s4911_s6 }
  0xbd   : > { %p3952_p8 = scmp.lt.s32.totalorder %s3950_s5, %s3945_s15 }
  0xbe   : > { %p3948_p12 = pnand %p3946_p10, %p4257_p7 }
  0xbf   : > { %3494 = dma.hbm_to_vmem [thread:$0]  (!%p4951_p2), %s4952_s0, 128, %s4381_s20, [#allocation4]  }
  0xc0   : > { %p3949_p13 = pneg %p3948_p12  ;;  %p3953_p9 = por %p3952_p8, %p3951_p6 }
  0xc2   : > { %p3954_p2 = pnand %p3953_p9, %p3949_p13 }
  0xc4   : > { %3957 = shalt.err (!%p3954_p2)
}
  0xc5   : > { %s3958_s20 = scalar_lea.vmem %s503_s1, 16  ;;  %s4121_s2 = smov [#allocation10]  }
  0xc6   : > { %p3959_p11 = scmp.ne.s32.totalorder %s503_s1, %s3958_s20  ;;  %s3963_s10 = sshll.u32 %s4121_s2, 4  ;;  %s3964_s10 = int_to_ptr.vmem [resolvable:$false] %s3963_s10 }
  0xc7   : > { %s3965_s22 = scalar_lea.vmem %s3964_s10, 32  ;;  %p3966_p3 = scmp.lt.s32.totalorder %s503_s1, %s3964_s10 }
  0xc8   : > { %p3961_p0 = pnand %p3959_p11, %p4257_p7  ;;  %p3967_p4 = scmp.lt.s32.totalorder %s3965_s22, %s3958_s20 }
  0xca   : > { %p3962_p1 = pneg %p3961_p0  ;;  %p3968_p10 = por %p3967_p4, %p3966_p3 }
  0xcc   : > { %p3969_p12 = pnand %p3968_p10, %p3962_p1 }
  0xce   : > { %3972 = shalt.err (!%p3969_p12)
}
  0xcf   : > { %s4953_s24 = scalar_lea.sflag [#allocation9], %s4234_s16  ;;  %s3224_s15 = sshll.u32 %s4111_s28, 10 }
  0xd0   : > { %3507 = dma.hbm_to_vmem [thread:$0]  (!%p4240_p5), %s4420_s23, 16, %s503_s1, %s4953_s24  }
  0xd1   : > { %s538_s21 = scalar_lea.vmem [#allocation13], %s3053_s25  ;;  %s4458_s8 = scalar_lea.hbm %s4914_s9, %s3224_s15 }
  0xd2   : > { %s545_s14 = sshll.u32 %s538_s21, 4  ;;  %s3973_s20 = scalar_lea.hbm %s4458_s8, 1024  ;;  %s4460_s14 = int_to_ptr.vmem [resolvable:$true] %s545_s14 }
  0xd3   : > { %p3974_p13 = scmp.ne.s32.totalorder %s4458_s8, %s3973_s20  ;;  %s3978_s28 = scalar_lea.hbm %s4914_s9, 2048 }
  0xd4   : > { %p3979_p9 = scmp.lt.s32.totalorder %s4458_s8, %s4914_s9  ;;  %p3980_p2 = scmp.lt.s32.totalorder %s3978_s28, %s3973_s20 }
  0xd5   : > { %p3976_p6 = pnand %p3974_p13, %p4257_p7 }
  0xd6   : > { %p3981_p11 = por %p3980_p2, %p3979_p9 }
  0xd7   : > { %p3977_p8 = pneg %p3976_p6 }
  0xd9   : > { %p3982_p0 = pnand %p3981_p11, %p3977_p8 }
  0xdb   : > { %3985 = shalt.err (!%p3982_p0)
}
  0xdc   : > { %s3986_s10 = scalar_lea.vmem %s4460_s14, 1024  ;;  %s4122_s22 = smov [#allocation13]  }
  0xdd   : > { %p3987_p1 = scmp.ne.s32.totalorder %s4460_s14, %s3986_s10  ;;  %s3991_s24 = sshll.u32 %s4122_s22, 4  ;;  %s3992_s24 = int_to_ptr.vmem [resolvable:$false] %s3991_s24 }
  0xde   : > { %s3993_s15 = scalar_lea.vmem %s3992_s24, 2048  ;;  %p3994_p10 = scmp.lt.s32.totalorder %s4460_s14, %s3992_s24 }
  0xdf   : > { %p3989_p3 = pnand %p3987_p1, %p4257_p7  ;;  %p3995_p12 = scmp.lt.s32.totalorder %s3993_s15, %s3986_s10 }
  0xe1   : > { %p3990_p4 = pneg %p3989_p3  ;;  %p3996_p13 = por %p3995_p12, %p3994_p10 }
  0xe3   : > { %p3997_p6 = pnand %p3996_p13, %p3990_p4 }
  0xe5   : > { %4000 = shalt.err (!%p3997_p6)
}
  0xe6   : > { %s4123_s21 = smov 64   ;;  %s4124_s5 = smov 4  }
  0xe7   : > { %s4954_s18 = scalar_lea.sflag [#allocation12], %s4234_s16  ;;  %s580_s23 = scalar_lea.hbm %s4916_s11, %s4282_s29 }
  0xe8   : > { %3513 = dma.hbm_to_vmem [thread:$0]  (!%p4240_p5), %s4458_s8, 1024, %s4460_s14, %s4954_s18, %s4123_s21, %s4123_s21, %s4124_s5  }
  0xe9   : > { %s575_s28 = scalar_lea.vmem [#allocation16], %s4237_s17  ;;  %s4001_s25 = scalar_lea.hbm %s580_s23, 16 }
  0xea   : > { %s582_s1 = sshll.u32 %s575_s28, 4  ;;  %p4002_p8 = scmp.ne.s32.totalorder %s580_s23, %s4001_s25  ;;  %s583_s1 = int_to_ptr.vmem [resolvable:$true] %s582_s1 }
  0xeb   : > { %s4006_s24 = scalar_lea.hbm %s4916_s11, 32  ;;  %p4007_p11 = scmp.lt.s32.totalorder %s580_s23, %s4916_s11 }
  0xec   : > { %p4004_p9 = pnand %p4002_p8, %p4257_p7  ;;  %p4008_p0 = scmp.lt.s32.totalorder %s4006_s24, %s4001_s25 }
  0xee   : > { %p4005_p2 = pneg %p4004_p9  ;;  %p4009_p1 = por %p4008_p0, %p4007_p11 }
  0xf0   : > { %p4010_p3 = pnand %p4009_p1, %p4005_p2 }
  0xf2   : > { %4013 = shalt.err (!%p4010_p3)
}
  0xf3   : > { %s4014_s14 = scalar_lea.vmem %s583_s1, 16  ;;  %s4125_s8 = smov [#allocation16]  }
  0xf4   : > { %p4015_p4 = scmp.ne.s32.totalorder %s583_s1, %s4014_s14  ;;  %s4019_s21 = sshll.u32 %s4125_s8, 4  ;;  %s4020_s21 = int_to_ptr.vmem [resolvable:$false] %s4019_s21 }
  0xf5   : > { %s4021_s5 = scalar_lea.vmem %s4020_s21, 32  ;;  %p4022_p13 = scmp.lt.s32.totalorder %s583_s1, %s4020_s21 }
  0xf6   : > { %p4017_p10 = pnand %p4015_p4, %p4257_p7  ;;  %p4023_p6 = scmp.lt.s32.totalorder %s4021_s5, %s4014_s14 }
  0xf8   : > { %p4018_p12 = pneg %p4017_p10  ;;  %p4024_p8 = por %p4023_p6, %p4022_p13 }
  0xfa   : > { %p4025_p9 = pnand %p4024_p8, %p4018_p12 }
  0xfc   : > { %4028 = shalt.err (!%p4025_p9)
}
  0xfd   : > { %s4955_s0 = scalar_lea.sflag [#allocation15], %s4234_s16  ;;  %s4507_s2 = scalar_lea.hbm %s4917_s12, %s4282_s29 }
  0xfe   : > { %3519 = dma.hbm_to_vmem [thread:$0]  (!%p4240_p5), %s580_s23, 16, %s583_s1, %s4955_s0  }
  0xff   : > { %s592_s28 = scalar_lea.vmem [#allocation17], %s4237_s17  ;;  %s590_s10 = scalar_lea.sflag [#allocation18], %s4237_s17 }
 0x100   : > { %s599_s25 = sshll.u32 %s592_s28, 4  ;;  %s4029_s22 = scalar_lea.hbm %s4507_s2, 16  ;;  %s600_s25 = int_to_ptr.vmem [resolvable:$true] %s599_s25 }
 0x101   : > { %p4030_p2 = scmp.ne.s32.totalorder %s4507_s2, %s4029_s22  ;;  %s4034_s23 = scalar_lea.hbm %s4917_s12, 32 }
 0x102   : > { %p4035_p1 = scmp.lt.s32.totalorder %s4507_s2, %s4917_s12  ;;  %p4036_p3 = scmp.lt.s32.totalorder %s4034_s23, %s4029_s22 }
 0x103   : > { %p4032_p11 = pnand %p4030_p2, %p4257_p7 }
 0x104   : > { %p4037_p4 = por %p4036_p3, %p4035_p1 }
 0x105   : > { %p4033_p0 = pneg %p4032_p11 }
 0x107   : > { %p4038_p10 = pnand %p4037_p4, %p4033_p0 }
 0x109   : > { %4041 = shalt.err (!%p4038_p10)
}
 0x10a   : > { %s4042_s29 = scalar_lea.vmem %s600_s25, 16  ;;  %s4126_s17 = smov [#allocation17]  }
 0x10b   : > { %p4043_p12 = scmp.ne.s32.totalorder %s600_s25, %s4042_s29  ;;  %s4047_s14 = sshll.u32 %s4126_s17, 4  ;;  %s4048_s14 = int_to_ptr.vmem [resolvable:$false] %s4047_s14 }
 0x10c   : > { %s4049_s8 = scalar_lea.vmem %s4048_s14, 32  ;;  %p4050_p8 = scmp.lt.s32.totalorder %s600_s25, %s4048_s14 }
 0x10d   : > { %p4045_p13 = pnand %p4043_p12, %p4257_p7  ;;  %p4051_p9 = scmp.lt.s32.totalorder %s4049_s8, %s4042_s29 }
 0x10f   : > { %p4046_p6 = pneg %p4045_p13  ;;  %p4052_p2 = por %p4051_p9, %p4050_p8 }
 0x111   : > { %p4053_p11 = pnand %p4052_p2, %p4046_p6 }
 0x113   : > { %4056 = shalt.err (!%p4053_p11)
}
 0x114   : > { %3522 = dma.hbm_to_vmem [thread:$0]  (!%p4240_p5), %s4507_s2, 16, %s600_s25, %s590_s10  }
 0x115   : > { %p4956_p0 = scmp.ne.s32.totalorder %s4948_s13, 0 }
 0x116   : > { %p4957_p1 = scmp.eq.s32.totalorder (!%p4956_p0), %s4363_s30, 0 }
 0x117   : > { %608 = sbr.rel (%p4956_p0) target bundleno = 2257 (0x8d1), region = 72 }
 0x11c   : > { %4074 = dma.done.wait (%p4957_p1), [#allocation4], 128   ;;  %p4958_p7 = pmov %p4957_p1 }
 0x11d   : > { %s614_s27 = sand.u32 1, %s4363_s30   ;;  %s4535_s21 = sand.u32 1, %s4103_s26  }
 0x11e   : > { %4076 = vsyncadd (%p4958_p7), [#allocation4], 4294967168  ;;  %s3467_s5 = smul.u32 768, %s4535_s21  ;;  %s615_s19 = scalar_lea.sflag [#allocation6], %s614_s27 }
 0x11f   : > { %p4959_p5 = scmp.ne.s32.totalorder %s4947_s7, 0 }
 0x120   : > { %s4538_s0 = scalar_lea.vmem [#allocation5], %s3467_s5 }
 0x121   : > { %4078 = dma.done.wait (%p4959_p5), %s615_s19, 12304  }
 0x122   : > { %4080 = vsyncadd (%p4959_p5), %s615_s19, 4294954992  ;;  %s626_s13 = scalar_lea.vmem [#allocation7], %s4535_s21  ;;  %s632_s18 = scalar_lea.sflag [#allocation9], %s614_s27 }
 0x123   : > { %s634_s20 = scalar_lea.vmem [#allocation8], %s4535_s21 }
 0x124   : > { %4082 = dma.done.wait (%p4959_p5), %s632_s18, 32  }
 0x125   : > { %4084 = vsyncadd (%p4959_p5), %s632_s18, 4294967264  ;;  %s642_s2 = scalar_lea.vmem [#allocation10], %s4535_s21  ;;  %s648_s28 = scalar_lea.sflag [#allocation12], %s614_s27 }
 0x126   : > { %s650_s25 = scalar_lea.vmem [#allocation11], %s4535_s21 }
 0x127   : > { %4086 = dma.done.wait (%p4959_p5), %s648_s28, 1040  }
 0x128   : > { %4088 = vsyncadd (%p4959_p5), %s648_s28, 4294966256  ;;  %s3061_s10 = sshll.u32 %s4535_s21, 6  ;;  %s665_s16 = scalar_lea.sflag [#allocation15], %s614_s27 }
 0x129   : > { %s4557_s22 = scalar_lea.vmem [#allocation13], %s3061_s10  ;;  %s667_s24 = scalar_lea.vmem [#allocation14], %s4535_s21 }
 0x12a   : > { %4090 = dma.done.wait (%p4959_p5), %s665_s16, 32  }
 0x12b   : > { %4092 = vsyncadd (%p4959_p5), %s665_s16, 4294967264  ;;  %s681_s1 = scalar_lea.sflag [#allocation18], %s4535_s21 }
 0x12c   : > { %4094 = dma.done.wait (%p4959_p5), %s681_s1, 16  }
 0x12d   : > { %4096 = vsyncadd (%p4959_p5), %s681_s1, 4294967280  ;;  %p768_p3 = scmp.lt.s32.totalorder %s4363_s30, 1  ;;  %s4960_s10 = sld [smem:[#allocation30_spill]] }
 0x12e   : > { %s4961_s1 = sld [smem:[#allocation32_spill]]  ;;  %p4962_p4 = scmp.ne.s32.totalorder %s4363_s30, 0 }
 0x12f   : > { %s769_s29 = scalar_select %p768_p3, %s4363_s30, 1 }
 0x130   : > { %786 = sbr.rel (%p4962_p4) target bundleno = 311 (0x137), region = 116 }
 0x131   : > { %s3468_s17 = smul.u32 12, %s769_s29  ;;  %s3225_s14 = sshll.u32 %s769_s29, 8 }
 0x132   : > { %s4576_s5 = scalar_lea.vmem %s4908_s3, %s3225_s14  ;;  %s3226_s19 = sshll.u32 %s769_s29, 6 }
 0x133   : > { %s4581_s16 = scalar_lea.vmem %s4960_s10, %s3468_s17 }
 0x134   : > { %s4586_s23 = scalar_lea.vmem %s4961_s1, %s3226_s19 }
 0x135   : > { %v787_v0 = vld [vmem:[#allocation3] sm:$0xff] }
 0x136   : > { %788 = vst [vmem:[#allocation2] sm:$0xff] %v787_v0 }
 0x137 PF: > { %v3566_v1 = vld [vmem:[%s4538_s0 + $0x2a4] ss:$48 sps:$4 sm:$0xff]   ;;  %v3568_v2 = vld [vmem:[%s4538_s0 + $0x2a0] ss:$48 sps:$4 sm:$0xff]   ;;  %v4127_v3 = vmov 0   ;;  %vm4129_vm0 = vmmov 0  }
 0x138   : > { %1463 = vmatprep.mubr.bf16.mxu0 %v4127_v3  ;;  %1504 = vmatprep.mubr.bf16.mxu1 %v4127_v3  ;;  %v3569_v4 = vld [vmem:[%s4538_s0 + $0x244] ss:$48 sps:$4 sm:$0xff]   ;;  %v3571_v5 = vld [vmem:[%s4538_s0 + $0x240] ss:$48 sps:$4 sm:$0xff]   ;;  %v3574_v7 = vld [vmem:[%s4538_s0 + $0x2ac] ss:$48 sps:$4 sm:$0xff]  }
 0x139   : > { %1431 = vmatprep.subr.bf16.mxu0 %v3566_v1  ;;  %v3572_v6 = vld [vmem:[%s4538_s0 + $0x1e4] ss:$48 sps:$4 sm:$0xff]   ;;  %v3577_v8 = vld [vmem:[%s4538_s0 + $0x2a8] ss:$48 sps:$4 sm:$0xff]   ;;  %1472 = vmatprep.subr.bf16.mxu1 %v3574_v7  ;;  %v3576_v9 = vld [vmem:[%s4538_s0 + $0x1e0] ss:$48 sps:$4 sm:$0xff]  }
 0x13a   : > { %1432 = vmatpush1.bf16.msra.mxu0 %v3568_v2  ;;  %1473 = vmatpush1.bf16.msra.mxu1 %v3577_v8  ;;  %v3580_v10 = vld [vmem:[%s4538_s0 + $0x24c] ss:$48 sps:$4 sm:$0xff]   ;;  %v3583_v11 = vld [vmem:[%s4538_s0 + $0x248] ss:$48 sps:$4 sm:$0xff]   ;;  %v3578_v12 = vld [vmem:[%s4538_s0 + $0x184] ss:$48 sps:$4 sm:$0xff]  }
 0x13b   : > { %1433 = vmatprep.subr.bf16.mxu0 %v3569_v4  ;;  %1474 = vmatprep.subr.bf16.mxu1 %v3580_v10  ;;  %v3586_v13 = vld [vmem:[%s4538_s0 + $0x1ec] ss:$48 sps:$4 sm:$0xff]   ;;  %v3582_v14 = vld [vmem:[%s4538_s0 + $0x180] ss:$48 sps:$4 sm:$0xff]   ;;  %v3589_v15 = vld [vmem:[%s4538_s0 + $0x1e8] ss:$48 sps:$4 sm:$0xff]  }
 0x13c   : > { %v3584_v16 = vld [vmem:[%s4538_s0 + $0x124] ss:$48 sps:$4 sm:$0xff]   ;;  %v3592_v17 = vld [vmem:[%s4538_s0 + $0x18c] ss:$48 sps:$4 sm:$0xff]   ;;  %v3588_v18 = vld [vmem:[%s4538_s0 + $0x120] ss:$48 sps:$4 sm:$0xff]  }
 0x13d   : > { %v3590_v19 = vld [vmem:[%s4538_s0 + $0xc4] ss:$48 sps:$4 sm:$0xff]   ;;  %v3595_v20 = vld [vmem:[%s4538_s0 + $0x188] ss:$48 sps:$4 sm:$0xff]   ;;  %v3598_v21 = vld [vmem:[%s4538_s0 + $0x12c] ss:$48 sps:$4 sm:$0xff]  }
 0x13e   : > { %1434 = vmatpush1.bf16.msra.mxu0 %v3571_v5  ;;  %1475 = vmatpush1.bf16.msra.mxu1 %v3583_v11  ;;  %v3594_v22 = vld [vmem:[%s4538_s0 + $0xc0] ss:$48 sps:$4 sm:$0xff]   ;;  %v3596_v23 = vld [vmem:[%s4538_s0 + $0x64] ss:$48 sps:$4 sm:$0xff]   ;;  %v3601_v24 = vld [vmem:[%s4538_s0 + $0x128] ss:$48 sps:$4 sm:$0xff]  }
 0x13f   : > { %1435 = vmatprep.subr.bf16.mxu0 %v3572_v6  ;;  %1476 = vmatprep.subr.bf16.mxu1 %v3586_v13  ;;  %v3604_v25 = vld [vmem:[%s4538_s0 + $0xcc] ss:$48 sps:$4 sm:$0xff]   ;;  %v3600_v26 = vld [vmem:[%s4538_s0 + $0x60] ss:$48 sps:$4 sm:$0xff]   ;;  %v3602_v27 = vld [vmem:[%s4538_s0 + $0x4] ss:$48 sps:$4 sm:$0xff]  }
 0x140   : > { %v3607_v28 = vld [vmem:[%s4538_s0 + $0xc8] ss:$48 sps:$4 sm:$0xff]   ;;  %v3608_v29 = vld [vmem:[%s4538_s0 + $0x6c] ss:$48 sps:$4 sm:$0xff]   ;;  %v3606_v30 = vld [vmem:[%s4538_s0] ss:$48 sps:$4 sm:$0xff]  }
 0x141   : > { %v789_v31 = vld [vmem:[#allocation2] sm:$0xff]  ;;  %v3613_v33 = vld [vmem:[%s4538_s0 + $0x68] ss:$48 sps:$4 sm:$0xff]   ;;  %v3614_v34 = vld [vmem:[%s4538_s0 + $0xc] ss:$48 sps:$4 sm:$0xff]   ;;  %vm1905_vm1 = vcmask 1043456  }
 0x142   : > { %1436 = vmatpush1.bf16.msra.mxu0 %v3576_v9  ;;  %1477 = vmatpush1.bf16.msra.mxu1 %v3589_v15  ;;  %v3612_v32 = vld [vmem:[%s4538_s0 + $0x2b4] ss:$48 sps:$4 sm:$0xff]   ;;  %v4624_v35 = vpack.c.bf16 %v789_v31, %v789_v31  ;;  %v3610_v36 = vld [vmem:[%s4538_s0 + $0x2b0] ss:$48 sps:$4 sm:$0xff]   ;;  %v3619_v38 = vld [vmem:[%s4538_s0 + $0x8] ss:$48 sps:$4 sm:$0xff]  }
 0x143   : > { %1437 = vmatprep.subr.bf16.mxu0 %v3578_v12  ;;  %1478 = vmatprep.subr.bf16.mxu1 %v3592_v17  ;;  %v3618_v37 = vld [vmem:[%s4538_s0 + $0x254] ss:$48 sps:$4 sm:$0xff]   ;;  %v3625_v39 = vld [vmem:[%s4538_s0 + $0x2bc] ss:$48 sps:$4 sm:$0xff]   ;;  %v3616_v40 = vld [vmem:[%s4538_s0 + $0x250] ss:$48 sps:$4 sm:$0xff]  }
 0x144   : > { %v3622_v41 = vld [vmem:[%s4538_s0 + $0x1f4] ss:$48 sps:$4 sm:$0xff]   ;;  %v3623_v42 = vld [vmem:[%s4538_s0 + $0x2b8] ss:$48 sps:$4 sm:$0xff]   ;;  %v3631_v43 = vld [vmem:[%s4538_s0 + $0x25c] ss:$48 sps:$4 sm:$0xff]  }
 0x145   : > { %v3620_v44 = vld [vmem:[%s4538_s0 + $0x1f0] ss:$48 sps:$4 sm:$0xff]   ;;  %v3628_v45 = vld [vmem:[%s4538_s0 + $0x194] ss:$48 sps:$4 sm:$0xff]   ;;  %v3629_v46 = vld [vmem:[%s4538_s0 + $0x258] ss:$48 sps:$4 sm:$0xff]  }
 0x146   : > { %1438 = vmatpush1.bf16.msra.mxu0 %v3582_v14  ;;  %1479 = vmatpush1.bf16.msra.mxu1 %v3595_v20  ;;  %v3637_v47 = vld [vmem:[%s4538_s0 + $0x1fc] ss:$48 sps:$4 sm:$0xff]   ;;  %v3626_v48 = vld [vmem:[%s4538_s0 + $0x190] ss:$48 sps:$4 sm:$0xff]   ;;  %v3634_v49 = vld [vmem:[%s4538_s0 + $0x134] ss:$48 sps:$4 sm:$0xff]  }
 0x147   : > { %1439 = vmatprep.subr.bf16.mxu0 %v3584_v16  ;;  %1480 = vmatprep.subr.bf16.mxu1 %v3598_v21  ;;  %v3635_v50 = vld [vmem:[%s4538_s0 + $0x1f8] ss:$48 sps:$4 sm:$0xff]   ;;  %v3643_v51 = vld [vmem:[%s4538_s0 + $0x19c] ss:$48 sps:$4 sm:$0xff]   ;;  %v3632_v52 = vld [vmem:[%s4538_s0 + $0x130] ss:$48 sps:$4 sm:$0xff]  }
 0x148   : > { %v3641_v53 = vld [vmem:[%s4538_s0 + $0x198] ss:$48 sps:$4 sm:$0xff]   ;;  %v3640_v54 = vld [vmem:[%s4538_s0 + $0xd4] ss:$48 sps:$4 sm:$0xff]   ;;  %v3649_v55 = vld [vmem:[%s4538_s0 + $0x13c] ss:$48 sps:$4 sm:$0xff]  }
 0x149   : > { %v3638_v56 = vld [vmem:[%s4538_s0 + $0xd0] ss:$48 sps:$4 sm:$0xff]   ;;  %v3647_v57 = vld [vmem:[%s4538_s0 + $0x138] ss:$48 sps:$4 sm:$0xff]   ;;  %v3646_v58 = vld [vmem:[%s4538_s0 + $0x74] ss:$48 sps:$4 sm:$0xff]  }
 0x14a   : > { %1440 = vmatpush1.bf16.msra.mxu0 %v3588_v18  ;;  %1481 = vmatpush1.bf16.msra.mxu1 %v3601_v24  ;;  %v3655_v59 = vld [vmem:[%s4538_s0 + $0xdc] ss:$48 sps:$4 sm:$0xff]   ;;  %v3644_v60 = vld [vmem:[%s4538_s0 + $0x70] ss:$48 sps:$4 sm:$0xff]   ;;  %v3653_v61 = vld [vmem:[%s4538_s0 + $0xd8] ss:$48 sps:$4 sm:$0xff]  }
 0x14b   : > { %1441 = vmatprep.subr.bf16.mxu0 %v3590_v19  ;;  %1482 = vmatprep.subr.bf16.mxu1 %v3604_v25  ;;  %v3652_v62 = vld [vmem:[%s4538_s0 + $0x14] ss:$48 sps:$4 sm:$0xff]   ;;  %v3658_v63 = vld [vmem:[%s4538_s0 + $0x7c] ss:$48 sps:$4 sm:$0xff]   ;;  %v3650_v0 = vld [vmem:[%s4538_s0 + $0x10] ss:$48 sps:$4 sm:$0xff]  }
 0x14c   : > { %v3656_v1 = vld [vmem:[%s4538_s0 + $0x78] ss:$48 sps:$4 sm:$0xff]   ;;  %v3661_v2 = vld [vmem:[%s4538_s0 + $0x1c] ss:$48 sps:$4 sm:$0xff]   ;;  %v3667_v7 = vld [vmem:[%s4538_s0 + $0x2c4] ss:$48 sps:$4 sm:$0xff]  }
 0x14d   : > { %v3659_v4 = vld [vmem:[%s4538_s0 + $0x18] ss:$48 sps:$4 sm:$0xff]   ;;  %v3664_v5 = vld [vmem:[%s4538_s0 + $0x2cc] ss:$48 sps:$4 sm:$0xff]   ;;  %v3665_v9 = vld [vmem:[%s4538_s0 + $0x2c0] ss:$48 sps:$4 sm:$0xff]  }
 0x14e   : > { %1442 = vmatpush1.bf16.msra.mxu0 %v3594_v22  ;;  %1483 = vmatpush1.bf16.msra.mxu1 %v3607_v28  ;;  %v3662_v6 = vld [vmem:[%s4538_s0 + $0x2c8] ss:$48 sps:$4 sm:$0xff]   ;;  %v3670_v8 = vld [vmem:[%s4538_s0 + $0x26c] ss:$48 sps:$4 sm:$0xff]   ;;  %v3673_v11 = vld [vmem:[%s4538_s0 + $0x264] ss:$48 sps:$4 sm:$0xff]  }
 0x14f   : > { %1443 = vmatprep.subr.bf16.mxu0 %v3596_v23  ;;  %1484 = vmatprep.subr.bf16.mxu1 %v3608_v29  ;;  %v3668_v10 = vld [vmem:[%s4538_s0 + $0x268] ss:$48 sps:$4 sm:$0xff]   ;;  %v3676_v13 = vld [vmem:[%s4538_s0 + $0x20c] ss:$48 sps:$4 sm:$0xff]   ;;  %v3679_v14 = vld [vmem:[%s4538_s0 + $0x204] ss:$48 sps:$4 sm:$0xff]  }
 0x150   : > { %v3674_v12 = vld [vmem:[%s4538_s0 + $0x208] ss:$48 sps:$4 sm:$0xff]   ;;  %v3682_v15 = vld [vmem:[%s4538_s0 + $0x1ac] ss:$48 sps:$4 sm:$0xff]   ;;  %v3677_v16 = vld [vmem:[%s4538_s0 + $0x200] ss:$48 sps:$4 sm:$0xff]  }
 0x151   : > { %v3680_v17 = vld [vmem:[%s4538_s0 + $0x1a8] ss:$48 sps:$4 sm:$0xff]   ;;  %v3685_v18 = vld [vmem:[%s4538_s0 + $0x1a4] ss:$48 sps:$4 sm:$0xff]   ;;  %v3688_v19 = vld [vmem:[%s4538_s0 + $0x14c] ss:$48 sps:$4 sm:$0xff]  }
 0x152   : > { %1444 = vmatpush1.bf16.msra.mxu0 %v3600_v26  ;;  %1485 = vmatpush1.bf16.msra.mxu1 %v3613_v33  ;;  %v3683_v20 = vld [vmem:[%s4538_s0 + $0x1a0] ss:$48 sps:$4 sm:$0xff]   ;;  %v3686_v21 = vld [vmem:[%s4538_s0 + $0x148] ss:$48 sps:$4 sm:$0xff]   ;;  %v3691_v22 = vld [vmem:[%s4538_s0 + $0x144] ss:$48 sps:$4 sm:$0xff]  }
 0x153   : > { %1445 = vmatprep.subr.bf16.mxu0 %v3602_v27  ;;  %1486 = vmatprep.subr.bf16.mxu1 %v3614_v34  ;;  %v3694_v23 = vld [vmem:[%s4538_s0 + $0xec] ss:$48 sps:$4 sm:$0xff]   ;;  %v3689_v24 = vld [vmem:[%s4538_s0 + $0x140] ss:$48 sps:$4 sm:$0xff]   ;;  %v3692_v25 = vld [vmem:[%s4538_s0 + $0xe8] ss:$48 sps:$4 sm:$0xff]  }
 0x154   : > { %v3697_v26 = vld [vmem:[%s4538_s0 + $0xe4] ss:$48 sps:$4 sm:$0xff]   ;;  %v3700_v27 = vld [vmem:[%s4538_s0 + $0x8c] ss:$48 sps:$4 sm:$0xff]   ;;  %v3695_v28 = vld [vmem:[%s4538_s0 + $0xe0] ss:$48 sps:$4 sm:$0xff]  }
 0x155   : > { %v3698_v29 = vld [vmem:[%s4538_s0 + $0x88] ss:$48 sps:$4 sm:$0xff]   ;;  %v3706_v31 = vld [vmem:[%s4538_s0 + $0x2c] ss:$48 sps:$4 sm:$0xff]   ;;  %v3709_v34 = vld [vmem:[%s4538_s0 + $0x24] ss:$48 sps:$4 sm:$0xff]  }
 0x156   : > { %1446 = vmatpush1.bf16.msra.mxu0 %v3606_v30  ;;  %1487 = vmatpush1.bf16.msra.mxu1 %v3619_v38  ;;  %v3703_v30 = vld [vmem:[%s4538_s0 + $0x84] ss:$48 sps:$4 sm:$0xff]   ;;  %v3704_v33 = vld [vmem:[%s4538_s0 + $0x28] ss:$48 sps:$4 sm:$0xff]   ;;  %v891_v38 = vlaneseq  ;;  %vm1849_vm2 = vcmask 64512   ;;  %s4963_s30 = scalar_lea.vmem [#allocation16], %s4535_s21 }
 0x157   : > { %1513 = vmatprep.subr.bf16.mxu0 %v3612_v32  ;;  %1554 = vmatprep.subr.bf16.mxu1 %v3625_v39  ;;  %v3701_v32 = vld [vmem:[%s4538_s0 + $0x80] ss:$48 sps:$4 sm:$0xff]  }
 0x158   : > { %v4706_v39 = vshrl.u32 %v891_v38, 7 }
 0x159   : > { %1464 = vmatmul.mubr.bf16.vlgmr.msra.gmra.mxu0 %v4624_v35  ;;  %1505 = vmatmul.mubr.bf16.vlgmr.msra.gmra.mxu1 %v4624_v35 }
 0x15a   : > { %1514 = vmatpush1.bf16.msra.mxu0 %v3610_v36  ;;  %1545 = vmatprep.mubr.bf16.mxu0 %v4127_v3  ;;  %v3707_v36 = vld [vmem:[%s4538_s0 + $0x20] ss:$48 sps:$4 sm:$0xff]  }
 0x15b   : > { %1515 = vmatprep.subr.bf16.mxu0 %v3618_v37  ;;  %1555 = vmatpush1.bf16.msra.mxu1 %v3623_v42  ;;  %v4128_v37 = vmov 0.0  }
 0x15c   : > { %1556 = vmatprep.subr.bf16.mxu1 %v3631_v43  ;;  %1586 = vmatprep.mubr.bf16.mxu1 %v4127_v3 }
 0x15e   : > { %1516 = vmatpush1.bf16.msra.mxu0 %v3616_v40  ;;  %v901_v40 = vsub.s32 2, %v4706_v39 }
 0x15f   : > { %1517 = vmatprep.subr.bf16.mxu0 %v3622_v41  ;;  %1557 = vmatpush1.bf16.msra.mxu1 %v3629_v46  ;;  %v4710_v41 = vld [vmem:[%s4581_s16 + $0x8] sm:$0xf] }
 0x160   : > { %1558 = vmatprep.subr.bf16.mxu1 %v3637_v47 }
 0x162   : > { %1518 = vmatpush1.bf16.msra.mxu0 %v3620_v44 }
 0x163   : > { %1519 = vmatprep.subr.bf16.mxu0 %v3628_v45  ;;  %1559 = vmatpush1.bf16.msra.mxu1 %v3635_v50  ;;  %v909_v50 = vsub.s32 4, %v4706_v39 }
 0x164   : > { %1560 = vmatprep.subr.bf16.mxu1 %v3643_v51  ;;  %v913_v51 = vsub.s32 5, %v4706_v39 }
 0x166   : > { %1520 = vmatpush1.bf16.msra.mxu0 %v3626_v48 }
 0x167   : > { %1521 = vmatprep.subr.bf16.mxu0 %v3634_v49  ;;  %1561 = vmatpush1.bf16.msra.mxu1 %v3641_v53 }
 0x168   : > { %1562 = vmatprep.subr.bf16.mxu1 %v3649_v55  ;;  %v893_v55 = vsub.s32 0, %v4706_v39 }
 0x16a   : > { %1522 = vmatpush1.bf16.msra.mxu0 %v3632_v52  ;;  %v887_v52 = vld [vmem:[%s4581_s16] sm:$0xff] }
 0x16b   : > { %1523 = vmatprep.subr.bf16.mxu0 %v3640_v54  ;;  %1563 = vmatpush1.bf16.msra.mxu1 %v3647_v57  ;;  %v910_v53 = vrot.slane %v887_v52, %v909_v50  ;;  %v917_v54 = vsub.s32 6, %v4706_v39  ;;  %v921_v57 = vsub.s32 7, %v4706_v39 }
 0x16c   : > { %1564 = vmatprep.subr.bf16.mxu1 %v3655_v59 }
 0x16e   : > { %1524 = vmatpush1.bf16.msra.mxu0 %v3638_v56  ;;  %v914_v56 = vrot.slane %v887_v52, %v913_v51 }
 0x16f   : > { %1525 = vmatprep.subr.bf16.mxu0 %v3646_v58  ;;  %1565 = vmatpush1.bf16.msra.mxu1 %v3653_v61  ;;  %v897_v58 = vsub.s32 1, %v4706_v39  ;;  %v918_v61 = vrot.slane %v887_v52, %v917_v54 }
 0x170   : > { %1566 = vmatprep.subr.bf16.mxu1 %v3658_v63 }
 0x172   : > { %1526 = vmatpush1.bf16.msra.mxu0 %v3644_v60 }
 0x173   : > { %1527 = vmatprep.subr.bf16.mxu0 %v3652_v62  ;;  %1567 = vmatpush1.bf16.msra.mxu1 %v3656_v1  ;;  %v894_v62 = vrot.slane %v887_v52, %v893_v55 }
 0x174   : > { %1568 = vmatprep.subr.bf16.mxu1 %v3661_v2  ;;  %v922_v2 = vrot.slane %v887_v52, %v921_v57 }
 0x176   : > { %1528 = vmatpush1.bf16.msra.mxu0 %v3650_v0 }
 0x177   : > { %1569 = vmatpush1.bf16.msra.mxu1 %v3659_v4  ;;  %1595 = vmatprep.subr.bf16.mxu0 %v3667_v7  ;;  %v898_v4 = vrot.slane %v887_v52, %v897_v58 }
 0x178   : > { %1636 = vmatprep.subr.bf16.mxu1 %v3664_v5 }
 0x179   : > { %1546 = vmatmul.mubr.bf16.vlgmr.msra.gmra.mxu0 %v4624_v35 }
 0x17a   : > { %1627 = vmatprep.mubr.bf16.mxu0 %v4127_v3  ;;  %1587 = vmatmul.mubr.bf16.vlgmr.msra.gmra.mxu1 %v4624_v35 }
 0x17b   : > { %1668 = vmatprep.mubr.bf16.mxu1 %v4127_v3  ;;  %1637 = vmatpush1.bf16.msra.mxu1 %v3662_v6  ;;  %v3671_v3 = vld [vmem:[%s4538_s0 + $0x260] ss:$48 sps:$4 sm:$0xff]   ;;  %s4964_s0 = scalar_lea.vmem [#allocation17], %s4535_s21 }
 0x17c   : > { %1638 = vmatprep.subr.bf16.mxu1 %v3670_v8  ;;  %1596 = vmatpush1.bf16.msra.mxu0 %v3665_v9 }
 0x17d   : > { %1597 = vmatprep.subr.bf16.mxu0 %v3673_v11 }
 0x17f   : > { %1639 = vmatpush1.bf16.msra.mxu1 %v3668_v10 }
 0x180   : > { %1598 = vmatpush1.bf16.msra.mxu0 %v3671_v3  ;;  %1640 = vmatprep.subr.bf16.mxu1 %v3676_v13  ;;  %v905_v13 = vsub.s32 3, %v4706_v39 }
 0x181   : > { %1599 = vmatprep.subr.bf16.mxu0 %v3679_v14 }
 0x183   : > { %1641 = vmatpush1.bf16.msra.mxu1 %v3674_v12 }
 0x184   : > { %1642 = vmatprep.subr.bf16.mxu1 %v3682_v15  ;;  %1600 = vmatpush1.bf16.msra.mxu0 %v3677_v16 }
 0x185   : > { %1601 = vmatprep.subr.bf16.mxu0 %v3685_v18 }
 0x187   : > { %1643 = vmatpush1.bf16.msra.mxu1 %v3680_v17  ;;  %v902_v17 = vrot.slane %v887_v52, %v901_v40 }
 0x188   : > { %1644 = vmatprep.subr.bf16.mxu1 %v3688_v19  ;;  %1602 = vmatpush1.bf16.msra.mxu0 %v3683_v20 }
 0x189   : > { %1603 = vmatprep.subr.bf16.mxu0 %v3691_v22 }
 0x18b   : > { %1645 = vmatpush1.bf16.msra.mxu1 %v3686_v21  ;;  %v906_v21 = vrot.slane %v887_v52, %v905_v13 }
 0x18c   : > { %1646 = vmatprep.subr.bf16.mxu1 %v3694_v23  ;;  %1604 = vmatpush1.bf16.msra.mxu0 %v3689_v24 }
 0x18d   : > { %1605 = vmatprep.subr.bf16.mxu0 %v3697_v26  ;;  %v938_v26 = vrot.slane %v4710_v41, %v905_v13 }
 0x18f   : > { %1647 = vmatpush1.bf16.msra.mxu1 %v3692_v25 }
 0x190   : > { %1648 = vmatprep.subr.bf16.mxu1 %v3700_v27  ;;  %1606 = vmatpush1.bf16.msra.mxu0 %v3695_v28  ;;  %v926_v28 = vrot.slane %v4710_v41, %v893_v55 }
 0x191   : > { %1607 = vmatprep.subr.bf16.mxu0 %v3703_v30 }
 0x193   : > { %1649 = vmatpush1.bf16.msra.mxu1 %v3698_v29 }
 0x194   : > { %1650 = vmatprep.subr.bf16.mxu1 %v3706_v31  ;;  %1608 = vmatpush1.bf16.msra.mxu0 %v3701_v32  ;;  %v930_v31 = vrot.slane %v4710_v41, %v897_v58 }
 0x195   : > { %1609 = vmatprep.subr.bf16.mxu0 %v3709_v34 }
 0x197   : > { %1651 = vmatpush1.bf16.msra.mxu1 %v3704_v33 }
 0x198   : > { %1610 = vmatpush1.bf16.msra.mxu0 %v3707_v36  ;;  %3303 = vmatprep.subr.bf16.mxu1 %v4128_v37 }
 0x199   : > { %3297 = vmatprep.subr.bf16.mxu0 %v4128_v37 }
 0x19a   : > { %1669 = vmatmul.mubr.bf16.vlgmr.msra.gmra.mxu1 %v4624_v35 }
 0x19b   : > { %1628 = vmatmul.mubr.bf16.vlgmr.msra.gmra.mxu0 %v4624_v35  ;;  %3305 = vmatprep.mubr.msk.bf16.mxu1 %vm4129_vm0, %v4128_v37  ;;  %v4713_v35 = vrot.slane %v4710_v41, %v901_v40 }
 0x19c   : > { %3299 = vmatprep.mubr.msk.bf16.mxu0 %vm4129_vm0, %v4128_v37 }
 0x219   : > { %v1465_v42 = vpop.f32.mrf.mxu0  ;;  %v1506_v45 = vpop.f32.mrf.mxu1 }
 0x21a   : > { %v1466_v9 = vadd.f32 %v1465_v42, %v894_v62  ;;  %v1507_v22 = vadd.f32 %v1506_v45, %v902_v17 }
 0x21b   : > { %v1467_v43 = vpop.f32.mrf.mxu0  ;;  %v1508_v47 = vpop.f32.mrf.mxu1 }
 0x21c   : > { %v1468_v12 = vadd.f32 %v1467_v43, %v898_v4  ;;  %v1677_v16 = vpack.c.bf16 %v1466_v9, %v1466_v9  ;;  %v1509_v23 = vadd.f32 %v1508_v47, %v906_v21  ;;  %v1679_v24 = vpack.c.bf16 %v1507_v22, %v1507_v22 }
 0x21d   : > { %v1469_v44 = vpop.f32.mrf.mxu0  ;;  %v1510_v48 = vpop.f32.mrf.mxu1 }
 0x21e   : > { %v1678_v20 = vpack.c.bf16 %v1468_v12, %v1468_v12  ;;  %v1680_v25 = vpack.c.bf16 %v1509_v23, %v1509_v23 }
 0x21f   : > { %v1470_v46 = vpop.f32.mrf.mxu0  ;;  %v1511_v49 = vpop.f32.mrf.mxu1 }
 0x239   : > { %v1547_v59 = vpop.f32.mrf.mxu0 }
 0x23a   : > { %v1548_v60 = vadd.f32 %v1547_v59, %v910_v53  ;;  %v1588_v6 = vpop.f32.mrf.mxu1 }
 0x23b   : > { %v1549_v63 = vpop.f32.mrf.mxu0  ;;  %v1589_v8 = vadd.f32 %v1588_v6, %v918_v61 }
 0x23c   : > { %v1681_v0 = vpack.c.bf16 %v1548_v60, %v1548_v60  ;;  %v1550_v1 = vadd.f32 %v1549_v63, %v914_v56  ;;  %v1590_v3 = vpop.f32.mrf.mxu1 }
 0x23d   : > { %v1551_v5 = vpop.f32.mrf.mxu0  ;;  %v1591_v11 = vadd.f32 %v1590_v3, %v922_v2  ;;  %v1683_v15 = vpack.c.bf16 %v1589_v8, %v1589_v8 }
 0x23e   : > { %v1682_v7 = vpack.c.bf16 %v1550_v1, %v1550_v1  ;;  %3298 = vmatpush3.bf16.xpose.msra.mxu0 %v1681_v0  ;;  %v1592_v14 = vpop.f32.mrf.mxu1 }
 0x23f   : > { %v1552_v10 = vpop.f32.mrf.mxu0  ;;  %3309 = vmatprep.subr.bf16.mxu0 %v4128_v37  ;;  %v1684_v19 = vpack.c.bf16 %v1591_v11, %v1591_v11 }
 0x240   : > { %3304 = vmatpush3.bf16.xpose.msra.mxu1 %v1682_v7  ;;  %v1593_v18 = vpop.f32.mrf.mxu1 }
 0x241   : > { %3315 = vmatprep.subr.bf16.mxu1 %v4128_v37 }
 0x245   : > { %3300 = vmatmul.mubr.bf16.vlgmr.msra.gmra.mxu0 %v1677_v16 }
 0x246   : > { %3310 = vmatpush3.bf16.xpose.msra.mxu0 %v1683_v15  ;;  %3311 = vmatprep.mubr.msk.bf16.mxu0 %vm4129_vm0, %v4128_v37 }
 0x247   : > { %3306 = vmatmul.mubr.bf16.vlgmr.msra.gmra.mxu1 %v1678_v20  ;;  %3321 = vmatprep.subr.bf16.mxu0 %v4128_v37 }
 0x248   : > { %3316 = vmatpush3.bf16.xpose.msra.mxu1 %v1684_v19  ;;  %3317 = vmatprep.mubr.msk.bf16.mxu1 %vm4129_vm0, %v4128_v37 }
 0x249   : > { %3327 = vmatprep.subr.bf16.mxu1 %v4128_v37 }
 0x24d   : > { %3312 = vmatmul.mubr.bf16.vlgmr.msra.gmra.mxu0 %v1679_v24 }
 0x24e   : > { %3323 = vmatprep.mubr.msk.bf16.mxu0 %vm4129_vm0, %v4128_v37 }
 0x24f   : > { %3318 = vmatmul.mubr.bf16.vlgmr.msra.gmra.mxu1 %v1680_v25 }
 0x250   : > { %3329 = vmatprep.mubr.msk.bf16.mxu1 %vm4129_vm0, %v4128_v37 }
 0x25a   : > { %v1670_v27 = vpop.f32.mrf.mxu1 }
 0x25b   : > { %v1671_v29 = vadd.f32 %v1670_v27, %v4713_v35  ;;  %v1629_v34 = vpop.f32.mrf.mxu0 }
 0x25c   : > { %v1672_v30 = vpop.f32.mrf.mxu1  ;;  %v1630_v36 = vadd.f32 %v1629_v34, %v926_v28 }
 0x25d   : > { %v1900_v32 = vpack.c.bf16 %v1671_v29, %v1671_v29  ;;  %v1673_v33 = vadd.f32 %v1672_v30, %v938_v26  ;;  %v1631_v42 = vpop.f32.mrf.mxu0 }
 0x25e   : > { %v1674_v38 = vpop.f32.mrf.mxu1  ;;  %v1898_v43 = vpack.c.bf16 %v1630_v36, %v1630_v36  ;;  %v1632_v44 = vadd.f32 %v1631_v42, %v930_v31 }
 0x25f   : > { %v4740_v39 = vsel %vm1905_vm1, %v1900_v32, 0  ;;  %v1901_v40 = vpack.c.bf16 %v1673_v33, %v1673_v33  ;;  %v1633_v35 = vpop.f32.mrf.mxu0 }
 0x260   : > { %v1675_v45 = vpop.f32.mrf.mxu1  ;;  %v1907_v47 = vsel %vm1905_vm1, %v1898_v43, 0  ;;  %v1899_v41 = vpack.c.bf16 %v1632_v44, %v1632_v44 }
 0x261   : > { %v4743_v46 = vsel %vm1905_vm1, %v1901_v40, 0  ;;  %v1634_v48 = vpop.f32.mrf.mxu0  ;;  %3322 = vmatpush3.bf16.msra.mxu0 %v1907_v47 }
 0x262   : > { %v1953_v49 = vsel %vm1905_vm1, %v1899_v41, 0  ;;  %3333 = vmatprep.subr.bf16.mxu0 %v4128_v37  ;;  %v3710_v48 = vld [vmem:[%s4576_s5 + $0x78] sm:$0xff]  }
 0x263   : > { %3328 = vmatpush3.bf16.msra.mxu1 %v1953_v49 }
 0x264   : > { %3339 = vmatprep.subr.bf16.mxu1 %v4128_v37 }
 0x305   : > { %v1719_v50 = vpop.f32.mrf.mxu0 }
 0x306   : > { %v1845_v56 = vmul.f32 0.35355338, %v1719_v50  ;;  %v3714_v50 = vld [vmem:[%s4576_s5 + $0x30] sm:$0xff]  }
 0x307   : > { %v3301_v51 = vpop.f32.mrf.mxu0  ;;  %v1759_v52 = vpop.f32.mrf.mxu1 }
 0x308   : > { %v1846_v53 = vmul.f32 0.35355338, %v1759_v52  ;;  %v1850_v63 = vsel %vm1849_vm2, %v1845_v56, -inf  ;;  %v3716_v51 = vld [vmem:[%s4576_s5 + $0x28] sm:$0xff]  }
 0x309   : > { %v1722_v54 = vpop.f32.mrf.mxu0  ;;  %v3307_v55 = vpop.f32.mrf.mxu1  ;;  %v3713_v52 = vld [vmem:[%s4576_s5 + $0x68] sm:$0xff]  }
 0x30a   : > { %v1853_v57 = vsel %vm1849_vm2, %v1846_v53, -inf  ;;  %v3715_v54 = vld [vmem:[%s4576_s5 + $0x60] sm:$0xff]   ;;  %v3720_v55 = vld [vmem:[%s4576_s5 + $0x18] sm:$0xff]  }
 0x30b   : > { %1854 = vmax.xlane.f32.xlu0 %v1853_v57  ;;  %v3302_v58 = vpop.f32.mrf.mxu0  ;;  %v1762_v59 = vpop.f32.mrf.mxu1  ;;  %v3722_v57 = vld [vmem:[%s4576_s5 + $0x10] sm:$0xff]  }
 0x30c   : > { %v3719_v58 = vld [vmem:[%s4576_s5 + $0x50] sm:$0xff]   ;;  %v3724_v59 = vld [vmem:[%s4576_s5 + $0x8] sm:$0xff]  }
 0x30d   : > { %v3308_v60 = vpop.f32.mrf.mxu1  ;;  %v1799_v61 = vpop.f32.mrf.mxu0 }
 0x30e   : > { %v1847_v62 = vmul.f32 0.35355338, %v1799_v61  ;;  %v3721_v60 = vld [vmem:[%s4576_s5 + $0x48] sm:$0xff]   ;;  %v3723_v61 = vld [vmem:[%s4576_s5 + $0x40] sm:$0xff]  }
 0x30f   : > { %v1839_v0 = vpop.f32.mrf.mxu1  ;;  %1851 = vmax.xlane.f32.xlu0 %v1850_v63  ;;  %v3313_v1 = vpop.f32.mrf.mxu0 }
 0x310   : > { %v1848_v2 = vmul.f32 0.35355338, %v1839_v0  ;;  %v1856_v4 = vsel %vm1849_vm2, %v1847_v62, -inf  ;;  %v3726_v0 = vld [vmem:[%s4576_s5 + $0xb8] sm:$0xff]  }
 0x311   : > { %v3319_v5 = vpop.f32.mrf.mxu1  ;;  %1857 = vmax.xlane.f32.xlu1 %v1856_v4  ;;  %v1802_v6 = vpop.f32.mrf.mxu0 }
 0x312   : > { %v1859_v9 = vsel %vm1849_vm2, %v1848_v2, -inf  ;;  %v3727_v6 = vld [vmem:[%s4576_s5 + $0xb0] sm:$0xff]  }
 0x313   : > { %v3314_v7 = vpop.f32.mrf.mxu0  ;;  %v1842_v8 = vpop.f32.mrf.mxu1 }
 0x314   : > { %v3728_v7 = vld [vmem:[%s4576_s5 + $0xf8] sm:$0xff]  }
 0x315   : > { %v3320_v10 = vpop.f32.mrf.mxu1  ;;  %1860 = vmax.xlane.f32.xlu1 %v1859_v9 }
 0x394   : > { %v1855_v3 = vpop.xlane.xlu0 %1854 }
 0x395   : > { %v1863_v11 = vsub.f32 %v1846_v53, %v1855_v3  ;;  %v3718_v53 = vld [vmem:[%s4576_s5 + $0x20] sm:$0xff]  }
 0x397   : > { %v1868_v12 = vmul.f32 1.442695, %v1863_v11  ;;  %v3729_v11 = vld [vmem:[%s4576_s5 + $0xa8] sm:$0xff]  }
 0x398   : > { %v1852_v13 = vpop.xlane.xlu0 %1851 }
 0x399   : > { %3758 = vpow2.f32 %v1868_v12  ;;  %v1862_v14 = vsub.f32 %v1845_v56, %v1852_v13  ;;  %v3717_v56 = vld [vmem:[%s4576_s5 + $0x58] sm:$0xff]   ;;  %v3730_v12 = vld [vmem:[%s4576_s5 + $0xf0] sm:$0xff]  }
 0x39a   : > { %v1858_v15 = vpop.xlane.xlu1 %1857 }
 0x39b   : > { %v1866_v16 = vmul.f32 1.442695, %v1862_v14  ;;  %v1864_v17 = vsub.f32 %v1847_v62, %v1858_v15  ;;  %v3725_v62 = vld [vmem:[%s4576_s5] sm:$0xff]  }
 0x39d   : > { %3760 = vpow2.f32 %v1866_v16  ;;  %v1870_v18 = vmul.f32 1.442695, %v1864_v17  ;;  %v3731_v17 = vld [vmem:[%s4576_s5 + $0xa0] sm:$0xff]  }
 0x39e   : > { %v1861_v19 = vpop.xlane.xlu1 %1860 }
 0x39f   : > { %3762 = vpow2.f32 %v1870_v18  ;;  %v1865_v20 = vsub.f32 %v1848_v2, %v1861_v19  ;;  %v3732_v18 = vld [vmem:[%s4576_s5 + $0xe8] sm:$0xff]  }
 0x3a1   : > { %v1872_v21 = vmul.f32 1.442695, %v1865_v20 }
 0x3a3   : > { %3764 = vpow2.f32 %v1872_v21 }
 0x3a6   : > { %v3759_v22 = vpop.eup %3758 }
 0x3a7   : > { %v1877_v23 = vsel %vm1849_vm2, %v3759_v22, 0.0 }
 0x3a8   : > { %1878 = vadd.xlane.f32.xlu0 %v1877_v23  ;;  %v3733_v23 = vld [vmem:[%s4576_s5 + $0x98] sm:$0xff]  }
 0x3aa   : > { %v3761_v24 = vpop.eup %3760 }
 0x3ab   : > { %v1874_v25 = vsel %vm1849_vm2, %v3761_v24, 0.0 }
 0x3ac   : > { %v3763_v26 = vpop.eup %3762  ;;  %1875 = vadd.xlane.f32.xlu1 %v1874_v25 }
 0x3ad   : > { %v1880_v27 = vsel %vm1849_vm2, %v3763_v26, 0.0 }
 0x3ae   : > { %1881 = vadd.xlane.f32.xlu0 %v1880_v27  ;;  %v3736_v27 = vld [vmem:[%s4576_s5 + $0xd8] sm:$0xff]  }
 0x3b0   : > { %v3765_v28 = vpop.eup %3764 }
 0x3b1   : > { %v1883_v29 = vsel %vm1849_vm2, %v3765_v28, 0.0 }
 0x3b2   : > { %1884 = vadd.xlane.f32.xlu1 %v1883_v29  ;;  %v3738_v29 = vld [vmem:[%s4576_s5 + $0xd0] sm:$0xff]  }
 0x431   : > { %v1879_v30 = vpop.xlane.xlu0 %1878 }
 0x432   : > { %3766 = vrcp.f32 %v1879_v30  ;;  %v3739_v30 = vld [vmem:[%s4576_s5 + $0x80] sm:$0xff]  }
 0x435   : > { %v1876_v31 = vpop.xlane.xlu1 %1875 }
 0x436   : > { %3768 = vrcp.f32 %v1876_v31  ;;  %v3740_v31 = vld [vmem:[%s4576_s5 + $0xc8] sm:$0xff]  }
 0x437   : > { %v1882_v32 = vpop.xlane.xlu0 %1881 }
 0x438   : > { %3770 = vrcp.f32 %v1882_v32  ;;  %v3741_v32 = vld [vmem:[%s4576_s5 + $0xc0] sm:$0xff]  }
 0x43b   : > { %v1885_v33 = vpop.xlane.xlu1 %1884 }
 0x43c   : > { %3772 = vrcp.f32 %v1885_v33 }
 0x43f   : > { %v3767_v34 = vpop.eup %3766 }
 0x440   : > { %v1889_v36 = vmul.f32 %v3767_v34, %v3759_v22 }
 0x442   : > { %v1895_v38 = vpack.c.bf16 %v1889_v36, %v1889_v36 }
 0x443   : > { %v3769_v40 = vpop.eup %3768 }
 0x444   : > { %3330 = vmatmul.mubr.msk.bf16.vlgmr.msra.gmra.mxu1 %vm1849_vm2, %v1895_v38  ;;  %v1887_v42 = vmul.f32 %v3769_v40, %v3761_v24  ;;  %v3734_v24 = vld [vmem:[%s4576_s5 + $0xe0] sm:$0xff]  }
 0x445   : > { %3340 = vmatpush3.bf16.msra.mxu1 %v4743_v46  ;;  %3341 = vmatprep.mubr.msk.bf16.mxu1 %vm4129_vm0, %v4128_v37  ;;  %v3771_v44 = vpop.eup %3770  ;;  %v3712_v46 = vld [vmem:[%s4576_s5 + $0x38] sm:$0xff]  }
 0x446   : > { %v1894_v43 = vpack.c.bf16 %v1887_v42, %v1887_v42  ;;  %3365 = vmatprep.subr.bf16.mxu1 %v4128_v37  ;;  %v1891_v47 = vmul.f32 %v3771_v44, %v3763_v26  ;;  %v3735_v26 = vld [vmem:[%s4576_s5 + $0x90] sm:$0xff]  }
 0x448   : > { %3324 = vmatmul.mubr.msk.bf16.vlgmr.msra.gmra.mxu0 %vm1849_vm2, %v1894_v43  ;;  %v1896_v49 = vpack.c.bf16 %v1891_v47, %v1891_v47 }
 0x449   : > { %v3773_v45 = vpop.eup %3772  ;;  %3334 = vmatpush3.bf16.msra.mxu0 %v4740_v39  ;;  %3335 = vmatprep.mubr.msk.bf16.mxu0 %vm4129_vm0, %v4128_v37  ;;  %v3711_v39 = vld [vmem:[%s4576_s5 + $0x70] sm:$0xff]  }
 0x44a   : > { %v1893_v35 = vmul.f32 %v3773_v45, %v3765_v28  ;;  %3345 = vmatprep.subr.bf16.mxu0 %v4128_v37  ;;  %v3737_v28 = vld [vmem:[%s4576_s5 + $0x88] sm:$0xff]  }
 0x44c   : > { %v1897_v41 = vpack.c.bf16 %v1893_v35, %v1893_v35 }
 0x44e   : > { %3342 = vmatmul.mubr.msk.bf16.vlgmr.msra.gmra.mxu1 %vm1849_vm2, %v1897_v41 }
 0x44f   : > { %3366 = vmatpush3.bf16.msra.mxu1 %v3712_v46  ;;  %3381 = vmatprep.mubr.msk.bf16.mxu1 %vm4129_vm0, %v4128_v37 }
 0x450   : > { %3336 = vmatmul.mubr.msk.bf16.vlgmr.msra.gmra.mxu0 %vm1849_vm2, %v1896_v49  ;;  %3367 = vmatprep.subr.bf16.mxu1 %v4128_v37 }
 0x451   : > { %3346 = vmatpush3.bf16.msra.mxu0 %v3710_v48  ;;  %3361 = vmatprep.mubr.msk.bf16.mxu0 %vm4129_vm0, %v4128_v37 }
 0x452   : > { %3347 = vmatprep.subr.bf16.mxu0 %v4128_v37 }
 0x453   : > { %3368 = vmatpush3.bf16.msra.mxu1 %v3714_v50 }
 0x454   : > { %3369 = vmatprep.subr.bf16.mxu1 %v4128_v37 }
 0x455   : > { %3348 = vmatpush3.bf16.msra.mxu0 %v3711_v39  ;;  %v3199_v39 = vld [vmem:[%s626_s13] ss:$0 sm:$0xff] }
 0x456   : > { %3349 = vmatprep.subr.bf16.mxu0 %v4128_v37 }
 0x457   : > { %3370 = vmatpush3.bf16.msra.mxu1 %v3716_v51 }
 0x458   : > { %3371 = vmatprep.subr.bf16.mxu1 %v4128_v37 }
 0x459   : > { %3350 = vmatpush3.bf16.msra.mxu0 %v3713_v52 }
 0x45a   : > { %3351 = vmatprep.subr.bf16.mxu0 %v4128_v37 }
 0x45b   : > { %3372 = vmatpush3.bf16.msra.mxu1 %v3718_v53 }
 0x45c   : > { %3373 = vmatprep.subr.bf16.mxu1 %v4128_v37 }
 0x45d   : > { %3352 = vmatpush3.bf16.msra.mxu0 %v3715_v54 }
 0x45e   : > { %3353 = vmatprep.subr.bf16.mxu0 %v4128_v37 }
 0x45f   : > { %3374 = vmatpush3.bf16.msra.mxu1 %v3720_v55 }
 0x460   : > { %3375 = vmatprep.subr.bf16.mxu1 %v4128_v37 }
 0x461   : > { %3354 = vmatpush3.bf16.msra.mxu0 %v3717_v56  ;;  %v3778_v56 = vld [vmem:[#allocation2] sm:$0xff] }
 0x462   : > { %3355 = vmatprep.subr.bf16.mxu0 %v4128_v37 }
 0x463   : > { %3376 = vmatpush3.bf16.msra.mxu1 %v3722_v57 }
 0x464   : > { %3377 = vmatprep.subr.bf16.mxu1 %v4128_v37 }
 0x465   : > { %3356 = vmatpush3.bf16.msra.mxu0 %v3719_v58 }
 0x466   : > { %3357 = vmatprep.subr.bf16.mxu0 %v4128_v37 }
 0x467   : > { %3378 = vmatpush3.bf16.msra.mxu1 %v3724_v59 }
 0x468   : > { %3379 = vmatprep.subr.bf16.mxu1 %v4128_v37 }
 0x469   : > { %3358 = vmatpush3.bf16.msra.mxu0 %v3721_v60  ;;  %v3742_v60 = vld [vmem:[%s4586_s23 + $0x38] sm:$0xff]  }
 0x46a   : > { %3359 = vmatprep.subr.bf16.mxu0 %v4128_v37 }
 0x46b   : > { %3380 = vmatpush3.bf16.msra.mxu1 %v3725_v62  ;;  %v3744_v62 = vld [vmem:[%s4586_s23 + $0x28] sm:$0xff]  }
 0x46c   : > { %3405 = vmatprep.subr.bf16.mxu1 %v4128_v37 }
 0x46d   : > { %3360 = vmatpush3.bf16.msra.mxu0 %v3723_v61  ;;  %v3743_v61 = vld [vmem:[%s4586_s23 + $0x30] sm:$0xff]  }
 0x46e   : > { %3385 = vmatprep.subr.bf16.mxu0 %v4128_v37 }
 0x504   : > { %v1989_v63 = vpop.f32.mrf.mxu1 }
 0x505   : > { %v2152_v1 = vpack.c.bf16 %v1989_v63, %v1989_v63  ;;  %v3745_v63 = vld [vmem:[%s4586_s23 + $0x20] sm:$0xff]  }
 0x506   : > { %v3331_v2 = vpop.f32.mrf.mxu1 }
 0x507   : > { %3362 = vmatmul.mubr.bf16.vlgmr.msra.gmra.mxu0 %v2152_v1  ;;  %v3747_v1 = vld [vmem:[%s4586_s23 + $0x10] sm:$0xff]   ;;  %v3748_v2 = vld [vmem:[%s4586_s23 + $0x8] sm:$0xff]  }
 0x508   : > { %3386 = vmatpush3.bf16.msra.mxu0 %v3726_v0  ;;  %v1943_v4 = vpop.f32.mrf.mxu0  ;;  %v1992_v5 = vpop.f32.mrf.mxu1  ;;  %3401 = vmatprep.mubr.msk.bf16.mxu0 %vm4129_vm0, %v4128_v37  ;;  %v3746_v0 = vld [vmem:[%s4586_s23 + $0x18] sm:$0xff]  }
 0x509   : > { %v2151_v8 = vpack.c.bf16 %v1943_v4, %v1943_v4  ;;  %3387 = vmatprep.subr.bf16.mxu0 %v4128_v37  ;;  %v3749_v4 = vld [vmem:[%s4586_s23] sm:$0xff]   ;;  %v3750_v5 = vld [vmem:[%s4557_s22 + $0x38] sm:$0xff]  }
 0x50a   : > { %v3325_v9 = vpop.f32.mrf.mxu0  ;;  %v3332_v10 = vpop.f32.mrf.mxu1 }
 0x50b   : > { %3382 = vmatmul.mubr.bf16.vlgmr.msra.gmra.mxu1 %v2151_v8  ;;  %v3753_v8 = vld [vmem:[%s4557_s22 + $0x20] sm:$0xff]   ;;  %v3754_v9 = vld [vmem:[%s4557_s22 + $0x18] sm:$0xff]   ;;  %v3755_v10 = vld [vmem:[%s4557_s22 + $0x10] sm:$0xff]  }
 0x50c   : > { %3388 = vmatpush3.bf16.msra.mxu0 %v3727_v6  ;;  %3406 = vmatpush3.bf16.msra.mxu1 %v3728_v7  ;;  %v1946_v3 = vpop.f32.mrf.mxu0  ;;  %v3751_v6 = vld [vmem:[%s4557_s22 + $0x30] sm:$0xff]   ;;  %v3752_v7 = vld [vmem:[%s4557_s22 + $0x28] sm:$0xff]  }
 0x50d   : > { %3389 = vmatprep.subr.bf16.mxu0 %v4128_v37  ;;  %3407 = vmatprep.subr.bf16.mxu1 %v4128_v37 }
 0x50e   : > { %v3326_v13 = vpop.f32.mrf.mxu0  ;;  %v2081_v14 = vpop.f32.mrf.mxu1  ;;  %3421 = vmatprep.mubr.msk.bf16.mxu1 %vm4129_vm0, %v4128_v37 }
 0x50f   : > { %v2419_v34 = vpack.c.bf16 %v2081_v14, %v2081_v14 }
 0x510   : > { %3390 = vmatpush3.bf16.msra.mxu0 %v3729_v11  ;;  %3408 = vmatpush3.bf16.msra.mxu1 %v3730_v12  ;;  %v2035_v15 = vpop.f32.mrf.mxu0  ;;  %v3343_v16 = vpop.f32.mrf.mxu1 }
 0x511   : > { %3391 = vmatprep.subr.bf16.mxu0 %v4128_v37  ;;  %3409 = vmatprep.subr.bf16.mxu1 %v4128_v37  ;;  %v2329_v33 = vpack.c.bf16 %v2035_v15, %v2035_v15 }
 0x512   : > { %v3337_v19 = vpop.f32.mrf.mxu0  ;;  %v2084_v20 = vpop.f32.mrf.mxu1 }
 0x513   : > { %v3200_v20 = vld [vmem:[%s634_s20] ss:$0 sm:$0xff] }
 0x514   : > { %3392 = vmatpush3.bf16.msra.mxu0 %v3731_v17  ;;  %3410 = vmatpush3.bf16.msra.mxu1 %v3732_v18  ;;  %v2038_v21 = vpop.f32.mrf.mxu0  ;;  %v3344_v22 = vpop.f32.mrf.mxu1 }
 0x515   : > { %3393 = vmatprep.subr.bf16.mxu0 %v4128_v37  ;;  %3411 = vmatprep.subr.bf16.mxu1 %v4128_v37  ;;  %v3201_v22 = vld [vmem:[%s642_s2] ss:$0 sm:$0xff]  ;;  %s4965_s2 = sld [smem:[#allocation35_spill]] }
 0x516   : > { %v3338_v25 = vpop.f32.mrf.mxu0 }
 0x518   : > { %3394 = vmatpush3.bf16.msra.mxu0 %v3733_v23  ;;  %3412 = vmatpush3.bf16.msra.mxu1 %v3734_v24 }
 0x519   : > { %3395 = vmatprep.subr.bf16.mxu0 %v4128_v37  ;;  %3413 = vmatprep.subr.bf16.mxu1 %v4128_v37 }
 0x51c   : > { %3396 = vmatpush3.bf16.msra.mxu0 %v3735_v26  ;;  %3414 = vmatpush3.bf16.msra.mxu1 %v3736_v27  ;;  %v3756_v26 = vld [vmem:[%s4557_s22 + $0x8] sm:$0xff]   ;;  %v3757_v27 = vld [vmem:[%s4557_s22] sm:$0xff]  }
 0x51d   : > { %3397 = vmatprep.subr.bf16.mxu0 %v4128_v37  ;;  %3415 = vmatprep.subr.bf16.mxu1 %v4128_v37 }
 0x520   : > { %3398 = vmatpush3.bf16.msra.mxu0 %v3737_v28  ;;  %3416 = vmatpush3.bf16.msra.mxu1 %v3738_v29  ;;  %v3202_v28 = vld [vmem:[%s650_s25] ss:$0 sm:$0xff] }
 0x521   : > { %3399 = vmatprep.subr.bf16.mxu0 %v4128_v37  ;;  %3417 = vmatprep.subr.bf16.mxu1 %v4128_v37 }
 0x524   : > { %3400 = vmatpush3.bf16.msra.mxu0 %v3739_v30  ;;  %3418 = vmatpush3.bf16.msra.mxu1 %v3740_v31 }
 0x525   : > { %3419 = vmatprep.subr.bf16.mxu1 %v4128_v37  ;;  %3425 = vmatprep.subr.bf16.mxu0 %v4128_v37 }
 0x527   : > { %3402 = vmatmul.mubr.bf16.vlgmr.msra.gmra.mxu0 %v2329_v33 }
 0x528   : > { %3420 = vmatpush3.bf16.msra.mxu1 %v3741_v32  ;;  %3441 = vmatprep.mubr.msk.bf16.mxu0 %vm4129_vm0, %v4128_v37 }
 0x529   : > { %3445 = vmatprep.subr.bf16.mxu1 %v4128_v37  ;;  %3426 = vmatpush3.bf16.msra.mxu0 %v3742_v60 }
 0x52a   : > { %3427 = vmatprep.subr.bf16.mxu0 %v4128_v37 }
 0x52b   : > { %3422 = vmatmul.mubr.bf16.vlgmr.msra.gmra.mxu1 %v2419_v34 }
 0x52c   : > { %3461 = vmatprep.mubr.msk.bf16.mxu1 %vm4129_vm0, %v4128_v37  ;;  %3446 = vmatpush3.bf16.msra.mxu1 %v3750_v5 }
 0x52d   : > { %3428 = vmatpush3.bf16.msra.mxu0 %v3743_v61  ;;  %3447 = vmatprep.subr.bf16.mxu1 %v4128_v37 }
 0x52e   : > { %3429 = vmatprep.subr.bf16.mxu0 %v4128_v37 }
 0x530   : > { %3448 = vmatpush3.bf16.msra.mxu1 %v3751_v6 }
 0x531   : > { %3430 = vmatpush3.bf16.msra.mxu0 %v3744_v62  ;;  %3449 = vmatprep.subr.bf16.mxu1 %v4128_v37 }
 0x532   : > { %3431 = vmatprep.subr.bf16.mxu0 %v4128_v37 }
 0x534   : > { %3450 = vmatpush3.bf16.msra.mxu1 %v3752_v7 }
 0x535   : > { %3432 = vmatpush3.bf16.msra.mxu0 %v3745_v63  ;;  %3451 = vmatprep.subr.bf16.mxu1 %v4128_v37 }
 0x536   : > { %3433 = vmatprep.subr.bf16.mxu0 %v4128_v37 }
 0x538   : > { %3452 = vmatpush3.bf16.msra.mxu1 %v3753_v8 }
 0x539   : > { %3434 = vmatpush3.bf16.msra.mxu0 %v3746_v0  ;;  %3453 = vmatprep.subr.bf16.mxu1 %v4128_v37 }
 0x53a   : > { %3435 = vmatprep.subr.bf16.mxu0 %v4128_v37 }
 0x53c   : > { %3454 = vmatpush3.bf16.msra.mxu1 %v3754_v9 }
 0x53d   : > { %3436 = vmatpush3.bf16.msra.mxu0 %v3747_v1  ;;  %3455 = vmatprep.subr.bf16.mxu1 %v4128_v37 }
 0x53e   : > { %3437 = vmatprep.subr.bf16.mxu0 %v4128_v37 }
 0x540   : > { %3456 = vmatpush3.bf16.msra.mxu1 %v3755_v10 }
 0x541   : > { %3438 = vmatpush3.bf16.msra.mxu0 %v3748_v2  ;;  %3457 = vmatprep.subr.bf16.mxu1 %v4128_v37 }
 0x542   : > { %3439 = vmatprep.subr.bf16.mxu0 %v4128_v37 }
 0x544   : > { %3458 = vmatpush3.bf16.msra.mxu1 %v3756_v26 }
 0x545   : > { %3440 = vmatpush3.bf16.msra.mxu0 %v3749_v4  ;;  %3459 = vmatprep.subr.bf16.mxu1 %v4128_v37 }
 0x548   : > { %3460 = vmatpush3.bf16.msra.mxu1 %v3757_v27 }
 0x5c7   : > { %v2235_v36 = vpop.f32.mrf.mxu0 }
 0x5c9   : > { %v3363_v38 = vpop.f32.mrf.mxu0 }
 0x5ca   : > { %v3211_v38 = vld [vmem:[%s667_s24] ss:$0 sm:$0xff] }
 0x5cb   : > { %v2238_v40 = vpop.f32.mrf.mxu0  ;;  %v2323_v42 = vpop.f32.mrf.mxu1 }
 0x5cc   : > { %v2324_v46 = vadd.f32 %v2323_v42, %v2235_v36 }
 0x5cd   : > { %v3364_v43 = vpop.f32.mrf.mxu0  ;;  %v3383_v44 = vpop.f32.mrf.mxu1 }
 0x5cf   : > { %v2326_v45 = vpop.f32.mrf.mxu1 }
 0x5d1   : > { %v3384_v35 = vpop.f32.mrf.mxu1 }
 0x5e7   : > { %v2412_v47 = vpop.f32.mrf.mxu0 }
 0x5e8   : > { %v2418_v48 = vadd.f32 %v2412_v47, %v2324_v46 }
 0x5e9   : > { %v3403_v41 = vpop.f32.mrf.mxu0 }
 0x5eb   : > { %v2415_v49 = vpop.f32.mrf.mxu0  ;;  %v2502_v50 = vpop.f32.mrf.mxu1 }
 0x5ec   : > { %v2508_v51 = vadd.f32 %v2502_v50, %v2418_v48 }
 0x5ed   : > { %v3404_v52 = vpop.f32.mrf.mxu0  ;;  %v3423_v53 = vpop.f32.mrf.mxu1 }
 0x5ee   : > { %v2516_v54 = vadd.f32 %v3199_v39, %v2508_v51 }
 0x5ef   : > { %v2505_v55 = vpop.f32.mrf.mxu1 }
 0x5f0   : > { %v2517_v57 = vadd.f32 %v3778_v56, %v2516_v54  ;;  %v3220_v54 = vld [vmem:[%s4963_s30] ss:$0 sm:$0xff] }
 0x5f1   : > { %v3424_v58 = vpop.f32.mrf.mxu1  ;;  %v3221_v56 = vld [vmem:[%s4964_s0] ss:$0 sm:$0xff] }
 0x5f2   : > { %2520 = vadd.xlane.f32.xlu0 %v2517_v57  ;;  %v2523_v59 = vmul.f32 %v2517_v57, %v2517_v57 }
 0x5f4   : > { %2524 = vadd.xlane.f32.xlu1 %v2523_v59 }
 0x67b   : > { %v2521_v3 = vpop.xlane.xlu0 %2520 }
 0x67c   : > { %v2522_v11 = vmul.f32 0.03125, %v2521_v3 }
 0x67d   : > { %v2525_v12 = vpop.xlane.xlu1 %2524 }
 0x67e   : > { %v2527_v13 = vmul.f32 %v2522_v11, %v2522_v11  ;;  %v2526_v14 = vmul.f32 0.03125, %v2525_v12  ;;  %v2530_v18 = vsub.f32 %v2517_v57, %v2522_v11 }
 0x680   : > { %v2528_v15 = vsub.f32 %v2526_v14, %v2527_v13 }
 0x682   : > { %v2529_v16 = vmax.f32 %v2528_v15, 0.0 }
 0x684   : > { %v2531_v17 = vadd.f32 1e-05, %v2529_v16 }
 0x686   : > { %3774 = vrsqrt.f32 %v2531_v17 }
 0x693   : > { %v3775_v19 = vpop.eup %3774 }
 0x694   : > { %v2533_v21 = vmul.f32 %v3775_v19, %v2530_v18 }
 0x696   : > { %v2540_v23 = vmul.f32 %v3200_v20, %v2533_v21 }
 0x698   : > { %v2547_v24 = vadd.f32 %v3201_v22, %v2540_v23 }
 0x69a   : > { %v2548_v25 = vpack.c.bf16 %v2547_v24, %v2547_v24 }
 0x69c   : > { %3442 = vmatmul.mubr.bf16.vlgmr.msra.gmra.mxu0 %v2548_v25 }
 0x75c   : > { %v2654_v29 = vpop.f32.mrf.mxu0 }
 0x75d   : > { %v2655_v30 = vadd.f32 %v3202_v28, %v2654_v29 }
 0x75e   : > { %v3443_v31 = vpop.f32.mrf.mxu0 }
 0x75f   : > { %v2660_v32 = vmax.f32 %v2655_v30, 0.0 }
 0x760   : > { %v2657_v33 = vpop.f32.mrf.mxu0 }
 0x761   : > { %v2661_v34 = vpack.c.bf16 %v2660_v32, %v2660_v32 }
 0x762   : > { %v3444_v36 = vpop.f32.mrf.mxu0 }
 0x763   : > { %3462 = vmatmul.mubr.bf16.vlgmr.msra.gmra.mxu1 %v2661_v34 }
 0x823   : > { %v2767_v40 = vpop.f32.mrf.mxu1 }
 0x824   : > { %v2768_v42 = vadd.f32 %v3211_v38, %v2767_v40 }
 0x825   : > { %v3463_v43 = vpop.f32.mrf.mxu1 }
 0x826   : > { %v2773_v44 = vadd.f32 %v2768_v42, %v2547_v24 }
 0x827   : > { %v2770_v45 = vpop.f32.mrf.mxu1 }
 0x828   : > { %2776 = vadd.xlane.f32.xlu0 %v2773_v44  ;;  %v2779_v37 = vmul.f32 %v2773_v44, %v2773_v44 }
 0x829   : > { %v3464_v35 = vpop.f32.mrf.mxu1 }
 0x82a   : > { %2780 = vadd.xlane.f32.xlu1 %v2779_v37 }
 0x8b1   : > { %v2777_v47 = vpop.xlane.xlu0 %2776 }
 0x8b2   : > { %v2778_v46 = vmul.f32 0.03125, %v2777_v47 }
 0x8b3   : > { %v2781_v41 = vpop.xlane.xlu1 %2780 }
 0x8b4   : > { %v2783_v48 = vmul.f32 %v2778_v46, %v2778_v46  ;;  %v2782_v49 = vmul.f32 0.03125, %v2781_v41  ;;  %v2786_v52 = vsub.f32 %v2773_v44, %v2778_v46 }
 0x8b6   : > { %v2784_v50 = vsub.f32 %v2782_v49, %v2783_v48 }
 0x8b8   : > { %v2785_v39 = vmax.f32 %v2784_v50, 0.0 }
 0x8ba   : > { %v2787_v51 = vadd.f32 1e-05, %v2785_v39 }
 0x8bc   : > { %3776 = vrsqrt.f32 %v2787_v51 }
 0x8c9   : > { %v3777_v53 = vpop.eup %3776 }
 0x8ca   : > { %v2789_v55 = vmul.f32 %v3777_v53, %v2786_v52 }
 0x8cc   : > { %v2796_v57 = vmul.f32 %v3220_v54, %v2789_v55 }
 0x8ce   : > { %v2803_v58 = vadd.f32 %v3221_v56, %v2796_v57 }
 0x8d0   : > { %2804 = vst [vmem:[#allocation2] sm:$0xff] %v2803_v58  ;;  %2805 = vst [vmem:[%s4965_s2] sm:$0xff] %v2803_v58 }
 0x8d1 PF: > { %s4966_s28 = sld [smem:[#allocation26_spill]]  ;;  %s4969_s25 = smov %s4103_s26 }
 0x8d2   : > { %s4967_s22 = sld [smem:[#allocation25_spill]] }
 0x8d3   : > { %s4968_s27 = sld [smem:[#allocation27_spill]] }
 0x8d7   : > { %p36_p10 = scmp.ge.s32.totalorder %s4966_s28, 4  }
 0x8d8   : > { %s4970_s26 = smov %s4967_s22 }
 0x8d9   :  { %38 = sbr.rel (!%p36_p10) target bundleno = 21 (0x15), region = 222 }
 0x8de   :  { %2817 = vsyncpa [#allocation4], 1 }
 0x8df   :  { %2819 = vsyncpa [#allocation4 + $0x1], 1 }
 0x8e0   :  { %2820 = vsyncpa [#allocation6], 1 }
 0x8e1   :  { %2822 = vsyncpa [#allocation6 + $0x1], 1 }
 0x8e2   :  { %2823 = vsyncpa [#allocation9], 1 }
 0x8e3   :  { %2825 = vsyncpa [#allocation9 + $0x1], 1 }
 0x8e4   :  { %2826 = vsyncpa [#allocation12], 1 }
 0x8e5   :  { %2828 = vsyncpa [#allocation12 + $0x1], 1 }
 0x8e6   :  { %2829 = vsyncpa [#allocation15], 1 }
 0x8e7   :  { %2831 = vsyncpa [#allocation15 + $0x1], 1 }
 0x8e8   :  { %2832 = vsyncpa [#allocation18], 1 }
 0x8e9   :  { %2834 = vsyncpa [#allocation18 + $0x1], 1 }

// kernel: cla_model_forward.5
= control target key start
LH: loop header
LB: loop body
LE: loop exit
PB: predicated region body
PF: predicated region fallthrough
CT: control target
= control target key end

     0   :  { %s7075_s0 = inlined_call_operand.hbm [shape: bf16[2,8], index: 0, kind: input, shape index: {}]   ;;  %s7076_s1 = inlined_call_operand.hbm [shape: bf16[2,8], index: 1, kind: input, shape index: {}]   ;;  %s7077_s2 = inlined_call_operand.vmem [shape: f32[8,128], index: 2, kind: input, shape index: {}]   ;;  %s7078_s3 = inlined_call_operand.vmem [shape: f32[8,128], index: 3, kind: input, shape index: {}]   ;;  %s7079_s4 = inlined_call_operand.hbm [shape: bf16[128,128], index: 4, kind: input, shape index: {}]   ;;  %s7080_s5 = inlined_call_operand.hbm [shape: f32[1,128], index: 5, kind: input, shape index: {}]   ;;  %s7081_s6 = inlined_call_operand.hbm [shape: bf16[128,128], index: 6, kind: input, shape index: {}]   ;;  %s7082_s7 = inlined_call_operand.hbm [shape: f32[1,128], index: 7, kind: input, shape index: {}]   ;;  %s7083_s8 = inlined_call_operand.hbm [shape: bf16[128,128], index: 8, kind: input, shape index: {}]   ;;  %s7084_s9 = inlined_call_operand.hbm [shape: f32[1,128], index: 9, kind: input, shape index: {}]   ;;  %s7085_s10 = inlined_call_operand.hbm [shape: bf16[128,128], index: 10, kind: input, shape index: {}]   ;;  %s7086_s11 = inlined_call_operand.hbm [shape: f32[1,128], index: 11, kind: input, shape index: {}]   ;;  %s7087_s12 = inlined_call_operand.hbm [shape: bf16[128,128], index: 12, kind: input, shape index: {}]   ;;  %s7088_s13 = inlined_call_operand.hbm [shape: f32[1,128], index: 13, kind: input, shape index: {}]   ;;  %s7089_s14 = inlined_call_operand.hbm [shape: bf16[128,128], index: 14, kind: input, shape index: {}]   ;;  %s7090_s15 = inlined_call_operand.hbm [shape: f32[1,128], index: 15, kind: input, shape index: {}]   ;;  %s7091_s16 = inlined_call_operand.vmem [shape: bf16[128,1024], index: 16, kind: input, shape index: {}]   ;;  %s7092_s17 = inlined_call_operand.vmem [shape: f32[1,1024], index: 17, kind: input, shape index: {}]   ;;  %s7093_s18 = inlined_call_operand.vmem [shape: bf16[1024,512], index: 18, kind: input, shape index: {}]   ;;  %s7094_s19 = inlined_call_operand.hbm [shape: f32[1,512], index: 19, kind: input, shape index: {}]   ;;  %s7095_s20 = inlined_call_operand.hbm [shape: bf16[512,128], index: 20, kind: input, shape index: {}]   ;;  %s7096_s21 = inlined_call_operand.hbm [shape: f32[1,128], index: 21, kind: input, shape index: {}]   ;;  %s7097_s22 = inlined_call_operand.hbm [shape: bf16[128,128], index: 22, kind: input, shape index: {}]   ;;  %s7098_s23 = inlined_call_operand.hbm [shape: f32[1,128], index: 23, kind: input, shape index: {}]   ;;  %s7099_s24 = inlined_call_operand.hbm [shape: f32[2,128], index: 24, kind: output, shape index: {}]  }
   0x1   :  { %7100 = sst [smem:[#allocation44_spill]] %s7075_s0 }
   0x2   :  { %7101 = sst [smem:[#allocation45_spill]] %s7076_s1 }
   0x3   :  { %7102 = sst [smem:[#allocation46_spill]] %s7077_s2 }
   0x4   :  { %7103 = sst [smem:[#allocation47_spill]] %s7078_s3 }
   0x5   :  { %7104 = sst [smem:[#allocation48_spill]] %s7079_s4 }
   0x6   :  { %7105 = sst [smem:[#allocation49_spill]] %s7080_s5 }
   0x7   :  { %7106 = sst [smem:[#allocation50_spill]] %s7081_s6 }
   0x8   :  { %7107 = sst [smem:[#allocation51_spill]] %s7082_s7 }
   0x9   :  { %7108 = sst [smem:[#allocation52_spill]] %s7083_s8 }
   0xa   :  { %29 = vsyncpa [#allocation3], 0 }
   0xb   :  { %30 = vsyncpa [#allocation6], 0 }
   0xc   :  { %31 = vsyncpa [#allocation9], 0 }
   0xd   :  { %32 = vsyncpa [#allocation12], 0 }
   0xe   :  { %33 = vsyncpa [#allocation15], 0 }
   0xf   :  { %34 = vsyncpa [#allocation18], 0 }
  0x10   :  { %35 = vsyncpa [#allocation21], 0 }
  0x11   :  { %36 = vsyncpa [#allocation24], 0 }
  0x12   :  { %37 = vsyncpa [#allocation27], 0 }
  0x13   :  { %38 = vsyncpa [#allocation30], 0 }
  0x14   :  { %39 = vsyncpa [#allocation4], 0  ;;  %s5695_s5 = smov [#allocation5]   ;;  %s5696_s27 = smov [#allocation8]  }
  0x15   :  { %s56_s26 = sshll.u32 %s5695_s5, 4  ;;  %s82_s28 = sshll.u32 %s5696_s27, 4  ;;  %s57_s26 = int_to_ptr.vmem [resolvable:$true] %s56_s26  ;;  %s83_s28 = int_to_ptr.vmem [resolvable:$true] %s82_s28 }
  0x16   :  { %s5281_s6 = scalar_lea.vmem %s57_s26, 16  ;;  %s5285_s2 = scalar_lea.vmem %s57_s26, 32 }
  0x17   :  { %p5282_p0 = scmp.ne.s32.totalorder %s57_s26, %s5281_s6  ;;  %p5286_p1 = scmp.lt.s32.totalorder %s57_s26, %s57_s26 }
  0x18   :  { %p5287_p2 = scmp.lt.s32.totalorder %s5285_s2, %s5281_s6 }
  0x1a   :  { %p5288_p3 = por %p5287_p2, %p5286_p1 }
  0x1c   :  { %p5289_p4 = pnand %p5288_p3, %p5282_p0 }
  0x1e   :  { %5292 = shalt.err (!%p5289_p4)
}
  0x1f   :  { %s7109_s7 = sld [smem:[#allocation45_spill]]  ;;  %s5301_s30 = scalar_lea.vmem %s83_s28, 16 }
  0x20   :  { %p5302_p5 = scmp.ne.s32.totalorder %s83_s28, %s5301_s30  ;;  %s5305_s3 = scalar_lea.vmem %s83_s28, 32 }
  0x21   :  { %p5306_p6 = scmp.lt.s32.totalorder %s83_s28, %s83_s28  ;;  %p5307_p7 = scmp.lt.s32.totalorder %s5305_s3, %s5301_s30 }
  0x23   :  { %p5308_p8 = por %p5307_p7, %p5306_p6 }
  0x25   :  { %59 = dma.hbm_to_vmem [thread:$0]  %s7109_s7, 16, %s57_s26, [#allocation6]  }
  0x26   :  { %p5309_p9 = pnand %p5308_p8, %p5302_p5 }
  0x28   :  { %5312 = shalt.err (!%p5309_p9)
}
  0x29   :  { %s7110_s4 = sld [smem:[#allocation49_spill]]  ;;  %s5697_s1 = smov [#allocation11]  }
  0x2a   :  { %s104_s5 = sshll.u32 %s5697_s1, 4  ;;  %s5698_s27 = smov [#allocation14]   ;;  %s105_s5 = int_to_ptr.vmem [resolvable:$true] %s104_s5 }
  0x2b   :  { %s126_s6 = sshll.u32 %s5698_s27, 4  ;;  %s5321_s2 = scalar_lea.vmem %s105_s5, 16  ;;  %s127_s6 = int_to_ptr.vmem [resolvable:$true] %s126_s6 }
  0x2c   :  { %p5322_p10 = scmp.ne.s32.totalorder %s105_s5, %s5321_s2  ;;  %s5325_s26 = scalar_lea.vmem %s105_s5, 32 }
  0x2d   :  { %p5326_p11 = scmp.lt.s32.totalorder %s105_s5, %s105_s5  ;;  %p5327_p12 = scmp.lt.s32.totalorder %s5325_s26, %s5321_s2 }
  0x2f   :  { %85 = dma.hbm_to_vmem [thread:$0]  %s7110_s4, 16, %s83_s28, [#allocation9]  }
  0x30   :  { %p5328_p13 = por %p5327_p12, %p5326_p11 }
  0x32   :  { %p5329_p0 = pnand %p5328_p13, %p5322_p10 }
  0x34   :  { %5332 = shalt.err (!%p5329_p0)
}
  0x35   :  { %s7111_s7 = sld [smem:[#allocation51_spill]]  ;;  %s5341_s30 = scalar_lea.vmem %s127_s6, 16 }
  0x36   :  { %p5342_p1 = scmp.ne.s32.totalorder %s127_s6, %s5341_s30  ;;  %s5345_s28 = scalar_lea.vmem %s127_s6, 32 }
  0x37   :  { %p5346_p2 = scmp.lt.s32.totalorder %s127_s6, %s127_s6  ;;  %p5347_p3 = scmp.lt.s32.totalorder %s5345_s28, %s5341_s30 }
  0x39   :  { %p5348_p4 = por %p5347_p3, %p5346_p2 }
  0x3b   :  { %107 = dma.hbm_to_vmem [thread:$0]  %s7111_s7, 16, %s105_s5, [#allocation12]  }
  0x3c   :  { %p5349_p5 = pnand %p5348_p4, %p5342_p1 }
  0x3e   :  { %5352 = shalt.err (!%p5349_p5)
}
  0x3f   :  { %129 = dma.hbm_to_vmem [thread:$0]  %s7084_s9, 16, %s127_s6, [#allocation15]  }
  0x40   :  { %s5699_s8 = smov [#allocation17]   ;;  %s5700_s1 = smov [#allocation20]  }
  0x41   :  { %s148_s4 = sshll.u32 %s5699_s8, 4  ;;  %s170_s27 = sshll.u32 %s5700_s1, 4  ;;  %s149_s4 = int_to_ptr.vmem [resolvable:$true] %s148_s4  ;;  %s171_s27 = int_to_ptr.vmem [resolvable:$true] %s170_s27 }
  0x42   :  { %s5361_s2 = scalar_lea.vmem %s149_s4, 16  ;;  %s5365_s5 = scalar_lea.vmem %s149_s4, 32 }
  0x43   :  { %p5362_p6 = scmp.ne.s32.totalorder %s149_s4, %s5361_s2  ;;  %p5366_p7 = scmp.lt.s32.totalorder %s149_s4, %s149_s4 }
  0x44   :  { %p5367_p8 = scmp.lt.s32.totalorder %s5365_s5, %s5361_s2 }
  0x46   :  { %p5368_p9 = por %p5367_p8, %p5366_p7 }
  0x48   :  { %p5369_p10 = pnand %p5368_p9, %p5362_p6 }
  0x4a   :  { %5372 = shalt.err (!%p5369_p10)
}
  0x4b   :  { %151 = dma.hbm_to_vmem [thread:$0]  %s7086_s11, 16, %s149_s4, [#allocation18]  }
  0x4c   :  { %s5381_s0 = scalar_lea.vmem %s171_s27, 16  ;;  %s5385_s9 = scalar_lea.vmem %s171_s27, 32 }
  0x4d   :  { %p5382_p11 = scmp.ne.s32.totalorder %s171_s27, %s5381_s0  ;;  %p5386_p12 = scmp.lt.s32.totalorder %s171_s27, %s171_s27 }
  0x4e   :  { %p5387_p13 = scmp.lt.s32.totalorder %s5385_s9, %s5381_s0 }
  0x50   :  { %p5388_p0 = por %p5387_p13, %p5386_p12 }
  0x52   :  { %p5389_p1 = pnand %p5388_p0, %p5382_p11 }
  0x54   :  { %5392 = shalt.err (!%p5389_p1)
}
  0x55   :  { %173 = dma.hbm_to_vmem [thread:$0]  %s7088_s13, 16, %s171_s27, [#allocation21]  }
  0x56   :  { %s5701_s30 = smov [#allocation23]  }
  0x57   :  { %s192_s28 = sshll.u32 %s5701_s30, 4  ;;  %s193_s28 = int_to_ptr.vmem [resolvable:$true] %s192_s28 }
  0x58   :  { %s5401_s3 = scalar_lea.vmem %s193_s28, 16  ;;  %s5405_s25 = scalar_lea.vmem %s193_s28, 32 }
  0x59   :  { %p5402_p2 = scmp.ne.s32.totalorder %s193_s28, %s5401_s3  ;;  %p5406_p3 = scmp.lt.s32.totalorder %s193_s28, %s193_s28 }
  0x5a   :  { %p5407_p4 = scmp.lt.s32.totalorder %s5405_s25, %s5401_s3 }
  0x5c   :  { %p5408_p5 = por %p5407_p4, %p5406_p3 }
  0x5e   :  { %p5409_p6 = pnand %p5408_p5, %p5402_p2 }
  0x60   :  { %5412 = shalt.err (!%p5409_p6)
}
  0x61   :  { %195 = dma.hbm_to_vmem [thread:$0]  %s7090_s15, 16, %s193_s28, [#allocation24]  }
  0x62   :  { %s5702_s4 = smov [#allocation26]   ;;  %s5703_s2 = smov [#allocation29]  }
  0x63   :  { %s217_s1 = sshll.u32 %s5702_s4, 4  ;;  %s239_s13 = sshll.u32 %s5703_s2, 4  ;;  %s218_s1 = int_to_ptr.vmem [resolvable:$true] %s217_s1  ;;  %s240_s13 = int_to_ptr.vmem [resolvable:$true] %s239_s13 }
  0x64   :  { %s5421_s27 = scalar_lea.vmem %s218_s1, 4096  ;;  %p5426_p8 = scmp.lt.s32.totalorder %s218_s1, %s218_s1 }
  0x65   :  { %p5422_p7 = scmp.ne.s32.totalorder %s218_s1, %s5421_s27  ;;  %p5427_p9 = scmp.lt.s32.totalorder %s5421_s27, %s5421_s27 }
  0x67   :  { %p5428_p10 = por %p5427_p9, %p5426_p8 }
  0x69   :  { %p5429_p11 = pnand %p5428_p10, %p5422_p7 }
  0x6b   :  { %5432 = shalt.err (!%p5429_p11)
}
  0x6c   :  { %s5704_s5 = smov 64   ;;  %s5705_s26 = smov 4  }
  0x6d   :  { %223 = dma.hbm_to_vmem [thread:$0]  %s7095_s20, 4096, %s218_s1, [#allocation27], %s5704_s5, %s5704_s5, %s5705_s26  }
  0x6e   :  { %s5441_s15 = scalar_lea.vmem %s240_s13, 1024  ;;  %p5446_p13 = scmp.lt.s32.totalorder %s240_s13, %s240_s13 }
  0x6f   :  { %p5442_p12 = scmp.ne.s32.totalorder %s240_s13, %s5441_s15  ;;  %p5447_p0 = scmp.lt.s32.totalorder %s5441_s15, %s5441_s15 }
  0x71   :  { %p5448_p1 = por %p5447_p0, %p5446_p13 }
  0x73   :  { %p5449_p2 = pnand %p5448_p1, %p5442_p12 }
  0x75   :  { %5452 = shalt.err (!%p5449_p2)
}
  0x76   :  { %245 = dma.hbm_to_vmem [thread:$0]  %s7097_s22, 1024, %s240_s13, [#allocation30], %s5704_s5, %s5704_s5, %s5705_s26  }
  0x77   :  { %s5706_s7 = smov [#allocation2]   ;;  %s5707_s28 = smov [#allocation7]  }
  0x78   :  { %s46_s30 = sshll.u32 %s5706_s7, 4  ;;  %s69_s20 = sshll.u32 %s5707_s28, 4  ;;  %s47_s30 = int_to_ptr.vmem [resolvable:$true] %s46_s30  ;;  %s70_s20 = int_to_ptr.vmem [resolvable:$true] %s69_s20 }
  0x79   :  { %s5461_s3 = scalar_lea.vmem %s47_s30, 16  ;;  %s5465_s25 = scalar_lea.vmem %s47_s30, 32 }
  0x7a   :  { %p5462_p3 = scmp.ne.s32.totalorder %s47_s30, %s5461_s3  ;;  %p5466_p4 = scmp.lt.s32.totalorder %s47_s30, %s47_s30 }
  0x7b   :  { %p5467_p5 = scmp.lt.s32.totalorder %s5465_s25, %s5461_s3 }
  0x7d   :  { %p5468_p6 = por %p5467_p5, %p5466_p4 }
  0x7f   :  { %p5469_p7 = pnand %p5468_p6, %p5462_p3 }
  0x81   :  { %5472 = shalt.err (!%p5469_p7)
}
  0x82   :  { %s7112_s4 = sld [smem:[#allocation44_spill]]  ;;  %s5481_s1 = scalar_lea.vmem %s70_s20, 1024 }
  0x83   :  { %p5482_p8 = scmp.ne.s32.totalorder %s70_s20, %s5481_s1  ;;  %p5486_p9 = scmp.lt.s32.totalorder %s70_s20, %s70_s20 }
  0x84   :  { %p5487_p10 = scmp.lt.s32.totalorder %s5481_s1, %s5481_s1 }
  0x86   :  { %p5488_p11 = por %p5487_p10, %p5486_p9 }
  0x88   :  { %49 = dma.hbm_to_vmem [thread:$0]  %s7112_s4, 16, %s47_s30, [#allocation3]  }
  0x89   :  { %p5489_p12 = pnand %p5488_p11, %p5482_p8 }
  0x8b   :  { %5492 = shalt.err (!%p5489_p12)
}
  0x8c   :  { %s7113_s13 = sld [smem:[#allocation48_spill]]  ;;  %s5708_s27 = smov [#allocation10]  }
  0x8d   :  { %s91_s29 = sshll.u32 %s5708_s27, 4  ;;  %s5709_s0 = smov [#allocation13]   ;;  %s92_s29 = int_to_ptr.vmem [resolvable:$true] %s91_s29 }
  0x8e   :  { %s113_s15 = sshll.u32 %s5709_s0, 4  ;;  %s5501_s9 = scalar_lea.vmem %s92_s29, 1024  ;;  %s114_s15 = int_to_ptr.vmem [resolvable:$true] %s113_s15 }
  0x8f   :  { %p5502_p13 = scmp.ne.s32.totalorder %s92_s29, %s5501_s9  ;;  %p5506_p0 = scmp.lt.s32.totalorder %s92_s29, %s92_s29 }
  0x90   :  { %p5507_p1 = scmp.lt.s32.totalorder %s5501_s9, %s5501_s9 }
  0x92   :  { %75 = dma.hbm_to_vmem [thread:$0]  %s7113_s13, 1024, %s70_s20, [#allocation6], %s5704_s5, %s5704_s5, %s5705_s26  }
  0x93   :  { %p5508_p2 = por %p5507_p1, %p5506_p0 }
  0x95   :  { %p5509_p3 = pnand %p5508_p2, %p5502_p13 }
  0x97   :  { %5512 = shalt.err (!%p5509_p3)
}
  0x98   :  { %s7114_s30 = sld [smem:[#allocation50_spill]]  ;;  %s5521_s28 = scalar_lea.vmem %s114_s15, 1024 }
  0x99   :  { %p5522_p4 = scmp.ne.s32.totalorder %s114_s15, %s5521_s28  ;;  %p5526_p5 = scmp.lt.s32.totalorder %s114_s15, %s114_s15 }
  0x9a   :  { %p5527_p6 = scmp.lt.s32.totalorder %s5521_s28, %s5521_s28 }
  0x9c   :  { %p5528_p7 = por %p5527_p6, %p5526_p5 }
  0x9e   :  { %97 = dma.hbm_to_vmem [thread:$0]  %s7114_s30, 1024, %s92_s29, [#allocation9], %s5704_s5, %s5704_s5, %s5705_s26  }
  0x9f   :  { %p5529_p8 = pnand %p5528_p7, %p5522_p4 }
  0xa1   :  { %5532 = shalt.err (!%p5529_p8)
}
  0xa2   :  { %s7115_s25 = sld [smem:[#allocation52_spill]]  ;;  %s5710_s11 = smov [#allocation16]  }
  0xa3   :  { %s135_s8 = sshll.u32 %s5710_s11, 4  ;;  %s5711_s4 = smov [#allocation19]   ;;  %s136_s8 = int_to_ptr.vmem [resolvable:$true] %s135_s8 }
  0xa4   :  { %s157_s1 = sshll.u32 %s5711_s4, 4  ;;  %s5541_s22 = scalar_lea.vmem %s136_s8, 1024  ;;  %s158_s1 = int_to_ptr.vmem [resolvable:$true] %s157_s1 }
  0xa5   :  { %p5542_p9 = scmp.ne.s32.totalorder %s136_s8, %s5541_s22  ;;  %p5546_p10 = scmp.lt.s32.totalorder %s136_s8, %s136_s8 }
  0xa6   :  { %p5547_p11 = scmp.lt.s32.totalorder %s5541_s22, %s5541_s22 }
  0xa8   :  { %119 = dma.hbm_to_vmem [thread:$0]  %s7115_s25, 1024, %s114_s15, [#allocation12], %s5704_s5, %s5704_s5, %s5705_s26  }
  0xa9   :  { %p5548_p12 = por %p5547_p11, %p5546_p10 }
  0xab   :  { %p5549_p13 = pnand %p5548_p12, %p5542_p9 }
  0xad   :  { %5552 = shalt.err (!%p5549_p13)
}
  0xae   :  { %141 = dma.hbm_to_vmem [thread:$0]  %s7085_s10, 1024, %s136_s8, [#allocation15], %s5704_s5, %s5704_s5, %s5705_s26  }
  0xaf   :  { %s5561_s27 = scalar_lea.vmem %s158_s1, 1024  ;;  %p5566_p1 = scmp.lt.s32.totalorder %s158_s1, %s158_s1 }
  0xb0   :  { %p5562_p0 = scmp.ne.s32.totalorder %s158_s1, %s5561_s27  ;;  %p5567_p2 = scmp.lt.s32.totalorder %s5561_s27, %s5561_s27 }
  0xb2   :  { %p5568_p3 = por %p5567_p2, %p5566_p1 }
  0xb4   :  { %p5569_p4 = pnand %p5568_p3, %p5562_p0 }
  0xb6   :  { %5572 = shalt.err (!%p5569_p4)
}
  0xb7   :  { %163 = dma.hbm_to_vmem [thread:$0]  %s7087_s12, 1024, %s158_s1, [#allocation18], %s5704_s5, %s5704_s5, %s5705_s26  }
  0xb8   :  { %s5712_s15 = smov [#allocation22]   ;;  %s5713_s6 = smov [#allocation25]  }
  0xb9   :  { %s179_s9 = sshll.u32 %s5712_s15, 4  ;;  %s208_s10 = sshll.u32 %s5713_s6, 4  ;;  %s180_s9 = int_to_ptr.vmem [resolvable:$true] %s179_s9  ;;  %s209_s10 = int_to_ptr.vmem [resolvable:$true] %s208_s10 }
  0xba   :  { %s5581_s7 = scalar_lea.vmem %s180_s9, 1024  ;;  %p5586_p6 = scmp.lt.s32.totalorder %s180_s9, %s180_s9 }
  0xbb   :  { %p5582_p5 = scmp.ne.s32.totalorder %s180_s9, %s5581_s7  ;;  %p5587_p7 = scmp.lt.s32.totalorder %s5581_s7, %s5581_s7 }
  0xbd   :  { %p5588_p8 = por %p5587_p7, %p5586_p6 }
  0xbf   :  { %p5589_p9 = pnand %p5588_p8, %p5582_p5 }
  0xc1   :  { %5592 = shalt.err (!%p5589_p9)
}
  0xc2   :  { %185 = dma.hbm_to_vmem [thread:$0]  %s7089_s14, 1024, %s180_s9, [#allocation21], %s5704_s5, %s5704_s5, %s5705_s26  }
  0xc3   :  { %s5601_s12 = scalar_lea.vmem %s209_s10, 64  ;;  %p5606_p11 = scmp.lt.s32.totalorder %s209_s10, %s209_s10 }
  0xc4   :  { %p5602_p10 = scmp.ne.s32.totalorder %s209_s10, %s5601_s12  ;;  %p5607_p12 = scmp.lt.s32.totalorder %s5601_s12, %s5601_s12 }
  0xc6   :  { %p5608_p13 = por %p5607_p12, %p5606_p11 }
  0xc8   :  { %p5609_p0 = pnand %p5608_p13, %p5602_p10 }
  0xca   :  { %5612 = shalt.err (!%p5609_p0)
}
  0xcb   :  { %211 = dma.hbm_to_vmem [thread:$0]  %s7094_s19, 64, %s209_s10, [#allocation24]  }
  0xcc   :  { %s5714_s25 = smov [#allocation28]   ;;  %s5715_s8 = smov [#allocation31]  }
  0xcd   :  { %s230_s11 = sshll.u32 %s5714_s25, 4  ;;  %s252_s4 = sshll.u32 %s5715_s8, 4  ;;  %s231_s11 = int_to_ptr.vmem [resolvable:$true] %s230_s11  ;;  %s253_s4 = int_to_ptr.vmem [resolvable:$true] %s252_s4 }
  0xce   :  { %s5621_s1 = scalar_lea.vmem %s231_s11, 16  ;;  %s5625_s14 = scalar_lea.vmem %s231_s11, 32 }
  0xcf   :  { %p5622_p1 = scmp.ne.s32.totalorder %s231_s11, %s5621_s1  ;;  %p5626_p2 = scmp.lt.s32.totalorder %s231_s11, %s231_s11 }
  0xd0   :  { %p5627_p3 = scmp.lt.s32.totalorder %s5625_s14, %s5621_s1 }
  0xd2   :  { %p5628_p4 = por %p5627_p3, %p5626_p2 }
  0xd4   :  { %p5629_p5 = pnand %p5628_p4, %p5622_p1 }
  0xd6   :  { %5632 = shalt.err (!%p5629_p5)
}
  0xd7   :  { %233 = dma.hbm_to_vmem [thread:$0]  %s7096_s21, 16, %s231_s11, [#allocation27]  }
  0xd8   :  { %s5641_s22 = scalar_lea.vmem %s253_s4, 16  ;;  %s5645_s19 = scalar_lea.vmem %s253_s4, 32 }
  0xd9   :  { %p5642_p6 = scmp.ne.s32.totalorder %s253_s4, %s5641_s22  ;;  %p5646_p7 = scmp.lt.s32.totalorder %s253_s4, %s253_s4 }
  0xda   :  { %p5647_p8 = scmp.lt.s32.totalorder %s5645_s19, %s5641_s22 }
  0xdc   :  { %p5648_p9 = por %p5647_p8, %p5646_p7 }
  0xde   :  { %p5649_p10 = pnand %p5648_p9, %p5642_p6 }
  0xe0   :  { %5652 = shalt.err (!%p5649_p10)
}
  0xe1   :  { %255 = dma.hbm_to_vmem [thread:$0]  %s7098_s23, 16, %s253_s4, [#allocation30]  }
  0xe2   :  { %5673 = dma.done.wait [#allocation3], 16  }
  0xe3   :  { %5674 = vsyncadd [#allocation3], 4294967280 }
  0xe4   :  { %5675 = dma.done.wait [#allocation6], 1040  }
  0xe5   :  { %5676 = vsyncadd [#allocation6], 4294966256 }
  0xe6   :  { %5677 = dma.done.wait [#allocation9], 1040  }
  0xe7   :  { %5678 = vsyncadd [#allocation9], 4294966256 }
  0xe8   :  { %5679 = dma.done.wait [#allocation12], 1040  }
  0xe9   :  { %5680 = vsyncadd [#allocation12], 4294966256 }
  0xea   :  { %5681 = dma.done.wait [#allocation15], 1040  }
  0xeb   :  { %5682 = vsyncadd [#allocation15], 4294966256 }
  0xec   :  { %5683 = dma.done.wait [#allocation18], 1040  }
  0xed   :  { %5684 = vsyncadd [#allocation18], 4294966256 }
  0xee   :  { %5685 = dma.done.wait [#allocation21], 1040  }
  0xef   :  { %5686 = vsyncadd [#allocation21], 4294966256 }
  0xf0   :  { %5687 = dma.done.wait [#allocation24], 80  }
  0xf1   :  { %5688 = vsyncadd [#allocation24], 4294967216 }
  0xf2   :  { %5689 = dma.done.wait [#allocation27], 4112  }
  0xf3   :  { %5690 = vsyncadd [#allocation27], 4294963184 }
  0xf4   :  { %5691 = dma.done.wait [#allocation30], 1040  }
  0xf5   :  { %5692 = vsyncadd [#allocation30], 4294966256  ;;  %v5716_v0 = vmov 0.0   ;;  %vm5717_vm0 = vmmov 0   ;;  %s7116_s27 = sld [smem:[#allocation46_spill]]  ;;  %vm321_vm1 = vcmask 1043456  }
  0xf6   :  { %4618 = vmatprep.subr.bf16.mxu1 %v5716_v0  ;;  %4620 = vmatprep.mubr.msk.bf16.mxu1 %vm5717_vm0, %v5716_v0  ;;  %s7117_s15 = sld [smem:[#allocation47_spill]]  ;;  %v4795_v5 = vld [vmem:[#allocation7 + $0x38] sm:$0xff]   ;;  %vm317_vm2 = vcmask 64512   ;;  %v4797_v9 = vld [vmem:[#allocation7 + $0x30] sm:$0xff]   ;;  %v4799_v10 = vld [vmem:[#allocation7 + $0x28] sm:$0xff]   ;;  %vm972_vm3 = vcmask 1041408  }
  0xf7   :  { %4630 = vmatprep.subr.bf16.mxu0 %v5716_v0  ;;  %4646 = vmatprep.mubr.msk.bf16.mxu0 %vm5717_vm0, %v5716_v0  ;;  %v314_v7 = vld [vmem:[#allocation2] sm:$0x1]  ;;  %v365_v11 = vld [vmem:[#allocation5] sm:$0x1]  ;;  %v4801_v13 = vld [vmem:[#allocation7 + $0x20] sm:$0xff]  }
  0xf8   :  { %4631 = vmatpush3.bf16.msra.mxu0 %v4795_v5  ;;  %v4796_v12 = vld [vmem:[#allocation10 + $0x38] sm:$0xff]   ;;  %v4798_v14 = vld [vmem:[#allocation10 + $0x30] sm:$0xff]   ;;  %v4800_v16 = vld [vmem:[#allocation10 + $0x28] sm:$0xff]  }
  0xf9   :  { %4632 = vmatprep.subr.bf16.mxu0 %v5716_v0  ;;  %v4803_v15 = vld [vmem:[#allocation7 + $0x18] sm:$0xff]   ;;  %v4805_v17 = vld [vmem:[#allocation7 + $0x10] sm:$0xff]   ;;  %v4802_v18 = vld [vmem:[#allocation10 + $0x20] sm:$0xff]  }
  0xfa   :  { %v4807_v19 = vld [vmem:[#allocation7 + $0x8] sm:$0xff]   ;;  %v4804_v20 = vld [vmem:[#allocation10 + $0x18] sm:$0xff]   ;;  %v4806_v22 = vld [vmem:[#allocation10 + $0x10] sm:$0xff]  }
  0xfb   :  { %v315_v1 = vld [vmem:[%s7116_s27] sm:$0xff]  ;;  %v4808_v23 = vld [vmem:[#allocation10 + $0x8] sm:$0xff]   ;;  %v4813_v31 = vld [vmem:[#allocation13 + $0x30] sm:$0xff]  }
  0xfc   :  { %v366_v2 = vld [vmem:[%s7117_s15] sm:$0xff]  ;;  %v316_v3 = vpack.c.bf16 %v315_v1, %v315_v1  ;;  %4633 = vmatpush3.bf16.msra.mxu0 %v4797_v9  ;;  %v4815_v34 = vld [vmem:[#allocation13 + $0x28] sm:$0xff]   ;;  %v4817_v38 = vld [vmem:[#allocation13 + $0x20] sm:$0xff]  }
  0xfd   :  { %v367_v4 = vpack.c.bf16 %v366_v2, %v366_v2  ;;  %4634 = vmatprep.subr.bf16.mxu0 %v5716_v0  ;;  %v4809_v21 = vld [vmem:[#allocation7] sm:$0xff]   ;;  %v4814_v32 = vld [vmem:[#allocation16 + $0x30] sm:$0xff]   ;;  %v4816_v35 = vld [vmem:[#allocation16 + $0x28] sm:$0xff]  }
  0xfe   :  { %v323_v6 = vsel %vm321_vm1, %v316_v3, 0  ;;  %v4810_v24 = vld [vmem:[#allocation10] sm:$0xff]   ;;  %v4821_v44 = vld [vmem:[#allocation13 + $0x10] sm:$0xff]   ;;  %v4823_v46 = vld [vmem:[#allocation13 + $0x8] sm:$0xff]  }
  0xff   :  { %4619 = vmatpush3.bf16.msra.mxu1 %v323_v6  ;;  %v372_v8 = vsel %vm321_vm1, %v367_v4, 0  ;;  %v4811_v26 = vld [vmem:[#allocation13 + $0x38] sm:$0xff]   ;;  %v4818_v39 = vld [vmem:[#allocation16 + $0x20] sm:$0xff]   ;;  %v4824_v47 = vld [vmem:[#allocation16 + $0x8] sm:$0xff]  }
 0x100   :  { %4624 = vmatprep.subr.bf16.mxu1 %v5716_v0  ;;  %4635 = vmatpush3.bf16.msra.mxu0 %v4799_v10  ;;  %v4812_v27 = vld [vmem:[#allocation16 + $0x38] sm:$0xff]   ;;  %v4822_v45 = vld [vmem:[#allocation16 + $0x10] sm:$0xff]   ;;  %v4826_v49 = vld [vmem:[#allocation16] sm:$0xff]  }
 0x101   :  { %4636 = vmatprep.subr.bf16.mxu0 %v5716_v0  ;;  %v4819_v42 = vld [vmem:[#allocation13 + $0x18] sm:$0xff]   ;;  %v4825_v48 = vld [vmem:[#allocation13] sm:$0xff]   ;;  %v4829_v53 = vld [vmem:[#allocation19 + $0x28] sm:$0xff]  }
 0x102   :  { %4621 = vmatmul.mubr.msk.bf16.vlgmr.msra.gmra.mxu1 %vm317_vm2, %v314_v7  ;;  %v4820_v43 = vld [vmem:[#allocation16 + $0x18] sm:$0xff]   ;;  %v4830_v54 = vld [vmem:[#allocation19 + $0x20] sm:$0xff]   ;;  %v4833_v57 = vld [vmem:[#allocation19 + $0x8] sm:$0xff]  }
 0x103   :  { %4625 = vmatpush3.bf16.msra.mxu1 %v372_v8  ;;  %4626 = vmatprep.mubr.msk.bf16.mxu1 %vm5717_vm0, %v5716_v0  ;;  %v4827_v51 = vld [vmem:[#allocation19 + $0x38] sm:$0xff]   ;;  %v4828_v52 = vld [vmem:[#allocation19 + $0x30] sm:$0xff]   ;;  %v4834_v58 = vld [vmem:[#allocation19] sm:$0xff]  }
 0x104   :  { %4650 = vmatprep.subr.bf16.mxu1 %v5716_v0  ;;  %4637 = vmatpush3.bf16.msra.mxu0 %v4801_v13  ;;  %v4831_v55 = vld [vmem:[#allocation19 + $0x18] sm:$0xff]   ;;  %v4832_v56 = vld [vmem:[#allocation19 + $0x10] sm:$0xff]  }
 0x105   :  { %4638 = vmatprep.subr.bf16.mxu0 %v5716_v0  ;;  %v4091_v59 = vld [vmem:[#allocation8] ss:$0 sm:$0xff]  ;;  %v4100_v60 = vld [vmem:[#allocation11] ss:$0 sm:$0xff]  ;;  %v4109_v10 = vld [vmem:[#allocation14] ss:$0 sm:$0xff] }
 0x108   :  { %4639 = vmatpush3.bf16.msra.mxu0 %v4803_v15 }
 0x109   :  { %4640 = vmatprep.subr.bf16.mxu0 %v5716_v0 }
 0x10a   :  { %4627 = vmatmul.mubr.msk.bf16.vlgmr.msra.gmra.mxu1 %vm317_vm2, %v365_v11 }
 0x10b   :  { %4651 = vmatpush3.bf16.msra.mxu1 %v4796_v12  ;;  %4666 = vmatprep.mubr.msk.bf16.mxu1 %vm5717_vm0, %v5716_v0 }
 0x10c   :  { %4652 = vmatprep.subr.bf16.mxu1 %v5716_v0  ;;  %4641 = vmatpush3.bf16.msra.mxu0 %v4805_v17 }
 0x10d   :  { %4642 = vmatprep.subr.bf16.mxu0 %v5716_v0 }
 0x10f   :  { %4653 = vmatpush3.bf16.msra.mxu1 %v4798_v14 }
 0x110   :  { %4654 = vmatprep.subr.bf16.mxu1 %v5716_v0  ;;  %4643 = vmatpush3.bf16.msra.mxu0 %v4807_v19 }
 0x111   :  { %4644 = vmatprep.subr.bf16.mxu0 %v5716_v0 }
 0x113   :  { %4655 = vmatpush3.bf16.msra.mxu1 %v4800_v16 }
 0x114   :  { %4656 = vmatprep.subr.bf16.mxu1 %v5716_v0  ;;  %4645 = vmatpush3.bf16.msra.mxu0 %v4809_v21 }
 0x115   :  { %4670 = vmatprep.subr.bf16.mxu0 %v5716_v0 }
 0x117   :  { %4657 = vmatpush3.bf16.msra.mxu1 %v4802_v18 }
 0x118   :  { %4658 = vmatprep.subr.bf16.mxu1 %v5716_v0 }
 0x11b   :  { %4659 = vmatpush3.bf16.msra.mxu1 %v4804_v20 }
 0x11c   :  { %4660 = vmatprep.subr.bf16.mxu1 %v5716_v0 }
 0x11f   :  { %4661 = vmatpush3.bf16.msra.mxu1 %v4806_v22  ;;  %v4835_v22 = vld [vmem:[#allocation22 + $0x38] sm:$0xff]  }
 0x120   :  { %4662 = vmatprep.subr.bf16.mxu1 %v5716_v0 }
 0x123   :  { %4663 = vmatpush3.bf16.msra.mxu1 %v4808_v23 }
 0x124   :  { %4664 = vmatprep.subr.bf16.mxu1 %v5716_v0 }
 0x127   :  { %4665 = vmatpush3.bf16.msra.mxu1 %v4810_v24  ;;  %v4836_v24 = vld [vmem:[#allocation22 + $0x30] sm:$0xff]  }
 0x128   :  { %4690 = vmatprep.subr.bf16.mxu1 %v5716_v0 }
 0x1c2   :  { %v359_v25 = vpop.f32.mrf.mxu1 }
 0x1c3   :  { %v414_v28 = vpack.c.bf16 %v359_v25, %v359_v25 }
 0x1c4   :  { %v4622_v29 = vpop.f32.mrf.mxu1 }
 0x1c5   :  { %4647 = vmatmul.mubr.bf16.vlgmr.msra.gmra.mxu0 %v414_v28  ;;  %4667 = vmatmul.mubr.bf16.vlgmr.msra.gmra.mxu1 %v414_v28  ;;  %v4838_v29 = vld [vmem:[#allocation22 + $0x20] sm:$0xff]  }
 0x1c6   :  { %4671 = vmatpush3.bf16.msra.mxu0 %v4811_v26  ;;  %4691 = vmatpush3.bf16.msra.mxu1 %v4812_v27  ;;  %v362_v30 = vpop.f32.mrf.mxu1  ;;  %v4837_v27 = vld [vmem:[#allocation22 + $0x28] sm:$0xff]  }
 0x1c7   :  { %4672 = vmatprep.subr.bf16.mxu0 %v5716_v0  ;;  %4692 = vmatprep.subr.bf16.mxu1 %v5716_v0  ;;  %v4839_v30 = vld [vmem:[#allocation22 + $0x18] sm:$0xff]  }
 0x1c8   :  { %v4623_v33 = vpop.f32.mrf.mxu1  ;;  %4686 = vmatprep.mubr.msk.bf16.mxu0 %vm5717_vm0, %v5716_v0  ;;  %4706 = vmatprep.mubr.msk.bf16.mxu1 %vm5717_vm0, %v5716_v0 }
 0x1c9   :  { %v4842_v33 = vld [vmem:[#allocation22] sm:$0xff]  }
 0x1ca   :  { %4673 = vmatpush3.bf16.msra.mxu0 %v4813_v31  ;;  %4693 = vmatpush3.bf16.msra.mxu1 %v4814_v32  ;;  %v408_v36 = vpop.f32.mrf.mxu1  ;;  %v4840_v31 = vld [vmem:[#allocation22 + $0x10] sm:$0xff]   ;;  %v4841_v32 = vld [vmem:[#allocation22 + $0x8] sm:$0xff]  }
 0x1cb   :  { %4674 = vmatprep.subr.bf16.mxu0 %v5716_v0  ;;  %4694 = vmatprep.subr.bf16.mxu1 %v5716_v0  ;;  %v415_v50 = vpack.c.bf16 %v408_v36, %v408_v36  ;;  %v6015_v36 = vld [vmem:[%s7091_s16 + $0x1c8] sm:$0xff] }
 0x1cc   :  { %v4628_v37 = vpop.f32.mrf.mxu1 }
 0x1ce   :  { %4675 = vmatpush3.bf16.msra.mxu0 %v4815_v34  ;;  %4695 = vmatpush3.bf16.msra.mxu1 %v4816_v35  ;;  %v411_v40 = vpop.f32.mrf.mxu1  ;;  %v1164_v34 = vld [vmem:[%s7091_s16 + $0x1c0] sm:$0xff] }
 0x1cf   :  { %4676 = vmatprep.subr.bf16.mxu0 %v5716_v0  ;;  %4696 = vmatprep.subr.bf16.mxu1 %v5716_v0  ;;  %v1168_v35 = vld [vmem:[%s7091_s16 + $0x1e0] sm:$0xff] }
 0x1d0   :  { %v4629_v41 = vpop.f32.mrf.mxu1  ;;  %v4201_v37 = vcombine.low %v1164_v34, %v1168_v35  ;;  %v1156_v40 = vld [vmem:[%s7091_s16 + $0x180] sm:$0xff] }
 0x1d1   :  { %v1160_v41 = vld [vmem:[%s7091_s16 + $0x1a0] sm:$0xff] }
 0x1d2   :  { %4677 = vmatpush3.bf16.msra.mxu0 %v4817_v38  ;;  %4697 = vmatpush3.bf16.msra.mxu1 %v4818_v39  ;;  %v4202_v38 = vcombine.high %v1164_v34, %v1168_v35  ;;  %v6020_v39 = vld [vmem:[%s7091_s16 + $0x1e8] sm:$0xff] }
 0x1d3   :  { %4678 = vmatprep.subr.bf16.mxu0 %v5716_v0  ;;  %4698 = vmatprep.subr.bf16.mxu1 %v5716_v0  ;;  %v1133_v35 = vld [vmem:[%s7091_s16 + $0xc8] sm:$0xff] }
 0x1d6   :  { %4679 = vmatpush3.bf16.msra.mxu0 %v4819_v42  ;;  %4699 = vmatpush3.bf16.msra.mxu1 %v4820_v43  ;;  %v4203_v42 = vcombine.low %v6015_v36, %v6020_v39  ;;  %v4204_v43 = vcombine.high %v6015_v36, %v6020_v39  ;;  %v1137_v36 = vld [vmem:[%s7091_s16 + $0xe8] sm:$0xff] }
 0x1d7   :  { %4680 = vmatprep.subr.bf16.mxu0 %v5716_v0  ;;  %4700 = vmatprep.subr.bf16.mxu1 %v5716_v0  ;;  %v1125_v39 = vld [vmem:[%s7091_s16 + $0x88] sm:$0xff] }
 0x1da   :  { %4681 = vmatpush3.bf16.msra.mxu0 %v4821_v44  ;;  %4701 = vmatpush3.bf16.msra.mxu1 %v4822_v45  ;;  %v4194_v44 = vcombine.high %v1156_v40, %v1160_v41  ;;  %v4193_v45 = vcombine.low %v1156_v40, %v1160_v41  ;;  %v1129_v40 = vld [vmem:[%s7091_s16 + $0xa8] sm:$0xff]  ;;  %v4171_v41 = vcombine.low %v1133_v35, %v1137_v36 }
 0x1db   :  { %4682 = vmatprep.subr.bf16.mxu0 %v5716_v0  ;;  %4702 = vmatprep.subr.bf16.mxu1 %v5716_v0 }
 0x1de   :  { %4683 = vmatpush3.bf16.msra.mxu0 %v4823_v46  ;;  %4703 = vmatpush3.bf16.msra.mxu1 %v4824_v47  ;;  %v1148_v46 = vld [vmem:[%s7091_s16 + $0x140] sm:$0xff] }
 0x1df   :  { %4684 = vmatprep.subr.bf16.mxu0 %v5716_v0  ;;  %4704 = vmatprep.subr.bf16.mxu1 %v5716_v0  ;;  %v1152_v47 = vld [vmem:[%s7091_s16 + $0x160] sm:$0xff] }
 0x1e2   :  { %4685 = vmatpush3.bf16.msra.mxu0 %v4825_v48  ;;  %4705 = vmatpush3.bf16.msra.mxu1 %v4826_v49  ;;  %v4186_v48 = vcombine.high %v1148_v46, %v1152_v47  ;;  %v4185_v49 = vcombine.low %v1148_v46, %v1152_v47 }
 0x1e3   :  { %4710 = vmatprep.subr.bf16.mxu0 %v5716_v0  ;;  %4730 = vmatprep.subr.bf16.mxu1 %v5716_v0 }
 0x1e5   :  { %4687 = vmatmul.mubr.bf16.vlgmr.msra.gmra.mxu0 %v415_v50  ;;  %4707 = vmatmul.mubr.bf16.vlgmr.msra.gmra.mxu1 %v414_v28 }
 0x1e6   :  { %4711 = vmatpush3.bf16.msra.mxu0 %v4827_v51  ;;  %4726 = vmatprep.mubr.msk.bf16.mxu0 %vm5717_vm0, %v5716_v0  ;;  %v1144_v51 = vld [vmem:[%s7091_s16 + $0x120] sm:$0xff] }
 0x1e7   :  { %4712 = vmatprep.subr.bf16.mxu0 %v5716_v0  ;;  %4746 = vmatprep.mubr.msk.bf16.mxu1 %vm5717_vm0, %v5716_v0 }
 0x1e8   :  { %4731 = vmatpush3.bf16.msra.mxu1 %v4835_v22 }
 0x1e9   :  { %4732 = vmatprep.subr.bf16.mxu1 %v5716_v0 }
 0x1ea   :  { %4713 = vmatpush3.bf16.msra.mxu0 %v4828_v52 }
 0x1eb   :  { %4714 = vmatprep.subr.bf16.mxu0 %v5716_v0 }
 0x1ec   :  { %4733 = vmatpush3.bf16.msra.mxu1 %v4836_v24  ;;  %v1157_v24 = vld [vmem:[%s7091_s16 + $0x188] sm:$0xff] }
 0x1ed   :  { %4734 = vmatprep.subr.bf16.mxu1 %v5716_v0 }
 0x1ee   :  { %4715 = vmatpush3.bf16.msra.mxu0 %v4829_v53 }
 0x1ef   :  { %4716 = vmatprep.subr.bf16.mxu0 %v5716_v0 }
 0x1f0   :  { %4735 = vmatpush3.bf16.msra.mxu1 %v4837_v27 }
 0x1f1   :  { %4736 = vmatprep.subr.bf16.mxu1 %v5716_v0 }
 0x1f2   :  { %4717 = vmatpush3.bf16.msra.mxu0 %v4830_v54  ;;  %v1132_v54 = vld [vmem:[%s7091_s16 + $0xc0] sm:$0xff] }
 0x1f3   :  { %4718 = vmatprep.subr.bf16.mxu0 %v5716_v0 }
 0x1f4   :  { %4737 = vmatpush3.bf16.msra.mxu1 %v4838_v29 }
 0x1f5   :  { %4738 = vmatprep.subr.bf16.mxu1 %v5716_v0 }
 0x1f6   :  { %4719 = vmatpush3.bf16.msra.mxu0 %v4831_v55  ;;  %v1136_v55 = vld [vmem:[%s7091_s16 + $0xe0] sm:$0xff] }
 0x1f7   :  { %4720 = vmatprep.subr.bf16.mxu0 %v5716_v0 }
 0x1f8   :  { %4739 = vmatpush3.bf16.msra.mxu1 %v4839_v30 }
 0x1f9   :  { %4740 = vmatprep.subr.bf16.mxu1 %v5716_v0 }
 0x1fa   :  { %4721 = vmatpush3.bf16.msra.mxu0 %v4832_v56  ;;  %v4170_v56 = vcombine.high %v1132_v54, %v1136_v55 }
 0x1fb   :  { %4722 = vmatprep.subr.bf16.mxu0 %v5716_v0 }
 0x1fc   :  { %4741 = vmatpush3.bf16.msra.mxu1 %v4840_v31  ;;  %v1141_v31 = vld [vmem:[%s7091_s16 + $0x108] sm:$0xff] }
 0x1fd   :  { %4742 = vmatprep.subr.bf16.mxu1 %v5716_v0 }
 0x1fe   :  { %4723 = vmatpush3.bf16.msra.mxu0 %v4833_v57  ;;  %v4169_v57 = vcombine.low %v1132_v54, %v1136_v55 }
 0x1ff   :  { %4724 = vmatprep.subr.bf16.mxu0 %v5716_v0 }
 0x200   :  { %4743 = vmatpush3.bf16.msra.mxu1 %v4841_v32  ;;  %v1145_v32 = vld [vmem:[%s7091_s16 + $0x128] sm:$0xff] }
 0x201   :  { %4744 = vmatprep.subr.bf16.mxu1 %v5716_v0  ;;  %v4180_v34 = vcombine.high %v1141_v31, %v1145_v32 }
 0x202   :  { %4725 = vmatpush3.bf16.msra.mxu0 %v4834_v58  ;;  %v1124_v58 = vld [vmem:[%s7091_s16 + $0x80] sm:$0xff] }
 0x203   :  { %1534 = vmatprep.subr.bf16.mxu0 %v4202_v38  ;;  %v4172_v38 = vcombine.high %v1133_v35, %v1137_v36 }
 0x204   :  { %4745 = vmatpush3.bf16.msra.mxu1 %v4842_v33 }
 0x205   :  { %4727 = vmatmul.mubr.bf16.vlgmr.msra.gmra.mxu0 %v415_v50  ;;  %1575 = vmatprep.subr.bf16.mxu1 %v4204_v43  ;;  %v1140_v50 = vld [vmem:[%s7091_s16 + $0x100] sm:$0xff]  ;;  %v1117_v43 = vld [vmem:[%s7091_s16 + $0x48] sm:$0xff] }
 0x206   :  { %1535 = vmatpush1.bf16.msra.mxu0 %v4201_v37  ;;  %v4178_v52 = vcombine.high %v1140_v50, %v1144_v51  ;;  %v4177_v53 = vcombine.low %v1140_v50, %v1144_v51  ;;  %v4179_v37 = vcombine.low %v1141_v31, %v1145_v32  ;;  %v1109_v50 = vld [vmem:[%s7091_s16 + $0x8] sm:$0xff]  ;;  %v1134_v31 = vld [vmem:[%s7091_s16 + $0xd0] sm:$0xff] }
 0x207   :  { %1536 = vmatprep.subr.bf16.mxu0 %v4194_v44  ;;  %v1121_v44 = vld [vmem:[%s7091_s16 + $0x68] sm:$0xff]  ;;  %v1138_v32 = vld [vmem:[%s7091_s16 + $0xf0] sm:$0xff] }
 0x208   :  { %v4156_v46 = vcombine.high %v1117_v43, %v1121_v44  ;;  %v4155_v47 = vcombine.low %v1117_v43, %v1121_v44  ;;  %v4173_v43 = vcombine.low %v1134_v31, %v1138_v32 }
 0x20a   :  { %1537 = vmatpush1.bf16.msra.mxu0 %v4193_v45  ;;  %v4163_v45 = vcombine.low %v1125_v39, %v1129_v40 }
 0x20b   :  { %1538 = vmatprep.subr.bf16.mxu0 %v4186_v48  ;;  %v1108_v48 = vld [vmem:[%s7091_s16] sm:$0xff] }
 0x20e   :  { %1539 = vmatpush1.bf16.msra.mxu0 %v4185_v49  ;;  %v1112_v49 = vld [vmem:[%s7091_s16 + $0x20] sm:$0xff] }
 0x20f   :  { %1540 = vmatprep.subr.bf16.mxu0 %v4178_v52  ;;  %v4146_v51 = vcombine.high %v1108_v48, %v1112_v49  ;;  %v1113_v52 = vld [vmem:[%s7091_s16 + $0x28] sm:$0xff] }
 0x210   :  { %v4147_v54 = vcombine.low %v1109_v50, %v1113_v52  ;;  %v4148_v55 = vcombine.high %v1109_v50, %v1113_v52  ;;  %v1123_v50 = vld [vmem:[%s7091_s16 + $0x78] sm:$0xff] }
 0x212   :  { %1541 = vmatpush1.bf16.msra.mxu0 %v4177_v53  ;;  %v4145_v53 = vcombine.low %v1108_v48, %v1112_v49  ;;  %v1122_v48 = vld [vmem:[%s7091_s16 + $0x70] sm:$0xff]  ;;  %v1119_v49 = vld [vmem:[%s7091_s16 + $0x58] sm:$0xff] }
 0x213   :  { %1542 = vmatprep.subr.bf16.mxu0 %v4170_v56  ;;  %v1166_v56 = vld [vmem:[%s7091_s16 + $0x1d0] sm:$0xff] }
 0x216   :  { %1543 = vmatpush1.bf16.msra.mxu0 %v4169_v57  ;;  %v1170_v57 = vld [vmem:[%s7091_s16 + $0x1f0] sm:$0xff] }
 0x285   :  { %v521_v61 = vpop.f32.mrf.mxu0  ;;  %v632_v62 = vpop.f32.mrf.mxu1 }
 0x286   :  { %v522_v63 = vadd.f32 %v4091_v59, %v521_v61  ;;  %v633_v1 = vadd.f32 %v4100_v60, %v632_v62  ;;  %v1128_v59 = vld [vmem:[%s7091_s16 + $0xa0] sm:$0xff] }
 0x287   :  { %v4648_v2 = vpop.f32.mrf.mxu0  ;;  %v4668_v3 = vpop.f32.mrf.mxu1  ;;  %v4162_v60 = vcombine.high %v1124_v58, %v1128_v59  ;;  %v4161_v61 = vcombine.low %v1124_v58, %v1128_v59  ;;  %v1116_v62 = vld [vmem:[%s7091_s16 + $0x40] sm:$0xff]  ;;  %v1167_v58 = vld [vmem:[%s7091_s16 + $0x1d8] sm:$0xff]  ;;  %v4206_v59 = vcombine.high %v1166_v56, %v1170_v57 }
 0x288   :  { %v971_v4 = vmul.f32 %v633_v1, %v522_v63 }
 0x289   :  { %v524_v5 = vpop.f32.mrf.mxu0  ;;  %v635_v6 = vpop.f32.mrf.mxu1  ;;  %1544 = vmatprep.subr.bf16.mxu0 %v4162_v60  ;;  %v1171_v60 = vld [vmem:[%s7091_s16 + $0x1f8] sm:$0xff] }
 0x28a   :  { %v973_v7 = vsel %vm972_vm3, %v971_v4, 0.0  ;;  %1545 = vmatpush1.bf16.msra.mxu0 %v4161_v61  ;;  %v4205_v61 = vcombine.low %v1166_v56, %v1170_v57  ;;  %v1114_v56 = vld [vmem:[%s7091_s16 + $0x30] sm:$0xff]  ;;  %v1111_v57 = vld [vmem:[%s7091_s16 + $0x18] sm:$0xff] }
 0x28b   :  { %v4649_v8 = vpop.f32.mrf.mxu0  ;;  %974 = vadd.xlane.f32.xlu0 %v973_v7  ;;  %v4669_v9 = vpop.f32.mrf.mxu1 }
 0x2a5   :  { %v743_v11 = vpop.f32.mrf.mxu0  ;;  %v5994_v12 = vpop.f32.mrf.mxu1 }
 0x2a6   :  { %v744_v13 = vadd.f32 %v4109_v10, %v743_v11 }
 0x2a7   :  { %v4688_v14 = vpop.f32.mrf.mxu0  ;;  %v4708_v15 = vpop.f32.mrf.mxu1 }
 0x2a8   :  { %v976_v16 = vmul.f32 %v744_v13, %v522_v63  ;;  %v1120_v63 = vld [vmem:[%s7091_s16 + $0x60] sm:$0xff]  ;;  %v4118_v14 = vld [vmem:[#allocation17] ss:$0 sm:$0xff]  ;;  %v4127_v15 = vld [vmem:[#allocation20] ss:$0 sm:$0xff] }
 0x2a9   :  { %v746_v17 = vpop.f32.mrf.mxu0  ;;  %v857_v18 = vpop.f32.mrf.mxu1  ;;  %v4154_v1 = vcombine.high %v1116_v62, %v1120_v63  ;;  %v4153_v2 = vcombine.low %v1116_v62, %v1120_v63  ;;  %v4207_v62 = vcombine.low %v1167_v58, %v1171_v60  ;;  %v4208_v63 = vcombine.high %v1167_v58, %v1171_v60  ;;  %v1115_v58 = vld [vmem:[%s7091_s16 + $0x38] sm:$0xff] }
 0x2aa   :  { %v977_v19 = vsel %vm972_vm3, %v976_v16, 0.0  ;;  %v855_v17 = vadd.f32 %v4118_v14, %v5994_v12  ;;  %v1149_v12 = vld [vmem:[%s7091_s16 + $0x148] sm:$0xff]  ;;  %v1150_v14 = vld [vmem:[%s7091_s16 + $0x150] sm:$0xff]  ;;  %v4159_v60 = vcombine.low %v1119_v49, %v1123_v50 }
 0x2ab   :  { %v4689_v20 = vpop.f32.mrf.mxu0  ;;  %978 = vadd.xlane.f32.xlu0 %v977_v19  ;;  %v4709_v21 = vpop.f32.mrf.mxu1  ;;  %1546 = vmatprep.subr.bf16.mxu0 %v4154_v1  ;;  %v5718_v1 = vmov 0  }
 0x2ac   :  { %1547 = vmatpush1.bf16.msra.mxu0 %v4153_v2  ;;  %1566 = vmatprep.mubr.bf16.mxu0 %v5718_v1  ;;  %v4136_v2 = vld [vmem:[#allocation23] ss:$0 sm:$0xff] }
 0x2ad   :  { %1548 = vmatprep.subr.bf16.mxu0 %v4146_v51 }
 0x2b0   :  { %1549 = vmatpush1.bf16.msra.mxu0 %v4145_v53 }
 0x2b1   :  { %1616 = vmatprep.subr.bf16.mxu0 %v4206_v59 }
 0x2c5   :  { %v5998_v23 = vpop.f32.mrf.mxu0 }
 0x2c6   :  { %v966_v18 = vadd.f32 %v4127_v15, %v5998_v23  ;;  %v1153_v23 = vld [vmem:[%s7091_s16 + $0x168] sm:$0xff] }
 0x2c7   :  { %v4728_v25 = vpop.f32.mrf.mxu0  ;;  %v4188_v30 = vcombine.high %v1149_v12, %v1153_v23  ;;  %v4187_v33 = vcombine.low %v1149_v12, %v1153_v23 }
 0x2c8   :  { %v1161_v25 = vld [vmem:[%s7091_s16 + $0x1a8] sm:$0xff] }
 0x2c9   :  { %v968_v26 = vpop.f32.mrf.mxu0  ;;  %v4195_v29 = vcombine.low %v1157_v24, %v1161_v25 }
 0x2cb   :  { %v4729_v28 = vpop.f32.mrf.mxu0 }
 0x2cc   :  { %v4196_v28 = vcombine.high %v1157_v24, %v1161_v25  ;;  %v1142_v25 = vld [vmem:[%s7091_s16 + $0x110] sm:$0xff] }
 0x314   :  { %v975_v3 = vpop.xlane.xlu0 %974 }
 0x334   :  { %v979_v4 = vpop.xlane.xlu0 %978 }
 0x335   :  { %v980_v5 = vmax.f32 %v975_v3, %v979_v4 }
 0x337   :  { %v981_v6 = vsub.f32 %v975_v3, %v980_v5  ;;  %v984_v7 = vsub.f32 %v979_v4, %v980_v5  ;;  %v1158_v3 = vld [vmem:[%s7091_s16 + $0x190] sm:$0xff] }
 0x338   :  { %v1162_v5 = vld [vmem:[%s7091_s16 + $0x1b0] sm:$0xff] }
 0x339   :  { %v982_v8 = vmul.f32 1.442695, %v981_v6  ;;  %v985_v9 = vmul.f32 1.442695, %v984_v7  ;;  %v1159_v6 = vld [vmem:[%s7091_s16 + $0x198] sm:$0xff] }
 0x33a   :  { %v1163_v7 = vld [vmem:[%s7091_s16 + $0x1b8] sm:$0xff] }
 0x33b   :  { %5267 = vpow2.f32 %v982_v8 }
 0x33c   :  { %5269 = vpow2.f32 %v985_v9 }
 0x348   :  { %v5268_v10 = vpop.eup %5267 }
 0x349   :  { %v5270_v11 = vpop.eup %5269 }
 0x34a   :  { %v987_v13 = vadd.f32 %v5270_v11, %v5268_v10 }
 0x34c   :  { %5271 = vrcp.f32 %v987_v13  ;;  %v4200_v13 = vcombine.high %v1159_v6, %v1163_v7 }
 0x359   :  { %v5272_v16 = vpop.eup %5271 }
 0x35a   :  { %v990_v19 = vmul.f32 %v5272_v16, %v5268_v10  ;;  %v992_v20 = vmul.f32 %v5272_v16, %v5270_v11  ;;  %v4198_v11 = vcombine.high %v1158_v3, %v1162_v5  ;;  %v1154_v16 = vld [vmem:[%s7091_s16 + $0x170] sm:$0xff] }
 0x35b   :  { %v4189_v12 = vcombine.low %v1150_v14, %v1154_v16 }
 0x35c   :  { %v991_v21 = vmul.f32 %v990_v19, %v855_v17  ;;  %v993_v22 = vmul.f32 %v992_v20, %v966_v18  ;;  %v1151_v17 = vld [vmem:[%s7091_s16 + $0x158] sm:$0xff]  ;;  %v4197_v20 = vcombine.low %v1158_v3, %v1162_v5  ;;  %v4848_v3 = vld [vmem:[%s7093_s18 + $0x2e4] ss:$16 sps:$4 sm:$0xff]   ;;  %v4846_v5 = vld [vmem:[%s7093_s18 + $0x2e0] ss:$16 sps:$4 sm:$0xff]  }
 0x35d   :  { %v1155_v18 = vld [vmem:[%s7091_s16 + $0x178] sm:$0xff] }
 0x35e   :  { %v994_v26 = vadd.f32 %v993_v22, %v991_v21  ;;  %v4199_v21 = vcombine.low %v1159_v6, %v1163_v7  ;;  %v4190_v22 = vcombine.high %v1150_v14, %v1154_v16  ;;  %v4192_v24 = vcombine.high %v1151_v17, %v1155_v18  ;;  %v4851_v6 = vld [vmem:[%s7093_s18 + $0xc4] ss:$16 sps:$4 sm:$0xff]   ;;  %v4858_v14 = vld [vmem:[%s7093_s18 + $0x2a0] ss:$16 sps:$4 sm:$0xff]  }
 0x35f   :  { %v4191_v23 = vcombine.low %v1151_v17, %v1155_v18  ;;  %v4854_v7 = vld [vmem:[%s7093_s18 + $0x2c4] ss:$16 sps:$4 sm:$0xff]   ;;  %v4861_v17 = vld [vmem:[%s7093_s18 + $0x80] ss:$16 sps:$4 sm:$0xff]  }
 0x360   :  { %v995_v27 = vpack.c.bf16 %v994_v26, %v994_v26  ;;  %v1146_v26 = vld [vmem:[%s7091_s16 + $0x130] sm:$0xff] }
 0x361   :  { %v4181_v35 = vcombine.low %v1142_v25, %v1146_v26  ;;  %v4866_v16 = vld [vmem:[%s7093_s18 + $0x284] ss:$16 sps:$4 sm:$0xff]   ;;  %v4864_v18 = vld [vmem:[%s7093_s18 + $0x280] ss:$16 sps:$4 sm:$0xff]  }
 0x362   :  { %4747 = vmatmul.mubr.bf16.vlgmr.msra.gmra.mxu1 %v995_v27  ;;  %v1143_v27 = vld [vmem:[%s7091_s16 + $0x118] sm:$0xff] }
 0x363   :  { %1576 = vmatpush1.bf16.msra.mxu1 %v4203_v42  ;;  %v4164_v42 = vcombine.high %v1125_v39, %v1129_v40  ;;  %1607 = vmatprep.mubr.bf16.mxu1 %v5718_v1  ;;  %v1126_v39 = vld [vmem:[%s7091_s16 + $0x90] sm:$0xff] }
 0x364   :  { %1577 = vmatprep.subr.bf16.mxu1 %v4196_v28  ;;  %v1147_v28 = vld [vmem:[%s7091_s16 + $0x138] sm:$0xff]  ;;  %v1130_v40 = vld [vmem:[%s7091_s16 + $0xb0] sm:$0xff] }
 0x365   :  { %v4183_v36 = vcombine.low %v1143_v27, %v1147_v28  ;;  %v4165_v51 = vcombine.low %v1126_v39, %v1130_v40 }
 0x367   :  { %1578 = vmatpush1.bf16.msra.mxu1 %v4195_v29  ;;  %v4182_v29 = vcombine.high %v1142_v25, %v1146_v26  ;;  %v4878_v25 = vld [vmem:[%s7093_s18 + $0x244] ss:$16 sps:$4 sm:$0xff]   ;;  %v4873_v26 = vld [vmem:[%s7093_s18 + $0x40] ss:$16 sps:$4 sm:$0xff]  }
 0x368   :  { %1579 = vmatprep.subr.bf16.mxu1 %v4188_v30  ;;  %v4184_v30 = vcombine.high %v1143_v27, %v1147_v28  ;;  %v4876_v27 = vld [vmem:[%s7093_s18 + $0x240] ss:$16 sps:$4 sm:$0xff]   ;;  %v4881_v28 = vld [vmem:[%s7093_s18 + $0x24] ss:$16 sps:$4 sm:$0xff]  }
 0x36b   :  { %1580 = vmatpush1.bf16.msra.mxu1 %v4187_v33  ;;  %v1135_v33 = vld [vmem:[%s7091_s16 + $0xd8] sm:$0xff] }
 0x36c   :  { %1581 = vmatprep.subr.bf16.mxu1 %v4180_v34  ;;  %v1139_v34 = vld [vmem:[%s7091_s16 + $0xf8] sm:$0xff] }
 0x36d   :  { %v4175_v44 = vcombine.low %v1135_v33, %v1139_v34 }
 0x36f   :  { %1582 = vmatpush1.bf16.msra.mxu1 %v4179_v37  ;;  %v4174_v37 = vcombine.high %v1134_v31, %v1138_v32  ;;  %v4890_v31 = vld [vmem:[%s7093_s18 + $0x204] ss:$16 sps:$4 sm:$0xff]   ;;  %v4885_v32 = vld [vmem:[%s7093_s18] ss:$16 sps:$4 sm:$0xff]  }
 0x370   :  { %1583 = vmatprep.subr.bf16.mxu1 %v4172_v38  ;;  %v4176_v38 = vcombine.high %v1135_v33, %v1139_v34  ;;  %v4888_v33 = vld [vmem:[%s7093_s18 + $0x200] ss:$16 sps:$4 sm:$0xff]   ;;  %v4893_v34 = vld [vmem:[%s7093_s18 + $0x1e4] ss:$16 sps:$4 sm:$0xff]  }
 0x373   :  { %1584 = vmatpush1.bf16.msra.mxu1 %v4171_v41  ;;  %v1127_v41 = vld [vmem:[%s7091_s16 + $0x98] sm:$0xff] }
 0x374   :  { %1585 = vmatprep.subr.bf16.mxu1 %v4164_v42  ;;  %v1131_v42 = vld [vmem:[%s7091_s16 + $0xb8] sm:$0xff] }
 0x375   :  { %v4167_v52 = vcombine.low %v1127_v41, %v1131_v42 }
 0x377   :  { %1586 = vmatpush1.bf16.msra.mxu1 %v4163_v45  ;;  %v4166_v45 = vcombine.high %v1126_v39, %v1130_v40  ;;  %v4902_v39 = vld [vmem:[%s7093_s18 + $0x3c4] ss:$16 sps:$4 sm:$0xff]   ;;  %v4897_v40 = vld [vmem:[%s7093_s18 + $0x1c0] ss:$16 sps:$4 sm:$0xff]  }
 0x378   :  { %1587 = vmatprep.subr.bf16.mxu1 %v4156_v46  ;;  %v4168_v46 = vcombine.high %v1127_v41, %v1131_v42  ;;  %v4900_v41 = vld [vmem:[%s7093_s18 + $0x3c0] ss:$16 sps:$4 sm:$0xff]   ;;  %v4905_v42 = vld [vmem:[%s7093_s18 + $0x1a4] ss:$16 sps:$4 sm:$0xff]  }
 0x37b   :  { %1588 = vmatpush1.bf16.msra.mxu1 %v4155_v47  ;;  %v1118_v47 = vld [vmem:[%s7091_s16 + $0x50] sm:$0xff] }
 0x37c   :  { %1589 = vmatprep.subr.bf16.mxu1 %v4148_v55  ;;  %v4158_v53 = vcombine.high %v1118_v47, %v1122_v48  ;;  %v1110_v55 = vld [vmem:[%s7091_s16 + $0x10] sm:$0xff]  ;;  %v4157_v59 = vcombine.low %v1118_v47, %v1122_v48 }
 0x37d   :  { %v4914_v47 = vld [vmem:[%s7093_s18 + $0x384] ss:$16 sps:$4 sm:$0xff]   ;;  %v4909_v48 = vld [vmem:[%s7093_s18 + $0x180] ss:$16 sps:$4 sm:$0xff]  }
 0x37f   :  { %1590 = vmatpush1.bf16.msra.mxu1 %v4147_v54  ;;  %v4160_v54 = vcombine.high %v1119_v49, %v1123_v50  ;;  %v4912_v49 = vld [vmem:[%s7093_s18 + $0x380] ss:$16 sps:$4 sm:$0xff]   ;;  %v4917_v50 = vld [vmem:[%s7093_s18 + $0x164] ss:$16 sps:$4 sm:$0xff]  }
 0x380   :  { %1657 = vmatprep.subr.bf16.mxu1 %v4208_v63  ;;  %v4149_v63 = vcombine.low %v1110_v55, %v1114_v56 }
 0x422   :  { %v1101_v4 = vpop.f32.mrf.mxu1 }
 0x423   :  { %v1102_v8 = vadd.f32 %v4136_v2, %v1101_v4  ;;  %v4845_v2 = vld [vmem:[%s7093_s18 + $0xe4] ss:$16 sps:$4 sm:$0xff]   ;;  %v4843_v4 = vld [vmem:[%s7093_s18 + $0xe0] ss:$16 sps:$4 sm:$0xff]  }
 0x424   :  { %v4748_v9 = vpop.f32.mrf.mxu1 }
 0x425   :  { %v6139_v10 = vpack.c.bf16 %v1102_v8, %v1102_v8  ;;  %v4849_v8 = vld [vmem:[%s7093_s18 + $0xc0] ss:$16 sps:$4 sm:$0xff]  }
 0x426   :  { %v1104_v15 = vpop.f32.mrf.mxu1  ;;  %v4852_v9 = vld [vmem:[%s7093_s18 + $0x2c0] ss:$16 sps:$4 sm:$0xff]  }
 0x427   :  { %1567 = vmatmul.mubr.bf16.vlgmr.msra.gmra.mxu0 %v6139_v10  ;;  %1608 = vmatmul.mubr.bf16.vlgmr.msra.gmra.mxu1 %v6139_v10  ;;  %v4863_v15 = vld [vmem:[%s7093_s18 + $0x84] ss:$16 sps:$4 sm:$0xff]  }
 0x428   :  { %1617 = vmatpush1.bf16.msra.mxu0 %v4205_v61  ;;  %1658 = vmatpush1.bf16.msra.mxu1 %v4207_v62  ;;  %v4749_v19 = vpop.f32.mrf.mxu1  ;;  %v4150_v61 = vcombine.high %v1110_v55, %v1114_v56  ;;  %v4152_v62 = vcombine.high %v1111_v57, %v1115_v58  ;;  %v4926_v55 = vld [vmem:[%s7093_s18 + $0x344] ss:$16 sps:$4 sm:$0xff]   ;;  %v4921_v56 = vld [vmem:[%s7093_s18 + $0x140] ss:$16 sps:$4 sm:$0xff]  }
 0x429   :  { %1618 = vmatprep.subr.bf16.mxu0 %v4198_v11  ;;  %1659 = vmatprep.subr.bf16.mxu1 %v4200_v13  ;;  %v4857_v11 = vld [vmem:[%s7093_s18 + $0xa4] ss:$16 sps:$4 sm:$0xff]   ;;  %v4855_v13 = vld [vmem:[%s7093_s18 + $0xa0] ss:$16 sps:$4 sm:$0xff]  }
 0x42a   :  { %1648 = vmatprep.mubr.bf16.mxu0 %v5718_v1  ;;  %1689 = vmatprep.mubr.bf16.mxu1 %v5718_v1  ;;  %v4151_v1 = vcombine.low %v1111_v57, %v1115_v58  ;;  %v4869_v19 = vld [vmem:[%s7093_s18 + $0x64] ss:$16 sps:$4 sm:$0xff]   ;;  %v4924_v57 = vld [vmem:[%s7093_s18 + $0x340] ss:$16 sps:$4 sm:$0xff]  }
 0x42b   :  { %v4929_v58 = vld [vmem:[%s7093_s18 + $0x124] ss:$16 sps:$4 sm:$0xff]  }
 0x42c   :  { %1619 = vmatpush1.bf16.msra.mxu0 %v4197_v20  ;;  %1660 = vmatpush1.bf16.msra.mxu1 %v4199_v21  ;;  %v4872_v20 = vld [vmem:[%s7093_s18 + $0x264] ss:$16 sps:$4 sm:$0xff]   ;;  %v4867_v21 = vld [vmem:[%s7093_s18 + $0x60] ss:$16 sps:$4 sm:$0xff]  }
 0x42d   :  { %1620 = vmatprep.subr.bf16.mxu0 %v4190_v22  ;;  %1661 = vmatprep.subr.bf16.mxu1 %v4192_v24  ;;  %v4870_v22 = vld [vmem:[%s7093_s18 + $0x260] ss:$16 sps:$4 sm:$0xff]   ;;  %v4875_v24 = vld [vmem:[%s7093_s18 + $0x44] ss:$16 sps:$4 sm:$0xff]  }
 0x430   :  { %1621 = vmatpush1.bf16.msra.mxu0 %v4189_v12  ;;  %1662 = vmatpush1.bf16.msra.mxu1 %v4191_v23  ;;  %v4884_v12 = vld [vmem:[%s7093_s18 + $0x224] ss:$16 sps:$4 sm:$0xff]   ;;  %v4879_v23 = vld [vmem:[%s7093_s18 + $0x20] ss:$16 sps:$4 sm:$0xff]  }
 0x431   :  { %1622 = vmatprep.subr.bf16.mxu0 %v4182_v29  ;;  %1663 = vmatprep.subr.bf16.mxu1 %v4184_v30  ;;  %v4882_v29 = vld [vmem:[%s7093_s18 + $0x220] ss:$16 sps:$4 sm:$0xff]   ;;  %v4887_v30 = vld [vmem:[%s7093_s18 + $0x4] ss:$16 sps:$4 sm:$0xff]  }
 0x434   :  { %1623 = vmatpush1.bf16.msra.mxu0 %v4181_v35  ;;  %1664 = vmatpush1.bf16.msra.mxu1 %v4183_v36  ;;  %v4896_v35 = vld [vmem:[%s7093_s18 + $0x3e4] ss:$16 sps:$4 sm:$0xff]   ;;  %v4891_v36 = vld [vmem:[%s7093_s18 + $0x1e0] ss:$16 sps:$4 sm:$0xff]  }
 0x435   :  { %1624 = vmatprep.subr.bf16.mxu0 %v4174_v37  ;;  %1665 = vmatprep.subr.bf16.mxu1 %v4176_v38  ;;  %v4894_v37 = vld [vmem:[%s7093_s18 + $0x3e0] ss:$16 sps:$4 sm:$0xff]   ;;  %v4899_v38 = vld [vmem:[%s7093_s18 + $0x1c4] ss:$16 sps:$4 sm:$0xff]  }
 0x438   :  { %1625 = vmatpush1.bf16.msra.mxu0 %v4173_v43  ;;  %1666 = vmatpush1.bf16.msra.mxu1 %v4175_v44  ;;  %v4908_v43 = vld [vmem:[%s7093_s18 + $0x3a4] ss:$16 sps:$4 sm:$0xff]   ;;  %v4903_v44 = vld [vmem:[%s7093_s18 + $0x1a0] ss:$16 sps:$4 sm:$0xff]  }
 0x439   :  { %1626 = vmatprep.subr.bf16.mxu0 %v4166_v45  ;;  %1667 = vmatprep.subr.bf16.mxu1 %v4168_v46  ;;  %v4906_v45 = vld [vmem:[%s7093_s18 + $0x3a0] ss:$16 sps:$4 sm:$0xff]   ;;  %v4911_v46 = vld [vmem:[%s7093_s18 + $0x184] ss:$16 sps:$4 sm:$0xff]  }
 0x43c   :  { %1627 = vmatpush1.bf16.msra.mxu0 %v4165_v51  ;;  %1668 = vmatpush1.bf16.msra.mxu1 %v4167_v52  ;;  %v4920_v51 = vld [vmem:[%s7093_s18 + $0x364] ss:$16 sps:$4 sm:$0xff]   ;;  %v4915_v52 = vld [vmem:[%s7093_s18 + $0x160] ss:$16 sps:$4 sm:$0xff]  }
 0x43d   :  { %1628 = vmatprep.subr.bf16.mxu0 %v4158_v53  ;;  %1669 = vmatprep.subr.bf16.mxu1 %v4160_v54  ;;  %v4918_v53 = vld [vmem:[%s7093_s18 + $0x360] ss:$16 sps:$4 sm:$0xff]   ;;  %v4923_v54 = vld [vmem:[%s7093_s18 + $0x144] ss:$16 sps:$4 sm:$0xff]  }
 0x440   :  { %1629 = vmatpush1.bf16.msra.mxu0 %v4157_v59  ;;  %1670 = vmatpush1.bf16.msra.mxu1 %v4159_v60  ;;  %v4932_v59 = vld [vmem:[%s7093_s18 + $0x324] ss:$16 sps:$4 sm:$0xff]   ;;  %v4927_v60 = vld [vmem:[%s7093_s18 + $0x120] ss:$16 sps:$4 sm:$0xff]  }
 0x441   :  { %1630 = vmatprep.subr.bf16.mxu0 %v4150_v61  ;;  %1671 = vmatprep.subr.bf16.mxu1 %v4152_v62  ;;  %v4930_v61 = vld [vmem:[%s7093_s18 + $0x320] ss:$16 sps:$4 sm:$0xff]   ;;  %v4935_v62 = vld [vmem:[%s7093_s18 + $0x104] ss:$16 sps:$4 sm:$0xff]  }
 0x444   :  { %1631 = vmatpush1.bf16.msra.mxu0 %v4149_v63  ;;  %1672 = vmatpush1.bf16.msra.mxu1 %v4151_v1  ;;  %v4938_v63 = vld [vmem:[%s7093_s18 + $0x304] ss:$16 sps:$4 sm:$0xff]   ;;  %v4933_v1 = vld [vmem:[%s7093_s18 + $0x100] ss:$16 sps:$4 sm:$0xff]  }
 0x445   :  { %3272 = vmatprep.subr.bf16.mxu0 %v4845_v2  ;;  %3313 = vmatprep.subr.bf16.mxu1 %v4848_v3  ;;  %v4936_v2 = vld [vmem:[%s7093_s18 + $0x300] ss:$16 sps:$4 sm:$0xff]   ;;  %v4941_v3 = vld [vmem:[%s7093_s18 + $0x4e4] ss:$16 sps:$4 sm:$0xff]  }
 0x447   :  { %1649 = vmatmul.mubr.bf16.vlgmr.msra.gmra.mxu0 %v6139_v10  ;;  %1690 = vmatmul.mubr.bf16.vlgmr.msra.gmra.mxu1 %v6139_v10  ;;  %v4860_v10 = vld [vmem:[%s7093_s18 + $0x2a4] ss:$16 sps:$4 sm:$0xff]  }
 0x448   :  { %3273 = vmatpush1.bf16.msra.mxu0 %v4843_v4  ;;  %3314 = vmatpush1.bf16.msra.mxu1 %v4846_v5  ;;  %v4944_v4 = vld [vmem:[%s7093_s18 + $0x6e4] ss:$16 sps:$4 sm:$0xff]   ;;  %v1174_v5 = vlaneseq }
 0x449   :  { %3274 = vmatprep.subr.bf16.mxu0 %v4851_v6  ;;  %3315 = vmatprep.subr.bf16.mxu1 %v4854_v7 }
 0x44a   :  { %v6415_v6 = vshrl.u32 %v1174_v5, 7  ;;  %v4983_v5 = vld [vmem:[%s7093_s18 + $0x404] ss:$16 sps:$4 sm:$0xff]  }
 0x44c   :  { %3275 = vmatpush1.bf16.msra.mxu0 %v4849_v8  ;;  %3316 = vmatpush1.bf16.msra.mxu1 %v4852_v9  ;;  %v1176_v7 = vsub.s32 0, %v6415_v6  ;;  %v1184_v8 = vsub.s32 2, %v6415_v6  ;;  %v6422_v9 = vld [vmem:[%s7092_s17] sm:$0xff] }
 0x44d   :  { %3276 = vmatprep.subr.bf16.mxu0 %v4857_v11  ;;  %3317 = vmatprep.subr.bf16.mxu1 %v4860_v10  ;;  %v1180_v11 = vsub.s32 1, %v6415_v6  ;;  %v1188_v10 = vsub.s32 3, %v6415_v6 }
 0x450   :  { %3277 = vmatpush1.bf16.msra.mxu0 %v4855_v13  ;;  %3318 = vmatpush1.bf16.msra.mxu1 %v4858_v14  ;;  %v1177_v13 = vrot.slane %v6422_v9, %v1176_v7  ;;  %v1185_v14 = vrot.slane %v6422_v9, %v1184_v8 }
 0x451   :  { %3278 = vmatprep.subr.bf16.mxu0 %v4863_v15  ;;  %3319 = vmatprep.subr.bf16.mxu1 %v4866_v16  ;;  %v1181_v15 = vrot.slane %v6422_v9, %v1180_v11  ;;  %v1189_v16 = vrot.slane %v6422_v9, %v1188_v10 }
 0x454   :  { %3279 = vmatpush1.bf16.msra.mxu0 %v4861_v17  ;;  %3320 = vmatpush1.bf16.msra.mxu1 %v4864_v18 }
 0x455   :  { %3280 = vmatprep.subr.bf16.mxu0 %v4869_v19  ;;  %3321 = vmatprep.subr.bf16.mxu1 %v4872_v20 }
 0x458   :  { %3281 = vmatpush1.bf16.msra.mxu0 %v4867_v21  ;;  %3322 = vmatpush1.bf16.msra.mxu1 %v4870_v22 }
 0x459   :  { %3282 = vmatprep.subr.bf16.mxu0 %v4875_v24  ;;  %3323 = vmatprep.subr.bf16.mxu1 %v4878_v25 }
 0x45c   :  { %3283 = vmatpush1.bf16.msra.mxu0 %v4873_v26  ;;  %3324 = vmatpush1.bf16.msra.mxu1 %v4876_v27 }
 0x45d   :  { %3284 = vmatprep.subr.bf16.mxu0 %v4881_v28  ;;  %3325 = vmatprep.subr.bf16.mxu1 %v4884_v12 }
 0x460   :  { %3285 = vmatpush1.bf16.msra.mxu0 %v4879_v23  ;;  %3326 = vmatpush1.bf16.msra.mxu1 %v4882_v29 }
 0x461   :  { %3286 = vmatprep.subr.bf16.mxu0 %v4887_v30  ;;  %3327 = vmatprep.subr.bf16.mxu1 %v4890_v31 }
 0x464   :  { %3287 = vmatpush1.bf16.msra.mxu0 %v4885_v32  ;;  %3328 = vmatpush1.bf16.msra.mxu1 %v4888_v33 }
 0x465   :  { %3288 = vmatprep.subr.bf16.mxu0 %v4893_v34  ;;  %3329 = vmatprep.subr.bf16.mxu1 %v4896_v35  ;;  %v4939_v34 = vld [vmem:[%s7093_s18 + $0x4e0] ss:$16 sps:$4 sm:$0xff]  }
 0x466   :  { %v4942_v35 = vld [vmem:[%s7093_s18 + $0x6e0] ss:$16 sps:$4 sm:$0xff]  }
 0x468   :  { %3289 = vmatpush2.bf16.msra.mxu0 %v4891_v36  ;;  %3330 = vmatpush2.bf16.msra.mxu1 %v4894_v37 }
 0x469   :  { %3290 = vmatprep.subr.bf16.mxu0 %v4899_v38  ;;  %3331 = vmatprep.subr.bf16.mxu1 %v4902_v39  ;;  %v4947_v38 = vld [vmem:[%s7093_s18 + $0x4c4] ss:$16 sps:$4 sm:$0xff]  }
 0x46a   :  { %v4950_v39 = vld [vmem:[%s7093_s18 + $0x6c4] ss:$16 sps:$4 sm:$0xff]  }
 0x46c   :  { %3291 = vmatpush2.bf16.msra.mxu0 %v4897_v40  ;;  %3332 = vmatpush2.bf16.msra.mxu1 %v4900_v41  ;;  %v4945_v40 = vld [vmem:[%s7093_s18 + $0x4c0] ss:$16 sps:$4 sm:$0xff]  }
 0x46d   :  { %3292 = vmatprep.subr.bf16.mxu0 %v4905_v42  ;;  %3333 = vmatprep.subr.bf16.mxu1 %v4908_v43  ;;  %v4948_v41 = vld [vmem:[%s7093_s18 + $0x6c0] ss:$16 sps:$4 sm:$0xff]   ;;  %v4953_v42 = vld [vmem:[%s7093_s18 + $0x4a4] ss:$16 sps:$4 sm:$0xff]  }
 0x46e   :  { %v4956_v43 = vld [vmem:[%s7093_s18 + $0x6a4] ss:$16 sps:$4 sm:$0xff]  }
 0x470   :  { %3293 = vmatpush2.bf16.msra.mxu0 %v4903_v44  ;;  %3334 = vmatpush2.bf16.msra.mxu1 %v4906_v45  ;;  %v4951_v44 = vld [vmem:[%s7093_s18 + $0x4a0] ss:$16 sps:$4 sm:$0xff]  }
 0x471   :  { %3294 = vmatprep.subr.bf16.mxu0 %v4911_v46  ;;  %3335 = vmatprep.subr.bf16.mxu1 %v4914_v47  ;;  %v4954_v45 = vld [vmem:[%s7093_s18 + $0x6a0] ss:$16 sps:$4 sm:$0xff]   ;;  %v4959_v46 = vld [vmem:[%s7093_s18 + $0x484] ss:$16 sps:$4 sm:$0xff]  }
 0x472   :  { %v4962_v47 = vld [vmem:[%s7093_s18 + $0x684] ss:$16 sps:$4 sm:$0xff]  }
 0x474   :  { %3295 = vmatpush2.bf16.msra.mxu0 %v4909_v48  ;;  %3336 = vmatpush2.bf16.msra.mxu1 %v4912_v49  ;;  %v4957_v48 = vld [vmem:[%s7093_s18 + $0x480] ss:$16 sps:$4 sm:$0xff]  }
 0x475   :  { %3296 = vmatprep.subr.bf16.mxu0 %v4917_v50  ;;  %3337 = vmatprep.subr.bf16.mxu1 %v4920_v51  ;;  %v4960_v49 = vld [vmem:[%s7093_s18 + $0x680] ss:$16 sps:$4 sm:$0xff]   ;;  %v4965_v50 = vld [vmem:[%s7093_s18 + $0x464] ss:$16 sps:$4 sm:$0xff]  }
 0x476   :  { %v4968_v51 = vld [vmem:[%s7093_s18 + $0x664] ss:$16 sps:$4 sm:$0xff]  }
 0x478   :  { %3297 = vmatpush2.bf16.msra.mxu0 %v4915_v52  ;;  %3338 = vmatpush2.bf16.msra.mxu1 %v4918_v53  ;;  %v4963_v52 = vld [vmem:[%s7093_s18 + $0x460] ss:$16 sps:$4 sm:$0xff]  }
 0x479   :  { %3298 = vmatprep.subr.bf16.mxu0 %v4923_v54  ;;  %3339 = vmatprep.subr.bf16.mxu1 %v4926_v55  ;;  %v4966_v53 = vld [vmem:[%s7093_s18 + $0x660] ss:$16 sps:$4 sm:$0xff]   ;;  %v4971_v54 = vld [vmem:[%s7093_s18 + $0x444] ss:$16 sps:$4 sm:$0xff]  }
 0x47a   :  { %v4974_v55 = vld [vmem:[%s7093_s18 + $0x644] ss:$16 sps:$4 sm:$0xff]  }
 0x47c   :  { %3299 = vmatpush2.bf16.msra.mxu0 %v4921_v56  ;;  %3340 = vmatpush2.bf16.msra.mxu1 %v4924_v57  ;;  %v4969_v56 = vld [vmem:[%s7093_s18 + $0x440] ss:$16 sps:$4 sm:$0xff]  }
 0x47d   :  { %3300 = vmatprep.subr.bf16.mxu0 %v4929_v58  ;;  %3341 = vmatprep.subr.bf16.mxu1 %v4932_v59  ;;  %v4972_v57 = vld [vmem:[%s7093_s18 + $0x640] ss:$16 sps:$4 sm:$0xff]   ;;  %v1196_v58 = vsub.s32 5, %v6415_v6  ;;  %v1204_v59 = vsub.s32 7, %v6415_v6 }
 0x480   :  { %3301 = vmatpush2.bf16.msra.mxu0 %v4927_v60  ;;  %3342 = vmatpush2.bf16.msra.mxu1 %v4930_v61  ;;  %v4977_v60 = vld [vmem:[%s7093_s18 + $0x424] ss:$16 sps:$4 sm:$0xff]  }
 0x481   :  { %3302 = vmatprep.subr.bf16.mxu0 %v4935_v62  ;;  %3343 = vmatprep.subr.bf16.mxu1 %v4938_v63  ;;  %v4980_v61 = vld [vmem:[%s7093_s18 + $0x624] ss:$16 sps:$4 sm:$0xff]   ;;  %v1197_v62 = vrot.slane %v6422_v9, %v1196_v58  ;;  %v1205_v63 = vrot.slane %v6422_v9, %v1204_v59 }
 0x482   :  { %v5025_v59 = vld [vmem:[%s7093_s18 + $0x524] ss:$16 sps:$4 sm:$0xff]  }
 0x484   :  { %3303 = vmatpush2.bf16.msra.mxu0 %v4933_v1  ;;  %3344 = vmatpush2.bf16.msra.mxu1 %v4936_v2  ;;  %v4975_v1 = vld [vmem:[%s7093_s18 + $0x420] ss:$16 sps:$4 sm:$0xff]  }
 0x485   :  { %3354 = vmatprep.subr.bf16.mxu0 %v4941_v3  ;;  %3395 = vmatprep.subr.bf16.mxu1 %v4944_v4  ;;  %v4978_v2 = vld [vmem:[%s7093_s18 + $0x620] ss:$16 sps:$4 sm:$0xff]  }
 0x4e7   :  { %v1568_v17 = vpop.f32.mrf.mxu0  ;;  %v1609_v18 = vpop.f32.mrf.mxu1 }
 0x4e8   :  { %v1569_v19 = vadd.f32 %v1568_v17, %v1177_v13  ;;  %v1610_v20 = vadd.f32 %v1609_v18, %v1185_v14  ;;  %v4986_v13 = vld [vmem:[%s7093_s18 + $0x604] ss:$16 sps:$4 sm:$0xff]   ;;  %v4981_v18 = vld [vmem:[%s7093_s18 + $0x400] ss:$16 sps:$4 sm:$0xff]  }
 0x4e9   :  { %v1570_v21 = vpop.f32.mrf.mxu0  ;;  %v1611_v22 = vpop.f32.mrf.mxu1 }
 0x4ea   :  { %v1571_v24 = vadd.f32 %v1570_v21, %v1181_v15  ;;  %v1612_v25 = vadd.f32 %v1611_v22, %v1189_v16  ;;  %v1698_v26 = vmax.f32 %v1569_v19, 0.0  ;;  %v1700_v27 = vmax.f32 %v1610_v20, 0.0  ;;  %v4984_v19 = vld [vmem:[%s7093_s18 + $0x600] ss:$16 sps:$4 sm:$0xff]   ;;  %v4989_v22 = vld [vmem:[%s7093_s18 + $0x5e4] ss:$16 sps:$4 sm:$0xff]  }
 0x4eb   :  { %v1572_v28 = vpop.f32.mrf.mxu0  ;;  %v1613_v12 = vpop.f32.mrf.mxu1 }
 0x4ec   :  { %v1699_v23 = vmax.f32 %v1571_v24, 0.0  ;;  %v1701_v29 = vmax.f32 %v1612_v25, 0.0  ;;  %v6448_v36 = vpack.c.bf16 %v1698_v26, %v1698_v26  ;;  %v6450_v37 = vpack.c.bf16 %v1700_v27, %v1700_v27  ;;  %v4992_v24 = vld [vmem:[%s7093_s18 + $0x7e4] ss:$16 sps:$4 sm:$0xff]  }
 0x4ed   :  { %v1573_v30 = vpop.f32.mrf.mxu0  ;;  %v1614_v31 = vpop.f32.mrf.mxu1 }
 0x4ee   :  { %v6438_v32 = vpack.c.bf16 %v1699_v23, %v1699_v23  ;;  %v6440_v33 = vpack.c.bf16 %v1701_v29, %v1701_v29  ;;  %v4987_v29 = vld [vmem:[%s7093_s18 + $0x5e0] ss:$16 sps:$4 sm:$0xff]   ;;  %v4995_v31 = vld [vmem:[%s7093_s18 + $0x5c4] ss:$16 sps:$4 sm:$0xff]  }
 0x4ef   :  { %v4990_v30 = vld [vmem:[%s7093_s18 + $0x7e0] ss:$16 sps:$4 sm:$0xff]  }
 0x4f0   :  { %3304 = vmatprep.mubr.bf16.mxu0 %v6438_v32  ;;  %3345 = vmatprep.mubr.bf16.mxu1 %v6440_v33 }
 0x4f1   :  { %3305 = vmatmul.mubr.bf16.vlgmr.msra.gmra.mxu0 %v6448_v36  ;;  %3346 = vmatmul.mubr.bf16.vlgmr.msra.gmra.mxu1 %v6450_v37 }
 0x4f2   :  { %3355 = vmatpush1.bf16.msra.mxu0 %v4939_v34  ;;  %3396 = vmatpush1.bf16.msra.mxu1 %v4942_v35  ;;  %v4998_v34 = vld [vmem:[%s7093_s18 + $0x7c4] ss:$16 sps:$4 sm:$0xff]   ;;  %v4993_v35 = vld [vmem:[%s7093_s18 + $0x5c0] ss:$16 sps:$4 sm:$0xff]  }
 0x4f3   :  { %3356 = vmatprep.subr.bf16.mxu0 %v4947_v38  ;;  %3397 = vmatprep.subr.bf16.mxu1 %v4950_v39  ;;  %v4996_v38 = vld [vmem:[%s7093_s18 + $0x7c0] ss:$16 sps:$4 sm:$0xff]   ;;  %v5001_v39 = vld [vmem:[%s7093_s18 + $0x5a4] ss:$16 sps:$4 sm:$0xff]  }
 0x4f6   :  { %3357 = vmatpush1.bf16.msra.mxu0 %v4945_v40  ;;  %3398 = vmatpush1.bf16.msra.mxu1 %v4948_v41  ;;  %v5004_v40 = vld [vmem:[%s7093_s18 + $0x7a4] ss:$16 sps:$4 sm:$0xff]   ;;  %v4999_v41 = vld [vmem:[%s7093_s18 + $0x5a0] ss:$16 sps:$4 sm:$0xff]  }
 0x4f7   :  { %3358 = vmatprep.subr.bf16.mxu0 %v4953_v42  ;;  %3399 = vmatprep.subr.bf16.mxu1 %v4956_v43  ;;  %v5002_v42 = vld [vmem:[%s7093_s18 + $0x7a0] ss:$16 sps:$4 sm:$0xff]   ;;  %v5007_v43 = vld [vmem:[%s7093_s18 + $0x584] ss:$16 sps:$4 sm:$0xff]  }
 0x4fa   :  { %3359 = vmatpush1.bf16.msra.mxu0 %v4951_v44  ;;  %3400 = vmatpush1.bf16.msra.mxu1 %v4954_v45  ;;  %v5010_v44 = vld [vmem:[%s7093_s18 + $0x784] ss:$16 sps:$4 sm:$0xff]   ;;  %v5005_v45 = vld [vmem:[%s7093_s18 + $0x580] ss:$16 sps:$4 sm:$0xff]  }
 0x4fb   :  { %3360 = vmatprep.subr.bf16.mxu0 %v4959_v46  ;;  %3401 = vmatprep.subr.bf16.mxu1 %v4962_v47  ;;  %v5008_v46 = vld [vmem:[%s7093_s18 + $0x780] ss:$16 sps:$4 sm:$0xff]   ;;  %v5013_v47 = vld [vmem:[%s7093_s18 + $0x564] ss:$16 sps:$4 sm:$0xff]  }
 0x4fe   :  { %3361 = vmatpush1.bf16.msra.mxu0 %v4957_v48  ;;  %3402 = vmatpush1.bf16.msra.mxu1 %v4960_v49  ;;  %v5016_v48 = vld [vmem:[%s7093_s18 + $0x764] ss:$16 sps:$4 sm:$0xff]   ;;  %v5011_v49 = vld [vmem:[%s7093_s18 + $0x560] ss:$16 sps:$4 sm:$0xff]  }
 0x4ff   :  { %3362 = vmatprep.subr.bf16.mxu0 %v4965_v50  ;;  %3403 = vmatprep.subr.bf16.mxu1 %v4968_v51  ;;  %v5014_v50 = vld [vmem:[%s7093_s18 + $0x760] ss:$16 sps:$4 sm:$0xff]   ;;  %v1192_v51 = vsub.s32 4, %v6415_v6 }
 0x502   :  { %3363 = vmatpush1.bf16.msra.mxu0 %v4963_v52  ;;  %3404 = vmatpush1.bf16.msra.mxu1 %v4966_v53  ;;  %v1200_v52 = vsub.s32 6, %v6415_v6  ;;  %v5019_v53 = vld [vmem:[%s7093_s18 + $0x544] ss:$16 sps:$4 sm:$0xff]  }
 0x503   :  { %3364 = vmatprep.subr.bf16.mxu0 %v4971_v54  ;;  %3405 = vmatprep.subr.bf16.mxu1 %v4974_v55  ;;  %v5022_v54 = vld [vmem:[%s7093_s18 + $0x744] ss:$16 sps:$4 sm:$0xff]   ;;  %v5017_v55 = vld [vmem:[%s7093_s18 + $0x540] ss:$16 sps:$4 sm:$0xff]  }
 0x504   :  { %v1201_v58 = vrot.slane %v6422_v9, %v1200_v52  ;;  %v5088_v52 = vld [vmem:[%s7093_s18 + $0x3ec] ss:$16 sps:$4 sm:$0xff]  }
 0x506   :  { %3365 = vmatpush1.bf16.msra.mxu0 %v4969_v56  ;;  %3406 = vmatpush1.bf16.msra.mxu1 %v4972_v57  ;;  %v5020_v56 = vld [vmem:[%s7093_s18 + $0x740] ss:$16 sps:$4 sm:$0xff]   ;;  %v1193_v57 = vrot.slane %v6422_v9, %v1192_v51  ;;  %v5085_v51 = vld [vmem:[%s7093_s18 + $0x1ec] ss:$16 sps:$4 sm:$0xff]  }
 0x507   :  { %v6532_v3 = vpop.f32.mrf.mxu0  ;;  %v6534_v4 = vpop.f32.mrf.mxu1  ;;  %3366 = vmatprep.subr.bf16.mxu0 %v4977_v60  ;;  %3407 = vmatprep.subr.bf16.mxu1 %v4980_v61  ;;  %v5028_v60 = vld [vmem:[%s7093_s18 + $0x724] ss:$16 sps:$4 sm:$0xff]   ;;  %v5023_v61 = vld [vmem:[%s7093_s18 + $0x520] ss:$16 sps:$4 sm:$0xff]  }
 0x508   :  { %v5026_v9 = vld [vmem:[%s7093_s18 + $0x720] ss:$16 sps:$4 sm:$0xff]  }
 0x509   :  { %v1652_v14 = vpop.f32.mrf.mxu0  ;;  %v1693_v15 = vpop.f32.mrf.mxu1 }
 0x50a   :  { %v1653_v16 = vadd.f32 %v1652_v14, %v1197_v62  ;;  %v1694_v17 = vadd.f32 %v1693_v15, %v1205_v63  ;;  %3367 = vmatpush1.bf16.msra.mxu0 %v4975_v1  ;;  %3408 = vmatpush1.bf16.msra.mxu1 %v4978_v2  ;;  %v1651_v62 = vadd.f32 %v6532_v3, %v1193_v57  ;;  %v5031_v1 = vld [vmem:[%s7093_s18 + $0x504] ss:$16 sps:$4 sm:$0xff]   ;;  %v5032_v3 = vld [vmem:[%s7093_s18 + $0x700] ss:$16 sps:$4 sm:$0xff]   ;;  %v5037_v14 = vld [vmem:[%s7093_s18 + $0xec] ss:$16 sps:$4 sm:$0xff]  }
 0x50b   :  { %v1654_v20 = vpop.f32.mrf.mxu0  ;;  %v1695_v21 = vpop.f32.mrf.mxu1  ;;  %3368 = vmatprep.subr.bf16.mxu0 %v4983_v5  ;;  %3409 = vmatprep.subr.bf16.mxu1 %v4986_v13  ;;  %v1692_v63 = vadd.f32 %v6534_v4, %v1201_v58  ;;  %v5034_v2 = vld [vmem:[%s7093_s18 + $0x704] ss:$16 sps:$4 sm:$0xff]   ;;  %v5029_v5 = vld [vmem:[%s7093_s18 + $0x500] ss:$16 sps:$4 sm:$0xff]   ;;  %v5040_v15 = vld [vmem:[%s7093_s18 + $0x2ec] ss:$16 sps:$4 sm:$0xff]  }
 0x50c   :  { %v1703_v25 = vmax.f32 %v1653_v16, 0.0  ;;  %v1705_v26 = vmax.f32 %v1694_v17, 0.0  ;;  %v1702_v4 = vmax.f32 %v1651_v62, 0.0  ;;  %v5035_v16 = vld [vmem:[%s7093_s18 + $0xe8] ss:$16 sps:$4 sm:$0xff]  }
 0x50d   :  { %v1655_v27 = vpop.f32.mrf.mxu0  ;;  %v1696_v28 = vpop.f32.mrf.mxu1  ;;  %v1704_v13 = vmax.f32 %v1692_v63, 0.0  ;;  %v5043_v20 = vld [vmem:[%s7093_s18 + $0xcc] ss:$16 sps:$4 sm:$0xff]   ;;  %v5089_v57 = vld [vmem:[%s7093_s18 + $0x1c8] ss:$16 sps:$4 sm:$0xff]  }
 0x50e   :  { %v6554_v12 = vpack.c.bf16 %v1703_v25, %v1703_v25  ;;  %v6556_v23 = vpack.c.bf16 %v1705_v26, %v1705_v26  ;;  %3369 = vmatpush1.bf16.msra.mxu0 %v4981_v18  ;;  %3410 = vmatpush1.bf16.msra.mxu1 %v4984_v19  ;;  %v6665_v17 = vpack.c.bf16 %v1702_v4, %v1702_v4  ;;  %v5038_v19 = vld [vmem:[%s7093_s18 + $0x2e8] ss:$16 sps:$4 sm:$0xff]   ;;  %v5046_v21 = vld [vmem:[%s7093_s18 + $0x2cc] ss:$16 sps:$4 sm:$0xff]  }
 0x50f   :  { %3370 = vmatprep.subr.bf16.mxu0 %v4989_v22  ;;  %3411 = vmatprep.subr.bf16.mxu1 %v4992_v24  ;;  %v6667_v18 = vpack.c.bf16 %v1704_v13, %v1704_v13  ;;  %v5041_v22 = vld [vmem:[%s7093_s18 + $0xc8] ss:$16 sps:$4 sm:$0xff]   ;;  %v5049_v25 = vld [vmem:[%s7093_s18 + $0xac] ss:$16 sps:$4 sm:$0xff]  }
 0x510   :  { %3386 = vmatprep.mubr.bf16.mxu0 %v6554_v12  ;;  %3427 = vmatprep.mubr.bf16.mxu1 %v6556_v23  ;;  %v5044_v24 = vld [vmem:[%s7093_s18 + $0x2c8] ss:$16 sps:$4 sm:$0xff]   ;;  %v5055_v27 = vld [vmem:[%s7093_s18 + $0x8c] ss:$16 sps:$4 sm:$0xff]  }
 0x511   :  { %v5047_v26 = vld [vmem:[%s7093_s18 + $0xa8] ss:$16 sps:$4 sm:$0xff]   ;;  %v5058_v28 = vld [vmem:[%s7093_s18 + $0x28c] ss:$16 sps:$4 sm:$0xff]  }
 0x512   :  { %3371 = vmatpush2.bf16.msra.mxu0 %v4987_v29  ;;  %3412 = vmatpush2.bf16.msra.mxu1 %v4990_v30  ;;  %v5053_v29 = vld [vmem:[%s7093_s18 + $0x88] ss:$16 sps:$4 sm:$0xff]   ;;  %v5103_v62 = vld [vmem:[%s7093_s18 + $0x18c] ss:$16 sps:$4 sm:$0xff]  }
 0x513   :  { %3372 = vmatprep.subr.bf16.mxu0 %v4995_v31  ;;  %3413 = vmatprep.subr.bf16.mxu1 %v4998_v34  ;;  %v5056_v30 = vld [vmem:[%s7093_s18 + $0x288] ss:$16 sps:$4 sm:$0xff]   ;;  %v5061_v31 = vld [vmem:[%s7093_s18 + $0x6c] ss:$16 sps:$4 sm:$0xff]  }
 0x514   :  { %v5064_v34 = vld [vmem:[%s7093_s18 + $0x26c] ss:$16 sps:$4 sm:$0xff]   ;;  %v5092_v58 = vld [vmem:[%s7093_s18 + $0x3c8] ss:$16 sps:$4 sm:$0xff]  }
 0x515   :  { %v5106_v63 = vld [vmem:[%s7093_s18 + $0x38c] ss:$16 sps:$4 sm:$0xff]   ;;  %v5107_v4 = vld [vmem:[%s7093_s18 + $0x168] ss:$16 sps:$4 sm:$0xff]  }
 0x516   :  { %3373 = vmatpush2.bf16.msra.mxu0 %v4993_v35  ;;  %3414 = vmatpush2.bf16.msra.mxu1 %v4996_v38  ;;  %v5059_v35 = vld [vmem:[%s7093_s18 + $0x68] ss:$16 sps:$4 sm:$0xff]  }
 0x517   :  { %3374 = vmatprep.subr.bf16.mxu0 %v5001_v39  ;;  %3415 = vmatprep.subr.bf16.mxu1 %v5004_v40  ;;  %v5062_v38 = vld [vmem:[%s7093_s18 + $0x268] ss:$16 sps:$4 sm:$0xff]   ;;  %v5067_v39 = vld [vmem:[%s7093_s18 + $0x4c] ss:$16 sps:$4 sm:$0xff]  }
 0x518   :  { %v5070_v40 = vld [vmem:[%s7093_s18 + $0x24c] ss:$16 sps:$4 sm:$0xff]   ;;  %v5110_v13 = vld [vmem:[%s7093_s18 + $0x368] ss:$16 sps:$4 sm:$0xff]  }
 0x51a   :  { %3375 = vmatpush2.bf16.msra.mxu0 %v4999_v41  ;;  %3416 = vmatpush2.bf16.msra.mxu1 %v5002_v42  ;;  %v5065_v41 = vld [vmem:[%s7093_s18 + $0x48] ss:$16 sps:$4 sm:$0xff]  }
 0x51b   :  { %3376 = vmatprep.subr.bf16.mxu0 %v5007_v43  ;;  %3417 = vmatprep.subr.bf16.mxu1 %v5010_v44  ;;  %v5068_v42 = vld [vmem:[%s7093_s18 + $0x248] ss:$16 sps:$4 sm:$0xff]   ;;  %v5073_v43 = vld [vmem:[%s7093_s18 + $0x2c] ss:$16 sps:$4 sm:$0xff]  }
 0x51c   :  { %v5076_v44 = vld [vmem:[%s7093_s18 + $0x22c] ss:$16 sps:$4 sm:$0xff]  }
 0x51e   :  { %3377 = vmatpush2.bf16.msra.mxu0 %v5005_v45  ;;  %3418 = vmatpush2.bf16.msra.mxu1 %v5008_v46  ;;  %v5071_v45 = vld [vmem:[%s7093_s18 + $0x28] ss:$16 sps:$4 sm:$0xff]  }
 0x51f   :  { %3378 = vmatprep.subr.bf16.mxu0 %v5013_v47  ;;  %3419 = vmatprep.subr.bf16.mxu1 %v5016_v48  ;;  %v5074_v46 = vld [vmem:[%s7093_s18 + $0x228] ss:$16 sps:$4 sm:$0xff]   ;;  %v5079_v47 = vld [vmem:[%s7093_s18 + $0xc] ss:$16 sps:$4 sm:$0xff]  }
 0x520   :  { %v5082_v48 = vld [vmem:[%s7093_s18 + $0x20c] ss:$16 sps:$4 sm:$0xff]  }
 0x522   :  { %3379 = vmatpush2.bf16.msra.mxu0 %v5011_v49  ;;  %3420 = vmatpush2.bf16.msra.mxu1 %v5014_v50  ;;  %v5077_v49 = vld [vmem:[%s7093_s18 + $0x8] ss:$16 sps:$4 sm:$0xff]  }
 0x523   :  { %3380 = vmatprep.subr.bf16.mxu0 %v5019_v53  ;;  %3421 = vmatprep.subr.bf16.mxu1 %v5022_v54  ;;  %v5080_v50 = vld [vmem:[%s7093_s18 + $0x208] ss:$16 sps:$4 sm:$0xff]  }
 0x524   :  { %v5083_v53 = vld [vmem:[%s7093_s18 + $0x1e8] ss:$16 sps:$4 sm:$0xff]  }
 0x525   :  { %v5086_v54 = vld [vmem:[%s7093_s18 + $0x3e8] ss:$16 sps:$4 sm:$0xff]  }
 0x526   :  { %3381 = vmatpush2.bf16.msra.mxu0 %v5017_v55  ;;  %3422 = vmatpush2.bf16.msra.mxu1 %v5020_v56  ;;  %v5091_v55 = vld [vmem:[%s7093_s18 + $0x1cc] ss:$16 sps:$4 sm:$0xff]  }
 0x527   :  { %3382 = vmatprep.subr.bf16.mxu0 %v5025_v59  ;;  %3423 = vmatprep.subr.bf16.mxu1 %v5028_v60  ;;  %v5094_v56 = vld [vmem:[%s7093_s18 + $0x3cc] ss:$16 sps:$4 sm:$0xff]  }
 0x528   :  { %v5097_v59 = vld [vmem:[%s7093_s18 + $0x1ac] ss:$16 sps:$4 sm:$0xff]  }
 0x529   :  { %v5100_v60 = vld [vmem:[%s7093_s18 + $0x3ac] ss:$16 sps:$4 sm:$0xff]  }
 0x52a   :  { %3383 = vmatpush2.bf16.msra.mxu0 %v5023_v61  ;;  %3424 = vmatpush2.bf16.msra.mxu1 %v5026_v9  ;;  %v5095_v61 = vld [vmem:[%s7093_s18 + $0x1a8] ss:$16 sps:$4 sm:$0xff]  }
 0x52b   :  { %3384 = vmatprep.subr.bf16.mxu0 %v5031_v1  ;;  %3425 = vmatprep.subr.bf16.mxu1 %v5034_v2  ;;  %v5098_v9 = vld [vmem:[%s7093_s18 + $0x3a8] ss:$16 sps:$4 sm:$0xff]  }
 0x52c   :  { %v5101_v1 = vld [vmem:[%s7093_s18 + $0x188] ss:$16 sps:$4 sm:$0xff]  }
 0x52d   :  { %v5104_v2 = vld [vmem:[%s7093_s18 + $0x388] ss:$16 sps:$4 sm:$0xff]  }
 0x52e   :  { %3385 = vmatpush2.bf16.msra.mxu0 %v5029_v5  ;;  %3426 = vmatpush2.bf16.msra.mxu1 %v5032_v3  ;;  %v5109_v5 = vld [vmem:[%s7093_s18 + $0x16c] ss:$16 sps:$4 sm:$0xff]  }
 0x52f   :  { %3436 = vmatprep.subr.bf16.mxu0 %v5037_v14  ;;  %3477 = vmatprep.subr.bf16.mxu1 %v5040_v15  ;;  %v5112_v3 = vld [vmem:[%s7093_s18 + $0x36c] ss:$16 sps:$4 sm:$0xff]  }
 0x530   :  { %v5115_v14 = vld [vmem:[%s7093_s18 + $0x14c] ss:$16 sps:$4 sm:$0xff]  }
 0x531   :  { %3387 = vmatmul.mubr.bf16.vlgmr.msra.gmra.mxu0 %v6665_v17  ;;  %3428 = vmatmul.mubr.bf16.vlgmr.msra.gmra.mxu1 %v6667_v18  ;;  %v5118_v15 = vld [vmem:[%s7093_s18 + $0x34c] ss:$16 sps:$4 sm:$0xff]  }
 0x532   :  { %3437 = vmatpush1.bf16.msra.mxu0 %v5035_v16  ;;  %3468 = vmatprep.mubr.bf16.mxu0 %v6438_v32  ;;  %v5052_v32 = vld [vmem:[%s7093_s18 + $0x2ac] ss:$16 sps:$4 sm:$0xff]   ;;  %v5113_v16 = vld [vmem:[%s7093_s18 + $0x148] ss:$16 sps:$4 sm:$0xff]  }
 0x533   :  { %3478 = vmatpush1.bf16.msra.mxu1 %v5038_v19  ;;  %3509 = vmatprep.mubr.bf16.mxu1 %v6440_v33  ;;  %v5050_v33 = vld [vmem:[%s7093_s18 + $0x2a8] ss:$16 sps:$4 sm:$0xff]  }
 0x534   :  { %3438 = vmatprep.subr.bf16.mxu0 %v5043_v20  ;;  %3479 = vmatprep.subr.bf16.mxu1 %v5046_v21  ;;  %v5116_v19 = vld [vmem:[%s7093_s18 + $0x348] ss:$16 sps:$4 sm:$0xff]   ;;  %v5121_v20 = vld [vmem:[%s7093_s18 + $0x12c] ss:$16 sps:$4 sm:$0xff]  }
 0x535   :  { %v5124_v21 = vld [vmem:[%s7093_s18 + $0x32c] ss:$16 sps:$4 sm:$0xff]  }
 0x536   :  { %3439 = vmatpush1.bf16.msra.mxu0 %v5041_v22  ;;  %v5119_v22 = vld [vmem:[%s7093_s18 + $0x128] ss:$16 sps:$4 sm:$0xff]  }
 0x537   :  { %3480 = vmatpush1.bf16.msra.mxu1 %v5044_v24  ;;  %3440 = vmatprep.subr.bf16.mxu0 %v5049_v25  ;;  %v5122_v24 = vld [vmem:[%s7093_s18 + $0x328] ss:$16 sps:$4 sm:$0xff]   ;;  %v5127_v25 = vld [vmem:[%s7093_s18 + $0x10c] ss:$16 sps:$4 sm:$0xff]  }
 0x538   :  { %3481 = vmatprep.subr.bf16.mxu1 %v5052_v32  ;;  %v5130_v32 = vld [vmem:[%s7093_s18 + $0x30c] ss:$16 sps:$4 sm:$0xff]  }
 0x53a   :  { %3441 = vmatpush1.bf16.msra.mxu0 %v5047_v26  ;;  %v5125_v26 = vld [vmem:[%s7093_s18 + $0x108] ss:$16 sps:$4 sm:$0xff]  }
 0x53b   :  { %3482 = vmatpush1.bf16.msra.mxu1 %v5050_v33  ;;  %3442 = vmatprep.subr.bf16.mxu0 %v5055_v27  ;;  %v5128_v33 = vld [vmem:[%s7093_s18 + $0x308] ss:$16 sps:$4 sm:$0xff]   ;;  %v5133_v27 = vld [vmem:[%s7093_s18 + $0x4ec] ss:$16 sps:$4 sm:$0xff]  }
 0x53c   :  { %3483 = vmatprep.subr.bf16.mxu1 %v5058_v28  ;;  %v5136_v28 = vld [vmem:[%s7093_s18 + $0x6ec] ss:$16 sps:$4 sm:$0xff]  }
 0x53e   :  { %3443 = vmatpush1.bf16.msra.mxu0 %v5053_v29  ;;  %v5131_v29 = vld [vmem:[%s7093_s18 + $0x4e8] ss:$16 sps:$4 sm:$0xff]  }
 0x53f   :  { %3484 = vmatpush1.bf16.msra.mxu1 %v5056_v30  ;;  %3444 = vmatprep.subr.bf16.mxu0 %v5061_v31  ;;  %v5134_v30 = vld [vmem:[%s7093_s18 + $0x6e8] ss:$16 sps:$4 sm:$0xff]   ;;  %v5139_v31 = vld [vmem:[%s7093_s18 + $0x4cc] ss:$16 sps:$4 sm:$0xff]  }
 0x540   :  { %3485 = vmatprep.subr.bf16.mxu1 %v5064_v34  ;;  %v5142_v34 = vld [vmem:[%s7093_s18 + $0x6cc] ss:$16 sps:$4 sm:$0xff]  }
 0x542   :  { %3445 = vmatpush1.bf16.msra.mxu0 %v5059_v35  ;;  %v5137_v35 = vld [vmem:[%s7093_s18 + $0x4c8] ss:$16 sps:$4 sm:$0xff]  }
 0x543   :  { %3486 = vmatpush1.bf16.msra.mxu1 %v5062_v38  ;;  %3446 = vmatprep.subr.bf16.mxu0 %v5067_v39  ;;  %v5140_v38 = vld [vmem:[%s7093_s18 + $0x6c8] ss:$16 sps:$4 sm:$0xff]  }
 0x544   :  { %3487 = vmatprep.subr.bf16.mxu1 %v5070_v40  ;;  %v5146_v39 = vld [vmem:[%s7093_s18 + $0x6a8] ss:$16 sps:$4 sm:$0xff]   ;;  %v5154_v40 = vld [vmem:[%s7093_s18 + $0x68c] ss:$16 sps:$4 sm:$0xff]  }
 0x546   :  { %3447 = vmatpush1.bf16.msra.mxu0 %v5065_v41  ;;  %v5149_v41 = vld [vmem:[%s7093_s18 + $0x488] ss:$16 sps:$4 sm:$0xff]  }
 0x547   :  { %3488 = vmatpush1.bf16.msra.mxu1 %v5068_v42  ;;  %3448 = vmatprep.subr.bf16.mxu0 %v5073_v43  ;;  %v5152_v42 = vld [vmem:[%s7093_s18 + $0x688] ss:$16 sps:$4 sm:$0xff]   ;;  %v5157_v43 = vld [vmem:[%s7093_s18 + $0x46c] ss:$16 sps:$4 sm:$0xff]  }
 0x548   :  { %3489 = vmatprep.subr.bf16.mxu1 %v5076_v44  ;;  %v5160_v44 = vld [vmem:[%s7093_s18 + $0x66c] ss:$16 sps:$4 sm:$0xff]  }
 0x54a   :  { %3449 = vmatpush1.bf16.msra.mxu0 %v5071_v45  ;;  %v5155_v45 = vld [vmem:[%s7093_s18 + $0x468] ss:$16 sps:$4 sm:$0xff]  }
 0x54b   :  { %3490 = vmatpush1.bf16.msra.mxu1 %v5074_v46  ;;  %3450 = vmatprep.subr.bf16.mxu0 %v5079_v47  ;;  %v5158_v46 = vld [vmem:[%s7093_s18 + $0x668] ss:$16 sps:$4 sm:$0xff]   ;;  %v5163_v47 = vld [vmem:[%s7093_s18 + $0x44c] ss:$16 sps:$4 sm:$0xff]  }
 0x54c   :  { %3491 = vmatprep.subr.bf16.mxu1 %v5082_v48  ;;  %v5166_v48 = vld [vmem:[%s7093_s18 + $0x64c] ss:$16 sps:$4 sm:$0xff]  }
 0x54e   :  { %3451 = vmatpush1.bf16.msra.mxu0 %v5077_v49  ;;  %v5161_v49 = vld [vmem:[%s7093_s18 + $0x448] ss:$16 sps:$4 sm:$0xff]  }
 0x54f   :  { %3492 = vmatpush1.bf16.msra.mxu1 %v5080_v50  ;;  %3452 = vmatprep.subr.bf16.mxu0 %v5085_v51  ;;  %v5164_v50 = vld [vmem:[%s7093_s18 + $0x648] ss:$16 sps:$4 sm:$0xff]   ;;  %v5169_v51 = vld [vmem:[%s7093_s18 + $0x42c] ss:$16 sps:$4 sm:$0xff]  }
 0x550   :  { %3493 = vmatprep.subr.bf16.mxu1 %v5088_v52  ;;  %v5172_v52 = vld [vmem:[%s7093_s18 + $0x62c] ss:$16 sps:$4 sm:$0xff]  }
 0x552   :  { %3453 = vmatpush2.bf16.msra.mxu0 %v5083_v53  ;;  %v5167_v53 = vld [vmem:[%s7093_s18 + $0x428] ss:$16 sps:$4 sm:$0xff]  }
 0x553   :  { %3494 = vmatpush2.bf16.msra.mxu1 %v5086_v54  ;;  %3454 = vmatprep.subr.bf16.mxu0 %v5091_v55  ;;  %v5170_v54 = vld [vmem:[%s7093_s18 + $0x628] ss:$16 sps:$4 sm:$0xff]   ;;  %v5175_v55 = vld [vmem:[%s7093_s18 + $0x40c] ss:$16 sps:$4 sm:$0xff]  }
 0x554   :  { %3495 = vmatprep.subr.bf16.mxu1 %v5094_v56  ;;  %v5178_v56 = vld [vmem:[%s7093_s18 + $0x60c] ss:$16 sps:$4 sm:$0xff]  }
 0x556   :  { %3455 = vmatpush2.bf16.msra.mxu0 %v5089_v57  ;;  %v5173_v57 = vld [vmem:[%s7093_s18 + $0x408] ss:$16 sps:$4 sm:$0xff]  }
 0x557   :  { %3496 = vmatpush2.bf16.msra.mxu1 %v5092_v58  ;;  %3456 = vmatprep.subr.bf16.mxu0 %v5097_v59  ;;  %v5176_v58 = vld [vmem:[%s7093_s18 + $0x608] ss:$16 sps:$4 sm:$0xff]   ;;  %v5181_v59 = vld [vmem:[%s7093_s18 + $0x5ec] ss:$16 sps:$4 sm:$0xff]  }
 0x558   :  { %3497 = vmatprep.subr.bf16.mxu1 %v5100_v60  ;;  %v5184_v60 = vld [vmem:[%s7093_s18 + $0x7ec] ss:$16 sps:$4 sm:$0xff]  }
 0x55a   :  { %3457 = vmatpush2.bf16.msra.mxu0 %v5095_v61  ;;  %v5179_v61 = vld [vmem:[%s7093_s18 + $0x5e8] ss:$16 sps:$4 sm:$0xff]  }
 0x55b   :  { %3498 = vmatpush2.bf16.msra.mxu1 %v5098_v9  ;;  %3458 = vmatprep.subr.bf16.mxu0 %v5103_v62  ;;  %v5182_v9 = vld [vmem:[%s7093_s18 + $0x7e8] ss:$16 sps:$4 sm:$0xff]   ;;  %v5187_v62 = vld [vmem:[%s7093_s18 + $0x5cc] ss:$16 sps:$4 sm:$0xff]  }
 0x55c   :  { %3499 = vmatprep.subr.bf16.mxu1 %v5106_v63  ;;  %v5190_v63 = vld [vmem:[%s7093_s18 + $0x7cc] ss:$16 sps:$4 sm:$0xff]  }
 0x55e   :  { %3459 = vmatpush2.bf16.msra.mxu0 %v5101_v1  ;;  %v5185_v1 = vld [vmem:[%s7093_s18 + $0x5c8] ss:$16 sps:$4 sm:$0xff]  }
 0x55f   :  { %3500 = vmatpush2.bf16.msra.mxu1 %v5104_v2  ;;  %3460 = vmatprep.subr.bf16.mxu0 %v5109_v5  ;;  %v5188_v2 = vld [vmem:[%s7093_s18 + $0x7c8] ss:$16 sps:$4 sm:$0xff]   ;;  %v5193_v5 = vld [vmem:[%s7093_s18 + $0x5ac] ss:$16 sps:$4 sm:$0xff]  }
 0x560   :  { %3501 = vmatprep.subr.bf16.mxu1 %v5112_v3  ;;  %v5196_v3 = vld [vmem:[%s7093_s18 + $0x7ac] ss:$16 sps:$4 sm:$0xff]  }
 0x562   :  { %3461 = vmatpush2.bf16.msra.mxu0 %v5107_v4  ;;  %v5191_v4 = vld [vmem:[%s7093_s18 + $0x5a8] ss:$16 sps:$4 sm:$0xff]  }
 0x563   :  { %3502 = vmatpush2.bf16.msra.mxu1 %v5110_v13  ;;  %3462 = vmatprep.subr.bf16.mxu0 %v5115_v14  ;;  %v5194_v13 = vld [vmem:[%s7093_s18 + $0x7a8] ss:$16 sps:$4 sm:$0xff]   ;;  %v5199_v14 = vld [vmem:[%s7093_s18 + $0x58c] ss:$16 sps:$4 sm:$0xff]  }
 0x564   :  { %3503 = vmatprep.subr.bf16.mxu1 %v5118_v15  ;;  %v5202_v15 = vld [vmem:[%s7093_s18 + $0x78c] ss:$16 sps:$4 sm:$0xff]  }
 0x566   :  { %3463 = vmatpush2.bf16.msra.mxu0 %v5113_v16  ;;  %v5197_v16 = vld [vmem:[%s7093_s18 + $0x588] ss:$16 sps:$4 sm:$0xff]  }
 0x567   :  { %3504 = vmatpush2.bf16.msra.mxu1 %v5116_v19  ;;  %3464 = vmatprep.subr.bf16.mxu0 %v5121_v20  ;;  %v5200_v19 = vld [vmem:[%s7093_s18 + $0x788] ss:$16 sps:$4 sm:$0xff]   ;;  %v5205_v20 = vld [vmem:[%s7093_s18 + $0x56c] ss:$16 sps:$4 sm:$0xff]  }
 0x568   :  { %3505 = vmatprep.subr.bf16.mxu1 %v5124_v21  ;;  %v5208_v21 = vld [vmem:[%s7093_s18 + $0x76c] ss:$16 sps:$4 sm:$0xff]  }
 0x56a   :  { %3465 = vmatpush2.bf16.msra.mxu0 %v5119_v22  ;;  %v5203_v22 = vld [vmem:[%s7093_s18 + $0x568] ss:$16 sps:$4 sm:$0xff]  }
 0x56b   :  { %3506 = vmatpush2.bf16.msra.mxu1 %v5122_v24  ;;  %3466 = vmatprep.subr.bf16.mxu0 %v5127_v25  ;;  %v5206_v24 = vld [vmem:[%s7093_s18 + $0x768] ss:$16 sps:$4 sm:$0xff]   ;;  %v5211_v25 = vld [vmem:[%s7093_s18 + $0x54c] ss:$16 sps:$4 sm:$0xff]  }
 0x56c   :  { %3507 = vmatprep.subr.bf16.mxu1 %v5130_v32  ;;  %v5214_v32 = vld [vmem:[%s7093_s18 + $0x74c] ss:$16 sps:$4 sm:$0xff]  }
 0x56e   :  { %3467 = vmatpush2.bf16.msra.mxu0 %v5125_v26  ;;  %v5209_v26 = vld [vmem:[%s7093_s18 + $0x548] ss:$16 sps:$4 sm:$0xff]  }
 0x56f   :  { %3508 = vmatpush2.bf16.msra.mxu1 %v5128_v33  ;;  %3518 = vmatprep.subr.bf16.mxu0 %v5133_v27  ;;  %v5212_v33 = vld [vmem:[%s7093_s18 + $0x748] ss:$16 sps:$4 sm:$0xff]   ;;  %v5217_v27 = vld [vmem:[%s7093_s18 + $0x52c] ss:$16 sps:$4 sm:$0xff]  }
 0x570   :  { %3559 = vmatprep.subr.bf16.mxu1 %v5136_v28  ;;  %v5220_v28 = vld [vmem:[%s7093_s18 + $0x72c] ss:$16 sps:$4 sm:$0xff]  }
 0x571   :  { %3469 = vmatmul.mubr.bf16.vlgmr.msra.gmra.mxu0 %v6448_v36  ;;  %v5145_v36 = vld [vmem:[%s7093_s18 + $0x4ac] ss:$16 sps:$4 sm:$0xff]  }
 0x572   :  { %3510 = vmatmul.mubr.bf16.vlgmr.msra.gmra.mxu1 %v6450_v37  ;;  %3519 = vmatpush1.bf16.msra.mxu0 %v5131_v29  ;;  %v5148_v37 = vld [vmem:[%s7093_s18 + $0x6ac] ss:$16 sps:$4 sm:$0xff]   ;;  %v5215_v29 = vld [vmem:[%s7093_s18 + $0x528] ss:$16 sps:$4 sm:$0xff]  }
 0x573   :  { %3550 = vmatprep.mubr.bf16.mxu0 %v6554_v12  ;;  %3560 = vmatpush1.bf16.msra.mxu1 %v5134_v30  ;;  %v5143_v12 = vld [vmem:[%s7093_s18 + $0x4a8] ss:$16 sps:$4 sm:$0xff]  }
 0x574   :  { %3591 = vmatprep.mubr.bf16.mxu1 %v6556_v23  ;;  %3520 = vmatprep.subr.bf16.mxu0 %v5139_v31  ;;  %v5151_v23 = vld [vmem:[%s7093_s18 + $0x48c] ss:$16 sps:$4 sm:$0xff]   ;;  %v5218_v30 = vld [vmem:[%s7093_s18 + $0x728] ss:$16 sps:$4 sm:$0xff]  }
 0x575   :  { %3561 = vmatprep.subr.bf16.mxu1 %v5142_v34  ;;  %v5223_v31 = vld [vmem:[%s7093_s18 + $0x50c] ss:$16 sps:$4 sm:$0xff]  }
 0x576   :  { %3521 = vmatpush1.bf16.msra.mxu0 %v5137_v35  ;;  %v5226_v34 = vld [vmem:[%s7093_s18 + $0x70c] ss:$16 sps:$4 sm:$0xff]   ;;  %v5221_v35 = vld [vmem:[%s7093_s18 + $0x508] ss:$16 sps:$4 sm:$0xff]  }
 0x577   :  { %3562 = vmatpush1.bf16.msra.mxu1 %v5140_v38  ;;  %3522 = vmatprep.subr.bf16.mxu0 %v5145_v36  ;;  %v5224_v38 = vld [vmem:[%s7093_s18 + $0x708] ss:$16 sps:$4 sm:$0xff]   ;;  %v5227_v36 = vld [vmem:[#allocation26 + $0x78] sm:$0xff]   ;;  %s5719_s18 = smov [#allocation32]  }
 0x578   :  { %3563 = vmatprep.subr.bf16.mxu1 %v5148_v37  ;;  %v5228_v37 = vld [vmem:[#allocation26 + $0x38] sm:$0xff]   ;;  %s4071_s26 = sshll.u32 %s5719_s18, 4  ;;  %s4072_s26 = int_to_ptr.vmem [resolvable:$true] %s4071_s26 }
 0x579   :  { %s5653_s22 = scalar_lea.vmem %s4072_s26, 32  ;;  %p5658_p12 = scmp.lt.s32.totalorder %s4072_s26, %s4072_s26 }
 0x57a   :  { %3523 = vmatpush1.bf16.msra.mxu0 %v5143_v12  ;;  %v5229_v12 = vld [vmem:[#allocation26 + $0x70] sm:$0xff]   ;;  %p5654_p11 = scmp.ne.s32.totalorder %s4072_s26, %s5653_s22  ;;  %p5659_p13 = scmp.lt.s32.totalorder %s5653_s22, %s5653_s22 }
 0x57b   :  { %3564 = vmatpush1.bf16.msra.mxu1 %v5146_v39  ;;  %3524 = vmatprep.subr.bf16.mxu0 %v5151_v23 }
 0x57c   :  { %3565 = vmatprep.subr.bf16.mxu1 %v5154_v40  ;;  %v5230_v40 = vld [vmem:[#allocation26 + $0x30] sm:$0xff]   ;;  %p5660_p0 = por %p5659_p13, %p5658_p12 }
 0x57e   :  { %3525 = vmatpush1.bf16.msra.mxu0 %v5149_v41  ;;  %p5661_p1 = pnand %p5660_p0, %p5654_p11 }
 0x57f   :  { %3566 = vmatpush1.bf16.msra.mxu1 %v5152_v42  ;;  %3526 = vmatprep.subr.bf16.mxu0 %v5157_v43  ;;  %v5231_v43 = vld [vmem:[#allocation26 + $0x68] sm:$0xff]  }
 0x580   :  { %3567 = vmatprep.subr.bf16.mxu1 %v5160_v44 }
 0x582   :  { %3527 = vmatpush1.bf16.msra.mxu0 %v5155_v45 }
 0x583   :  { %3568 = vmatpush1.bf16.msra.mxu1 %v5158_v46  ;;  %3528 = vmatprep.subr.bf16.mxu0 %v5163_v47  ;;  %v5232_v46 = vld [vmem:[#allocation26 + $0x28] sm:$0xff]  }
 0x584   :  { %3569 = vmatprep.subr.bf16.mxu1 %v5166_v48 }
 0x586   :  { %3529 = vmatpush1.bf16.msra.mxu0 %v5161_v49  ;;  %v5233_v49 = vld [vmem:[#allocation26 + $0x60] sm:$0xff]  }
 0x587   :  { %3570 = vmatpush1.bf16.msra.mxu1 %v5164_v50  ;;  %3530 = vmatprep.subr.bf16.mxu0 %v5169_v51  ;;  %v5243_v50 = vld [vmem:[#allocation26 + $0xf8] sm:$0xff]   ;;  %v5245_v51 = vld [vmem:[#allocation26 + $0xf0] sm:$0xff]  }
 0x588   :  { %3571 = vmatprep.subr.bf16.mxu1 %v5172_v52  ;;  %v5234_v52 = vld [vmem:[#allocation26 + $0x20] sm:$0xff]  }
 0x58a   :  { %3531 = vmatpush1.bf16.msra.mxu0 %v5167_v53  ;;  %v5246_v53 = vld [vmem:[#allocation26 + $0xb0] sm:$0xff]  }
 0x58b   :  { %3572 = vmatpush1.bf16.msra.mxu1 %v5170_v54  ;;  %3532 = vmatprep.subr.bf16.mxu0 %v5175_v55  ;;  %v5247_v54 = vld [vmem:[#allocation26 + $0xe8] sm:$0xff]   ;;  %v5236_v55 = vld [vmem:[#allocation26 + $0x18] sm:$0xff]  }
 0x58c   :  { %3573 = vmatprep.subr.bf16.mxu1 %v5178_v56  ;;  %v5237_v56 = vld [vmem:[#allocation26 + $0x50] sm:$0xff]  }
 0x58e   :  { %3533 = vmatpush1.bf16.msra.mxu0 %v5173_v57  ;;  %v5248_v57 = vld [vmem:[#allocation26 + $0xa8] sm:$0xff]  }
 0x58f   :  { %3574 = vmatpush1.bf16.msra.mxu1 %v5176_v58  ;;  %3534 = vmatprep.subr.bf16.mxu0 %v5181_v59  ;;  %v5249_v58 = vld [vmem:[#allocation26 + $0xe0] sm:$0xff]   ;;  %v5238_v59 = vld [vmem:[#allocation26 + $0x10] sm:$0xff]  }
 0x590   :  { %3575 = vmatprep.subr.bf16.mxu1 %v5184_v60  ;;  %v5239_v60 = vld [vmem:[#allocation26 + $0x48] sm:$0xff]  }
 0x592   :  { %3535 = vmatpush2.bf16.msra.mxu0 %v5179_v61  ;;  %v5250_v61 = vld [vmem:[#allocation26 + $0xa0] sm:$0xff]  }
 0x593   :  { %3576 = vmatpush2.bf16.msra.mxu1 %v5182_v9  ;;  %3536 = vmatprep.subr.bf16.mxu0 %v5187_v62  ;;  %v5251_v9 = vld [vmem:[#allocation26 + $0xd8] sm:$0xff]   ;;  %v5240_v62 = vld [vmem:[#allocation26 + $0x8] sm:$0xff]  }
 0x594   :  { %3577 = vmatprep.subr.bf16.mxu1 %v5190_v63  ;;  %v5241_v63 = vld [vmem:[#allocation26 + $0x40] sm:$0xff]  }
 0x596   :  { %3537 = vmatpush2.bf16.msra.mxu0 %v5185_v1  ;;  %v5252_v1 = vld [vmem:[#allocation26 + $0x98] sm:$0xff]  }
 0x597   :  { %3578 = vmatpush2.bf16.msra.mxu1 %v5188_v2  ;;  %3538 = vmatprep.subr.bf16.mxu0 %v5193_v5  ;;  %v5242_v2 = vld [vmem:[#allocation26] sm:$0xff]   ;;  %v1970_v5 = vld [vmem:[#allocation25] sm:$0xf] }
 0x598   :  { %3579 = vmatprep.subr.bf16.mxu1 %v5196_v3  ;;  %v1975_v3 = vrot.slane %v1970_v5, %v1176_v7 }
 0x59a   :  { %3539 = vmatpush2.bf16.msra.mxu0 %v5191_v4  ;;  %v1979_v4 = vrot.slane %v1970_v5, %v1180_v11  ;;  %v5256_v11 = vld [vmem:[#allocation26 + $0x88] sm:$0xff]  }
 0x59b   :  { %3580 = vmatpush2.bf16.msra.mxu1 %v5194_v13  ;;  %3540 = vmatprep.subr.bf16.mxu0 %v5199_v14 }
 0x59c   :  { %3581 = vmatprep.subr.bf16.mxu1 %v5202_v15 }
 0x59e   :  { %3541 = vmatpush2.bf16.msra.mxu0 %v5197_v16 }
 0x59f   :  { %3582 = vmatpush2.bf16.msra.mxu1 %v5200_v19  ;;  %3542 = vmatprep.subr.bf16.mxu0 %v5205_v20  ;;  %v5253_v20 = vld [vmem:[#allocation26 + $0xd0] sm:$0xff]  }
 0x5a0   :  { %3583 = vmatprep.subr.bf16.mxu1 %v5208_v21 }
 0x5a2   :  { %3543 = vmatpush2.bf16.msra.mxu0 %v5203_v22 }
 0x5a3   :  { %3584 = vmatpush2.bf16.msra.mxu1 %v5206_v24  ;;  %3544 = vmatprep.subr.bf16.mxu0 %v5211_v25  ;;  %v5254_v24 = vld [vmem:[#allocation26 + $0x90] sm:$0xff]  }
 0x5a4   :  { %3585 = vmatprep.subr.bf16.mxu1 %v5214_v32 }
 0x5a6   :  { %3545 = vmatpush2.bf16.msra.mxu0 %v5209_v26 }
 0x5a7   :  { %3586 = vmatpush2.bf16.msra.mxu1 %v5212_v33  ;;  %3546 = vmatprep.subr.bf16.mxu0 %v5217_v27 }
 0x5a8   :  { %3587 = vmatprep.subr.bf16.mxu1 %v5220_v28  ;;  %v5255_v28 = vld [vmem:[#allocation26 + $0xc8] sm:$0xff]  }
 0x5aa   :  { %3547 = vmatpush2.bf16.msra.mxu0 %v5215_v29 }
 0x5ab   :  { %3588 = vmatpush2.bf16.msra.mxu1 %v5218_v30  ;;  %3548 = vmatprep.subr.bf16.mxu0 %v5223_v31 }
 0x5ac   :  { %3589 = vmatprep.subr.bf16.mxu1 %v5226_v34 }
 0x5ae   :  { %3549 = vmatpush2.bf16.msra.mxu0 %v5221_v35 }
 0x5af   :  { %3590 = vmatpush2.bf16.msra.mxu1 %v5224_v38  ;;  %4565 = vmatprep.subr.bf16.mxu0 %v5227_v36  ;;  %v5257_v38 = vld [vmem:[#allocation26 + $0xc0] sm:$0xff]  }
 0x5b0   :  { %4587 = vmatprep.subr.bf16.mxu1 %v5243_v50  ;;  %v5263_v50 = vld [vmem:[#allocation29 + $0x18] sm:$0xff]  }
 0x5b1   :  { %3551 = vmatmul.mubr.bf16.vlgmr.msra.gmra.mxu0 %v6665_v17  ;;  %v3306_v39 = vpop.f32.mrf.mxu0  ;;  %v3347_v23 = vpop.f32.mrf.mxu1  ;;  %v5244_v17 = vld [vmem:[#allocation26 + $0xb8] sm:$0xff]  }
 0x5b2   :  { %3592 = vmatmul.mubr.bf16.vlgmr.msra.gmra.mxu1 %v6667_v18  ;;  %4566 = vmatpush3.bf16.msra.mxu0 %v5228_v37  ;;  %v5235_v18 = vld [vmem:[#allocation26 + $0x58] sm:$0xff]   ;;  %v3307_v13 = vadd.f32 %v3306_v39, %v1975_v3  ;;  %v5258_v37 = vld [vmem:[#allocation26 + $0x80] sm:$0xff]  }
 0x5b3   :  { %v3308_v41 = vpop.f32.mrf.mxu0  ;;  %v3349_v42 = vpop.f32.mrf.mxu1  ;;  %4567 = vmatprep.subr.bf16.mxu0 %v5229_v12  ;;  %4588 = vmatpush3.bf16.msra.mxu1 %v5244_v17  ;;  %v1983_v17 = vrot.slane %v1970_v5, %v1184_v8 }
 0x5b4   :  { %4589 = vmatprep.subr.bf16.mxu1 %v5245_v51  ;;  %v3309_v14 = vadd.f32 %v3308_v41, %v1979_v4  ;;  %v3348_v15 = vadd.f32 %v3347_v23, %v3307_v13  ;;  %v1987_v51 = vrot.slane %v1970_v5, %v1188_v10  ;;  %v5264_v4 = vld [vmem:[#allocation29 + $0x10] sm:$0xff]  }
 0x5b5   :  { %v3310_v44 = vpop.f32.mrf.mxu0  ;;  %v3351_v45 = vpop.f32.mrf.mxu1 }
 0x5b6   :  { %4568 = vmatpush3.bf16.msra.mxu0 %v5230_v40  ;;  %v3350_v21 = vadd.f32 %v3349_v42, %v3309_v14 }
 0x5b7   :  { %v3311_v47 = vpop.f32.mrf.mxu0  ;;  %v3352_v48 = vpop.f32.mrf.mxu1  ;;  %4569 = vmatprep.subr.bf16.mxu0 %v5231_v43  ;;  %4590 = vmatpush3.bf16.msra.mxu1 %v5246_v53 }
 0x5b8   :  { %4591 = vmatprep.subr.bf16.mxu1 %v5247_v54  ;;  %v5260_v47 = vld [vmem:[#allocation29 + $0x30] sm:$0xff]   ;;  %v5261_v48 = vld [vmem:[#allocation29 + $0x28] sm:$0xff]  }
 0x5ba   :  { %4570 = vmatpush3.bf16.msra.mxu0 %v5232_v46  ;;  %v5259_v46 = vld [vmem:[#allocation29 + $0x38] sm:$0xff]  }
 0x5bb   :  { %4571 = vmatprep.subr.bf16.mxu0 %v5233_v49  ;;  %4592 = vmatpush3.bf16.msra.mxu1 %v5248_v57  ;;  %v5262_v49 = vld [vmem:[#allocation29 + $0x20] sm:$0xff]  }
 0x5bc   :  { %4593 = vmatprep.subr.bf16.mxu1 %v5249_v58 }
 0x5be   :  { %4572 = vmatpush3.bf16.msra.mxu0 %v5234_v52 }
 0x5bf   :  { %4573 = vmatprep.subr.bf16.mxu0 %v5235_v18  ;;  %4594 = vmatpush3.bf16.msra.mxu1 %v5250_v61 }
 0x5c0   :  { %4595 = vmatprep.subr.bf16.mxu1 %v5251_v9 }
 0x5c2   :  { %4574 = vmatpush3.bf16.msra.mxu0 %v5236_v55 }
 0x5c3   :  { %4575 = vmatprep.subr.bf16.mxu0 %v5237_v56  ;;  %4596 = vmatpush3.bf16.msra.mxu1 %v5252_v1 }
 0x5c4   :  { %4597 = vmatprep.subr.bf16.mxu1 %v5253_v20  ;;  %v5266_v20 = vld [vmem:[#allocation29] sm:$0xff]  }
 0x5c6   :  { %4576 = vmatpush3.bf16.msra.mxu0 %v5238_v59 }
 0x5c7   :  { %4577 = vmatprep.subr.bf16.mxu0 %v5239_v60  ;;  %4598 = vmatpush3.bf16.msra.mxu1 %v5254_v24 }
 0x5c8   :  { %4599 = vmatprep.subr.bf16.mxu1 %v5255_v28 }
 0x5ca   :  { %4578 = vmatpush3.bf16.msra.mxu0 %v5240_v62 }
 0x5cb   :  { %4579 = vmatprep.subr.bf16.mxu0 %v5241_v63  ;;  %4600 = vmatpush3.bf16.msra.mxu1 %v5256_v11 }
 0x5cc   :  { %4601 = vmatprep.subr.bf16.mxu1 %v5257_v38 }
 0x5ce   :  { %4580 = vmatpush3.bf16.msra.mxu0 %v5242_v2 }
 0x5cf   :  { %4750 = vmatprep.subr.bf16.mxu0 %v5716_v0  ;;  %4602 = vmatpush3.bf16.msra.mxu1 %v5258_v37 }
 0x5f1   :  { %v3388_v16 = vpop.f32.mrf.mxu0  ;;  %v3429_v19 = vpop.f32.mrf.mxu1 }
 0x5f2   :  { %v3389_v22 = vadd.f32 %v3388_v16, %v3348_v15  ;;  %v5265_v16 = vld [vmem:[#allocation29 + $0x8] sm:$0xff]  }
 0x5f3   :  { %v3390_v25 = vpop.f32.mrf.mxu0  ;;  %v3431_v32 = vpop.f32.mrf.mxu1 }
 0x5f4   :  { %v3430_v26 = vadd.f32 %v3429_v19, %v3389_v22  ;;  %v3391_v33 = vadd.f32 %v3390_v25, %v3350_v21  ;;  %v4465_v21 = vld [vmem:[#allocation28] ss:$0 sm:$0xff] }
 0x5f5   :  { %v3392_v27 = vpop.f32.mrf.mxu0  ;;  %v3433_v7 = vpop.f32.mrf.mxu1 }
 0x5f6   :  { %v3432_v29 = vadd.f32 %v3431_v32, %v3391_v33  ;;  %v3600_v30 = vmax.f32 %v3430_v26, 0.0 }
 0x5f7   :  { %v3393_v31 = vpop.f32.mrf.mxu0  ;;  %v3434_v34 = vpop.f32.mrf.mxu1 }
 0x5f8   :  { %v3601_v35 = vmax.f32 %v3432_v29, 0.0  ;;  %v3604_v12 = vpack.c.bf16 %v3600_v30, %v3600_v30  ;;  %v4498_v29 = vld [vmem:[#allocation31] ss:$0 sm:$0xff] }
 0x5fa   :  { %v3605_v36 = vpack.c.bf16 %v3601_v35, %v3601_v35 }
 0x5fc   :  { %3903 = vmatprep.mubr.bf16.mxu0 %v3605_v36 }
 0x5fd   :  { %3904 = vmatmul.mubr.bf16.vlgmr.msra.gmra.mxu0 %v3604_v12 }
 0x5fe   :  { %4766 = vmatprep.mubr.msk.bf16.mxu0 %vm5717_vm0, %v5716_v0  ;;  %4751 = vmatpush3.bf16.msra.mxu0 %v5259_v46 }
 0x5ff   :  { %4752 = vmatprep.subr.bf16.mxu0 %v5716_v0 }
 0x602   :  { %4753 = vmatpush3.bf16.msra.mxu0 %v5260_v47 }
 0x603   :  { %4754 = vmatprep.subr.bf16.mxu0 %v5716_v0 }
 0x606   :  { %4755 = vmatpush3.bf16.msra.mxu0 %v5261_v48 }
 0x607   :  { %4756 = vmatprep.subr.bf16.mxu0 %v5716_v0 }
 0x60a   :  { %4757 = vmatpush3.bf16.msra.mxu0 %v5262_v49 }
 0x60b   :  { %4758 = vmatprep.subr.bf16.mxu0 %v5716_v0 }
 0x60e   :  { %4759 = vmatpush3.bf16.msra.mxu0 %v5263_v50 }
 0x60f   :  { %4760 = vmatprep.subr.bf16.mxu0 %v5716_v0 }
 0x612   :  { %4761 = vmatpush3.bf16.msra.mxu0 %v5264_v4 }
 0x613   :  { %4762 = vmatprep.subr.bf16.mxu0 %v5716_v0 }
 0x616   :  { %4763 = vmatpush3.bf16.msra.mxu0 %v5265_v16 }
 0x617   :  { %4764 = vmatprep.subr.bf16.mxu0 %v5716_v0 }
 0x61a   :  { %4765 = vmatpush3.bf16.msra.mxu0 %v5266_v20 }
 0x631   :  { %v3470_v39 = vpop.f32.mrf.mxu0 }
 0x632   :  { %v3511_v23 = vpop.f32.mrf.mxu1  ;;  %v3471_v52 = vadd.f32 %v3470_v39, %v1983_v17 }
 0x633   :  { %v3472_v40 = vpop.f32.mrf.mxu0 }
 0x634   :  { %v3513_v41 = vpop.f32.mrf.mxu1  ;;  %v3473_v18 = vadd.f32 %v3472_v40, %v1987_v51  ;;  %v3512_v53 = vadd.f32 %v3511_v23, %v3471_v52 }
 0x635   :  { %v3474_v42 = vpop.f32.mrf.mxu0 }
 0x636   :  { %v3515_v43 = vpop.f32.mrf.mxu1  ;;  %v3514_v55 = vadd.f32 %v3513_v41, %v3473_v18 }
 0x637   :  { %v3475_v44 = vpop.f32.mrf.mxu0 }
 0x638   :  { %v3516_v45 = vpop.f32.mrf.mxu1 }
 0x671   :  { %v3552_v54 = vpop.f32.mrf.mxu0 }
 0x672   :  { %v3553_v56 = vadd.f32 %v3552_v54, %v3512_v53  ;;  %v3593_v57 = vpop.f32.mrf.mxu1 }
 0x673   :  { %v3554_v58 = vpop.f32.mrf.mxu0 }
 0x674   :  { %v3594_v59 = vadd.f32 %v3593_v57, %v3553_v56  ;;  %v3555_v60 = vadd.f32 %v3554_v58, %v3514_v55  ;;  %v3595_v61 = vpop.f32.mrf.mxu1 }
 0x675   :  { %v3556_v9 = vpop.f32.mrf.mxu0 }
 0x676   :  { %v3596_v62 = vadd.f32 %v3595_v61, %v3555_v60  ;;  %v3597_v63 = vpop.f32.mrf.mxu1  ;;  %v3602_v1 = vmax.f32 %v3594_v59, 0.0 }
 0x677   :  { %v3557_v2 = vpop.f32.mrf.mxu0 }
 0x678   :  { %v3603_v8 = vmax.f32 %v3596_v62, 0.0  ;;  %v3598_v3 = vpop.f32.mrf.mxu1  ;;  %v3606_v10 = vpack.c.bf16 %v3602_v1, %v3602_v1 }
 0x67a   :  { %v3607_v6 = vpack.c.bf16 %v3603_v8, %v3603_v8 }
 0x67c   :  { %3943 = vmatprep.mubr.bf16.mxu1 %v3607_v6 }
 0x67d   :  { %3944 = vmatmul.mubr.bf16.vlgmr.msra.gmra.mxu1 %v3606_v10 }
 0x6bd   :  { %v4581_v5 = vpop.f32.mrf.mxu0 }
 0x6bf   :  { %v4582_v13 = vpop.f32.mrf.mxu0 }
 0x6c0   :  { %v4583_v14 = vadd.f32 %v4582_v13, %v4581_v5 }
 0x6c1   :  { %v4584_v15 = vpop.f32.mrf.mxu0 }
 0x6c2   :  { %v3906_v25 = vadd.f32 %v4583_v14, %v4465_v21 }
 0x6c3   :  { %v4585_v19 = vpop.f32.mrf.mxu0 }
 0x73d   :  { %v4603_v22 = vpop.f32.mrf.mxu1 }
 0x73f   :  { %v4604_v24 = vpop.f32.mrf.mxu1 }
 0x740   :  { %v4605_v32 = vadd.f32 %v4604_v24, %v4603_v22 }
 0x741   :  { %v4606_v26 = vpop.f32.mrf.mxu1 }
 0x742   :  { %v3946_v33 = vadd.f32 %v4605_v32, %v3906_v25 }
 0x743   :  { %v4607_v27 = vpop.f32.mrf.mxu1 }
 0x744   :  { %v3951_v7 = vmax.f32 %v3946_v33, 0.0 }
 0x746   :  { %v3952_v28 = vpack.c.bf16 %v3951_v7, %v3951_v7 }
 0x748   :  { %4767 = vmatmul.mubr.bf16.vlgmr.msra.gmra.mxu0 %v3952_v28 }
 0x808   :  { %v4058_v11 = vpop.f32.mrf.mxu0 }
 0x809   :  { %v4059_v30 = vadd.f32 %v4498_v29, %v4058_v11 }
 0x80a   :  { %v4768_v0 = vpop.f32.mrf.mxu0 }
 0x80b   :  { %4064 = vst [vmem:[#allocation32] sm:$0x3] %v4059_v30 }
 0x80c   :  { %v4061_v31 = vpop.f32.mrf.mxu0 }
 0x80d   :  { %5664 = shalt.err (!%p5661_p1)
}
 0x80e   :  { %4074 = dma.vmem_to_hbm [thread:$0]  %s4072_s26, 32, %s7099_s24, [#allocation4]   ;;  %v4769_v34 = vpop.f32.mrf.mxu0 }
 0x80f   :  { %5693 = dma.done.wait [#allocation4], 32  }
 0x810   :  { %5694 = vsyncadd [#allocation4], 4294967264 }
 0x811   :  { %4078 = vsyncpa [#allocation3], 1 }
 0x812   :  { %4079 = vsyncpa [#allocation6], 1 }
 0x813   :  { %4080 = vsyncpa [#allocation9], 1 }
 0x814   :  { %4081 = vsyncpa [#allocation12], 1 }
 0x815   :  { %4082 = vsyncpa [#allocation15], 1 }
 0x816   :  { %4083 = vsyncpa [#allocation18], 1 }
 0x817   :  { %4084 = vsyncpa [#allocation21], 1 }
 0x818   :  { %4085 = vsyncpa [#allocation24], 1 }
 0x819   :  { %4086 = vsyncpa [#allocation27], 1 }
 0x81a   :  { %4087 = vsyncpa [#allocation30], 1 }
 0x81b   :  { %4088 = vsyncpa [#allocation4], 1 }

</bundles_post_ra>
